<compile_context>
chip_gen: v6e
topology: v6e:2x2x1
jax: 0.10.0
libtpu: 0.0.40
codegen_flags: <defaults>
</compile_context>

<pallas_src>
import numpy as np
import jax
import jax.numpy as jnp
from jax.experimental import pallas as pl
from jax.experimental.pallas import tpu as pltpu

CPAD = 16                           # internal channel width (all real C <= 16)
H_IN = 16                           # input spatial size (16 x 16)
C_IN = 3                            # input channels
LATENT_DIM = 8
OUT_FEATURES = C_IN * H_IN * H_IN   # 768 = PyTorch Flatten(1) of the final NCHW map

# (n_taps, m_out_rows_per_batch, apply_relu) for the 6 fused layers
LAYER_DEFS = (
    (9, 64, True),    # enc Conv2d 3->8,  16x16 -> 8x8,  k3 s2 p1, ReLU
    (9, 16, True),    # enc Conv2d 8->16,  8x8  -> 4x4,  k3 s2 p1, ReLU
    (16, 8, False),   # enc Linear 256->8 (latent); batch row padded to 8 sublanes
    (16, 16, True),   # dec Linear 8->256 + Unflatten(16,4,4) + ReLU
    (9, 64, True),    # dec ConvT 16->8,   4x4 -> 8x8,   k3 s2 p1 op1, ReLU
    (9, 256, False),  # dec ConvT  8->3,   8x8 -> 16x16, k3 s2 p1 op1 (last ReLU dropped)
)


# ------------------------------ fused Pallas kernel ------------------------------ #

def _vae_fused_kernel(x_ref, *refs):
    """One batch element per grid step; everything VMEM-resident.

    Every layer l is expressed uniformly as
        cols = Sel_l @ act                   # 0/1 gather: im2col / dilation / (un)flatten
        out  = sum_t cols[t] @ W_{l,t} + b   # per-tap MXU matmuls, f32 accumulate
    with activations stored as (spatial_rows, CPAD=16 channel lanes) bf16.
    """
    out_ref = refs[-1]
    act = x_ref[0]                                          # (256, 16) bf16
    for idx, (taps, m_out, relu) in enumerate(LAYER_DEFS):
        sel_ref, w_ref, b_ref = refs[3 * idx:3 * idx + 3]
        # gather matmul: row (tap, out_row) picks the input row feeding that tap
        cols = jnp.dot(sel_ref[...], act,
                       preferred_element_type=jnp.float32).astype(jnp.bfloat16)
        acc = jnp.zeros((m_out, CPAD), jnp.float32)
        for t in range(taps):                               # static unroll
            acc = acc + jnp.dot(cols[t * m_out:(t + 1) * m_out, :],
                                w_ref[t * CPAD:(t + 1) * CPAD, :],
                                preferred_element_type=jnp.float32)
        acc = acc + b_ref[...]
        if relu:
            acc = jnp.maximum(acc, 0.0)
        if idx + 1 < len(LAYER_DEFS):
            act = acc.astype(jnp.bfloat16)
        else:
            out_ref[0] = acc                                # (256, 16) f32


def vae_forward(prep, x):
    """CustomVAE forward. x: (B, 3, 16, 16) f32 -> (B, 768) f32 (PyTorch ordering)."""
    b = x.shape[0]
    hw = H_IN * H_IN
    # NCHW -> internal channels-last (B, H*W, 16) bf16, channel lanes zero padded
    xi = jnp.transpose(x, (0, 2, 3, 1)).reshape(b, hw, C_IN)
    xi = jnp.pad(xi, ((0, 0), (0, 0), (0, CPAD - C_IN))).astype(jnp.bfloat16)

    inputs = [xi]
    in_specs = [pl.BlockSpec((1, hw, CPAD), lambda i: (i, 0, 0))]
    for sel, w, bias in prep:
        inputs += [sel, w, bias]
        in_specs += [pl.BlockSpec(sel.shape, lambda i: (0, 0)),
                     pl.BlockSpec(w.shape, lambda i: (0, 0)),
                     pl.BlockSpec(bias.shape, lambda i: (0, 0))]

    out = pl.pallas_call(
        _vae_fused_kernel,
        out_shape=jax.ShapeDtypeStruct((b, hw, CPAD), jnp.float32),
        grid=(b,),                      # one batch element per step; v7x megacore
        in_specs=in_specs,              # splits this 'parallel' axis across its 2 TCs
        out_specs=pl.BlockSpec((1, hw, CPAD), lambda i: (i, 0, 0)),
        compiler_params=pltpu.CompilerParams(
            dimension_semantics=("parallel",),
            vmem_limit_bytes=32 * 1024 * 1024),
    )(*inputs)

    # internal (B, h*w, c) -> PyTorch Flatten(1) of NCHW, i.e. (B, c*h*w)
    y = out[:, :, :C_IN].reshape(b, H_IN, H_IN, C_IN)
    return y.transpose(0, 3, 1, 2).reshape(b, OUT_FEATURES)


# -------------------- host-side builders (gather matrices, weights) -------------------- #

def _conv_sel(hin, win, hout, wout, k, stride, pad):
    """Forward Conv2d gather: row (tap=(i,j), ho, wo) selects input row (h, w)."""
    sel = np.zeros((k * k * hout * wout, hin * win), np.float32)
    for i in range(k):
        for j in range(k):
            t = i * k + j
            for ho in range(hout):
                for wo in range(wout):
                    h = stride * ho + i - pad
                    w = stride * wo + j - pad
                    if 0 <= h < hin and 0 <= w < win:
                        sel[t * hout * wout + ho * wout + wo, h * win + w] = 1.0
    return sel


def _convt_sel(hin, win, hout, wout, k, stride, pad):
    """ConvTranspose2d gather: out (ho,wo) gets x(h,w) on tap (i,j) iff ho = s*h - p + i."""
    sel = np.zeros((k * k * hout * wout, hin * win), np.float32)
    for i in range(k):
        for j in range(k):
            t = i * k + j
            for h in range(hin):
                for w in range(win):
                    ho = stride * h - pad + i
                    wo = stride * w - pad + j
                    if 0 <= ho < hout and 0 <= wo < wout:
                        sel[t * hout * wout + ho * wout + wo, h * win + w] = 1.0
    return sel


def _fc_gather_sel(n_pos, m_out_pad):
    """enc_fc: one tap per input spatial position; valid sample lives in row 0."""
    sel = np.zeros((n_pos * m_out_pad, n_pos), np.float32)
    for t in range(n_pos):
        sel[t * m_out_pad, t] = 1.0
    return sel


def _fc_scatter_sel(n_pos, m_in_pad):
    """dec_fc: one tap per output spatial position; replicates latent row 0."""
    sel = np.zeros((n_pos * n_pos, m_in_pad), np.float32)
    for t in range(n_pos):
        sel[t * n_pos + t, 0] = 1.0
    return sel


def _conv_w_taps(w):          # torch (Cout, Cin, k, k) -> (k*k*CPAD, CPAD)
    cout, cin, k, _ = w.shape
    out = np.zeros((k * k * CPAD, CPAD), np.float32)
    for i in range(k):
        for j in range(k):
            t = i * k + j
            out[t * CPAD:t * CPAD + cin, :cout] = w[:, :, i, j].T
    return out


def _convt_w_taps(w):         # torch (Cin, Cout, k, k) -> (k*k*CPAD, CPAD)
    cin, cout, k, _ = w.shape
    out = np.zeros((k * k * CPAD, CPAD), np.float32)
    for i in range(k):
        for j in range(k):
            t = i * k + j
            out[t * CPAD:t * CPAD + cin, :cout] = w[:, :, i, j]
    return out


def _enc_fc_w_taps(w, c, hw):  # torch (latent, c*hw) with (c,h,w) ordering
    latent = w.shape[0]
    out = np.zeros((hw * CPAD, CPAD), np.float32)
    for t in range(hw):
        out[t * CPAD:t * CPAD + c, :latent] = w[:, t::hw].T      # [c_idx, l]
    return out


def _dec_fc_w_taps(w, c, hw):  # torch (c*hw, latent) with (c,h,w) ordering
    latent = w.shape[1]
    out = np.zeros((hw * CPAD, CPAD), np.float32)
    for t in range(hw):
        out[t * CPAD:t * CPAD + latent, :c] = w[t::hw, :].T      # [l, c_idx]
    return out


def _bias_row(b):
    row = np.zeros((1, CPAD), np.float32)
    row[0, :b.shape[0]] = b
    return row


def prepare_params(params):
    """Torch-layout params -> (Sel, tap-weights, bias) triples for the fused kernel."""
    p = {k: np.asarray(v, np.float32) for k, v in params.items()}
    layers = [
        (_conv_sel(16, 16, 8, 8, 3, 2, 1), _conv_w_taps(p["enc_conv1_w"]),
         _bias_row(p["enc_conv1_b"])),
        (_conv_sel(8, 8, 4, 4, 3, 2, 1), _conv_w_taps(p["enc_conv2_w"]),
         _bias_row(p["enc_conv2_b"])),
        (_fc_gather_sel(16, 8), _enc_fc_w_taps(p["enc_fc_w"], 16, 16),
         _bias_row(p["enc_fc_b"])),
    ]
    dec_fc_bias = np.zeros((16, CPAD), np.float32)
    dec_fc_bias[:, :16] = p["dec_fc_b"].reshape(16, 16).T          # [hw, c]
    layers += [
        (_fc_scatter_sel(16, 8), _dec_fc_w_taps(p["dec_fc_w"], 16, 16), dec_fc_bias),
        (_convt_sel(4, 4, 8, 8, 3, 2, 1), _convt_w_taps(p["dec_convt1_w"]),
         _bias_row(p["dec_convt1_b"])),
        (_convt_sel(8, 8, 16, 16, 3, 2, 1), _convt_w_taps(p["dec_convt2_w"]),
         _bias_row(p["dec_convt2_b"])),
    ]
    return [(jnp.asarray(s, jnp.bfloat16),
             jnp.asarray(w, jnp.bfloat16),
             jnp.asarray(b, jnp.float32)) for s, w, b in layers]


# ------------------------- deterministic init (torch layouts) ------------------------- #

def _uniform(key, shape, fan_in):
    bound = float(fan_in) ** -0.5
    return jax.random.uniform(key, shape, jnp.float32, -bound, bound)


def init_params(key):
    ks = jax.random.split(key, 12)
    p = {}
    p["enc_conv1_w"] = _uniform(ks[0], (8, 3, 3, 3), 3 * 9)
    p["enc_conv1_b"] = _uniform(ks[1], (8,), 3 * 9)
    p["enc_conv2_w"] = _uniform(ks[2], (16, 8, 3, 3), 8 * 9)
    p["enc_conv2_b"] = _uniform(ks[3], (16,), 8 * 9)
    p["enc_fc_w"] = _uniform(ks[4], (LATENT_DIM, 256), 256)
    p["enc_fc_b"] = _uniform(ks[5], (LATENT_DIM,), 256)
    p["dec_fc_w"] = _uniform(ks[6], (256, LATENT_DIM), LATENT_DIM)
    p["dec_fc_b"] = _uniform(ks[7], (256,), LATENT_DIM)
    p["dec_convt1_w"] = _uniform(ks[8], (16, 8, 3, 3), 8 * 9)
    p["dec_convt1_b"] = _uniform(ks[9], (8,), 8 * 9)
    p["dec_convt2_w"] = _uniform(ks[10], (8, 3, 3, 3), 3 * 9)
    p["dec_convt2_b"] = _uniform(ks[11], (3,), 3 * 9)
    return p


# ------------------------ pure-JAX f32 reference (sanity check) ------------------------ #

def _ref_conv2d(x, w, b, stride, pad, relu):
    out = jax.lax.conv_general_dilated(
        x, w, window_strides=(stride, stride),
        padding=((pad, pad), (pad, pad)),
        dimension_numbers=("NCHW", "OIHW", "NCHW"))
    out = out + b.reshape(1, -1, 1, 1)
    return jnp.maximum(out, 0.0) if relu else out


def _ref_conv_transpose2d(x, w, b, stride, pad, out_pad, relu):
    k = w.shape[-1]
    wf = jnp.flip(w, axis=(2, 3)).transpose(1, 0, 2, 3)     # (Cout, Cin, k, k)
    lo = k - 1 - pad
    out = jax.lax.conv_general_dilated(
        x, wf, window_strides=(1, 1),
        padding=((lo, lo + out_pad), (lo, lo + out_pad)),
        lhs_dilation=(stride, stride),
        dimension_numbers=("NCHW", "OIHW", "NCHW"))
    out = out + b.reshape(1, -1, 1, 1)
    return jnp.maximum(out, 0.0) if relu else out


def vae_forward_reference(params, x):
    b = x.shape[0]
    h = _ref_conv2d(x, params["enc_conv1_w"], params["enc_conv1_b"], 2, 1, True)
    h = _ref_conv2d(h, params["enc_conv2_w"], params["enc_conv2_b"], 2, 1, True)
    z = h.reshape(b, -1) @ params["enc_fc_w"].T + params["enc_fc_b"]
    h = z @ params["dec_fc_w"].T + params["dec_fc_b"]
    h = jnp.maximum(h, 0.0).reshape(b, 16, 4, 4)
    h = _ref_conv_transpose2d(h, params["dec_convt1_w"], params["dec_convt1_b"],
                              2, 1, 1, True)
    h = _ref_conv_transpose2d(h, params["dec_convt2_w"], params["dec_convt2_b"],
                              2, 1, 1, False)
    return h.reshape(b, -1)


# --------------------------------------- main --------------------------------------- #

if __name__ == "__main__":
    root = jax.random.PRNGKey(0)
    kp, kx = jax.random.split(root)
    params = init_params(kp)
    x = jax.random.normal(kx, (2, C_IN, H_IN, H_IN), jnp.float32)

    prep = prepare_params(params)
    fwd = jax.jit(vae_forward)
    out = jax.block_until_ready(fwd(prep, x))

    assert out.shape == (2, OUT_FEATURES), out.shape
    assert bool(jnp.all(jnp.isfinite(out)))

    # numerical sanity check against a pure-XLA f32 reference (bf16 operands in
    # the kernel, f32 accumulation -> loose tolerance)
    ref = jax.block_until_ready(vae_forward_reference(params, x))
    err = float(jnp.max(jnp.abs(out - ref)))
    assert err < 5e-2, f"max abs err vs f32 reference: {err}"

    print("KERNEL_OK")
</pallas_src>

<mosaic_0001>
module attributes {stable_mosaic.version = 11 : i64} {
  func.func @_vae_fused_kernel(%arg0: i32, %arg1: memref<1x256x16xbf16, #tpu.memory_space<vmem>>, %arg2: memref<576x256xbf16, #tpu.memory_space<vmem>>, %arg3: memref<144x16xbf16, #tpu.memory_space<vmem>>, %arg4: memref<1x16xf32, #tpu.memory_space<vmem>>, %arg5: memref<144x64xbf16, #tpu.memory_space<vmem>>, %arg6: memref<144x16xbf16, #tpu.memory_space<vmem>>, %arg7: memref<1x16xf32, #tpu.memory_space<vmem>>, %arg8: memref<128x16xbf16, #tpu.memory_space<vmem>>, %arg9: memref<256x16xbf16, #tpu.memory_space<vmem>>, %arg10: memref<1x16xf32, #tpu.memory_space<vmem>>, %arg11: memref<256x8xbf16, #tpu.memory_space<vmem>>, %arg12: memref<256x16xbf16, #tpu.memory_space<vmem>>, %arg13: memref<16x16xf32, #tpu.memory_space<vmem>>, %arg14: memref<576x16xbf16, #tpu.memory_space<vmem>>, %arg15: memref<144x16xbf16, #tpu.memory_space<vmem>>, %arg16: memref<1x16xf32, #tpu.memory_space<vmem>>, %arg17: memref<2304x64xbf16, #tpu.memory_space<vmem>>, %arg18: memref<144x16xbf16, #tpu.memory_space<vmem>>, %arg19: memref<1x16xf32, #tpu.memory_space<vmem>>, %arg20: memref<1x256x16xf32, #tpu.memory_space<vmem>>) attributes {dimension_semantics = [#tpu.dimension_semantics<parallel>], iteration_bounds = array<i64: 2>, scalar_prefetch = 0 : i64, scratch_operands = 0 : i64, tpu.core_type = #tpu.core_type<tc>, window_params = [{transform_indices = @transform_0, window_bounds = array<i64: 1, 256, 16>}, {pipeline_mode = #tpu.pipeline_mode<synchronous>, transform_indices = @transform_1, window_bounds = array<i64: 576, 256>}, {pipeline_mode = #tpu.pipeline_mode<synchronous>, transform_indices = @transform_2, window_bounds = array<i64: 144, 16>}, {pipeline_mode = #tpu.pipeline_mode<synchronous>, transform_indices = @transform_3, window_bounds = array<i64: 1, 16>}, {pipeline_mode = #tpu.pipeline_mode<synchronous>, transform_indices = @transform_4, window_bounds = array<i64: 144, 64>}, {pipeline_mode = #tpu.pipeline_mode<synchronous>, transform_indices = @transform_5, window_bounds = array<i64: 144, 16>}, {pipeline_mode = #tpu.pipeline_mode<synchronous>, transform_indices = @transform_6, window_bounds = array<i64: 1, 16>}, {pipeline_mode = #tpu.pipeline_mode<synchronous>, transform_indices = @transform_7, window_bounds = array<i64: 128, 16>}, {pipeline_mode = #tpu.pipeline_mode<synchronous>, transform_indices = @transform_8, window_bounds = array<i64: 256, 16>}, {pipeline_mode = #tpu.pipeline_mode<synchronous>, transform_indices = @transform_9, window_bounds = array<i64: 1, 16>}, {pipeline_mode = #tpu.pipeline_mode<synchronous>, transform_indices = @transform_10, window_bounds = array<i64: 256, 8>}, {pipeline_mode = #tpu.pipeline_mode<synchronous>, transform_indices = @transform_11, window_bounds = array<i64: 256, 16>}, {pipeline_mode = #tpu.pipeline_mode<synchronous>, transform_indices = @transform_12, window_bounds = array<i64: 16, 16>}, {pipeline_mode = #tpu.pipeline_mode<synchronous>, transform_indices = @transform_13, window_bounds = array<i64: 576, 16>}, {pipeline_mode = #tpu.pipeline_mode<synchronous>, transform_indices = @transform_14, window_bounds = array<i64: 144, 16>}, {pipeline_mode = #tpu.pipeline_mode<synchronous>, transform_indices = @transform_15, window_bounds = array<i64: 1, 16>}, {pipeline_mode = #tpu.pipeline_mode<synchronous>, transform_indices = @transform_16, window_bounds = array<i64: 2304, 64>}, {pipeline_mode = #tpu.pipeline_mode<synchronous>, transform_indices = @transform_17, window_bounds = array<i64: 144, 16>}, {pipeline_mode = #tpu.pipeline_mode<synchronous>, transform_indices = @transform_18, window_bounds = array<i64: 1, 16>}, {transform_indices = @transform_19, window_bounds = array<i64: 1, 256, 16>}]} {
    %c0 = arith.constant 0 : index
    %c0_0 = arith.constant 0 : index
    %c0_1 = arith.constant 0 : index
    %0 = vector.load %arg1[%c0, %c0_0, %c0_1] : memref<1x256x16xbf16, #tpu.memory_space<vmem>>, vector<1x256x16xbf16>
    %1 = vector.shape_cast %0 : vector<1x256x16xbf16> to vector<256x16xbf16>
    %c0_2 = arith.constant 0 : index
    %c0_3 = arith.constant 0 : index
    %2 = vector.load %arg2[%c0_2, %c0_3] : memref<576x256xbf16, #tpu.memory_space<vmem>>, vector<576x256xbf16>
    %cst = arith.constant dense<0.000000e+00> : vector<576x16xf32>
    %3 = tpu.matmul %2, %1, %cst {dimension_numbers = #tpu.dot_dimension_numbers<[1], [0], [0], [1], [0, 0, 1, 1], [], []>} : vector<576x256xbf16>, vector<256x16xbf16>, vector<576x16xf32> -> vector<576x16xf32>
    %4 = arith.truncf %3 : vector<576x16xf32> to vector<576x16xbf16>
    %cst_4 = arith.constant 0.000000e+00 : f32
    %5 = vector.broadcast %cst_4 : f32 to vector<64x16xf32>
    %6 = vector.extract_strided_slice %4 {offsets = [0, 0], sizes = [64, 16], strides = [1, 1]} : vector<576x16xbf16> to vector<64x16xbf16>
    %c0_5 = arith.constant 0 : index
    %c0_6 = arith.constant 0 : index
    %7 = vector.load %arg3[%c0_5, %c0_6] : memref<144x16xbf16, #tpu.memory_space<vmem>>, vector<16x16xbf16>
    %cst_7 = arith.constant dense<0.000000e+00> : vector<64x16xf32>
    %8 = tpu.matmul %6, %7, %cst_7 {dimension_numbers = #tpu.dot_dimension_numbers<[1], [0], [0], [1], [0, 0, 1, 1], [], []>} : vector<64x16xbf16>, vector<16x16xbf16>, vector<64x16xf32> -> vector<64x16xf32>
    %9 = arith.addf %5, %8 : vector<64x16xf32>
    %10 = vector.extract_strided_slice %4 {offsets = [64, 0], sizes = [64, 16], strides = [1, 1]} : vector<576x16xbf16> to vector<64x16xbf16>
    %c16 = arith.constant 16 : index
    %c0_8 = arith.constant 0 : index
    %11 = vector.load %arg3[%c16, %c0_8] : memref<144x16xbf16, #tpu.memory_space<vmem>>, vector<16x16xbf16>
    %cst_9 = arith.constant dense<0.000000e+00> : vector<64x16xf32>
    %12 = tpu.matmul %10, %11, %cst_9 {dimension_numbers = #tpu.dot_dimension_numbers<[1], [0], [0], [1], [0, 0, 1, 1], [], []>} : vector<64x16xbf16>, vector<16x16xbf16>, vector<64x16xf32> -> vector<64x16xf32>
    %13 = arith.addf %9, %12 : vector<64x16xf32>
    %14 = vector.extract_strided_slice %4 {offsets = [128, 0], sizes = [64, 16], strides = [1, 1]} : vector<576x16xbf16> to vector<64x16xbf16>
    %c32 = arith.constant 32 : index
    %c0_10 = arith.constant 0 : index
    %15 = vector.load %arg3[%c32, %c0_10] : memref<144x16xbf16, #tpu.memory_space<vmem>>, vector<16x16xbf16>
    %cst_11 = arith.constant dense<0.000000e+00> : vector<64x16xf32>
    %16 = tpu.matmul %14, %15, %cst_11 {dimension_numbers = #tpu.dot_dimension_numbers<[1], [0], [0], [1], [0, 0, 1, 1], [], []>} : vector<64x16xbf16>, vector<16x16xbf16>, vector<64x16xf32> -> vector<64x16xf32>
    %17 = arith.addf %13, %16 : vector<64x16xf32>
    %18 = vector.extract_strided_slice %4 {offsets = [192, 0], sizes = [64, 16], strides = [1, 1]} : vector<576x16xbf16> to vector<64x16xbf16>
    %c48 = arith.constant 48 : index
    %c0_12 = arith.constant 0 : index
    %19 = vector.load %arg3[%c48, %c0_12] : memref<144x16xbf16, #tpu.memory_space<vmem>>, vector<16x16xbf16>
    %cst_13 = arith.constant dense<0.000000e+00> : vector<64x16xf32>
    %20 = tpu.matmul %18, %19, %cst_13 {dimension_numbers = #tpu.dot_dimension_numbers<[1], [0], [0], [1], [0, 0, 1, 1], [], []>} : vector<64x16xbf16>, vector<16x16xbf16>, vector<64x16xf32> -> vector<64x16xf32>
    %21 = arith.addf %17, %20 : vector<64x16xf32>
    %22 = vector.extract_strided_slice %4 {offsets = [256, 0], sizes = [64, 16], strides = [1, 1]} : vector<576x16xbf16> to vector<64x16xbf16>
    %c64 = arith.constant 64 : index
    %c0_14 = arith.constant 0 : index
    %23 = vector.load %arg3[%c64, %c0_14] : memref<144x16xbf16, #tpu.memory_space<vmem>>, vector<16x16xbf16>
    %cst_15 = arith.constant dense<0.000000e+00> : vector<64x16xf32>
    %24 = tpu.matmul %22, %23, %cst_15 {dimension_numbers = #tpu.dot_dimension_numbers<[1], [0], [0], [1], [0, 0, 1, 1], [], []>} : vector<64x16xbf16>, vector<16x16xbf16>, vector<64x16xf32> -> vector<64x16xf32>
    %25 = arith.addf %21, %24 : vector<64x16xf32>
    %26 = vector.extract_strided_slice %4 {offsets = [320, 0], sizes = [64, 16], strides = [1, 1]} : vector<576x16xbf16> to vector<64x16xbf16>
    %c80 = arith.constant 80 : index
    %c0_16 = arith.constant 0 : index
    %27 = vector.load %arg3[%c80, %c0_16] : memref<144x16xbf16, #tpu.memory_space<vmem>>, vector<16x16xbf16>
    %cst_17 = arith.constant dense<0.000000e+00> : vector<64x16xf32>
    %28 = tpu.matmul %26, %27, %cst_17 {dimension_numbers = #tpu.dot_dimension_numbers<[1], [0], [0], [1], [0, 0, 1, 1], [], []>} : vector<64x16xbf16>, vector<16x16xbf16>, vector<64x16xf32> -> vector<64x16xf32>
    %29 = arith.addf %25, %28 : vector<64x16xf32>
    %30 = vector.extract_strided_slice %4 {offsets = [384, 0], sizes = [64, 16], strides = [1, 1]} : vector<576x16xbf16> to vector<64x16xbf16>
    %c96 = arith.constant 96 : index
    %c0_18 = arith.constant 0 : index
    %31 = vector.load %arg3[%c96, %c0_18] : memref<144x16xbf16, #tpu.memory_space<vmem>>, vector<16x16xbf16>
    %cst_19 = arith.constant dense<0.000000e+00> : vector<64x16xf32>
    %32 = tpu.matmul %30, %31, %cst_19 {dimension_numbers = #tpu.dot_dimension_numbers<[1], [0], [0], [1], [0, 0, 1, 1], [], []>} : vector<64x16xbf16>, vector<16x16xbf16>, vector<64x16xf32> -> vector<64x16xf32>
    %33 = arith.addf %29, %32 : vector<64x16xf32>
    %34 = vector.extract_strided_slice %4 {offsets = [448, 0], sizes = [64, 16], strides = [1, 1]} : vector<576x16xbf16> to vector<64x16xbf16>
    %c112 = arith.constant 112 : index
    %c0_20 = arith.constant 0 : index
    %35 = vector.load %arg3[%c112, %c0_20] : memref<144x16xbf16, #tpu.memory_space<vmem>>, vector<16x16xbf16>
    %cst_21 = arith.constant dense<0.000000e+00> : vector<64x16xf32>
    %36 = tpu.matmul %34, %35, %cst_21 {dimension_numbers = #tpu.dot_dimension_numbers<[1], [0], [0], [1], [0, 0, 1, 1], [], []>} : vector<64x16xbf16>, vector<16x16xbf16>, vector<64x16xf32> -> vector<64x16xf32>
    %37 = arith.addf %33, %36 : vector<64x16xf32>
    %38 = vector.extract_strided_slice %4 {offsets = [512, 0], sizes = [64, 16], strides = [1, 1]} : vector<576x16xbf16> to vector<64x16xbf16>
    %c128 = arith.constant 128 : index
    %c0_22 = arith.constant 0 : index
    %39 = vector.load %arg3[%c128, %c0_22] : memref<144x16xbf16, #tpu.memory_space<vmem>>, vector<16x16xbf16>
    %cst_23 = arith.constant dense<0.000000e+00> : vector<64x16xf32>
    %40 = tpu.matmul %38, %39, %cst_23 {dimension_numbers = #tpu.dot_dimension_numbers<[1], [0], [0], [1], [0, 0, 1, 1], [], []>} : vector<64x16xbf16>, vector<16x16xbf16>, vector<64x16xf32> -> vector<64x16xf32>
    %41 = arith.addf %37, %40 : vector<64x16xf32>
    %c0_24 = arith.constant 0 : index
    %c0_25 = arith.constant 0 : index
    %42 = vector.load %arg4[%c0_24, %c0_25] : memref<1x16xf32, #tpu.memory_space<vmem>>, vector<1x16xf32>
    %43 = vector.broadcast %42 : vector<1x16xf32> to vector<64x16xf32>
    %44 = arith.addf %41, %43 : vector<64x16xf32>
    %cst_26 = arith.constant 0.000000e+00 : f32
    %45 = vector.broadcast %cst_26 : f32 to vector<64x16xf32>
    %46 = arith.maximumf %44, %45 : vector<64x16xf32>
    %47 = arith.truncf %46 : vector<64x16xf32> to vector<64x16xbf16>
    %c0_27 = arith.constant 0 : index
    %c0_28 = arith.constant 0 : index
    %48 = vector.load %arg5[%c0_27, %c0_28] : memref<144x64xbf16, #tpu.memory_space<vmem>>, vector<144x64xbf16>
    %cst_29 = arith.constant dense<0.000000e+00> : vector<144x16xf32>
    %49 = tpu.matmul %48, %47, %cst_29 {dimension_numbers = #tpu.dot_dimension_numbers<[1], [0], [0], [1], [0, 0, 1, 1], [], []>} : vector<144x64xbf16>, vector<64x16xbf16>, vector<144x16xf32> -> vector<144x16xf32>
    %50 = arith.truncf %49 : vector<144x16xf32> to vector<144x16xbf16>
    %cst_30 = arith.constant 0.000000e+00 : f32
    %51 = vector.broadcast %cst_30 : f32 to vector<16x16xf32>
    %52 = vector.extract_strided_slice %50 {offsets = [0, 0], sizes = [16, 16], strides = [1, 1]} : vector<144x16xbf16> to vector<16x16xbf16>
    %c0_31 = arith.constant 0 : index
    %c0_32 = arith.constant 0 : index
    %53 = vector.load %arg6[%c0_31, %c0_32] : memref<144x16xbf16, #tpu.memory_space<vmem>>, vector<16x16xbf16>
    %cst_33 = arith.constant dense<0.000000e+00> : vector<16x16xf32>
    %54 = tpu.matmul %52, %53, %cst_33 {dimension_numbers = #tpu.dot_dimension_numbers<[1], [0], [0], [1], [0, 0, 1, 1], [], []>} : vector<16x16xbf16>, vector<16x16xbf16>, vector<16x16xf32> -> vector<16x16xf32>
    %55 = arith.addf %51, %54 : vector<16x16xf32>
    %56 = vector.extract_strided_slice %50 {offsets = [16, 0], sizes = [16, 16], strides = [1, 1]} : vector<144x16xbf16> to vector<16x16xbf16>
    %c16_34 = arith.constant 16 : index
    %c0_35 = arith.constant 0 : index
    %57 = vector.load %arg6[%c16_34, %c0_35] : memref<144x16xbf16, #tpu.memory_space<vmem>>, vector<16x16xbf16>
    %cst_36 = arith.constant dense<0.000000e+00> : vector<16x16xf32>
    %58 = tpu.matmul %56, %57, %cst_36 {dimension_numbers = #tpu.dot_dimension_numbers<[1], [0], [0], [1], [0, 0, 1, 1], [], []>} : vector<16x16xbf16>, vector<16x16xbf16>, vector<16x16xf32> -> vector<16x16xf32>
    %59 = arith.addf %55, %58 : vector<16x16xf32>
    %60 = vector.extract_strided_slice %50 {offsets = [32, 0], sizes = [16, 16], strides = [1, 1]} : vector<144x16xbf16> to vector<16x16xbf16>
    %c32_37 = arith.constant 32 : index
    %c0_38 = arith.constant 0 : index
    %61 = vector.load %arg6[%c32_37, %c0_38] : memref<144x16xbf16, #tpu.memory_space<vmem>>, vector<16x16xbf16>
    %cst_39 = arith.constant dense<0.000000e+00> : vector<16x16xf32>
    %62 = tpu.matmul %60, %61, %cst_39 {dimension_numbers = #tpu.dot_dimension_numbers<[1], [0], [0], [1], [0, 0, 1, 1], [], []>} : vector<16x16xbf16>, vector<16x16xbf16>, vector<16x16xf32> -> vector<16x16xf32>
    %63 = arith.addf %59, %62 : vector<16x16xf32>
    %64 = vector.extract_strided_slice %50 {offsets = [48, 0], sizes = [16, 16], strides = [1, 1]} : vector<144x16xbf16> to vector<16x16xbf16>
    %c48_40 = arith.constant 48 : index
    %c0_41 = arith.constant 0 : index
    %65 = vector.load %arg6[%c48_40, %c0_41] : memref<144x16xbf16, #tpu.memory_space<vmem>>, vector<16x16xbf16>
    %cst_42 = arith.constant dense<0.000000e+00> : vector<16x16xf32>
    %66 = tpu.matmul %64, %65, %cst_42 {dimension_numbers = #tpu.dot_dimension_numbers<[1], [0], [0], [1], [0, 0, 1, 1], [], []>} : vector<16x16xbf16>, vector<16x16xbf16>, vector<16x16xf32> -> vector<16x16xf32>
    %67 = arith.addf %63, %66 : vector<16x16xf32>
    %68 = vector.extract_strided_slice %50 {offsets = [64, 0], sizes = [16, 16], strides = [1, 1]} : vector<144x16xbf16> to vector<16x16xbf16>
    %c64_43 = arith.constant 64 : index
    %c0_44 = arith.constant 0 : index
    %69 = vector.load %arg6[%c64_43, %c0_44] : memref<144x16xbf16, #tpu.memory_space<vmem>>, vector<16x16xbf16>
    %cst_45 = arith.constant dense<0.000000e+00> : vector<16x16xf32>
    %70 = tpu.matmul %68, %69, %cst_45 {dimension_numbers = #tpu.dot_dimension_numbers<[1], [0], [0], [1], [0, 0, 1, 1], [], []>} : vector<16x16xbf16>, vector<16x16xbf16>, vector<16x16xf32> -> vector<16x16xf32>
    %71 = arith.addf %67, %70 : vector<16x16xf32>
    %72 = vector.extract_strided_slice %50 {offsets = [80, 0], sizes = [16, 16], strides = [1, 1]} : vector<144x16xbf16> to vector<16x16xbf16>
    %c80_46 = arith.constant 80 : index
    %c0_47 = arith.constant 0 : index
    %73 = vector.load %arg6[%c80_46, %c0_47] : memref<144x16xbf16, #tpu.memory_space<vmem>>, vector<16x16xbf16>
    %cst_48 = arith.constant dense<0.000000e+00> : vector<16x16xf32>
    %74 = tpu.matmul %72, %73, %cst_48 {dimension_numbers = #tpu.dot_dimension_numbers<[1], [0], [0], [1], [0, 0, 1, 1], [], []>} : vector<16x16xbf16>, vector<16x16xbf16>, vector<16x16xf32> -> vector<16x16xf32>
    %75 = arith.addf %71, %74 : vector<16x16xf32>
    %76 = vector.extract_strided_slice %50 {offsets = [96, 0], sizes = [16, 16], strides = [1, 1]} : vector<144x16xbf16> to vector<16x16xbf16>
    %c96_49 = arith.constant 96 : index
    %c0_50 = arith.constant 0 : index
    %77 = vector.load %arg6[%c96_49, %c0_50] : memref<144x16xbf16, #tpu.memory_space<vmem>>, vector<16x16xbf16>
    %cst_51 = arith.constant dense<0.000000e+00> : vector<16x16xf32>
    %78 = tpu.matmul %76, %77, %cst_51 {dimension_numbers = #tpu.dot_dimension_numbers<[1], [0], [0], [1], [0, 0, 1, 1], [], []>} : vector<16x16xbf16>, vector<16x16xbf16>, vector<16x16xf32> -> vector<16x16xf32>
    %79 = arith.addf %75, %78 : vector<16x16xf32>
    %80 = vector.extract_strided_slice %50 {offsets = [112, 0], sizes = [16, 16], strides = [1, 1]} : vector<144x16xbf16> to vector<16x16xbf16>
    %c112_52 = arith.constant 112 : index
    %c0_53 = arith.constant 0 : index
    %81 = vector.load %arg6[%c112_52, %c0_53] : memref<144x16xbf16, #tpu.memory_space<vmem>>, vector<16x16xbf16>
    %cst_54 = arith.constant dense<0.000000e+00> : vector<16x16xf32>
    %82 = tpu.matmul %80, %81, %cst_54 {dimension_numbers = #tpu.dot_dimension_numbers<[1], [0], [0], [1], [0, 0, 1, 1], [], []>} : vector<16x16xbf16>, vector<16x16xbf16>, vector<16x16xf32> -> vector<16x16xf32>
    %83 = arith.addf %79, %82 : vector<16x16xf32>
    %84 = vector.extract_strided_slice %50 {offsets = [128, 0], sizes = [16, 16], strides = [1, 1]} : vector<144x16xbf16> to vector<16x16xbf16>
    %c128_55 = arith.constant 128 : index
    %c0_56 = arith.constant 0 : index
    %85 = vector.load %arg6[%c128_55, %c0_56] : memref<144x16xbf16, #tpu.memory_space<vmem>>, vector<16x16xbf16>
    %cst_57 = arith.constant dense<0.000000e+00> : vector<16x16xf32>
    %86 = tpu.matmul %84, %85, %cst_57 {dimension_numbers = #tpu.dot_dimension_numbers<[1], [0], [0], [1], [0, 0, 1, 1], [], []>} : vector<16x16xbf16>, vector<16x16xbf16>, vector<16x16xf32> -> vector<16x16xf32>
    %87 = arith.addf %83, %86 : vector<16x16xf32>
    %c0_58 = arith.constant 0 : index
    %c0_59 = arith.constant 0 : index
    %88 = vector.load %arg7[%c0_58, %c0_59] : memref<1x16xf32, #tpu.memory_space<vmem>>, vector<1x16xf32>
    %89 = vector.broadcast %88 : vector<1x16xf32> to vector<16x16xf32>
    %90 = arith.addf %87, %89 : vector<16x16xf32>
    %cst_60 = arith.constant 0.000000e+00 : f32
    %91 = vector.broadcast %cst_60 : f32 to vector<16x16xf32>
    %92 = arith.maximumf %90, %91 : vector<16x16xf32>
    %93 = arith.truncf %92 : vector<16x16xf32> to vector<16x16xbf16>
    %c0_61 = arith.constant 0 : index
    %c0_62 = arith.constant 0 : index
    %94 = vector.load %arg8[%c0_61, %c0_62] : memref<128x16xbf16, #tpu.memory_space<vmem>>, vector<128x16xbf16>
    %cst_63 = arith.constant dense<0.000000e+00> : vector<128x16xf32>
    %95 = tpu.matmul %94, %93, %cst_63 {dimension_numbers = #tpu.dot_dimension_numbers<[1], [0], [0], [1], [0, 0, 1, 1], [], []>} : vector<128x16xbf16>, vector<16x16xbf16>, vector<128x16xf32> -> vector<128x16xf32>
    %96 = arith.truncf %95 : vector<128x16xf32> to vector<128x16xbf16>
    %cst_64 = arith.constant 0.000000e+00 : f32
    %97 = vector.broadcast %cst_64 : f32 to vector<8x16xf32>
    %98 = vector.extract_strided_slice %96 {offsets = [0, 0], sizes = [8, 16], strides = [1, 1]} : vector<128x16xbf16> to vector<8x16xbf16>
    %c0_65 = arith.constant 0 : index
    %c0_66 = arith.constant 0 : index
    %99 = vector.load %arg9[%c0_65, %c0_66] : memref<256x16xbf16, #tpu.memory_space<vmem>>, vector<16x16xbf16>
    %cst_67 = arith.constant dense<0.000000e+00> : vector<8x16xf32>
    %100 = tpu.matmul %98, %99, %cst_67 {dimension_numbers = #tpu.dot_dimension_numbers<[1], [0], [0], [1], [0, 0, 1, 1], [], []>} : vector<8x16xbf16>, vector<16x16xbf16>, vector<8x16xf32> -> vector<8x16xf32>
    %101 = arith.addf %97, %100 : vector<8x16xf32>
    %102 = vector.extract_strided_slice %96 {offsets = [8, 0], sizes = [8, 16], strides = [1, 1]} : vector<128x16xbf16> to vector<8x16xbf16>
    %c16_68 = arith.constant 16 : index
    %c0_69 = arith.constant 0 : index
    %103 = vector.load %arg9[%c16_68, %c0_69] : memref<256x16xbf16, #tpu.memory_space<vmem>>, vector<16x16xbf16>
    %cst_70 = arith.constant dense<0.000000e+00> : vector<8x16xf32>
    %104 = tpu.matmul %102, %103, %cst_70 {dimension_numbers = #tpu.dot_dimension_numbers<[1], [0], [0], [1], [0, 0, 1, 1], [], []>} : vector<8x16xbf16>, vector<16x16xbf16>, vector<8x16xf32> -> vector<8x16xf32>
    %105 = arith.addf %101, %104 : vector<8x16xf32>
    %106 = vector.extract_strided_slice %96 {offsets = [16, 0], sizes = [8, 16], strides = [1, 1]} : vector<128x16xbf16> to vector<8x16xbf16>
    %c32_71 = arith.constant 32 : index
    %c0_72 = arith.constant 0 : index
    %107 = vector.load %arg9[%c32_71, %c0_72] : memref<256x16xbf16, #tpu.memory_space<vmem>>, vector<16x16xbf16>
    %cst_73 = arith.constant dense<0.000000e+00> : vector<8x16xf32>
    %108 = tpu.matmul %106, %107, %cst_73 {dimension_numbers = #tpu.dot_dimension_numbers<[1], [0], [0], [1], [0, 0, 1, 1], [], []>} : vector<8x16xbf16>, vector<16x16xbf16>, vector<8x16xf32> -> vector<8x16xf32>
    %109 = arith.addf %105, %108 : vector<8x16xf32>
    %110 = vector.extract_strided_slice %96 {offsets = [24, 0], sizes = [8, 16], strides = [1, 1]} : vector<128x16xbf16> to vector<8x16xbf16>
    %c48_74 = arith.constant 48 : index
    %c0_75 = arith.constant 0 : index
    %111 = vector.load %arg9[%c48_74, %c0_75] : memref<256x16xbf16, #tpu.memory_space<vmem>>, vector<16x16xbf16>
    %cst_76 = arith.constant dense<0.000000e+00> : vector<8x16xf32>
    %112 = tpu.matmul %110, %111, %cst_76 {dimension_numbers = #tpu.dot_dimension_numbers<[1], [0], [0], [1], [0, 0, 1, 1], [], []>} : vector<8x16xbf16>, vector<16x16xbf16>, vector<8x16xf32> -> vector<8x16xf32>
    %113 = arith.addf %109, %112 : vector<8x16xf32>
    %114 = vector.extract_strided_slice %96 {offsets = [32, 0], sizes = [8, 16], strides = [1, 1]} : vector<128x16xbf16> to vector<8x16xbf16>
    %c64_77 = arith.constant 64 : index
    %c0_78 = arith.constant 0 : index
    %115 = vector.load %arg9[%c64_77, %c0_78] : memref<256x16xbf16, #tpu.memory_space<vmem>>, vector<16x16xbf16>
    %cst_79 = arith.constant dense<0.000000e+00> : vector<8x16xf32>
    %116 = tpu.matmul %114, %115, %cst_79 {dimension_numbers = #tpu.dot_dimension_numbers<[1], [0], [0], [1], [0, 0, 1, 1], [], []>} : vector<8x16xbf16>, vector<16x16xbf16>, vector<8x16xf32> -> vector<8x16xf32>
    %117 = arith.addf %113, %116 : vector<8x16xf32>
    %118 = vector.extract_strided_slice %96 {offsets = [40, 0], sizes = [8, 16], strides = [1, 1]} : vector<128x16xbf16> to vector<8x16xbf16>
    %c80_80 = arith.constant 80 : index
    %c0_81 = arith.constant 0 : index
    %119 = vector.load %arg9[%c80_80, %c0_81] : memref<256x16xbf16, #tpu.memory_space<vmem>>, vector<16x16xbf16>
    %cst_82 = arith.constant dense<0.000000e+00> : vector<8x16xf32>
    %120 = tpu.matmul %118, %119, %cst_82 {dimension_numbers = #tpu.dot_dimension_numbers<[1], [0], [0], [1], [0, 0, 1, 1], [], []>} : vector<8x16xbf16>, vector<16x16xbf16>, vector<8x16xf32> -> vector<8x16xf32>
    %121 = arith.addf %117, %120 : vector<8x16xf32>
    %122 = vector.extract_strided_slice %96 {offsets = [48, 0], sizes = [8, 16], strides = [1, 1]} : vector<128x16xbf16> to vector<8x16xbf16>
    %c96_83 = arith.constant 96 : index
    %c0_84 = arith.constant 0 : index
    %123 = vector.load %arg9[%c96_83, %c0_84] : memref<256x16xbf16, #tpu.memory_space<vmem>>, vector<16x16xbf16>
    %cst_85 = arith.constant dense<0.000000e+00> : vector<8x16xf32>
    %124 = tpu.matmul %122, %123, %cst_85 {dimension_numbers = #tpu.dot_dimension_numbers<[1], [0], [0], [1], [0, 0, 1, 1], [], []>} : vector<8x16xbf16>, vector<16x16xbf16>, vector<8x16xf32> -> vector<8x16xf32>
    %125 = arith.addf %121, %124 : vector<8x16xf32>
    %126 = vector.extract_strided_slice %96 {offsets = [56, 0], sizes = [8, 16], strides = [1, 1]} : vector<128x16xbf16> to vector<8x16xbf16>
    %c112_86 = arith.constant 112 : index
    %c0_87 = arith.constant 0 : index
    %127 = vector.load %arg9[%c112_86, %c0_87] : memref<256x16xbf16, #tpu.memory_space<vmem>>, vector<16x16xbf16>
    %cst_88 = arith.constant dense<0.000000e+00> : vector<8x16xf32>
    %128 = tpu.matmul %126, %127, %cst_88 {dimension_numbers = #tpu.dot_dimension_numbers<[1], [0], [0], [1], [0, 0, 1, 1], [], []>} : vector<8x16xbf16>, vector<16x16xbf16>, vector<8x16xf32> -> vector<8x16xf32>
    %129 = arith.addf %125, %128 : vector<8x16xf32>
    %130 = vector.extract_strided_slice %96 {offsets = [64, 0], sizes = [8, 16], strides = [1, 1]} : vector<128x16xbf16> to vector<8x16xbf16>
    %c128_89 = arith.constant 128 : index
    %c0_90 = arith.constant 0 : index
    %131 = vector.load %arg9[%c128_89, %c0_90] : memref<256x16xbf16, #tpu.memory_space<vmem>>, vector<16x16xbf16>
    %cst_91 = arith.constant dense<0.000000e+00> : vector<8x16xf32>
    %132 = tpu.matmul %130, %131, %cst_91 {dimension_numbers = #tpu.dot_dimension_numbers<[1], [0], [0], [1], [0, 0, 1, 1], [], []>} : vector<8x16xbf16>, vector<16x16xbf16>, vector<8x16xf32> -> vector<8x16xf32>
    %133 = arith.addf %129, %132 : vector<8x16xf32>
    %134 = vector.extract_strided_slice %96 {offsets = [72, 0], sizes = [8, 16], strides = [1, 1]} : vector<128x16xbf16> to vector<8x16xbf16>
    %c144 = arith.constant 144 : index
    %c0_92 = arith.constant 0 : index
    %135 = vector.load %arg9[%c144, %c0_92] : memref<256x16xbf16, #tpu.memory_space<vmem>>, vector<16x16xbf16>
    %cst_93 = arith.constant dense<0.000000e+00> : vector<8x16xf32>
    %136 = tpu.matmul %134, %135, %cst_93 {dimension_numbers = #tpu.dot_dimension_numbers<[1], [0], [0], [1], [0, 0, 1, 1], [], []>} : vector<8x16xbf16>, vector<16x16xbf16>, vector<8x16xf32> -> vector<8x16xf32>
    %137 = arith.addf %133, %136 : vector<8x16xf32>
    %138 = vector.extract_strided_slice %96 {offsets = [80, 0], sizes = [8, 16], strides = [1, 1]} : vector<128x16xbf16> to vector<8x16xbf16>
    %c160 = arith.constant 160 : index
    %c0_94 = arith.constant 0 : index
    %139 = vector.load %arg9[%c160, %c0_94] : memref<256x16xbf16, #tpu.memory_space<vmem>>, vector<16x16xbf16>
    %cst_95 = arith.constant dense<0.000000e+00> : vector<8x16xf32>
    %140 = tpu.matmul %138, %139, %cst_95 {dimension_numbers = #tpu.dot_dimension_numbers<[1], [0], [0], [1], [0, 0, 1, 1], [], []>} : vector<8x16xbf16>, vector<16x16xbf16>, vector<8x16xf32> -> vector<8x16xf32>
    %141 = arith.addf %137, %140 : vector<8x16xf32>
    %142 = vector.extract_strided_slice %96 {offsets = [88, 0], sizes = [8, 16], strides = [1, 1]} : vector<128x16xbf16> to vector<8x16xbf16>
    %c176 = arith.constant 176 : index
    %c0_96 = arith.constant 0 : index
    %143 = vector.load %arg9[%c176, %c0_96] : memref<256x16xbf16, #tpu.memory_space<vmem>>, vector<16x16xbf16>
    %cst_97 = arith.constant dense<0.000000e+00> : vector<8x16xf32>
    %144 = tpu.matmul %142, %143, %cst_97 {dimension_numbers = #tpu.dot_dimension_numbers<[1], [0], [0], [1], [0, 0, 1, 1], [], []>} : vector<8x16xbf16>, vector<16x16xbf16>, vector<8x16xf32> -> vector<8x16xf32>
    %145 = arith.addf %141, %144 : vector<8x16xf32>
    %146 = vector.extract_strided_slice %96 {offsets = [96, 0], sizes = [8, 16], strides = [1, 1]} : vector<128x16xbf16> to vector<8x16xbf16>
    %c192 = arith.constant 192 : index
    %c0_98 = arith.constant 0 : index
    %147 = vector.load %arg9[%c192, %c0_98] : memref<256x16xbf16, #tpu.memory_space<vmem>>, vector<16x16xbf16>
    %cst_99 = arith.constant dense<0.000000e+00> : vector<8x16xf32>
    %148 = tpu.matmul %146, %147, %cst_99 {dimension_numbers = #tpu.dot_dimension_numbers<[1], [0], [0], [1], [0, 0, 1, 1], [], []>} : vector<8x16xbf16>, vector<16x16xbf16>, vector<8x16xf32> -> vector<8x16xf32>
    %149 = arith.addf %145, %148 : vector<8x16xf32>
    %150 = vector.extract_strided_slice %96 {offsets = [104, 0], sizes = [8, 16], strides = [1, 1]} : vector<128x16xbf16> to vector<8x16xbf16>
    %c208 = arith.constant 208 : index
    %c0_100 = arith.constant 0 : index
    %151 = vector.load %arg9[%c208, %c0_100] : memref<256x16xbf16, #tpu.memory_space<vmem>>, vector<16x16xbf16>
    %cst_101 = arith.constant dense<0.000000e+00> : vector<8x16xf32>
    %152 = tpu.matmul %150, %151, %cst_101 {dimension_numbers = #tpu.dot_dimension_numbers<[1], [0], [0], [1], [0, 0, 1, 1], [], []>} : vector<8x16xbf16>, vector<16x16xbf16>, vector<8x16xf32> -> vector<8x16xf32>
    %153 = arith.addf %149, %152 : vector<8x16xf32>
    %154 = vector.extract_strided_slice %96 {offsets = [112, 0], sizes = [8, 16], strides = [1, 1]} : vector<128x16xbf16> to vector<8x16xbf16>
    %c224 = arith.constant 224 : index
    %c0_102 = arith.constant 0 : index
    %155 = vector.load %arg9[%c224, %c0_102] : memref<256x16xbf16, #tpu.memory_space<vmem>>, vector<16x16xbf16>
    %cst_103 = arith.constant dense<0.000000e+00> : vector<8x16xf32>
    %156 = tpu.matmul %154, %155, %cst_103 {dimension_numbers = #tpu.dot_dimension_numbers<[1], [0], [0], [1], [0, 0, 1, 1], [], []>} : vector<8x16xbf16>, vector<16x16xbf16>, vector<8x16xf32> -> vector<8x16xf32>
    %157 = arith.addf %153, %156 : vector<8x16xf32>
    %158 = vector.extract_strided_slice %96 {offsets = [120, 0], sizes = [8, 16], strides = [1, 1]} : vector<128x16xbf16> to vector<8x16xbf16>
    %c240 = arith.constant 240 : index
    %c0_104 = arith.constant 0 : index
    %159 = vector.load %arg9[%c240, %c0_104] : memref<256x16xbf16, #tpu.memory_space<vmem>>, vector<16x16xbf16>
    %cst_105 = arith.constant dense<0.000000e+00> : vector<8x16xf32>
    %160 = tpu.matmul %158, %159, %cst_105 {dimension_numbers = #tpu.dot_dimension_numbers<[1], [0], [0], [1], [0, 0, 1, 1], [], []>} : vector<8x16xbf16>, vector<16x16xbf16>, vector<8x16xf32> -> vector<8x16xf32>
    %161 = arith.addf %157, %160 : vector<8x16xf32>
    %c0_106 = arith.constant 0 : index
    %c0_107 = arith.constant 0 : index
    %162 = vector.load %arg10[%c0_106, %c0_107] : memref<1x16xf32, #tpu.memory_space<vmem>>, vector<1x16xf32>
    %163 = vector.broadcast %162 : vector<1x16xf32> to vector<8x16xf32>
    %164 = arith.addf %161, %163 : vector<8x16xf32>
    %165 = arith.truncf %164 : vector<8x16xf32> to vector<8x16xbf16>
    %c0_108 = arith.constant 0 : index
    %c0_109 = arith.constant 0 : index
    %166 = vector.load %arg11[%c0_108, %c0_109] : memref<256x8xbf16, #tpu.memory_space<vmem>>, vector<256x8xbf16>
    %cst_110 = arith.constant dense<0.000000e+00> : vector<256x16xf32>
    %167 = tpu.matmul %166, %165, %cst_110 {dimension_numbers = #tpu.dot_dimension_numbers<[1], [0], [0], [1], [0, 0, 1, 1], [], []>} : vector<256x8xbf16>, vector<8x16xbf16>, vector<256x16xf32> -> vector<256x16xf32>
    %168 = arith.truncf %167 : vector<256x16xf32> to vector<256x16xbf16>
    %cst_111 = arith.constant 0.000000e+00 : f32
    %169 = vector.broadcast %cst_111 : f32 to vector<16x16xf32>
    %170 = vector.extract_strided_slice %168 {offsets = [0, 0], sizes = [16, 16], strides = [1, 1]} : vector<256x16xbf16> to vector<16x16xbf16>
    %c0_112 = arith.constant 0 : index
    %c0_113 = arith.constant 0 : index
    %171 = vector.load %arg12[%c0_112, %c0_113] : memref<256x16xbf16, #tpu.memory_space<vmem>>, vector<16x16xbf16>
    %cst_114 = arith.constant dense<0.000000e+00> : vector<16x16xf32>
    %172 = tpu.matmul %170, %171, %cst_114 {dimension_numbers = #tpu.dot_dimension_numbers<[1], [0], [0], [1], [0, 0, 1, 1], [], []>} : vector<16x16xbf16>, vector<16x16xbf16>, vector<16x16xf32> -> vector<16x16xf32>
    %173 = arith.addf %169, %172 : vector<16x16xf32>
    %174 = vector.extract_strided_slice %168 {offsets = [16, 0], sizes = [16, 16], strides = [1, 1]} : vector<256x16xbf16> to vector<16x16xbf16>
    %c16_115 = arith.constant 16 : index
    %c0_116 = arith.constant 0 : index
    %175 = vector.load %arg12[%c16_115, %c0_116] : memref<256x16xbf16, #tpu.memory_space<vmem>>, vector<16x16xbf16>
    %cst_117 = arith.constant dense<0.000000e+00> : vector<16x16xf32>
    %176 = tpu.matmul %174, %175, %cst_117 {dimension_numbers = #tpu.dot_dimension_numbers<[1], [0], [0], [1], [0, 0, 1, 1], [], []>} : vector<16x16xbf16>, vector<16x16xbf16>, vector<16x16xf32> -> vector<16x16xf32>
    %177 = arith.addf %173, %176 : vector<16x16xf32>
    %178 = vector.extract_strided_slice %168 {offsets = [32, 0], sizes = [16, 16], strides = [1, 1]} : vector<256x16xbf16> to vector<16x16xbf16>
    %c32_118 = arith.constant 32 : index
    %c0_119 = arith.constant 0 : index
    %179 = vector.load %arg12[%c32_118, %c0_119] : memref<256x16xbf16, #tpu.memory_space<vmem>>, vector<16x16xbf16>
    %cst_120 = arith.constant dense<0.000000e+00> : vector<16x16xf32>
    %180 = tpu.matmul %178, %179, %cst_120 {dimension_numbers = #tpu.dot_dimension_numbers<[1], [0], [0], [1], [0, 0, 1, 1], [], []>} : vector<16x16xbf16>, vector<16x16xbf16>, vector<16x16xf32> -> vector<16x16xf32>
    %181 = arith.addf %177, %180 : vector<16x16xf32>
    %182 = vector.extract_strided_slice %168 {offsets = [48, 0], sizes = [16, 16], strides = [1, 1]} : vector<256x16xbf16> to vector<16x16xbf16>
    %c48_121 = arith.constant 48 : index
    %c0_122 = arith.constant 0 : index
    %183 = vector.load %arg12[%c48_121, %c0_122] : memref<256x16xbf16, #tpu.memory_space<vmem>>, vector<16x16xbf16>
    %cst_123 = arith.constant dense<0.000000e+00> : vector<16x16xf32>
    %184 = tpu.matmul %182, %183, %cst_123 {dimension_numbers = #tpu.dot_dimension_numbers<[1], [0], [0], [1], [0, 0, 1, 1], [], []>} : vector<16x16xbf16>, vector<16x16xbf16>, vector<16x16xf32> -> vector<16x16xf32>
    %185 = arith.addf %181, %184 : vector<16x16xf32>
    %186 = vector.extract_strided_slice %168 {offsets = [64, 0], sizes = [16, 16], strides = [1, 1]} : vector<256x16xbf16> to vector<16x16xbf16>
    %c64_124 = arith.constant 64 : index
    %c0_125 = arith.constant 0 : index
    %187 = vector.load %arg12[%c64_124, %c0_125] : memref<256x16xbf16, #tpu.memory_space<vmem>>, vector<16x16xbf16>
    %cst_126 = arith.constant dense<0.000000e+00> : vector<16x16xf32>
    %188 = tpu.matmul %186, %187, %cst_126 {dimension_numbers = #tpu.dot_dimension_numbers<[1], [0], [0], [1], [0, 0, 1, 1], [], []>} : vector<16x16xbf16>, vector<16x16xbf16>, vector<16x16xf32> -> vector<16x16xf32>
    %189 = arith.addf %185, %188 : vector<16x16xf32>
    %190 = vector.extract_strided_slice %168 {offsets = [80, 0], sizes = [16, 16], strides = [1, 1]} : vector<256x16xbf16> to vector<16x16xbf16>
    %c80_127 = arith.constant 80 : index
    %c0_128 = arith.constant 0 : index
    %191 = vector.load %arg12[%c80_127, %c0_128] : memref<256x16xbf16, #tpu.memory_space<vmem>>, vector<16x16xbf16>
    %cst_129 = arith.constant dense<0.000000e+00> : vector<16x16xf32>
    %192 = tpu.matmul %190, %191, %cst_129 {dimension_numbers = #tpu.dot_dimension_numbers<[1], [0], [0], [1], [0, 0, 1, 1], [], []>} : vector<16x16xbf16>, vector<16x16xbf16>, vector<16x16xf32> -> vector<16x16xf32>
    %193 = arith.addf %189, %192 : vector<16x16xf32>
    %194 = vector.extract_strided_slice %168 {offsets = [96, 0], sizes = [16, 16], strides = [1, 1]} : vector<256x16xbf16> to vector<16x16xbf16>
    %c96_130 = arith.constant 96 : index
    %c0_131 = arith.constant 0 : index
    %195 = vector.load %arg12[%c96_130, %c0_131] : memref<256x16xbf16, #tpu.memory_space<vmem>>, vector<16x16xbf16>
    %cst_132 = arith.constant dense<0.000000e+00> : vector<16x16xf32>
    %196 = tpu.matmul %194, %195, %cst_132 {dimension_numbers = #tpu.dot_dimension_numbers<[1], [0], [0], [1], [0, 0, 1, 1], [], []>} : vector<16x16xbf16>, vector<16x16xbf16>, vector<16x16xf32> -> vector<16x16xf32>
    %197 = arith.addf %193, %196 : vector<16x16xf32>
    %198 = vector.extract_strided_slice %168 {offsets = [112, 0], sizes = [16, 16], strides = [1, 1]} : vector<256x16xbf16> to vector<16x16xbf16>
    %c112_133 = arith.constant 112 : index
    %c0_134 = arith.constant 0 : index
    %199 = vector.load %arg12[%c112_133, %c0_134] : memref<256x16xbf16, #tpu.memory_space<vmem>>, vector<16x16xbf16>
    %cst_135 = arith.constant dense<0.000000e+00> : vector<16x16xf32>
    %200 = tpu.matmul %198, %199, %cst_135 {dimension_numbers = #tpu.dot_dimension_numbers<[1], [0], [0], [1], [0, 0, 1, 1], [], []>} : vector<16x16xbf16>, vector<16x16xbf16>, vector<16x16xf32> -> vector<16x16xf32>
    %201 = arith.addf %197, %200 : vector<16x16xf32>
    %202 = vector.extract_strided_slice %168 {offsets = [128, 0], sizes = [16, 16], strides = [1, 1]} : vector<256x16xbf16> to vector<16x16xbf16>
    %c128_136 = arith.constant 128 : index
    %c0_137 = arith.constant 0 : index
    %203 = vector.load %arg12[%c128_136, %c0_137] : memref<256x16xbf16, #tpu.memory_space<vmem>>, vector<16x16xbf16>
    %cst_138 = arith.constant dense<0.000000e+00> : vector<16x16xf32>
    %204 = tpu.matmul %202, %203, %cst_138 {dimension_numbers = #tpu.dot_dimension_numbers<[1], [0], [0], [1], [0, 0, 1, 1], [], []>} : vector<16x16xbf16>, vector<16x16xbf16>, vector<16x16xf32> -> vector<16x16xf32>
    %205 = arith.addf %201, %204 : vector<16x16xf32>
    %206 = vector.extract_strided_slice %168 {offsets = [144, 0], sizes = [16, 16], strides = [1, 1]} : vector<256x16xbf16> to vector<16x16xbf16>
    %c144_139 = arith.constant 144 : index
    %c0_140 = arith.constant 0 : index
    %207 = vector.load %arg12[%c144_139, %c0_140] : memref<256x16xbf16, #tpu.memory_space<vmem>>, vector<16x16xbf16>
    %cst_141 = arith.constant dense<0.000000e+00> : vector<16x16xf32>
    %208 = tpu.matmul %206, %207, %cst_141 {dimension_numbers = #tpu.dot_dimension_numbers<[1], [0], [0], [1], [0, 0, 1, 1], [], []>} : vector<16x16xbf16>, vector<16x16xbf16>, vector<16x16xf32> -> vector<16x16xf32>
    %209 = arith.addf %205, %208 : vector<16x16xf32>
    %210 = vector.extract_strided_slice %168 {offsets = [160, 0], sizes = [16, 16], strides = [1, 1]} : vector<256x16xbf16> to vector<16x16xbf16>
    %c160_142 = arith.constant 160 : index
    %c0_143 = arith.constant 0 : index
    %211 = vector.load %arg12[%c160_142, %c0_143] : memref<256x16xbf16, #tpu.memory_space<vmem>>, vector<16x16xbf16>
    %cst_144 = arith.constant dense<0.000000e+00> : vector<16x16xf32>
    %212 = tpu.matmul %210, %211, %cst_144 {dimension_numbers = #tpu.dot_dimension_numbers<[1], [0], [0], [1], [0, 0, 1, 1], [], []>} : vector<16x16xbf16>, vector<16x16xbf16>, vector<16x16xf32> -> vector<16x16xf32>
    %213 = arith.addf %209, %212 : vector<16x16xf32>
    %214 = vector.extract_strided_slice %168 {offsets = [176, 0], sizes = [16, 16], strides = [1, 1]} : vector<256x16xbf16> to vector<16x16xbf16>
    %c176_145 = arith.constant 176 : index
    %c0_146 = arith.constant 0 : index
    %215 = vector.load %arg12[%c176_145, %c0_146] : memref<256x16xbf16, #tpu.memory_space<vmem>>, vector<16x16xbf16>
    %cst_147 = arith.constant dense<0.000000e+00> : vector<16x16xf32>
    %216 = tpu.matmul %214, %215, %cst_147 {dimension_numbers = #tpu.dot_dimension_numbers<[1], [0], [0], [1], [0, 0, 1, 1], [], []>} : vector<16x16xbf16>, vector<16x16xbf16>, vector<16x16xf32> -> vector<16x16xf32>
    %217 = arith.addf %213, %216 : vector<16x16xf32>
    %218 = vector.extract_strided_slice %168 {offsets = [192, 0], sizes = [16, 16], strides = [1, 1]} : vector<256x16xbf16> to vector<16x16xbf16>
    %c192_148 = arith.constant 192 : index
    %c0_149 = arith.constant 0 : index
    %219 = vector.load %arg12[%c192_148, %c0_149] : memref<256x16xbf16, #tpu.memory_space<vmem>>, vector<16x16xbf16>
    %cst_150 = arith.constant dense<0.000000e+00> : vector<16x16xf32>
    %220 = tpu.matmul %218, %219, %cst_150 {dimension_numbers = #tpu.dot_dimension_numbers<[1], [0], [0], [1], [0, 0, 1, 1], [], []>} : vector<16x16xbf16>, vector<16x16xbf16>, vector<16x16xf32> -> vector<16x16xf32>
    %221 = arith.addf %217, %220 : vector<16x16xf32>
    %222 = vector.extract_strided_slice %168 {offsets = [208, 0], sizes = [16, 16], strides = [1, 1]} : vector<256x16xbf16> to vector<16x16xbf16>
    %c208_151 = arith.constant 208 : index
    %c0_152 = arith.constant 0 : index
    %223 = vector.load %arg12[%c208_151, %c0_152] : memref<256x16xbf16, #tpu.memory_space<vmem>>, vector<16x16xbf16>
    %cst_153 = arith.constant dense<0.000000e+00> : vector<16x16xf32>
    %224 = tpu.matmul %222, %223, %cst_153 {dimension_numbers = #tpu.dot_dimension_numbers<[1], [0], [0], [1], [0, 0, 1, 1], [], []>} : vector<16x16xbf16>, vector<16x16xbf16>, vector<16x16xf32> -> vector<16x16xf32>
    %225 = arith.addf %221, %224 : vector<16x16xf32>
    %226 = vector.extract_strided_slice %168 {offsets = [224, 0], sizes = [16, 16], strides = [1, 1]} : vector<256x16xbf16> to vector<16x16xbf16>
    %c224_154 = arith.constant 224 : index
    %c0_155 = arith.constant 0 : index
    %227 = vector.load %arg12[%c224_154, %c0_155] : memref<256x16xbf16, #tpu.memory_space<vmem>>, vector<16x16xbf16>
    %cst_156 = arith.constant dense<0.000000e+00> : vector<16x16xf32>
    %228 = tpu.matmul %226, %227, %cst_156 {dimension_numbers = #tpu.dot_dimension_numbers<[1], [0], [0], [1], [0, 0, 1, 1], [], []>} : vector<16x16xbf16>, vector<16x16xbf16>, vector<16x16xf32> -> vector<16x16xf32>
    %229 = arith.addf %225, %228 : vector<16x16xf32>
    %230 = vector.extract_strided_slice %168 {offsets = [240, 0], sizes = [16, 16], strides = [1, 1]} : vector<256x16xbf16> to vector<16x16xbf16>
    %c240_157 = arith.constant 240 : index
    %c0_158 = arith.constant 0 : index
    %231 = vector.load %arg12[%c240_157, %c0_158] : memref<256x16xbf16, #tpu.memory_space<vmem>>, vector<16x16xbf16>
    %cst_159 = arith.constant dense<0.000000e+00> : vector<16x16xf32>
    %232 = tpu.matmul %230, %231, %cst_159 {dimension_numbers = #tpu.dot_dimension_numbers<[1], [0], [0], [1], [0, 0, 1, 1], [], []>} : vector<16x16xbf16>, vector<16x16xbf16>, vector<16x16xf32> -> vector<16x16xf32>
    %233 = arith.addf %229, %232 : vector<16x16xf32>
    %c0_160 = arith.constant 0 : index
    %c0_161 = arith.constant 0 : index
    %234 = vector.load %arg13[%c0_160, %c0_161] : memref<16x16xf32, #tpu.memory_space<vmem>>, vector<16x16xf32>
    %235 = arith.addf %233, %234 : vector<16x16xf32>
    %cst_162 = arith.constant 0.000000e+00 : f32
    %236 = vector.broadcast %cst_162 : f32 to vector<16x16xf32>
    %237 = arith.maximumf %235, %236 : vector<16x16xf32>
    %238 = arith.truncf %237 : vector<16x16xf32> to vector<16x16xbf16>
    %c0_163 = arith.constant 0 : index
    %c0_164 = arith.constant 0 : index
    %239 = vector.load %arg14[%c0_163, %c0_164] : memref<576x16xbf16, #tpu.memory_space<vmem>>, vector<576x16xbf16>
    %cst_165 = arith.constant dense<0.000000e+00> : vector<576x16xf32>
    %240 = tpu.matmul %239, %238, %cst_165 {dimension_numbers = #tpu.dot_dimension_numbers<[1], [0], [0], [1], [0, 0, 1, 1], [], []>} : vector<576x16xbf16>, vector<16x16xbf16>, vector<576x16xf32> -> vector<576x16xf32>
    %241 = arith.truncf %240 : vector<576x16xf32> to vector<576x16xbf16>
    %cst_166 = arith.constant 0.000000e+00 : f32
    %242 = vector.broadcast %cst_166 : f32 to vector<64x16xf32>
    %243 = vector.extract_strided_slice %241 {offsets = [0, 0], sizes = [64, 16], strides = [1, 1]} : vector<576x16xbf16> to vector<64x16xbf16>
    %c0_167 = arith.constant 0 : index
    %c0_168 = arith.constant 0 : index
    %244 = vector.load %arg15[%c0_167, %c0_168] : memref<144x16xbf16, #tpu.memory_space<vmem>>, vector<16x16xbf16>
    %cst_169 = arith.constant dense<0.000000e+00> : vector<64x16xf32>
    %245 = tpu.matmul %243, %244, %cst_169 {dimension_numbers = #tpu.dot_dimension_numbers<[1], [0], [0], [1], [0, 0, 1, 1], [], []>} : vector<64x16xbf16>, vector<16x16xbf16>, vector<64x16xf32> -> vector<64x16xf32>
    %246 = arith.addf %242, %245 : vector<64x16xf32>
    %247 = vector.extract_strided_slice %241 {offsets = [64, 0], sizes = [64, 16], strides = [1, 1]} : vector<576x16xbf16> to vector<64x16xbf16>
    %c16_170 = arith.constant 16 : index
    %c0_171 = arith.constant 0 : index
    %248 = vector.load %arg15[%c16_170, %c0_171] : memref<144x16xbf16, #tpu.memory_space<vmem>>, vector<16x16xbf16>
    %cst_172 = arith.constant dense<0.000000e+00> : vector<64x16xf32>
    %249 = tpu.matmul %247, %248, %cst_172 {dimension_numbers = #tpu.dot_dimension_numbers<[1], [0], [0], [1], [0, 0, 1, 1], [], []>} : vector<64x16xbf16>, vector<16x16xbf16>, vector<64x16xf32> -> vector<64x16xf32>
    %250 = arith.addf %246, %249 : vector<64x16xf32>
    %251 = vector.extract_strided_slice %241 {offsets = [128, 0], sizes = [64, 16], strides = [1, 1]} : vector<576x16xbf16> to vector<64x16xbf16>
    %c32_173 = arith.constant 32 : index
    %c0_174 = arith.constant 0 : index
    %252 = vector.load %arg15[%c32_173, %c0_174] : memref<144x16xbf16, #tpu.memory_space<vmem>>, vector<16x16xbf16>
    %cst_175 = arith.constant dense<0.000000e+00> : vector<64x16xf32>
    %253 = tpu.matmul %251, %252, %cst_175 {dimension_numbers = #tpu.dot_dimension_numbers<[1], [0], [0], [1], [0, 0, 1, 1], [], []>} : vector<64x16xbf16>, vector<16x16xbf16>, vector<64x16xf32> -> vector<64x16xf32>
    %254 = arith.addf %250, %253 : vector<64x16xf32>
    %255 = vector.extract_strided_slice %241 {offsets = [192, 0], sizes = [64, 16], strides = [1, 1]} : vector<576x16xbf16> to vector<64x16xbf16>
    %c48_176 = arith.constant 48 : index
    %c0_177 = arith.constant 0 : index
    %256 = vector.load %arg15[%c48_176, %c0_177] : memref<144x16xbf16, #tpu.memory_space<vmem>>, vector<16x16xbf16>
    %cst_178 = arith.constant dense<0.000000e+00> : vector<64x16xf32>
    %257 = tpu.matmul %255, %256, %cst_178 {dimension_numbers = #tpu.dot_dimension_numbers<[1], [0], [0], [1], [0, 0, 1, 1], [], []>} : vector<64x16xbf16>, vector<16x16xbf16>, vector<64x16xf32> -> vector<64x16xf32>
    %258 = arith.addf %254, %257 : vector<64x16xf32>
    %259 = vector.extract_strided_slice %241 {offsets = [256, 0], sizes = [64, 16], strides = [1, 1]} : vector<576x16xbf16> to vector<64x16xbf16>
    %c64_179 = arith.constant 64 : index
    %c0_180 = arith.constant 0 : index
    %260 = vector.load %arg15[%c64_179, %c0_180] : memref<144x16xbf16, #tpu.memory_space<vmem>>, vector<16x16xbf16>
    %cst_181 = arith.constant dense<0.000000e+00> : vector<64x16xf32>
    %261 = tpu.matmul %259, %260, %cst_181 {dimension_numbers = #tpu.dot_dimension_numbers<[1], [0], [0], [1], [0, 0, 1, 1], [], []>} : vector<64x16xbf16>, vector<16x16xbf16>, vector<64x16xf32> -> vector<64x16xf32>
    %262 = arith.addf %258, %261 : vector<64x16xf32>
    %263 = vector.extract_strided_slice %241 {offsets = [320, 0], sizes = [64, 16], strides = [1, 1]} : vector<576x16xbf16> to vector<64x16xbf16>
    %c80_182 = arith.constant 80 : index
    %c0_183 = arith.constant 0 : index
    %264 = vector.load %arg15[%c80_182, %c0_183] : memref<144x16xbf16, #tpu.memory_space<vmem>>, vector<16x16xbf16>
    %cst_184 = arith.constant dense<0.000000e+00> : vector<64x16xf32>
    %265 = tpu.matmul %263, %264, %cst_184 {dimension_numbers = #tpu.dot_dimension_numbers<[1], [0], [0], [1], [0, 0, 1, 1], [], []>} : vector<64x16xbf16>, vector<16x16xbf16>, vector<64x16xf32> -> vector<64x16xf32>
    %266 = arith.addf %262, %265 : vector<64x16xf32>
    %267 = vector.extract_strided_slice %241 {offsets = [384, 0], sizes = [64, 16], strides = [1, 1]} : vector<576x16xbf16> to vector<64x16xbf16>
    %c96_185 = arith.constant 96 : index
    %c0_186 = arith.constant 0 : index
    %268 = vector.load %arg15[%c96_185, %c0_186] : memref<144x16xbf16, #tpu.memory_space<vmem>>, vector<16x16xbf16>
    %cst_187 = arith.constant dense<0.000000e+00> : vector<64x16xf32>
    %269 = tpu.matmul %267, %268, %cst_187 {dimension_numbers = #tpu.dot_dimension_numbers<[1], [0], [0], [1], [0, 0, 1, 1], [], []>} : vector<64x16xbf16>, vector<16x16xbf16>, vector<64x16xf32> -> vector<64x16xf32>
    %270 = arith.addf %266, %269 : vector<64x16xf32>
    %271 = vector.extract_strided_slice %241 {offsets = [448, 0], sizes = [64, 16], strides = [1, 1]} : vector<576x16xbf16> to vector<64x16xbf16>
    %c112_188 = arith.constant 112 : index
    %c0_189 = arith.constant 0 : index
    %272 = vector.load %arg15[%c112_188, %c0_189] : memref<144x16xbf16, #tpu.memory_space<vmem>>, vector<16x16xbf16>
    %cst_190 = arith.constant dense<0.000000e+00> : vector<64x16xf32>
    %273 = tpu.matmul %271, %272, %cst_190 {dimension_numbers = #tpu.dot_dimension_numbers<[1], [0], [0], [1], [0, 0, 1, 1], [], []>} : vector<64x16xbf16>, vector<16x16xbf16>, vector<64x16xf32> -> vector<64x16xf32>
    %274 = arith.addf %270, %273 : vector<64x16xf32>
    %275 = vector.extract_strided_slice %241 {offsets = [512, 0], sizes = [64, 16], strides = [1, 1]} : vector<576x16xbf16> to vector<64x16xbf16>
    %c128_191 = arith.constant 128 : index
    %c0_192 = arith.constant 0 : index
    %276 = vector.load %arg15[%c128_191, %c0_192] : memref<144x16xbf16, #tpu.memory_space<vmem>>, vector<16x16xbf16>
    %cst_193 = arith.constant dense<0.000000e+00> : vector<64x16xf32>
    %277 = tpu.matmul %275, %276, %cst_193 {dimension_numbers = #tpu.dot_dimension_numbers<[1], [0], [0], [1], [0, 0, 1, 1], [], []>} : vector<64x16xbf16>, vector<16x16xbf16>, vector<64x16xf32> -> vector<64x16xf32>
    %278 = arith.addf %274, %277 : vector<64x16xf32>
    %c0_194 = arith.constant 0 : index
    %c0_195 = arith.constant 0 : index
    %279 = vector.load %arg16[%c0_194, %c0_195] : memref<1x16xf32, #tpu.memory_space<vmem>>, vector<1x16xf32>
    %280 = vector.broadcast %279 : vector<1x16xf32> to vector<64x16xf32>
    %281 = arith.addf %278, %280 : vector<64x16xf32>
    %cst_196 = arith.constant 0.000000e+00 : f32
    %282 = vector.broadcast %cst_196 : f32 to vector<64x16xf32>
    %283 = arith.maximumf %281, %282 : vector<64x16xf32>
    %284 = arith.truncf %283 : vector<64x16xf32> to vector<64x16xbf16>
    %c0_197 = arith.constant 0 : index
    %c0_198 = arith.constant 0 : index
    %285 = vector.load %arg17[%c0_197, %c0_198] : memref<2304x64xbf16, #tpu.memory_space<vmem>>, vector<2304x64xbf16>
    %cst_199 = arith.constant dense<0.000000e+00> : vector<2304x16xf32>
    %286 = tpu.matmul %285, %284, %cst_199 {dimension_numbers = #tpu.dot_dimension_numbers<[1], [0], [0], [1], [0, 0, 1, 1], [], []>} : vector<2304x64xbf16>, vector<64x16xbf16>, vector<2304x16xf32> -> vector<2304x16xf32>
    %287 = arith.truncf %286 : vector<2304x16xf32> to vector<2304x16xbf16>
    %cst_200 = arith.constant 0.000000e+00 : f32
    %288 = vector.broadcast %cst_200 : f32 to vector<256x16xf32>
    %289 = vector.extract_strided_slice %287 {offsets = [0, 0], sizes = [256, 16], strides = [1, 1]} : vector<2304x16xbf16> to vector<256x16xbf16>
    %c0_201 = arith.constant 0 : index
    %c0_202 = arith.constant 0 : index
    %290 = vector.load %arg18[%c0_201, %c0_202] : memref<144x16xbf16, #tpu.memory_space<vmem>>, vector<16x16xbf16>
    %cst_203 = arith.constant dense<0.000000e+00> : vector<256x16xf32>
    %291 = tpu.matmul %289, %290, %cst_203 {dimension_numbers = #tpu.dot_dimension_numbers<[1], [0], [0], [1], [0, 0, 1, 1], [], []>} : vector<256x16xbf16>, vector<16x16xbf16>, vector<256x16xf32> -> vector<256x16xf32>
    %292 = arith.addf %288, %291 : vector<256x16xf32>
    %293 = vector.extract_strided_slice %287 {offsets = [256, 0], sizes = [256, 16], strides = [1, 1]} : vector<2304x16xbf16> to vector<256x16xbf16>
    %c16_204 = arith.constant 16 : index
    %c0_205 = arith.constant 0 : index
    %294 = vector.load %arg18[%c16_204, %c0_205] : memref<144x16xbf16, #tpu.memory_space<vmem>>, vector<16x16xbf16>
    %cst_206 = arith.constant dense<0.000000e+00> : vector<256x16xf32>
    %295 = tpu.matmul %293, %294, %cst_206 {dimension_numbers = #tpu.dot_dimension_numbers<[1], [0], [0], [1], [0, 0, 1, 1], [], []>} : vector<256x16xbf16>, vector<16x16xbf16>, vector<256x16xf32> -> vector<256x16xf32>
    %296 = arith.addf %292, %295 : vector<256x16xf32>
    %297 = vector.extract_strided_slice %287 {offsets = [512, 0], sizes = [256, 16], strides = [1, 1]} : vector<2304x16xbf16> to vector<256x16xbf16>
    %c32_207 = arith.constant 32 : index
    %c0_208 = arith.constant 0 : index
    %298 = vector.load %arg18[%c32_207, %c0_208] : memref<144x16xbf16, #tpu.memory_space<vmem>>, vector<16x16xbf16>
    %cst_209 = arith.constant dense<0.000000e+00> : vector<256x16xf32>
    %299 = tpu.matmul %297, %298, %cst_209 {dimension_numbers = #tpu.dot_dimension_numbers<[1], [0], [0], [1], [0, 0, 1, 1], [], []>} : vector<256x16xbf16>, vector<16x16xbf16>, vector<256x16xf32> -> vector<256x16xf32>
    %300 = arith.addf %296, %299 : vector<256x16xf32>
    %301 = vector.extract_strided_slice %287 {offsets = [768, 0], sizes = [256, 16], strides = [1, 1]} : vector<2304x16xbf16> to vector<256x16xbf16>
    %c48_210 = arith.constant 48 : index
    %c0_211 = arith.constant 0 : index
    %302 = vector.load %arg18[%c48_210, %c0_211] : memref<144x16xbf16, #tpu.memory_space<vmem>>, vector<16x16xbf16>
    %cst_212 = arith.constant dense<0.000000e+00> : vector<256x16xf32>
    %303 = tpu.matmul %301, %302, %cst_212 {dimension_numbers = #tpu.dot_dimension_numbers<[1], [0], [0], [1], [0, 0, 1, 1], [], []>} : vector<256x16xbf16>, vector<16x16xbf16>, vector<256x16xf32> -> vector<256x16xf32>
    %304 = arith.addf %300, %303 : vector<256x16xf32>
    %305 = vector.extract_strided_slice %287 {offsets = [1024, 0], sizes = [256, 16], strides = [1, 1]} : vector<2304x16xbf16> to vector<256x16xbf16>
    %c64_213 = arith.constant 64 : index
    %c0_214 = arith.constant 0 : index
    %306 = vector.load %arg18[%c64_213, %c0_214] : memref<144x16xbf16, #tpu.memory_space<vmem>>, vector<16x16xbf16>
    %cst_215 = arith.constant dense<0.000000e+00> : vector<256x16xf32>
    %307 = tpu.matmul %305, %306, %cst_215 {dimension_numbers = #tpu.dot_dimension_numbers<[1], [0], [0], [1], [0, 0, 1, 1], [], []>} : vector<256x16xbf16>, vector<16x16xbf16>, vector<256x16xf32> -> vector<256x16xf32>
    %308 = arith.addf %304, %307 : vector<256x16xf32>
    %309 = vector.extract_strided_slice %287 {offsets = [1280, 0], sizes = [256, 16], strides = [1, 1]} : vector<2304x16xbf16> to vector<256x16xbf16>
    %c80_216 = arith.constant 80 : index
    %c0_217 = arith.constant 0 : index
    %310 = vector.load %arg18[%c80_216, %c0_217] : memref<144x16xbf16, #tpu.memory_space<vmem>>, vector<16x16xbf16>
    %cst_218 = arith.constant dense<0.000000e+00> : vector<256x16xf32>
    %311 = tpu.matmul %309, %310, %cst_218 {dimension_numbers = #tpu.dot_dimension_numbers<[1], [0], [0], [1], [0, 0, 1, 1], [], []>} : vector<256x16xbf16>, vector<16x16xbf16>, vector<256x16xf32> -> vector<256x16xf32>
    %312 = arith.addf %308, %311 : vector<256x16xf32>
    %313 = vector.extract_strided_slice %287 {offsets = [1536, 0], sizes = [256, 16], strides = [1, 1]} : vector<2304x16xbf16> to vector<256x16xbf16>
    %c96_219 = arith.constant 96 : index
    %c0_220 = arith.constant 0 : index
    %314 = vector.load %arg18[%c96_219, %c0_220] : memref<144x16xbf16, #tpu.memory_space<vmem>>, vector<16x16xbf16>
    %cst_221 = arith.constant dense<0.000000e+00> : vector<256x16xf32>
    %315 = tpu.matmul %313, %314, %cst_221 {dimension_numbers = #tpu.dot_dimension_numbers<[1], [0], [0], [1], [0, 0, 1, 1], [], []>} : vector<256x16xbf16>, vector<16x16xbf16>, vector<256x16xf32> -> vector<256x16xf32>
    %316 = arith.addf %312, %315 : vector<256x16xf32>
    %317 = vector.extract_strided_slice %287 {offsets = [1792, 0], sizes = [256, 16], strides = [1, 1]} : vector<2304x16xbf16> to vector<256x16xbf16>
    %c112_222 = arith.constant 112 : index
    %c0_223 = arith.constant 0 : index
    %318 = vector.load %arg18[%c112_222, %c0_223] : memref<144x16xbf16, #tpu.memory_space<vmem>>, vector<16x16xbf16>
    %cst_224 = arith.constant dense<0.000000e+00> : vector<256x16xf32>
    %319 = tpu.matmul %317, %318, %cst_224 {dimension_numbers = #tpu.dot_dimension_numbers<[1], [0], [0], [1], [0, 0, 1, 1], [], []>} : vector<256x16xbf16>, vector<16x16xbf16>, vector<256x16xf32> -> vector<256x16xf32>
    %320 = arith.addf %316, %319 : vector<256x16xf32>
    %321 = vector.extract_strided_slice %287 {offsets = [2048, 0], sizes = [256, 16], strides = [1, 1]} : vector<2304x16xbf16> to vector<256x16xbf16>
    %c128_225 = arith.constant 128 : index
    %c0_226 = arith.constant 0 : index
    %322 = vector.load %arg18[%c128_225, %c0_226] : memref<144x16xbf16, #tpu.memory_space<vmem>>, vector<16x16xbf16>
    %cst_227 = arith.constant dense<0.000000e+00> : vector<256x16xf32>
    %323 = tpu.matmul %321, %322, %cst_227 {dimension_numbers = #tpu.dot_dimension_numbers<[1], [0], [0], [1], [0, 0, 1, 1], [], []>} : vector<256x16xbf16>, vector<16x16xbf16>, vector<256x16xf32> -> vector<256x16xf32>
    %324 = arith.addf %320, %323 : vector<256x16xf32>
    %c0_228 = arith.constant 0 : index
    %c0_229 = arith.constant 0 : index
    %325 = vector.load %arg19[%c0_228, %c0_229] : memref<1x16xf32, #tpu.memory_space<vmem>>, vector<1x16xf32>
    %326 = vector.broadcast %325 : vector<1x16xf32> to vector<256x16xf32>
    %327 = arith.addf %324, %326 : vector<256x16xf32>
    %c0_230 = arith.constant 0 : index
    %c0_231 = arith.constant 0 : index
    %c0_232 = arith.constant 0 : index
    %328 = vector.load %arg20[%c0_230, %c0_231, %c0_232] : memref<1x256x16xf32, #tpu.memory_space<vmem>>, vector<1x256x16xf32>
    %329 = vector.shape_cast %328 : vector<1x256x16xf32> to vector<256x16xf32>
    %330 = vector.shape_cast %327 : vector<256x16xf32> to vector<1x256x16xf32>
    tpu.vector_store %arg20[%c0_230, %c0_231, %c0_232], %330 {strides = array<i32>} : memref<1x256x16xf32, #tpu.memory_space<vmem>>, vector<1x256x16xf32>,
    return
  }
  func.func @transform_0(%arg0: i32) -> (i32, i32, i32) {
    %c0_i32 = arith.constant 0 : i32
    %c0_i32_0 = arith.constant 0 : i32
    %c0_i32_1 = arith.constant 0 : i32
    return %arg0, %c0_i32, %c0_i32_0 : i32, i32, i32
  }
  func.func @transform_1(%arg0: i32) -> (i32, i32) {
    %c0_i32 = arith.constant 0 : i32
    %c0_i32_0 = arith.constant 0 : i32
    %c0_i32_1 = arith.constant 0 : i32
    return %c0_i32, %c0_i32_0 : i32, i32
  }
  func.func @transform_2(%arg0: i32) -> (i32, i32) {
    %c0_i32 = arith.constant 0 : i32
    %c0_i32_0 = arith.constant 0 : i32
    %c0_i32_1 = arith.constant 0 : i32
    return %c0_i32, %c0_i32_0 : i32, i32
  }
  func.func @transform_3(%arg0: i32) -> (i32, i32) {
    %c0_i32 = arith.constant 0 : i32
    %c0_i32_0 = arith.constant 0 : i32
    %c0_i32_1 = arith.constant 0 : i32
    return %c0_i32, %c0_i32_0 : i32, i32
  }
  func.func @transform_4(%arg0: i32) -> (i32, i32) {
    %c0_i32 = arith.constant 0 : i32
    %c0_i32_0 = arith.constant 0 : i32
    %c0_i32_1 = arith.constant 0 : i32
    return %c0_i32, %c0_i32_0 : i32, i32
  }
  func.func @transform_5(%arg0: i32) -> (i32, i32) {
    %c0_i32 = arith.constant 0 : i32
    %c0_i32_0 = arith.constant 0 : i32
    %c0_i32_1 = arith.constant 0 : i32
    return %c0_i32, %c0_i32_0 : i32, i32
  }
  func.func @transform_6(%arg0: i32) -> (i32, i32) {
    %c0_i32 = arith.constant 0 : i32
    %c0_i32_0 = arith.constant 0 : i32
    %c0_i32_1 = arith.constant 0 : i32
    return %c0_i32, %c0_i32_0 : i32, i32
  }
  func.func @transform_7(%arg0: i32) -> (i32, i32) {
    %c0_i32 = arith.constant 0 : i32
    %c0_i32_0 = arith.constant 0 : i32
    %c0_i32_1 = arith.constant 0 : i32
    return %c0_i32, %c0_i32_0 : i32, i32
  }
  func.func @transform_8(%arg0: i32) -> (i32, i32) {
    %c0_i32 = arith.constant 0 : i32
    %c0_i32_0 = arith.constant 0 : i32
    %c0_i32_1 = arith.constant 0 : i32
    return %c0_i32, %c0_i32_0 : i32, i32
  }
  func.func @transform_9(%arg0: i32) -> (i32, i32) {
    %c0_i32 = arith.constant 0 : i32
    %c0_i32_0 = arith.constant 0 : i32
    %c0_i32_1 = arith.constant 0 : i32
    return %c0_i32, %c0_i32_0 : i32, i32
  }
  func.func @transform_10(%arg0: i32) -> (i32, i32) {
    %c0_i32 = arith.constant 0 : i32
    %c0_i32_0 = arith.constant 0 : i32
    %c0_i32_1 = arith.constant 0 : i32
    return %c0_i32, %c0_i32_0 : i32, i32
  }
  func.func @transform_11(%arg0: i32) -> (i32, i32) {
    %c0_i32 = arith.constant 0 : i32
    %c0_i32_0 = arith.constant 0 : i32
    %c0_i32_1 = arith.constant 0 : i32
    return %c0_i32, %c0_i32_0 : i32, i32
  }
  func.func @transform_12(%arg0: i32) -> (i32, i32) {
    %c0_i32 = arith.constant 0 : i32
    %c0_i32_0 = arith.constant 0 : i32
    %c0_i32_1 = arith.constant 0 : i32
    return %c0_i32, %c0_i32_0 : i32, i32
  }
  func.func @transform_13(%arg0: i32) -> (i32, i32) {
    %c0_i32 = arith.constant 0 : i32
    %c0_i32_0 = arith.constant 0 : i32
    %c0_i32_1 = arith.constant 0 : i32
    return %c0_i32, %c0_i32_0 : i32, i32
  }
  func.func @transform_14(%arg0: i32) -> (i32, i32) {
    %c0_i32 = arith.constant 0 : i32
    %c0_i32_0 = arith.constant 0 : i32
    %c0_i32_1 = arith.constant 0 : i32
    return %c0_i32, %c0_i32_0 : i32, i32
  }
  func.func @transform_15(%arg0: i32) -> (i32, i32) {
    %c0_i32 = arith.constant 0 : i32
    %c0_i32_0 = arith.constant 0 : i32
    %c0_i32_1 = arith.constant 0 : i32
    return %c0_i32, %c0_i32_0 : i32, i32
  }
  func.func @transform_16(%arg0: i32) -> (i32, i32) {
    %c0_i32 = arith.constant 0 : i32
    %c0_i32_0 = arith.constant 0 : i32
    %c0_i32_1 = arith.constant 0 : i32
    return %c0_i32, %c0_i32_0 : i32, i32
  }
  func.func @transform_17(%arg0: i32) -> (i32, i32) {
    %c0_i32 = arith.constant 0 : i32
    %c0_i32_0 = arith.constant 0 : i32
    %c0_i32_1 = arith.constant 0 : i32
    return %c0_i32, %c0_i32_0 : i32, i32
  }
  func.func @transform_18(%arg0: i32) -> (i32, i32) {
    %c0_i32 = arith.constant 0 : i32
    %c0_i32_0 = arith.constant 0 : i32
    %c0_i32_1 = arith.constant 0 : i32
    return %c0_i32, %c0_i32_0 : i32, i32
  }
  func.func @transform_19(%arg0: i32) -> (i32, i32, i32) {
    %c0_i32 = arith.constant 0 : i32
    %c0_i32_0 = arith.constant 0 : i32
    %c0_i32_1 = arith.constant 0 : i32
    return %arg0, %c0_i32, %c0_i32_0 : i32, i32, i32
  }
}

</mosaic_0001>

<bundles_post_ra>
// kernel: vae_forward.1
= control target key start
LH: loop header
LB: loop body
LE: loop exit
PB: predicated region body
PF: predicated region fallthrough
CT: control target
= control target key end

     0   :  { %s18586_s0 = inlined_call_operand.vmem [shape: bf16[2,256,16], index: 0, kind: input, shape index: {}]   ;;  %s18587_s1 = inlined_call_operand.vmem [shape: bf16[576,256], index: 1, kind: input, shape index: {}]   ;;  %s18588_s2 = inlined_call_operand.vmem [shape: bf16[144,16], index: 2, kind: input, shape index: {}]   ;;  %s18589_s3 = inlined_call_operand.vmem [shape: f32[1,16], index: 3, kind: input, shape index: {}]   ;;  %s18590_s4 = inlined_call_operand.vmem [shape: bf16[144,64], index: 4, kind: input, shape index: {}]   ;;  %s18591_s5 = inlined_call_operand.vmem [shape: bf16[144,16], index: 5, kind: input, shape index: {}]   ;;  %s18592_s6 = inlined_call_operand.vmem [shape: f32[1,16], index: 6, kind: input, shape index: {}]   ;;  %s18593_s7 = inlined_call_operand.vmem [shape: bf16[128,16], index: 7, kind: input, shape index: {}]   ;;  %s18594_s8 = inlined_call_operand.vmem [shape: bf16[256,16], index: 8, kind: input, shape index: {}]   ;;  %s18595_s9 = inlined_call_operand.vmem [shape: f32[1,16], index: 9, kind: input, shape index: {}]   ;;  %s18596_s10 = inlined_call_operand.vmem [shape: bf16[256,8], index: 10, kind: input, shape index: {}]   ;;  %s18597_s11 = inlined_call_operand.vmem [shape: bf16[256,16], index: 11, kind: input, shape index: {}]   ;;  %s18598_s12 = inlined_call_operand.vmem [shape: f32[16,16], index: 12, kind: input, shape index: {}]   ;;  %s18599_s13 = inlined_call_operand.vmem [shape: bf16[576,16], index: 13, kind: input, shape index: {}]   ;;  %s18600_s14 = inlined_call_operand.vmem [shape: bf16[144,16], index: 14, kind: input, shape index: {}]   ;;  %s18601_s15 = inlined_call_operand.vmem [shape: f32[1,16], index: 15, kind: input, shape index: {}]   ;;  %s18602_s16 = inlined_call_operand.vmem [shape: bf16[2304,64], index: 16, kind: input, shape index: {}]   ;;  %s18603_s17 = inlined_call_operand.vmem [shape: bf16[144,16], index: 17, kind: input, shape index: {}]   ;;  %s18604_s18 = inlined_call_operand.vmem [shape: f32[1,16], index: 18, kind: input, shape index: {}]   ;;  %s18605_s19 = inlined_call_operand.vmem [shape: f32[2,256,16], index: 19, kind: output, shape index: {}]  }
   0x1   :  { %18609 = sst [smem:[#allocation18_spill]] %s18586_s0  ;;  %s15087_s0 = smov 0  }
   0x2   :  { %18610 = sst [smem:[#allocation19_spill]] %s18587_s1 }
   0x3   :  { %18611 = sst [smem:[#allocation20_spill]] %s18588_s2 }
   0x4   :  { %18612 = sst [smem:[#allocation21_spill]] %s18589_s3 }
   0x5 LB: > { %s11955_s30 = sadd.s32 4294967295, %s14982_s0   ;;  %p11959_p0 = scmp.ge.s32.totalorder %s14982_s0, 1  ;;  %s14982_s0 = sphi %s15087_s0, %s29_s0  }
   0x6   : > { %p537_p1 = scmp.lt.s32.totalorder %s14982_s0, 3 }
   0x8   : > { %p538_p2 = pnand %p11959_p0, %p537_p1 }
   0xa   : > { %541 = sbr.rel (%p538_p2) target bundleno = 3853 (0xf0d), region = 96 }
   0xf   : > { %p593_p3 = scmp.lt.s32.totalorder %s11955_s30, 1  ;;  %v14984_v0 = vmov 0   ;;  %s18613_s1 = sld [smem:[#allocation19_spill]]  ;;  %vm1531_vm0 = vcmask 130048   ;;  %vm14986_vm1 = vmmov 0   ;;  %vm2433_vm2 = vcmask 523264  }
  0x10   : > { %1164 = vmatprep.subr.bf16.mxu0 %v14984_v0  ;;  %s18614_s24 = sld [smem:[#allocation18_spill]]  ;;  %vm4221_vm3 = vcmask 64512   ;;  %vm4270_vm4 = vcmask 1043456  }
  0x11   : > { %s18730_s30 = smov (!%p593_p3, %s11955_s30), 1  ;;  %s18616_s29 = sld [smem:[#allocation21_spill]] }
  0x12   : > { %s12810_s22 = sshll.u32 %s18730_s30, 7  ;;  %s12811_s23 = sshll.u32 %s18730_s30, 8 }
  0x13   : > { %s18432_s28 = scalar_lea.vmem %s18605_s19, %s12811_s23 }
  0x15   : > { %v14589_v1 = vld [vmem:[%s18613_s1 + $0x4] ss:$8 sps:$4 sm:$0xff]   ;;  %v14587_v18 = vld [vmem:[%s18613_s1] ss:$8 sps:$4 sm:$0xff]   ;;  %v14590_v19 = vld [vmem:[%s18613_s1 + $0x14] ss:$8 sps:$4 sm:$0xff]  }
  0x16   : > { %1196 = vmatprep.mubr.bf16.mxu0 %v14589_v1  ;;  %s15104_s25 = scalar_lea.vmem %s18614_s24, %s12810_s22  ;;  %v14592_v20 = vld [vmem:[%s18613_s1 + $0x10] ss:$8 sps:$4 sm:$0xff]   ;;  %v14593_v21 = vld [vmem:[%s18613_s1 + $0x24] ss:$8 sps:$4 sm:$0xff]   ;;  %v14595_v22 = vld [vmem:[%s18613_s1 + $0x20] ss:$8 sps:$4 sm:$0xff]  }
  0x17   : > { %v14571_v2 = vld [vmem:[%s15104_s25 + $0x38] sm:$0xff]   ;;  %v14572_v3 = vld [vmem:[%s15104_s25 + $0x30] sm:$0xff]   ;;  %v14573_v4 = vld [vmem:[%s15104_s25 + $0x28] sm:$0xff]   ;;  %s18615_s24 = sld [smem:[#allocation20_spill]] }
  0x18   : > { %1165 = vmatpush1.bf16.msra.mxu0 %v14571_v2  ;;  %v14574_v5 = vld [vmem:[%s15104_s25 + $0x20] sm:$0xff]   ;;  %v14575_v6 = vld [vmem:[%s15104_s25 + $0x18] sm:$0xff]   ;;  %v14576_v7 = vld [vmem:[%s15104_s25 + $0x10] sm:$0xff]  }
  0x19   : > { %1166 = vmatprep.subr.bf16.mxu0 %v14984_v0  ;;  %v14577_v8 = vld [vmem:[%s15104_s25 + $0x8] sm:$0xff]   ;;  %v14578_v9 = vld [vmem:[%s15104_s25] sm:$0xff]   ;;  %v14579_v10 = vld [vmem:[%s15104_s25 + $0x78] sm:$0xff]  }
  0x1a   : > { %v14580_v11 = vld [vmem:[%s15104_s25 + $0x70] sm:$0xff]   ;;  %v14581_v12 = vld [vmem:[%s15104_s25 + $0x68] sm:$0xff]   ;;  %v14582_v13 = vld [vmem:[%s15104_s25 + $0x60] sm:$0xff]  }
  0x1b   : > { %v14583_v14 = vld [vmem:[%s15104_s25 + $0x58] sm:$0xff]   ;;  %v14584_v15 = vld [vmem:[%s15104_s25 + $0x50] sm:$0xff]   ;;  %v14585_v16 = vld [vmem:[%s15104_s25 + $0x48] sm:$0xff]  }
  0x1c   : > { %1167 = vmatpush1.bf16.msra.mxu0 %v14572_v3  ;;  %v14586_v17 = vld [vmem:[%s15104_s25 + $0x40] sm:$0xff]   ;;  %v14596_v23 = vld [vmem:[%s18613_s1 + $0x34] ss:$8 sps:$4 sm:$0xff]   ;;  %v14598_v24 = vld [vmem:[%s18613_s1 + $0x30] ss:$8 sps:$4 sm:$0xff]  }
  0x1d   : > { %1168 = vmatprep.subr.bf16.mxu0 %v14984_v0  ;;  %v14599_v25 = vld [vmem:[%s18613_s1 + $0x44] ss:$8 sps:$4 sm:$0xff]   ;;  %v14601_v26 = vld [vmem:[%s18613_s1 + $0x40] ss:$8 sps:$4 sm:$0xff]   ;;  %v14602_v27 = vld [vmem:[%s18613_s1 + $0x54] ss:$8 sps:$4 sm:$0xff]  }
  0x1e   : > { %v14604_v28 = vld [vmem:[%s18613_s1 + $0x50] ss:$8 sps:$4 sm:$0xff]   ;;  %v14605_v29 = vld [vmem:[%s18613_s1 + $0x64] ss:$8 sps:$4 sm:$0xff]   ;;  %v14607_v30 = vld [vmem:[%s18613_s1 + $0x60] ss:$8 sps:$4 sm:$0xff]  }
  0x1f   : > { %v14608_v31 = vld [vmem:[%s18613_s1 + $0x74] ss:$8 sps:$4 sm:$0xff]   ;;  %v14610_v32 = vld [vmem:[%s18613_s1 + $0x70] ss:$8 sps:$4 sm:$0xff]   ;;  %v14611_v33 = vld [vmem:[%s18613_s1 + $0x84] ss:$8 sps:$4 sm:$0xff]  }
  0x20   : > { %1169 = vmatpush1.bf16.msra.mxu0 %v14573_v4  ;;  %v14613_v34 = vld [vmem:[%s18613_s1 + $0x80] ss:$8 sps:$4 sm:$0xff]   ;;  %v14614_v35 = vld [vmem:[%s18613_s1 + $0x94] ss:$8 sps:$4 sm:$0xff]   ;;  %v14616_v36 = vld [vmem:[%s18613_s1 + $0x90] ss:$8 sps:$4 sm:$0xff]  }
  0x21   : > { %1170 = vmatprep.subr.bf16.mxu0 %v14984_v0  ;;  %v14617_v37 = vld [vmem:[%s18613_s1 + $0xa4] ss:$8 sps:$4 sm:$0xff]   ;;  %v14619_v38 = vld [vmem:[%s18613_s1 + $0xa0] ss:$8 sps:$4 sm:$0xff]   ;;  %v14620_v39 = vld [vmem:[%s18613_s1 + $0xb4] ss:$8 sps:$4 sm:$0xff]  }
  0x22   : > { %v14622_v40 = vld [vmem:[%s18613_s1 + $0xb0] ss:$8 sps:$4 sm:$0xff]   ;;  %v14623_v41 = vld [vmem:[%s18613_s1 + $0xc4] ss:$8 sps:$4 sm:$0xff]   ;;  %v14625_v42 = vld [vmem:[%s18613_s1 + $0xc0] ss:$8 sps:$4 sm:$0xff]  }
  0x23   : > { %v14626_v43 = vld [vmem:[%s18613_s1 + $0xd4] ss:$8 sps:$4 sm:$0xff]   ;;  %v14628_v44 = vld [vmem:[%s18613_s1 + $0xd0] ss:$8 sps:$4 sm:$0xff]   ;;  %v14629_v45 = vld [vmem:[%s18613_s1 + $0xe4] ss:$8 sps:$4 sm:$0xff]  }
  0x24   : > { %1171 = vmatpush1.bf16.msra.mxu0 %v14574_v5  ;;  %v14677_v46 = vld [vmem:[%s18615_s24 + $0x8] sm:$0xff]   ;;  %v14632_v48 = vld [vmem:[%s18613_s1 + $0xf4] ss:$8 sps:$4 sm:$0xff]   ;;  %v14634_v49 = vld [vmem:[%s18613_s1 + $0xf0] ss:$8 sps:$4 sm:$0xff]  }
  0x25   : > { %1172 = vmatprep.subr.bf16.mxu0 %v14984_v0  ;;  %v14631_v47 = vld [vmem:[%s18613_s1 + $0xe0] ss:$8 sps:$4 sm:$0xff]   ;;  %13361 = vmatprep.subr.bf16.mxu1 %v14677_v46  ;;  %v14635_v50 = vld [vmem:[%s18613_s1 + $0x104] ss:$8 sps:$4 sm:$0xff]   ;;  %v14638_v52 = vld [vmem:[%s18613_s1 + $0x114] ss:$8 sps:$4 sm:$0xff]  }
  0x26   : > { %13362 = vmatpush3.bf16.msra.mxu1 %v14677_v46  ;;  %v14637_v51 = vld [vmem:[%s18613_s1 + $0x100] ss:$8 sps:$4 sm:$0xff]   ;;  %v14640_v54 = vld [vmem:[%s18613_s1 + $0x110] ss:$8 sps:$4 sm:$0xff]   ;;  %v14641_v55 = vld [vmem:[%s18613_s1 + $0x124] ss:$8 sps:$4 sm:$0xff]  }
  0x27   : > { %v15230_v53 = vld [vmem:[%s18615_s24] sm:$0xff]   ;;  %v14644_v57 = vld [vmem:[%s18613_s1 + $0x134] ss:$8 sps:$4 sm:$0xff]   ;;  %v14646_v58 = vld [vmem:[%s18613_s1 + $0x130] ss:$8 sps:$4 sm:$0xff]  }
  0x28   : > { %1173 = vmatpush1.bf16.msra.mxu0 %v14575_v6  ;;  %13371 = vmatprep.subr.bf16.mxu1 %v15230_v53  ;;  %v14643_v56 = vld [vmem:[%s18613_s1 + $0x120] ss:$8 sps:$4 sm:$0xff]   ;;  %v14647_v59 = vld [vmem:[%s18613_s1 + $0x144] ss:$8 sps:$4 sm:$0xff]   ;;  %v14650_v61 = vld [vmem:[%s18613_s1 + $0x154] ss:$8 sps:$4 sm:$0xff]  }
  0x29   : > { %1174 = vmatprep.subr.bf16.mxu0 %v14984_v0  ;;  %v14649_v60 = vld [vmem:[%s18613_s1 + $0x140] ss:$8 sps:$4 sm:$0xff]   ;;  %v14652_v62 = vld [vmem:[%s18613_s1 + $0x150] ss:$8 sps:$4 sm:$0xff]   ;;  %v14653_v63 = vld [vmem:[%s18613_s1 + $0x164] ss:$8 sps:$4 sm:$0xff]  }
  0x2a   : > { %v14656_v1 = vld [vmem:[%s18613_s1 + $0x174] ss:$8 sps:$4 sm:$0xff]   ;;  %v14658_v2 = vld [vmem:[%s18613_s1 + $0x170] ss:$8 sps:$4 sm:$0xff]   ;;  %v14659_v3 = vld [vmem:[%s18613_s1 + $0x184] ss:$8 sps:$4 sm:$0xff]  }
  0x2b   : > { %v14661_v4 = vld [vmem:[%s18613_s1 + $0x180] ss:$8 sps:$4 sm:$0xff]   ;;  %v14662_v5 = vld [vmem:[%s18613_s1 + $0x194] ss:$8 sps:$4 sm:$0xff]  }
  0x2c   : > { %1175 = vmatpush1.bf16.msra.mxu0 %v14576_v7 }
  0x2d   : > { %1176 = vmatprep.subr.bf16.mxu0 %v14984_v0 }
  0x30   : > { %1177 = vmatpush1.bf16.msra.mxu0 %v14577_v8 }
  0x31   : > { %1178 = vmatprep.subr.bf16.mxu0 %v14984_v0 }
  0x34   : > { %1179 = vmatpush1.bf16.msra.mxu0 %v14578_v9  ;;  %v14664_v9 = vld [vmem:[%s18613_s1 + $0x190] ss:$8 sps:$4 sm:$0xff]  }
  0x35   : > { %1180 = vmatprep.subr.bf16.mxu0 %v14984_v0 }
  0x38   : > { %1181 = vmatpush2.bf16.msra.mxu0 %v14579_v10  ;;  %v14665_v10 = vld [vmem:[%s18613_s1 + $0x1a4] ss:$8 sps:$4 sm:$0xff]  }
  0x39   : > { %1182 = vmatprep.subr.bf16.mxu0 %v14984_v0 }
  0x3c   : > { %1183 = vmatpush2.bf16.msra.mxu0 %v14580_v11 }
  0x3d   : > { %1184 = vmatprep.subr.bf16.mxu0 %v14984_v0 }
  0x40   : > { %1185 = vmatpush2.bf16.msra.mxu0 %v14581_v12 }
  0x41   : > { %1186 = vmatprep.subr.bf16.mxu0 %v14984_v0 }
  0x44   : > { %1187 = vmatpush2.bf16.msra.mxu0 %v14582_v13 }
  0x45   : > { %1188 = vmatprep.subr.bf16.mxu0 %v14984_v0 }
  0x48   : > { %1189 = vmatpush2.bf16.msra.mxu0 %v14583_v14 }
  0x49   : > { %1190 = vmatprep.subr.bf16.mxu0 %v14984_v0 }
  0x4c   : > { %1191 = vmatpush2.bf16.msra.mxu0 %v14584_v15  ;;  %v14667_v15 = vld [vmem:[%s18613_s1 + $0x1a0] ss:$8 sps:$4 sm:$0xff]  }
  0x4d   : > { %1192 = vmatprep.subr.bf16.mxu0 %v14984_v0 }
  0x50   : > { %1193 = vmatpush2.bf16.msra.mxu0 %v14585_v16  ;;  %v14668_v16 = vld [vmem:[%s18613_s1 + $0x1b4] ss:$8 sps:$4 sm:$0xff]  }
  0x51   : > { %1194 = vmatprep.subr.bf16.mxu0 %v14984_v0  ;;  %v14655_v0 = vld [vmem:[%s18613_s1 + $0x160] ss:$8 sps:$4 sm:$0xff]  }
  0x54   : > { %1195 = vmatpush2.bf16.msra.mxu0 %v14586_v17 }
  0x57   : > { %1197 = vmatmul.mubr.bf16.vlgmr.msra.gmra.mxu0 %v14587_v18 }
  0x58   : > { %1204 = vmatprep.mubr.bf16.mxu0 %v14590_v19 }
  0x5f   : > { %1205 = vmatmul.mubr.bf16.gmra.mxu0 %v14592_v20 }
  0x60   : > { %1212 = vmatprep.mubr.bf16.mxu0 %v14593_v21  ;;  %v14670_v21 = vld [vmem:[%s18613_s1 + $0x1b0] ss:$8 sps:$4 sm:$0xff]  }
  0x67   : > { %1213 = vmatmul.mubr.bf16.gmra.mxu0 %v14595_v22  ;;  %v14673_v22 = vld [vmem:[%s18613_s1 + $0x1c4] ss:$8 sps:$4 sm:$0xff]  }
  0x68   : > { %1220 = vmatprep.mubr.bf16.mxu0 %v14596_v23 }
  0x6f   : > { %1221 = vmatmul.mubr.bf16.gmra.mxu0 %v14598_v24 }
  0x70   : > { %1228 = vmatprep.mubr.bf16.mxu0 %v14599_v25 }
  0x77   : > { %1229 = vmatmul.mubr.bf16.gmra.mxu0 %v14601_v26 }
  0x78   : > { %1236 = vmatprep.mubr.bf16.mxu0 %v14602_v27  ;;  %v14671_v27 = vld [vmem:[%s18613_s1 + $0x1c0] ss:$8 sps:$4 sm:$0xff]  }
  0x7f   : > { %1237 = vmatmul.mubr.bf16.gmra.mxu0 %v14604_v28  ;;  %v14676_v28 = vld [vmem:[%s18613_s1 + $0x1d4] ss:$8 sps:$4 sm:$0xff]  }
  0x80   : > { %1244 = vmatprep.mubr.bf16.mxu0 %v14605_v29 }
  0x87   : > { %1245 = vmatmul.mubr.bf16.gmra.mxu0 %v14607_v30 }
  0x88   : > { %1252 = vmatprep.mubr.bf16.mxu0 %v14608_v31 }
  0x8f   : > { %1253 = vmatmul.mubr.bf16.gmra.mxu0 %v14610_v32 }
  0x90   : > { %1260 = vmatprep.mubr.bf16.mxu0 %v14611_v33  ;;  %v14674_v33 = vld [vmem:[%s18613_s1 + $0x1d0] ss:$8 sps:$4 sm:$0xff]  }
  0x97   : > { %1261 = vmatmul.mubr.bf16.gmra.mxu0 %v14613_v34 }
  0x98   : > { %1268 = vmatprep.mubr.bf16.mxu0 %v14614_v35  ;;  %v14680_v35 = vld [vmem:[%s18613_s1 + $0x1e4] ss:$8 sps:$4 sm:$0xff]  }
  0x9f   : > { %1269 = vmatmul.mubr.bf16.gmra.mxu0 %v14616_v36 }
  0xa0   : > { %1276 = vmatprep.mubr.bf16.mxu0 %v14617_v37 }
  0xa7   : > { %1277 = vmatmul.mubr.bf16.gmra.mxu0 %v14619_v38 }
  0xa8   : > { %1284 = vmatprep.mubr.bf16.mxu0 %v14620_v39 }
  0xaf   : > { %1285 = vmatmul.mubr.bf16.gmra.mxu0 %v14622_v40  ;;  %v14678_v40 = vld [vmem:[%s18613_s1 + $0x1e0] ss:$8 sps:$4 sm:$0xff]  }
  0xb0   : > { %1292 = vmatprep.mubr.bf16.mxu0 %v14623_v41 }
  0xb7   : > { %1293 = vmatmul.mubr.bf16.gmra.mxu0 %v14625_v42  ;;  %v14683_v42 = vld [vmem:[%s18613_s1 + $0x1f4] ss:$8 sps:$4 sm:$0xff]  }
  0xb8   : > { %1300 = vmatprep.mubr.bf16.mxu0 %v14626_v43  ;;  %v14694_v43 = vld [vmem:[%s18615_s24 + $0x10] sm:$0xff]  }
  0xbf   : > { %1301 = vmatmul.mubr.bf16.gmra.mxu0 %v14628_v44 }
  0xc0   : > { %1308 = vmatprep.mubr.bf16.mxu0 %v14629_v45 }
  0xc7   : > { %1309 = vmatmul.mubr.bf16.gmra.mxu0 %v14631_v47 }
  0xc8   : > { %1316 = vmatprep.mubr.bf16.mxu0 %v14632_v48  ;;  %v14681_v48 = vld [vmem:[%s18613_s1 + $0x1f0] ss:$8 sps:$4 sm:$0xff]  }
  0xcf   : > { %1317 = vmatmul.mubr.bf16.gmra.mxu0 %v14634_v49 }
  0xd0   : > { %1324 = vmatprep.mubr.bf16.mxu0 %v14635_v50  ;;  %v14686_v50 = vld [vmem:[%s18613_s1 + $0x204] ss:$8 sps:$4 sm:$0xff]  }
  0xd7   : > { %1325 = vmatmul.mubr.bf16.gmra.mxu0 %v14637_v51 }
  0xd8   : > { %1332 = vmatprep.mubr.bf16.mxu0 %v14638_v52 }
  0xdf   : > { %1333 = vmatmul.mubr.bf16.gmra.mxu0 %v14640_v54 }
  0xe0   : > { %1340 = vmatprep.mubr.bf16.mxu0 %v14641_v55  ;;  %v14684_v55 = vld [vmem:[%s18613_s1 + $0x200] ss:$8 sps:$4 sm:$0xff]  }
  0xe7   : > { %1341 = vmatmul.mubr.bf16.gmra.mxu0 %v14643_v56 }
  0xe8   : > { %1348 = vmatprep.mubr.bf16.mxu0 %v14644_v57  ;;  %v14690_v57 = vld [vmem:[%s18613_s1 + $0x214] ss:$8 sps:$4 sm:$0xff]  }
  0xef   : > { %1349 = vmatmul.mubr.bf16.gmra.mxu0 %v14646_v58 }
  0xf0   : > { %1356 = vmatprep.mubr.bf16.mxu0 %v14647_v59 }
  0xf7   : > { %1357 = vmatmul.mubr.bf16.gmra.mxu0 %v14649_v60 }
  0xf8   : > { %1364 = vmatprep.mubr.bf16.mxu0 %v14650_v61 }
  0xff   : > { %1365 = vmatmul.mubr.bf16.gmra.mxu0 %v14652_v62 }
 0x100   : > { %1372 = vmatprep.mubr.bf16.mxu0 %v14653_v63  ;;  %v14688_v63 = vld [vmem:[%s18613_s1 + $0x210] ss:$8 sps:$4 sm:$0xff]  }
 0x107   : > { %1373 = vmatmul.mubr.bf16.gmra.mxu0 %v14655_v0 }
 0x108   : > { %1380 = vmatprep.mubr.bf16.mxu0 %v14656_v1  ;;  %v14693_v1 = vld [vmem:[%s18613_s1 + $0x224] ss:$8 sps:$4 sm:$0xff]  }
 0x10f   : > { %1381 = vmatmul.mubr.bf16.gmra.mxu0 %v14658_v2 }
 0x110   : > { %1388 = vmatprep.mubr.bf16.mxu0 %v14659_v3 }
 0x117   : > { %v15281_v6 = vpop.f32.mrf.mxu0  ;;  %1389 = vmatmul.mubr.bf16.gmra.mxu0 %v14661_v4  ;;  %v14698_v4 = vld [vmem:[%s18615_s24 + $0x18] sm:$0xff]  }
 0x118   : > { %1396 = vmatprep.mubr.bf16.mxu0 %v14662_v5 }
 0x119   : > { %v1200_v7 = vpop.f32.mrf.mxu0 }
 0x11b   : > { %v15283_v8 = vpop.f32.mrf.mxu0 }
 0x11c   : > { %v1485_v58 = vpack.c.bf16 %v15283_v8, %v15281_v6  ;;  %v14691_v8 = vld [vmem:[%s18613_s1 + $0x220] ss:$8 sps:$4 sm:$0xff]  }
 0x11d   : > { %v1203_v11 = vpop.f32.mrf.mxu0 }
 0x11f   : > { %v15291_v12 = vpop.f32.mrf.mxu0  ;;  %1397 = vmatmul.mubr.bf16.gmra.mxu0 %v14664_v9 }
 0x120   : > { %1404 = vmatprep.mubr.bf16.mxu0 %v14665_v10  ;;  %v14697_v10 = vld [vmem:[%s18613_s1 + $0x234] ss:$8 sps:$4 sm:$0xff]  }
 0x121   : > { %v1208_v13 = vpop.f32.mrf.mxu0 }
 0x123   : > { %v15293_v14 = vpop.f32.mrf.mxu0 }
 0x124   : > { %v1486_v0 = vpack.c.bf16 %v15293_v14, %v15291_v12 }
 0x125   : > { %v1211_v17 = vpop.f32.mrf.mxu0 }
 0x127   : > { %v15301_v18 = vpop.f32.mrf.mxu0  ;;  %1405 = vmatmul.mubr.bf16.gmra.mxu0 %v14667_v15 }
 0x128   : > { %1412 = vmatprep.mubr.bf16.mxu0 %v14668_v16  ;;  %v14695_v16 = vld [vmem:[%s18613_s1 + $0x230] ss:$8 sps:$4 sm:$0xff]  }
 0x129   : > { %v1216_v19 = vpop.f32.mrf.mxu0 }
 0x12b   : > { %v15303_v20 = vpop.f32.mrf.mxu0 }
 0x12c   : > { %v1487_v2 = vpack.c.bf16 %v15303_v20, %v15301_v18  ;;  %v14699_v20 = vld [vmem:[%s18615_s24 + $0x20] sm:$0xff]  }
 0x12d   : > { %v1219_v23 = vpop.f32.mrf.mxu0 }
 0x12f   : > { %v15311_v24 = vpop.f32.mrf.mxu0  ;;  %1413 = vmatmul.mubr.bf16.gmra.mxu0 %v14670_v21 }
 0x130   : > { %1420 = vmatprep.mubr.bf16.mxu0 %v14673_v22 }
 0x131   : > { %v1224_v25 = vpop.f32.mrf.mxu0 }
 0x133   : > { %v15313_v26 = vpop.f32.mrf.mxu0 }
 0x134   : > { %v1488_v9 = vpack.c.bf16 %v15313_v26, %v15311_v24 }
 0x135   : > { %v1227_v29 = vpop.f32.mrf.mxu0 }
 0x137   : > { %v1230_v30 = vpop.f32.mrf.mxu0  ;;  %1421 = vmatmul.mubr.bf16.gmra.mxu0 %v14671_v27 }
 0x138   : > { %1428 = vmatprep.mubr.bf16.mxu0 %v14676_v28 }
 0x139   : > { %v1232_v31 = vpop.f32.mrf.mxu0 }
 0x13b   : > { %v1233_v32 = vpop.f32.mrf.mxu0 }
 0x13c   : > { %v1489_v34 = vpack.c.bf16 %v1233_v32, %v1230_v30 }
 0x13d   : > { %v1235_v36 = vpop.f32.mrf.mxu0 }
 0x13e   : > { %13363 = vmatprep.mubr.msk.bf16.mxu1 %vm1531_vm0, %v1489_v34 }
 0x13f   : > { %v1238_v37 = vpop.f32.mrf.mxu0  ;;  %1429 = vmatmul.mubr.bf16.gmra.mxu0 %v14674_v33 }
 0x140   : > { %1436 = vmatprep.mubr.bf16.mxu0 %v14680_v35  ;;  %v14700_v35 = vld [vmem:[%s18615_s24 + $0x28] sm:$0xff]  }
 0x141   : > { %v1240_v38 = vpop.f32.mrf.mxu0 }
 0x143   : > { %v1241_v39 = vpop.f32.mrf.mxu0 }
 0x144   : > { %v1490_v41 = vpack.c.bf16 %v1241_v39, %v1238_v37 }
 0x145   : > { %v1243_v44 = vpop.f32.mrf.mxu0 }
 0x146   : > { %13364 = vmatmul.mubr.msk.bf16.vlgmr.msra.gmra.mxu1 %vm1531_vm0, %v1490_v41 }
 0x147   : > { %v1246_v45 = vpop.f32.mrf.mxu0  ;;  %1437 = vmatmul.mubr.bf16.gmra.mxu0 %v14678_v40  ;;  %13372 = vmatpush3.bf16.msra.mxu1 %v15230_v53 }
 0x148   : > { %1444 = vmatprep.mubr.bf16.mxu0 %v14683_v42  ;;  %13381 = vmatprep.subr.bf16.mxu1 %v14694_v43 }
 0x149   : > { %v1248_v46 = vpop.f32.mrf.mxu0 }
 0x14b   : > { %v1249_v47 = vpop.f32.mrf.mxu0 }
 0x14c   : > { %v1491_v49 = vpack.c.bf16 %v1249_v47, %v1246_v45 }
 0x14d   : > { %v1251_v51 = vpop.f32.mrf.mxu0 }
 0x14e   : > { %13367 = vmatprep.mubr.msk.bf16.mxu1 %vm1531_vm0, %v1491_v49 }
 0x14f   : > { %v1254_v52 = vpop.f32.mrf.mxu0  ;;  %1445 = vmatmul.mubr.bf16.gmra.mxu0 %v14681_v48 }
 0x150   : > { %1452 = vmatprep.mubr.bf16.mxu0 %v14686_v50 }
 0x151   : > { %v1256_v53 = vpop.f32.mrf.mxu0 }
 0x153   : > { %v1257_v54 = vpop.f32.mrf.mxu0 }
 0x154   : > { %v1492_v56 = vpack.c.bf16 %v1257_v54, %v1254_v52 }
 0x155   : > { %v1259_v59 = vpop.f32.mrf.mxu0 }
 0x156   : > { %13368 = vmatmul.mubr.msk.bf16.gmra.mxu1 %vm1531_vm0, %v1492_v56  ;;  %v14701_v56 = vld [vmem:[%s18615_s24 + $0x30] sm:$0xff]  }
 0x157   : > { %v1262_v60 = vpop.f32.mrf.mxu0  ;;  %1453 = vmatmul.mubr.bf16.gmra.mxu0 %v14684_v55  ;;  %13373 = vmatprep.mubr.msk.bf16.mxu1 %vm1531_vm0, %v1485_v58 }
 0x158   : > { %1460 = vmatprep.mubr.bf16.mxu0 %v14690_v57 }
 0x159   : > { %v1264_v61 = vpop.f32.mrf.mxu0 }
 0x15b   : > { %v1265_v62 = vpop.f32.mrf.mxu0 }
 0x15c   : > { %v1493_v11 = vpack.c.bf16 %v1265_v62, %v1262_v60 }
 0x15d   : > { %v1267_v3 = vpop.f32.mrf.mxu0 }
 0x15e   : > { %13374 = vmatmul.mubr.msk.bf16.vlgmr.msra.gmra.mxu1 %vm1531_vm0, %v1486_v0 }
 0x15f   : > { %v1270_v5 = vpop.f32.mrf.mxu0  ;;  %1461 = vmatmul.mubr.bf16.gmra.mxu0 %v14688_v63  ;;  %13377 = vmatprep.mubr.msk.bf16.mxu1 %vm1531_vm0, %v1487_v2 }
 0x160   : > { %1468 = vmatprep.mubr.bf16.mxu0 %v14693_v1  ;;  %13382 = vmatpush3.bf16.msra.mxu1 %v14694_v43 }
 0x161   : > { %v1272_v6 = vpop.f32.mrf.mxu0  ;;  %13391 = vmatprep.subr.bf16.mxu1 %v14698_v4 }
 0x163   : > { %v1273_v7 = vpop.f32.mrf.mxu0 }
 0x164   : > { %v1494_v17 = vpack.c.bf16 %v1273_v7, %v1270_v5 }
 0x165   : > { %v1275_v12 = vpop.f32.mrf.mxu0 }
 0x166   : > { %13378 = vmatmul.mubr.msk.bf16.gmra.mxu1 %vm1531_vm0, %v1488_v9 }
 0x167   : > { %v1278_v13 = vpop.f32.mrf.mxu0  ;;  %1469 = vmatmul.mubr.bf16.gmra.mxu0 %v14691_v8  ;;  %13383 = vmatprep.mubr.msk.bf16.mxu1 %vm1531_vm0, %v1493_v11 }
 0x168   : > { %1476 = vmatprep.mubr.bf16.mxu0 %v14697_v10 }
 0x169   : > { %v1280_v14 = vpop.f32.mrf.mxu0 }
 0x16b   : > { %v1281_v15 = vpop.f32.mrf.mxu0 }
 0x16c   : > { %v1495_v18 = vpack.c.bf16 %v1281_v15, %v1278_v13  ;;  %v14702_v13 = vld [vmem:[%s18615_s24 + $0x38] sm:$0xff]  }
 0x16d   : > { %v1283_v19 = vpop.f32.mrf.mxu0 }
 0x16e   : > { %13384 = vmatmul.mubr.msk.bf16.vlgmr.msra.gmra.mxu1 %vm1531_vm0, %v1494_v17 }
 0x16f   : > { %v1286_v21 = vpop.f32.mrf.mxu0  ;;  %1477 = vmatmul.mubr.bf16.gmra.mxu0 %v14695_v16  ;;  %13387 = vmatprep.mubr.msk.bf16.mxu1 %vm1531_vm0, %v1495_v18 }
 0x170   : > { %13392 = vmatpush3.bf16.msra.mxu1 %v14698_v4 }
 0x171   : > { %v1288_v22 = vpop.f32.mrf.mxu0  ;;  %13401 = vmatprep.subr.bf16.mxu1 %v14699_v20 }
 0x173   : > { %v1289_v23 = vpop.f32.mrf.mxu0 }
 0x174   : > { %v1496_v24 = vpack.c.bf16 %v1289_v23, %v1286_v21 }
 0x175   : > { %v1291_v25 = vpop.f32.mrf.mxu0 }
 0x176   : > { %13388 = vmatmul.mubr.msk.bf16.gmra.mxu1 %vm1531_vm0, %v1496_v24 }
 0x177   : > { %v1294_v26 = vpop.f32.mrf.mxu0 }
 0x179   : > { %v1296_v27 = vpop.f32.mrf.mxu0 }
 0x17b   : > { %v1297_v28 = vpop.f32.mrf.mxu0 }
 0x17c   : > { %v1497_v29 = vpack.c.bf16 %v1297_v28, %v1294_v26 }
 0x17d   : > { %v1299_v30 = vpop.f32.mrf.mxu0 }
 0x17e   : > { %13393 = vmatprep.mubr.msk.bf16.mxu1 %vm1531_vm0, %v1497_v29 }
 0x17f   : > { %v1302_v31 = vpop.f32.mrf.mxu0 }
 0x181   : > { %v1304_v32 = vpop.f32.mrf.mxu0 }
 0x183   : > { %v1305_v33 = vpop.f32.mrf.mxu0 }
 0x184   : > { %v1498_v34 = vpack.c.bf16 %v1305_v33, %v1302_v31 }
 0x185   : > { %v1307_v36 = vpop.f32.mrf.mxu0 }
 0x186   : > { %13394 = vmatmul.mubr.msk.bf16.vlgmr.msra.gmra.mxu1 %vm1531_vm0, %v1498_v34  ;;  %v14703_v34 = vld [vmem:[%s18615_s24 + $0x40] sm:$0xff]  }
 0x187   : > { %v1310_v37 = vpop.f32.mrf.mxu0  ;;  %13402 = vmatpush3.bf16.msra.mxu1 %v14699_v20 }
 0x188   : > { %13411 = vmatprep.subr.bf16.mxu1 %v14700_v35 }
 0x189   : > { %v1312_v38 = vpop.f32.mrf.mxu0 }
 0x18b   : > { %v1313_v39 = vpop.f32.mrf.mxu0 }
 0x18c   : > { %v1499_v40 = vpack.c.bf16 %v1313_v39, %v1310_v37 }
 0x18d   : > { %v1315_v41 = vpop.f32.mrf.mxu0 }
 0x18e   : > { %13397 = vmatprep.mubr.msk.bf16.mxu1 %vm1531_vm0, %v1499_v40 }
 0x18f   : > { %v1318_v42 = vpop.f32.mrf.mxu0 }
 0x191   : > { %v1320_v43 = vpop.f32.mrf.mxu0 }
 0x193   : > { %v1321_v44 = vpop.f32.mrf.mxu0 }
 0x194   : > { %v1500_v45 = vpack.c.bf16 %v1321_v44, %v1318_v42 }
 0x195   : > { %v1323_v46 = vpop.f32.mrf.mxu0 }
 0x196   : > { %13398 = vmatmul.mubr.msk.bf16.gmra.mxu1 %vm1531_vm0, %v1500_v45 }
 0x197   : > { %v1326_v47 = vpop.f32.mrf.mxu0 }
 0x199   : > { %v1328_v48 = vpop.f32.mrf.mxu0 }
 0x19b   : > { %v1329_v49 = vpop.f32.mrf.mxu0 }
 0x19c   : > { %v1501_v50 = vpack.c.bf16 %v1329_v49, %v1326_v47 }
 0x19d   : > { %v1331_v51 = vpop.f32.mrf.mxu0 }
 0x19e   : > { %13403 = vmatprep.mubr.msk.bf16.mxu1 %vm1531_vm0, %v1501_v50 }
 0x19f   : > { %v1334_v52 = vpop.f32.mrf.mxu0 }
 0x1a1   : > { %v1336_v53 = vpop.f32.mrf.mxu0 }
 0x1a3   : > { %v1337_v54 = vpop.f32.mrf.mxu0 }
 0x1a4   : > { %v1502_v55 = vpack.c.bf16 %v1337_v54, %v1334_v52 }
 0x1a5   : > { %v1339_v57 = vpop.f32.mrf.mxu0 }
 0x1a6   : > { %13404 = vmatmul.mubr.msk.bf16.vlgmr.msra.gmra.mxu1 %vm1531_vm0, %v1502_v55 }
 0x1a7   : > { %v1342_v58 = vpop.f32.mrf.mxu0  ;;  %13412 = vmatpush3.bf16.msra.mxu1 %v14700_v35 }
 0x1a8   : > { %13421 = vmatprep.subr.bf16.mxu1 %v14701_v56 }
 0x1a9   : > { %v1344_v59 = vpop.f32.mrf.mxu0 }
 0x1ab   : > { %v1345_v60 = vpop.f32.mrf.mxu0 }
 0x1ac   : > { %v1503_v61 = vpack.c.bf16 %v1345_v60, %v1342_v58 }
 0x1ad   : > { %v1347_v62 = vpop.f32.mrf.mxu0 }
 0x1ae   : > { %13407 = vmatprep.mubr.msk.bf16.mxu1 %vm1531_vm0, %v1503_v61 }
 0x1af   : > { %v1350_v63 = vpop.f32.mrf.mxu0 }
 0x1b1   : > { %v1352_v0 = vpop.f32.mrf.mxu0 }
 0x1b3   : > { %v1353_v1 = vpop.f32.mrf.mxu0 }
 0x1b4   : > { %v1504_v2 = vpack.c.bf16 %v1353_v1, %v1350_v63 }
 0x1b5   : > { %v1355_v3 = vpop.f32.mrf.mxu0 }
 0x1b6   : > { %13408 = vmatmul.mubr.msk.bf16.gmra.mxu1 %vm1531_vm0, %v1504_v2 }
 0x1b7   : > { %v1358_v4 = vpop.f32.mrf.mxu0 }
 0x1b9   : > { %v1360_v5 = vpop.f32.mrf.mxu0 }
 0x1bb   : > { %v1361_v6 = vpop.f32.mrf.mxu0 }
 0x1bc   : > { %v1505_v7 = vpack.c.bf16 %v1361_v6, %v1358_v4 }
 0x1bd   : > { %v1363_v8 = vpop.f32.mrf.mxu0 }
 0x1be   : > { %13413 = vmatprep.mubr.msk.bf16.mxu1 %vm1531_vm0, %v1505_v7 }
 0x1bf   : > { %v1366_v9 = vpop.f32.mrf.mxu0 }
 0x1c1   : > { %v1368_v10 = vpop.f32.mrf.mxu0 }
 0x1c3   : > { %v1369_v11 = vpop.f32.mrf.mxu0 }
 0x1c4   : > { %v1506_v12 = vpack.c.bf16 %v1369_v11, %v1366_v9 }
 0x1c5   : > { %v1371_v14 = vpop.f32.mrf.mxu0 }
 0x1c6   : > { %13414 = vmatmul.mubr.msk.bf16.vlgmr.msra.gmra.mxu1 %vm1531_vm0, %v1506_v12 }
 0x1c7   : > { %v1374_v15 = vpop.f32.mrf.mxu0  ;;  %13422 = vmatpush3.bf16.msra.mxu1 %v14701_v56 }
 0x1c8   : > { %13431 = vmatprep.subr.bf16.mxu1 %v14702_v13 }
 0x1c9   : > { %v1376_v16 = vpop.f32.mrf.mxu0 }
 0x1cb   : > { %v1377_v17 = vpop.f32.mrf.mxu0 }
 0x1cc   : > { %v1507_v18 = vpack.c.bf16 %v1377_v17, %v1374_v15 }
 0x1cd   : > { %v1379_v19 = vpop.f32.mrf.mxu0 }
 0x1ce   : > { %13417 = vmatprep.mubr.msk.bf16.mxu1 %vm1531_vm0, %v1507_v18 }
 0x1cf   : > { %v1382_v20 = vpop.f32.mrf.mxu0 }
 0x1d1   : > { %v1384_v21 = vpop.f32.mrf.mxu0 }
 0x1d3   : > { %v1385_v22 = vpop.f32.mrf.mxu0 }
 0x1d4   : > { %v1508_v23 = vpack.c.bf16 %v1385_v22, %v1382_v20 }
 0x1d5   : > { %v1387_v24 = vpop.f32.mrf.mxu0 }
 0x1d6   : > { %13418 = vmatmul.mubr.msk.bf16.gmra.mxu1 %vm1531_vm0, %v1508_v23 }
 0x1d7   : > { %v1390_v25 = vpop.f32.mrf.mxu0 }
 0x1d9   : > { %v1392_v26 = vpop.f32.mrf.mxu0 }
 0x1db   : > { %v1393_v27 = vpop.f32.mrf.mxu0 }
 0x1dc   : > { %v1509_v28 = vpack.c.bf16 %v1393_v27, %v1390_v25 }
 0x1dd   : > { %v1395_v29 = vpop.f32.mrf.mxu0 }
 0x1de   : > { %13423 = vmatprep.mubr.msk.bf16.mxu1 %vm1531_vm0, %v1509_v28 }
 0x1df   : > { %v1398_v30 = vpop.f32.mrf.mxu0 }
 0x1e1   : > { %v1400_v31 = vpop.f32.mrf.mxu0 }
 0x1e3   : > { %v1401_v32 = vpop.f32.mrf.mxu0 }
 0x1e4   : > { %v1510_v33 = vpack.c.bf16 %v1401_v32, %v1398_v30 }
 0x1e5   : > { %v1403_v35 = vpop.f32.mrf.mxu0 }
 0x1e6   : > { %13424 = vmatmul.mubr.msk.bf16.vlgmr.msra.gmra.mxu1 %vm1531_vm0, %v1510_v33 }
 0x1e7   : > { %v1406_v36 = vpop.f32.mrf.mxu0  ;;  %13432 = vmatpush3.bf16.msra.mxu1 %v14702_v13 }
 0x1e8   : > { %13441 = vmatprep.subr.bf16.mxu1 %v14703_v34 }
 0x1e9   : > { %v1408_v37 = vpop.f32.mrf.mxu0 }
 0x1eb   : > { %v1409_v38 = vpop.f32.mrf.mxu0 }
 0x1ec   : > { %v1511_v39 = vpack.c.bf16 %v1409_v38, %v1406_v36 }
 0x1ed   : > { %v1411_v40 = vpop.f32.mrf.mxu0 }
 0x1ee   : > { %13427 = vmatprep.mubr.msk.bf16.mxu1 %vm1531_vm0, %v1511_v39 }
 0x1ef   : > { %v1414_v41 = vpop.f32.mrf.mxu0 }
 0x1f1   : > { %v1416_v42 = vpop.f32.mrf.mxu0 }
 0x1f3   : > { %v1417_v43 = vpop.f32.mrf.mxu0 }
 0x1f4   : > { %v1512_v44 = vpack.c.bf16 %v1417_v43, %v1414_v41 }
 0x1f5   : > { %v1419_v45 = vpop.f32.mrf.mxu0 }
 0x1f6   : > { %13428 = vmatmul.mubr.msk.bf16.gmra.mxu1 %vm1531_vm0, %v1512_v44 }
 0x1f7   : > { %v1422_v46 = vpop.f32.mrf.mxu0 }
 0x1f9   : > { %v1424_v47 = vpop.f32.mrf.mxu0 }
 0x1fb   : > { %v1425_v48 = vpop.f32.mrf.mxu0 }
 0x1fc   : > { %v1513_v49 = vpack.c.bf16 %v1425_v48, %v1422_v46 }
 0x1fd   : > { %v1427_v50 = vpop.f32.mrf.mxu0 }
 0x1fe   : > { %13433 = vmatprep.mubr.msk.bf16.mxu1 %vm1531_vm0, %v1513_v49 }
 0x1ff   : > { %v1430_v51 = vpop.f32.mrf.mxu0 }
 0x201   : > { %v1432_v52 = vpop.f32.mrf.mxu0 }
 0x203   : > { %v1433_v53 = vpop.f32.mrf.mxu0 }
 0x204   : > { %v1514_v54 = vpack.c.bf16 %v1433_v53, %v1430_v51 }
 0x205   : > { %v1435_v55 = vpop.f32.mrf.mxu0 }
 0x206   : > { %13434 = vmatmul.mubr.msk.bf16.vlgmr.msra.gmra.mxu1 %vm1531_vm0, %v1514_v54  ;;  %v13365_v57 = vpop.f32.mrf.mxu1 }
 0x207   : > { %v1438_v56 = vpop.f32.mrf.mxu0  ;;  %13442 = vmatpush3.bf16.msra.mxu1 %v14703_v34 }
 0x208   : > { %v1578_v60 = vpop.f32.mrf.mxu1 }
 0x209   : > { %v1440_v58 = vpop.f32.mrf.mxu0 }
 0x20a   : > { %v13366_v0 = vpop.f32.mrf.mxu1 }
 0x20b   : > { %v1441_v59 = vpop.f32.mrf.mxu0 }
 0x20c   : > { %v1515_v61 = vpack.c.bf16 %v1441_v59, %v1438_v56  ;;  %v15421_v3 = vpop.f32.mrf.mxu1 }
 0x20d   : > { %v1443_v62 = vpop.f32.mrf.mxu0 }
 0x20e   : > { %13437 = vmatprep.mubr.msk.bf16.mxu1 %vm1531_vm0, %v1515_v61 }
 0x20f   : > { %v1446_v63 = vpop.f32.mrf.mxu0 }
 0x211   : > { %v1448_v1 = vpop.f32.mrf.mxu0 }
 0x213   : > { %v1449_v2 = vpop.f32.mrf.mxu0 }
 0x214   : > { %v1516_v4 = vpack.c.bf16 %v1449_v2, %v1446_v63 }
 0x215   : > { %v1451_v5 = vpop.f32.mrf.mxu0 }
 0x216   : > { %v13369_v6 = vpop.f32.mrf.mxu1  ;;  %13438 = vmatmul.mubr.msk.bf16.gmra.mxu1 %vm1531_vm0, %v1516_v4 }
 0x217   : > { %v1454_v7 = vpop.f32.mrf.mxu0 }
 0x218   : > { %v1594_v8 = vpop.f32.mrf.mxu1 }
 0x219   : > { %v1456_v9 = vpop.f32.mrf.mxu0 }
 0x21a   : > { %v13370_v10 = vpop.f32.mrf.mxu1 }
 0x21b   : > { %v1457_v11 = vpop.f32.mrf.mxu0 }
 0x21c   : > { %v1517_v12 = vpack.c.bf16 %v1457_v11, %v1454_v7  ;;  %v15424_v13 = vpop.f32.mrf.mxu1 }
 0x21d   : > { %v1459_v14 = vpop.f32.mrf.mxu0 }
 0x21e   : > { %v13375_v15 = vpop.f32.mrf.mxu1  ;;  %13443 = vmatprep.mubr.msk.bf16.mxu1 %vm1531_vm0, %v1517_v12 }
 0x21f   : > { %v1670_v16 = vadd.f32 %v13375_v15, %v13365_v57  ;;  %v1462_v17 = vpop.f32.mrf.mxu0 }
 0x220   : > { %v1661_v18 = vpop.f32.mrf.mxu1 }
 0x221   : > { %v1662_v19 = vadd.f32 %v1661_v18, %v1578_v60  ;;  %v1464_v20 = vpop.f32.mrf.mxu0 }
 0x222   : > { %v13376_v21 = vpop.f32.mrf.mxu1  ;;  %v14985_v20 = vmov 0.0  }
 0x223   : > { %v1673_v22 = vadd.f32 %v13376_v21, %v13366_v0  ;;  %v1465_v23 = vpop.f32.mrf.mxu0  ;;  %13451 = vmatprep.subr.bf16.mxu1 %v14985_v20  ;;  %13591 = vmatprep.subr.bf16.mxu0 %v14985_v20 }
 0x224   : > { %v1518_v24 = vpack.c.bf16 %v1465_v23, %v1462_v17  ;;  %v15427_v25 = vpop.f32.mrf.mxu1  ;;  %13593 = vmatprep.mubr.msk.bf16.mxu0 %vm14986_vm1, %v14985_v20 }
 0x225   : > { %v1467_v26 = vpop.f32.mrf.mxu0 }
 0x226   : > { %v13379_v27 = vpop.f32.mrf.mxu1  ;;  %13444 = vmatmul.mubr.msk.bf16.vlgmr.msra.gmra.mxu1 %vm1531_vm0, %v1518_v24 }
 0x227   : > { %v1686_v28 = vadd.f32 %v13379_v27, %v13369_v6  ;;  %v1470_v29 = vpop.f32.mrf.mxu0 }
 0x228   : > { %v1677_v30 = vpop.f32.mrf.mxu1 }
 0x229   : > { %v1678_v31 = vadd.f32 %v1677_v30, %v1594_v8  ;;  %v1472_v32 = vpop.f32.mrf.mxu0 }
 0x22a   : > { %v13380_v33 = vpop.f32.mrf.mxu1 }
 0x22b   : > { %v1689_v34 = vadd.f32 %v13380_v33, %v13370_v10  ;;  %v1473_v35 = vpop.f32.mrf.mxu0 }
 0x22c   : > { %v1519_v36 = vpack.c.bf16 %v1473_v35, %v1470_v29  ;;  %v15430_v37 = vpop.f32.mrf.mxu1 }
 0x22d   : > { %v1475_v38 = vpop.f32.mrf.mxu0 }
 0x22e   : > { %v13385_v39 = vpop.f32.mrf.mxu1  ;;  %13447 = vmatprep.mubr.msk.bf16.mxu1 %vm1531_vm0, %v1519_v36 }
 0x22f   : > { %v1779_v40 = vadd.f32 %v13385_v39, %v1670_v16  ;;  %v1478_v41 = vpop.f32.mrf.mxu0 }
 0x230   : > { %v1746_v42 = vpop.f32.mrf.mxu1 }
 0x231   : > { %v1777_v43 = vadd.f32 %v1746_v42, %v1662_v19  ;;  %v1480_v44 = vpop.f32.mrf.mxu0 }
 0x232   : > { %v13386_v45 = vpop.f32.mrf.mxu1 }
 0x233   : > { %v1780_v46 = vadd.f32 %v13386_v45, %v1673_v22  ;;  %v1481_v47 = vpop.f32.mrf.mxu0 }
 0x234   : > { %v1520_v48 = vpack.c.bf16 %v1481_v47, %v1478_v41  ;;  %v15433_v49 = vpop.f32.mrf.mxu1 }
 0x235   : > { %v1483_v50 = vpop.f32.mrf.mxu0 }
 0x236   : > { %v13389_v51 = vpop.f32.mrf.mxu1  ;;  %13448 = vmatmul.mubr.msk.bf16.gmra.mxu1 %vm1531_vm0, %v1520_v48 }
 0x237   : > { %v1783_v52 = vadd.f32 %v13389_v51, %v1686_v28  ;;  %13459 = vmatprep.mubr.msk.bf16.mxu1 %vm14986_vm1, %v14985_v20 }
 0x238   : > { %v1762_v53 = vpop.f32.mrf.mxu1 }
 0x239   : > { %v1781_v54 = vadd.f32 %v1762_v53, %v1678_v31 }
 0x23a   : > { %v13390_v55 = vpop.f32.mrf.mxu1 }
 0x23b   : > { %v1784_v56 = vadd.f32 %v13390_v55, %v1689_v34 }
 0x23c   : > { %v15436_v57 = vpop.f32.mrf.mxu1 }
 0x246   : > { %v13395_v58 = vpop.f32.mrf.mxu1 }
 0x247   : > { %v1872_v59 = vadd.f32 %v13395_v58, %v1779_v40  ;;  %v12097_v58 = vld [vmem:[%s18616_s29] ss:$0 sm:$0xff] }
 0x248   : > { %v1839_v60 = vpop.f32.mrf.mxu1 }
 0x249   : > { %v1870_v61 = vadd.f32 %v1839_v60, %v1777_v43 }
 0x24a   : > { %v13396_v62 = vpop.f32.mrf.mxu1 }
 0x24b   : > { %v1873_v63 = vadd.f32 %v13396_v62, %v1780_v46 }
 0x24c   : > { %v15438_v0 = vpop.f32.mrf.mxu1 }
 0x256   : > { %v13399_v1 = vpop.f32.mrf.mxu1 }
 0x257   : > { %v15440_v2 = vadd.f32 %v13399_v1, %v1783_v52 }
 0x258   : > { %v1855_v4 = vpop.f32.mrf.mxu1 }
 0x259   : > { %v15442_v5 = vadd.f32 %v1855_v4, %v1781_v54  ;;  %v1681_v4 = vadd.f32 %v15430_v37, %v15424_v13 }
 0x25a   : > { %v13400_v6 = vpop.f32.mrf.mxu1 }
 0x25b   : > { %v15444_v7 = vadd.f32 %v13400_v6, %v1784_v56 }
 0x25c   : > { %v15446_v8 = vpop.f32.mrf.mxu1 }
 0x266   : > { %v13405_v9 = vpop.f32.mrf.mxu1 }
 0x267   : > { %v1965_v10 = vadd.f32 %v13405_v9, %v1872_v59 }
 0x268   : > { %v1932_v11 = vpop.f32.mrf.mxu1 }
 0x269   : > { %v1963_v12 = vadd.f32 %v1932_v11, %v1870_v61  ;;  %v1782_v11 = vadd.f32 %v15436_v57, %v1681_v4  ;;  %v14710_v4 = vld [vmem:[%s18590_s4 + $0x30] sm:$0xff]  }
 0x26a   : > { %v13406_v14 = vpop.f32.mrf.mxu1 }
 0x26b   : > { %v1966_v15 = vadd.f32 %v13406_v14, %v1873_v63 }
 0x26c   : > { %v15448_v16 = vpop.f32.mrf.mxu1 }
 0x276   : > { %v13409_v17 = vpop.f32.mrf.mxu1 }
 0x277   : > { %v1969_v6 = vadd.f32 %v13409_v17, %v15440_v2 }
 0x278   : > { %v1948_v18 = vpop.f32.mrf.mxu1 }
 0x27a   : > { %v13410_v19 = vpop.f32.mrf.mxu1 }
 0x27c   : > { %v1951_v21 = vpop.f32.mrf.mxu1 }
 0x286   : > { %v13415_v22 = vpop.f32.mrf.mxu1 }
 0x287   : > { %v2058_v48 = vadd.f32 %v13415_v22, %v1965_v10  ;;  %v1875_v22 = vadd.f32 %v15446_v8, %v1782_v11 }
 0x288   : > { %v2025_v23 = vpop.f32.mrf.mxu1 }
 0x289   : > { %v15452_v24 = vadd.f32 %v2025_v23, %v1963_v12  ;;  %v1967_v23 = vadd.f32 %v1948_v18, %v15442_v5  ;;  %v1968_v2 = vadd.f32 %v1951_v21, %v1875_v22 }
 0x28a   : > { %v13416_v26 = vpop.f32.mrf.mxu1 }
 0x28b   : > { %v2059_v52 = vadd.f32 %v13416_v26, %v1966_v15  ;;  %v1665_v15 = vadd.f32 %v15427_v25, %v15421_v3  ;;  %v1970_v26 = vadd.f32 %v13410_v19, %v15444_v7 }
 0x28c   : > { %v15458_v27 = vpop.f32.mrf.mxu1 }
 0x28d   : > { %v1778_v13 = vadd.f32 %v15433_v49, %v1665_v15 }
 0x28f   : > { %v1871_v57 = vadd.f32 %v15438_v0, %v1778_v13 }
 0x291   : > { %v1964_v8 = vadd.f32 %v15448_v16, %v1871_v57 }
 0x293   : > { %v2057_v49 = vadd.f32 %v15458_v27, %v1964_v8 }
 0x296   : > { %v13419_v28 = vpop.f32.mrf.mxu1 }
 0x297   : > { %v2062_v12 = vadd.f32 %v13419_v28, %v1969_v6  ;;  %v14711_v6 = vld [vmem:[%s18590_s4 + $0x38] sm:$0xff]  }
 0x298   : > { %v2041_v29 = vpop.f32.mrf.mxu1 }
 0x299   : > { %v2060_v17 = vadd.f32 %v2041_v29, %v1967_v23 }
 0x29a   : > { %v13420_v30 = vpop.f32.mrf.mxu1 }
 0x29c   : > { %v2044_v31 = vpop.f32.mrf.mxu1 }
 0x2a6   : > { %v13425_v32 = vpop.f32.mrf.mxu1 }
 0x2a7   : > { %v2151_v50 = vadd.f32 %v13425_v32, %v2058_v48 }
 0x2a8   : > { %v15460_v33 = vpop.f32.mrf.mxu1 }
 0x2aa   : > { %v13426_v34 = vpop.f32.mrf.mxu1 }
 0x2ab   : > { %v2152_v55 = vadd.f32 %v13426_v34, %v2059_v52  ;;  %v2063_v34 = vadd.f32 %v13420_v30, %v1970_v26 }
 0x2ac   : > { %v2121_v35 = vpop.f32.mrf.mxu1 }
 0x2b6   : > { %v13429_v36 = vpop.f32.mrf.mxu1 }
 0x2b7   : > { %v2155_v32 = vadd.f32 %v13429_v36, %v2062_v12 }
 0x2b8   : > { %v2134_v38 = vpop.f32.mrf.mxu1 }
 0x2b9   : > { %v2153_v48 = vadd.f32 %v2134_v38, %v2060_v17  ;;  %v2149_v38 = vadd.f32 %v15460_v33, %v15452_v24 }
 0x2ba   : > { %v13430_v39 = vpop.f32.mrf.mxu1 }
 0x2bb   : > { %v2156_v3 = vadd.f32 %v13430_v39, %v2063_v34 }
 0x2bc   : > { %v2137_v40 = vpop.f32.mrf.mxu1 }
 0x2c6   : > { %v13435_v41 = vpop.f32.mrf.mxu1 }
 0x2c7   : > { %v2244_v53 = vadd.f32 %v13435_v41, %v2151_v50  ;;  %v2150_v50 = vadd.f32 %v2121_v35, %v2057_v49  ;;  %v14717_v49 = vld [vmem:[%s18591_s5 + $0x20] sm:$0xff]  }
 0x2c8   : > { %v15462_v42 = vpop.f32.mrf.mxu1 }
 0x2ca   : > { %v13436_v43 = vpop.f32.mrf.mxu1 }
 0x2cb   : > { %v2245_v60 = vadd.f32 %v13436_v43, %v2152_v55  ;;  %v2061_v43 = vadd.f32 %v2044_v31, %v1968_v2 }
 0x2cc   : > { %v2214_v44 = vpop.f32.mrf.mxu1 }
 0x2cd   : > { %v2154_v18 = vadd.f32 %v2137_v40, %v2061_v43  ;;  %v2243_v39 = vadd.f32 %v2214_v44, %v2150_v50  ;;  %v14704_v44 = vld [vmem:[%s18590_s4] sm:$0xff]   ;;  %v14718_v50 = vld [vmem:[%s18591_s5 + $0x28] sm:$0xff]  }
 0x2d6   : > { %v13439_v45 = vpop.f32.mrf.mxu1 }
 0x2d7   : > { %v2248_v41 = vadd.f32 %v13439_v45, %v2155_v32  ;;  %v14714_v32 = vld [vmem:[%s18591_s5] sm:$0xff]  }
 0x2d8   : > { %v2227_v46 = vpop.f32.mrf.mxu1 }
 0x2d9   : > { %v2246_v7 = vadd.f32 %v2227_v46, %v2153_v48 }
 0x2da   : > { %v13440_v47 = vpop.f32.mrf.mxu1 }
 0x2db   : > { %v2249_v19 = vadd.f32 %v13440_v47, %v2156_v3  ;;  %v2242_v47 = vadd.f32 %v15462_v42, %v2149_v38 }
 0x2dc   : > { %v2230_v51 = vpop.f32.mrf.mxu1 }
 0x2dd   : > { %v2247_v21 = vadd.f32 %v2230_v51, %v2154_v18 }
 0x2e6   : > { %v13445_v54 = vpop.f32.mrf.mxu1 }
 0x2e7   : > { %v2337_v56 = vadd.f32 %v13445_v54, %v2244_v53 }
 0x2e8   : > { %v2304_v59 = vpop.f32.mrf.mxu1 }
 0x2e9   : > { %v2352_v62 = vadd.f32 %v12097_v58, %v2337_v56  ;;  %v2335_v55 = vadd.f32 %v2304_v59, %v2242_v47  ;;  %v14706_v59 = vld [vmem:[%s18590_s4 + $0x10] sm:$0xff]  }
 0x2ea   : > { %v13446_v61 = vpop.f32.mrf.mxu1 }
 0x2eb   : > { %v2338_v63 = vadd.f32 %v13446_v61, %v2245_v60  ;;  %v2360_v9 = vmax.f32 %v2352_v62, 0.0  ;;  %v2350_v61 = vadd.f32 %v12097_v58, %v2335_v55  ;;  %v14707_v62 = vld [vmem:[%s18590_s4 + $0x18] sm:$0xff]  }
 0x2ec   : > { %v2307_v37 = vpop.f32.mrf.mxu1 }
 0x2ed   : > { %v2353_v1 = vadd.f32 %v12097_v58, %v2338_v63  ;;  %v2336_v27 = vadd.f32 %v2307_v37, %v2243_v39  ;;  %v2358_v33 = vmax.f32 %v2350_v61, 0.0  ;;  %v14708_v63 = vld [vmem:[%s18590_s4 + $0x20] sm:$0xff]  }
 0x2ee   : > { %v14721_v61 = vld [vmem:[%s18591_s5 + $0x40] sm:$0xff]  }
 0x2ef   : > { %v2361_v10 = vmax.f32 %v2353_v1, 0.0  ;;  %v2351_v35 = vadd.f32 %v12097_v58, %v2336_v27  ;;  %v14709_v1 = vld [vmem:[%s18590_s4 + $0x28] sm:$0xff]  }
 0x2f1   : > { %v2367_v14 = vpack.c.bf16 %v2361_v10, %v2360_v9  ;;  %v2359_v24 = vmax.f32 %v2351_v35, 0.0  ;;  %v14712_v9 = vld [vmem:[%s18590_s4 + $0x40] sm:$0xff]   ;;  %v14713_v10 = vld [vmem:[%s18591_s5 + $0x8] sm:$0xff]  }
 0x2f3   : > { %v2366_v42 = vpack.c.bf16 %v2359_v24, %v2358_v33 }
 0x2f6   : > { %v13449_v28 = vpop.f32.mrf.mxu1 }
 0x2f7   : > { %v2341_v25 = vadd.f32 %v13449_v28, %v2248_v41  ;;  %v14715_v41 = vld [vmem:[%s18591_s5 + $0x10] sm:$0xff]  }
 0x2f8   : > { %v2320_v5 = vpop.f32.mrf.mxu1 }
 0x2f9   : > { %v2356_v29 = vadd.f32 %v12097_v58, %v2341_v25  ;;  %v2339_v30 = vadd.f32 %v2320_v5, %v2246_v7  ;;  %v14716_v25 = vld [vmem:[%s18591_s5 + $0x18] sm:$0xff]  }
 0x2fa   : > { %v13450_v36 = vpop.f32.mrf.mxu1 }
 0x2fb   : > { %v2342_v45 = vadd.f32 %v13450_v36, %v2249_v19  ;;  %v2364_v16 = vmax.f32 %v2356_v29, 0.0  ;;  %v2354_v53 = vadd.f32 %v12097_v58, %v2339_v30 }
 0x2fc   : > { %v2323_v0 = vpop.f32.mrf.mxu1 }
 0x2fd   : > { %v2357_v52 = vadd.f32 %v12097_v58, %v2342_v45  ;;  %v2340_v31 = vadd.f32 %v2323_v0, %v2247_v21  ;;  %v2362_v56 = vmax.f32 %v2354_v53, 0.0 }
 0x2ff   : > { %v2365_v40 = vmax.f32 %v2357_v52, 0.0  ;;  %v2355_v46 = vadd.f32 %v12097_v58, %v2340_v31  ;;  %v14705_v58 = vld [vmem:[%s18590_s4 + $0x8] sm:$0xff]  }
 0x301   : > { %v2369_v54 = vpack.c.bf16 %v2365_v40, %v2364_v16  ;;  %v2363_v51 = vmax.f32 %v2355_v46, 0.0  ;;  %v14719_v16 = vld [vmem:[%s18591_s5 + $0x30] sm:$0xff]  }
 0x303   : > { %13452 = vmatpush3.bf16.msra.mxu1 %v2369_v54  ;;  %v2368_v60 = vpack.c.bf16 %v2363_v51, %v2362_v56  ;;  %v14720_v54 = vld [vmem:[%s18591_s5 + $0x38] sm:$0xff]  }
 0x304   : > { %13453 = vmatprep.subr.bf16.mxu1 %v14985_v20 }
 0x307   : > { %13454 = vmatpush3.bf16.msra.mxu1 %v2368_v60 }
 0x308   : > { %13455 = vmatprep.subr.bf16.mxu1 %v14985_v20 }
 0x30b   : > { %13456 = vmatpush3.bf16.msra.mxu1 %v2367_v14 }
 0x30c   : > { %13457 = vmatprep.subr.bf16.mxu1 %v14985_v20 }
 0x30f   : > { %13458 = vmatpush3.bf16.msra.mxu1 %v2366_v42 }
 0x310   : > { %13495 = vmatprep.subr.bf16.mxu1 %v14985_v20 }
 0x312   : > { %13460 = vmatmul.mubr.msk.bf16.vlgmr.msra.gmra.mxu1 %vm2433_vm2, %v14704_v44  ;;  %v14722_v44 = vld [vmem:[%s18593_s7] sm:$0xff]  }
 0x313   : > { %13463 = vmatprep.mubr.msk.bf16.mxu1 %vm14986_vm1, %v14985_v20  ;;  %13496 = vmatpush3.bf16.msra.mxu1 %v14713_v10 }
 0x314   : > { %13501 = vmatprep.subr.bf16.mxu1 %v14985_v20 }
 0x31a   : > { %13464 = vmatmul.mubr.msk.bf16.gmra.mxu1 %vm2433_vm2, %v14705_v58  ;;  %v14730_v58 = vld [vmem:[%s18594_s8 + $0x20] sm:$0xff]  }
 0x31b   : > { %13467 = vmatprep.mubr.msk.bf16.mxu1 %vm14986_vm1, %v14985_v20  ;;  %13592 = vmatpush3.bf16.msra.mxu0 %v14730_v58  ;;  %v14727_v58 = vld [vmem:[%s18593_s7 + $0x28] sm:$0xff]  }
 0x31c   : > { %13603 = vmatprep.subr.bf16.mxu0 %v14985_v20 }
 0x322   : > { %13468 = vmatmul.mubr.msk.bf16.gmra.mxu1 %vm2433_vm2, %v14706_v59 }
 0x323   : > { %13471 = vmatprep.mubr.msk.bf16.mxu1 %vm14986_vm1, %v14985_v20 }
 0x32a   : > { %13472 = vmatmul.mubr.msk.bf16.gmra.mxu1 %vm2433_vm2, %v14707_v62 }
 0x32b   : > { %13475 = vmatprep.mubr.msk.bf16.mxu1 %vm14986_vm1, %v14985_v20 }
 0x332   : > { %13476 = vmatmul.mubr.msk.bf16.gmra.mxu1 %vm2433_vm2, %v14708_v63 }
 0x333   : > { %13479 = vmatprep.mubr.msk.bf16.mxu1 %vm14986_vm1, %v14985_v20 }
 0x33a   : > { %13480 = vmatmul.mubr.msk.bf16.gmra.mxu1 %vm2433_vm2, %v14709_v1 }
 0x33b   : > { %13483 = vmatprep.mubr.msk.bf16.mxu1 %vm14986_vm1, %v14985_v20 }
 0x342   : > { %13484 = vmatmul.mubr.msk.bf16.gmra.mxu1 %vm2433_vm2, %v14710_v4 }
 0x343   : > { %13487 = vmatprep.mubr.msk.bf16.mxu1 %vm14986_vm1, %v14985_v20 }
 0x34a   : > { %13488 = vmatmul.mubr.msk.bf16.gmra.mxu1 %vm2433_vm2, %v14711_v6 }
 0x34b   : > { %13491 = vmatprep.mubr.msk.bf16.mxu1 %vm14986_vm1, %v14985_v20 }
 0x352   : > { %13492 = vmatmul.mubr.msk.bf16.gmra.mxu1 %vm2433_vm2, %v14712_v9 }
 0x353   : > { %13497 = vmatprep.mubr.msk.bf16.mxu1 %vm14986_vm1, %v14985_v20 }
 0x3d2   : > { %v2495_v11 = vpop.f32.mrf.mxu1 }
 0x3d4   : > { %v13461_v12 = vpop.f32.mrf.mxu1 }
 0x3d6   : > { %v2498_v14 = vpop.f32.mrf.mxu1 }
 0x3d7   : > { %v2566_v57 = vpack.c.bf16 %v2498_v14, %v2495_v11 }
 0x3d8   : > { %v13462_v15 = vpop.f32.mrf.mxu1 }
 0x3da   : > { %v2503_v22 = vpop.f32.mrf.mxu1 }
 0x3dc   : > { %v13465_v23 = vpop.f32.mrf.mxu1 }
 0x3de   : > { %v2506_v26 = vpop.f32.mrf.mxu1 }
 0x3df   : > { %v2567_v13 = vpack.c.bf16 %v2506_v26, %v2503_v22 }
 0x3e0   : > { %v13466_v37 = vpop.f32.mrf.mxu1 }
 0x3e1   : > { %13498 = vmatmul.mubr.msk.bf16.vlgmr.msra.gmra.mxu1 %vm1531_vm0, %v2567_v13 }
 0x3e2   : > { %v2511_v2 = vpop.f32.mrf.mxu1  ;;  %13502 = vmatpush3.bf16.msra.mxu1 %v14714_v32  ;;  %13503 = vmatprep.mubr.msk.bf16.mxu1 %vm14986_vm1, %v14985_v20 }
 0x3e3   : > { %13507 = vmatprep.subr.bf16.mxu1 %v14985_v20 }
 0x3e4   : > { %v13469_v17 = vpop.f32.mrf.mxu1 }
 0x3e6   : > { %v2514_v34 = vpop.f32.mrf.mxu1 }
 0x3e7   : > { %v2568_v8 = vpack.c.bf16 %v2514_v34, %v2511_v2 }
 0x3e8   : > { %v13470_v28 = vpop.f32.mrf.mxu1 }
 0x3e9   : > { %13504 = vmatmul.mubr.msk.bf16.vlgmr.msra.gmra.mxu1 %vm1531_vm0, %v2566_v57 }
 0x3ea   : > { %v2519_v43 = vpop.f32.mrf.mxu1  ;;  %13508 = vmatpush3.bf16.msra.mxu1 %v14715_v41  ;;  %13509 = vmatprep.mubr.msk.bf16.mxu1 %vm14986_vm1, %v14985_v20 }
 0x3eb   : > { %13513 = vmatprep.subr.bf16.mxu1 %v14985_v20 }
 0x3ec   : > { %v13473_v48 = vpop.f32.mrf.mxu1 }
 0x3ee   : > { %v2522_v3 = vpop.f32.mrf.mxu1 }
 0x3ef   : > { %v2569_v36 = vpack.c.bf16 %v2522_v3, %v2519_v43 }
 0x3f0   : > { %v13474_v5 = vpop.f32.mrf.mxu1 }
 0x3f1   : > { %13510 = vmatmul.mubr.msk.bf16.vlgmr.msra.gmra.mxu1 %vm1531_vm0, %v2568_v8 }
 0x3f2   : > { %v2527_v18 = vpop.f32.mrf.mxu1  ;;  %13514 = vmatpush3.bf16.msra.mxu1 %v14716_v25  ;;  %13515 = vmatprep.mubr.msk.bf16.mxu1 %vm14986_vm1, %v14985_v20 }
 0x3f3   : > { %13519 = vmatprep.subr.bf16.mxu1 %v14985_v20 }
 0x3f4   : > { %v13477_v7 = vpop.f32.mrf.mxu1 }
 0x3f6   : > { %v2530_v19 = vpop.f32.mrf.mxu1 }
 0x3f7   : > { %v2570_v0 = vpack.c.bf16 %v2530_v19, %v2527_v18 }
 0x3f8   : > { %v13478_v21 = vpop.f32.mrf.mxu1 }
 0x3f9   : > { %13516 = vmatmul.mubr.msk.bf16.vlgmr.msra.gmra.mxu1 %vm1531_vm0, %v2569_v36 }
 0x3fa   : > { %v2535_v29 = vpop.f32.mrf.mxu1  ;;  %13520 = vmatpush3.bf16.msra.mxu1 %v14717_v49  ;;  %13521 = vmatprep.mubr.msk.bf16.mxu1 %vm14986_vm1, %v14985_v20 }
 0x3fb   : > { %13525 = vmatprep.subr.bf16.mxu1 %v14985_v20 }
 0x3fc   : > { %v13481_v30 = vpop.f32.mrf.mxu1 }
 0x3fe   : > { %v2538_v45 = vpop.f32.mrf.mxu1 }
 0x3ff   : > { %v2571_v53 = vpack.c.bf16 %v2538_v45, %v2535_v29 }
 0x400   : > { %v13482_v52 = vpop.f32.mrf.mxu1 }
 0x401   : > { %13522 = vmatmul.mubr.msk.bf16.vlgmr.msra.gmra.mxu1 %vm1531_vm0, %v2570_v0 }
 0x402   : > { %v2543_v31 = vpop.f32.mrf.mxu1  ;;  %13526 = vmatpush3.bf16.msra.mxu1 %v14718_v50  ;;  %13527 = vmatprep.mubr.msk.bf16.mxu1 %vm14986_vm1, %v14985_v20 }
 0x403   : > { %13531 = vmatprep.subr.bf16.mxu1 %v14985_v20 }
 0x404   : > { %v13485_v38 = vpop.f32.mrf.mxu1 }
 0x406   : > { %v2546_v39 = vpop.f32.mrf.mxu1 }
 0x407   : > { %v2572_v51 = vpack.c.bf16 %v2546_v39, %v2543_v31 }
 0x408   : > { %v13486_v40 = vpop.f32.mrf.mxu1 }
 0x409   : > { %13528 = vmatmul.mubr.msk.bf16.vlgmr.msra.gmra.mxu1 %vm1531_vm0, %v2571_v53  ;;  %v12134_v40 = vld [vmem:[%s18592_s6] ss:$0 sm:$0xff] }
 0x40a   : > { %v2551_v46 = vpop.f32.mrf.mxu1  ;;  %13532 = vmatpush3.bf16.msra.mxu1 %v14719_v16  ;;  %13533 = vmatprep.mubr.msk.bf16.mxu1 %vm14986_vm1, %v14985_v20 }
 0x40b   : > { %13537 = vmatprep.subr.bf16.mxu1 %v14985_v20 }
 0x40c   : > { %v13489_v47 = vpop.f32.mrf.mxu1 }
 0x40e   : > { %v2554_v27 = vpop.f32.mrf.mxu1 }
 0x40f   : > { %v2573_v24 = vpack.c.bf16 %v2554_v27, %v2551_v46 }
 0x410   : > { %v13490_v55 = vpop.f32.mrf.mxu1 }
 0x411   : > { %13534 = vmatmul.mubr.msk.bf16.vlgmr.msra.gmra.mxu1 %vm1531_vm0, %v2572_v51 }
 0x412   : > { %v2559_v56 = vpop.f32.mrf.mxu1  ;;  %13538 = vmatpush3.bf16.msra.mxu1 %v14720_v54  ;;  %13539 = vmatprep.mubr.msk.bf16.mxu1 %vm14986_vm1, %v14985_v20 }
 0x413   : > { %13543 = vmatprep.subr.bf16.mxu1 %v14985_v20 }
 0x414   : > { %v13493_v35 = vpop.f32.mrf.mxu1 }
 0x416   : > { %v2562_v60 = vpop.f32.mrf.mxu1 }
 0x417   : > { %v2574_v42 = vpack.c.bf16 %v2562_v60, %v2559_v56 }
 0x418   : > { %v13494_v33 = vpop.f32.mrf.mxu1 }
 0x419   : > { %13540 = vmatmul.mubr.msk.bf16.vlgmr.msra.gmra.mxu1 %vm1531_vm0, %v2573_v24  ;;  %v14723_v24 = vld [vmem:[%s18593_s7 + $0x8] sm:$0xff]   ;;  %v14724_v33 = vld [vmem:[%s18593_s7 + $0x10] sm:$0xff]  }
 0x41a   : > { %13544 = vmatpush3.bf16.msra.mxu1 %v14721_v61  ;;  %13545 = vmatprep.mubr.msk.bf16.mxu1 %vm14986_vm1, %v14985_v20 }
 0x421   : > { %13546 = vmatmul.mubr.msk.bf16.vlgmr.msra.gmra.mxu1 %vm1531_vm0, %v2574_v42  ;;  %v14725_v42 = vld [vmem:[%s18593_s7 + $0x18] sm:$0xff]  }
 0x422   : > { %13551 = vmatprep.mubr.msk.bf16.mxu1 %vm1531_vm0, %v14722_v44  ;;  %v14726_v44 = vld [vmem:[%s18593_s7 + $0x20] sm:$0xff]  }
 0x4a1   : > { %v2622_v59 = vpop.f32.mrf.mxu1 }
 0x4a3   : > { %v13499_v62 = vpop.f32.mrf.mxu1 }
 0x4a4   : > { %v14729_v62 = vld [vmem:[%s18593_s7 + $0x38] sm:$0xff]  }
 0x4a5   : > { %v2625_v63 = vpop.f32.mrf.mxu1 }
 0x4a7   : > { %v13500_v1 = vpop.f32.mrf.mxu1 }
 0x4a9   : > { %v2672_v4 = vpop.f32.mrf.mxu1 }
 0x4aa   : > { %v2673_v3 = vadd.f32 %v2672_v4, %v2622_v59  ;;  %v14728_v59 = vld [vmem:[%s18593_s7 + $0x30] sm:$0xff]  }
 0x4ab   : > { %v13505_v6 = vpop.f32.mrf.mxu1 }
 0x4ad   : > { %v2675_v9 = vpop.f32.mrf.mxu1 }
 0x4ae   : > { %v2676_v18 = vadd.f32 %v2675_v9, %v2625_v63  ;;  %v14731_v63 = vld [vmem:[%s18594_s8 + $0x8] sm:$0xff]  }
 0x4af   : > { %v13506_v10 = vpop.f32.mrf.mxu1 }
 0x4b1   : > { %v2724_v11 = vpop.f32.mrf.mxu1 }
 0x4b2   : > { %v2731_v8 = vadd.f32 %v2724_v11, %v2673_v3  ;;  %v14738_v3 = vld [vmem:[%s18594_s8 + $0x50] sm:$0xff]  }
 0x4b3   : > { %v13511_v12 = vpop.f32.mrf.mxu1 }
 0x4b4   : > { %v14732_v12 = vld [vmem:[%s18594_s8] sm:$0xff]  }
 0x4b5   : > { %v2727_v14 = vpop.f32.mrf.mxu1 }
 0x4b6   : > { %v2732_v49 = vadd.f32 %v2727_v14, %v2676_v18 }
 0x4b7   : > { %v13512_v15 = vpop.f32.mrf.mxu1 }
 0x4b9   : > { %v2778_v22 = vpop.f32.mrf.mxu1 }
 0x4ba   : > { %v2785_v7 = vadd.f32 %v2778_v22, %v2731_v8  ;;  %v14737_v8 = vld [vmem:[%s18594_s8 + $0x28] sm:$0xff]  }
 0x4bb   : > { %v13517_v23 = vpop.f32.mrf.mxu1 }
 0x4bd   : > { %v2781_v26 = vpop.f32.mrf.mxu1 }
 0x4be   : > { %v2786_v29 = vadd.f32 %v2781_v26, %v2732_v49  ;;  %v14734_v26 = vld [vmem:[%s18594_s8 + $0x30] sm:$0xff]   ;;  %v14740_v49 = vld [vmem:[%s18594_s8 + $0x60] sm:$0xff]  }
 0x4bf   : > { %v13518_v32 = vpop.f32.mrf.mxu1 }
 0x4c1   : > { %v2832_v13 = vpop.f32.mrf.mxu1 }
 0x4c2   : > { %v2839_v36 = vadd.f32 %v2832_v13, %v2785_v7  ;;  %v14733_v13 = vld [vmem:[%s18594_s8 + $0x10] sm:$0xff]  }
 0x4c3   : > { %v13523_v37 = vpop.f32.mrf.mxu1 }
 0x4c5   : > { %v2835_v2 = vpop.f32.mrf.mxu1 }
 0x4c6   : > { %v2840_v50 = vadd.f32 %v2835_v2, %v2786_v29 }
 0x4c7   : > { %v13524_v17 = vpop.f32.mrf.mxu1 }
 0x4c9   : > { %v2886_v34 = vpop.f32.mrf.mxu1 }
 0x4ca   : > { %v2893_v30 = vadd.f32 %v2886_v34, %v2839_v36  ;;  %v14739_v36 = vld [vmem:[%s18594_s8 + $0x38] sm:$0xff]  }
 0x4cb   : > { %v13529_v41 = vpop.f32.mrf.mxu1 }
 0x4cc   : > { %v14736_v41 = vld [vmem:[%s18594_s8 + $0x40] sm:$0xff]  }
 0x4cd   : > { %v2889_v57 = vpop.f32.mrf.mxu1 }
 0x4ce   : > { %v2894_v31 = vadd.f32 %v2889_v57, %v2840_v50  ;;  %v14735_v57 = vld [vmem:[%s18594_s8 + $0x18] sm:$0xff]   ;;  %v14741_v50 = vld [vmem:[%s18594_s8 + $0x48] sm:$0xff]  }
 0x4cf   : > { %v13530_v28 = vpop.f32.mrf.mxu1 }
 0x4d1   : > { %v2940_v43 = vpop.f32.mrf.mxu1 }
 0x4d2   : > { %v2947_v0 = vadd.f32 %v2940_v43, %v2893_v30 }
 0x4d3   : > { %v13535_v48 = vpop.f32.mrf.mxu1 }
 0x4d5   : > { %v2943_v25 = vpop.f32.mrf.mxu1 }
 0x4d6   : > { %v2948_v16 = vadd.f32 %v2943_v25, %v2894_v31  ;;  %v14743_v31 = vld [vmem:[%s18594_s8 + $0x58] sm:$0xff]  }
 0x4d7   : > { %v13536_v5 = vpop.f32.mrf.mxu1 }
 0x4d9   : > { %v2994_v19 = vpop.f32.mrf.mxu1 }
 0x4da   : > { %v3001_v38 = vadd.f32 %v2994_v19, %v2947_v0 }
 0x4db   : > { %v13541_v21 = vpop.f32.mrf.mxu1 }
 0x4dd   : > { %v2997_v45 = vpop.f32.mrf.mxu1 }
 0x4de   : > { %v3002_v47 = vadd.f32 %v2997_v45, %v2948_v16  ;;  %v14742_v45 = vld [vmem:[%s18594_s8 + $0x70] sm:$0xff]  }
 0x4df   : > { %v13542_v52 = vpop.f32.mrf.mxu1 }
 0x4e1   : > { %v3048_v39 = vpop.f32.mrf.mxu1 }
 0x4e2   : > { %v3055_v53 = vadd.f32 %v3048_v39, %v3001_v38  ;;  %v14744_v39 = vld [vmem:[%s18594_s8 + $0x68] sm:$0xff]  }
 0x4e3   : > { %v13547_v46 = vpop.f32.mrf.mxu1 }
 0x4e4   : > { %v3064_v54 = vadd.f32 %v12134_v40, %v3055_v53  ;;  %v14745_v53 = vld [vmem:[%s18594_s8 + $0x78] sm:$0xff]  }
 0x4e5   : > { %v3051_v27 = vpop.f32.mrf.mxu1 }
 0x4e6   : > { %v3056_v51 = vadd.f32 %v3051_v27, %v3002_v47  ;;  %v3066_v35 = vmax.f32 %v3064_v54, 0.0  ;;  %v14746_v47 = vld [vmem:[%s18596_s10] sm:$0xff]  }
 0x4e7   : > { %v13548_v55 = vpop.f32.mrf.mxu1 }
 0x4e8   : > { %v3065_v56 = vadd.f32 %v12134_v40, %v3056_v51 }
 0x4ea   : > { %v3067_v60 = vmax.f32 %v3065_v56, 0.0 }
 0x4ec   : > { %v3068_v61 = vpack.c.bf16 %v3067_v60, %v3066_v35 }
 0x4ee   : > { %13549 = vmatprep.subr.bf16.mxu1 %v3068_v61 }
 0x4ef   : > { %13550 = vmatpush3.bf16.msra.mxu1 %v3068_v61 }
 0x4f0   : > { %13567 = vmatprep.subr.bf16.mxu1 %v14985_v20 }
 0x4f2   : > { %13552 = vmatmul.mubr.msk.bf16.vlgmr.msra.gmra.mxu1 %vm1531_vm0, %v14723_v24 }
 0x4f3   : > { %13555 = vmatprep.mubr.msk.bf16.mxu1 %vm1531_vm0, %v14724_v33  ;;  %13568 = vmatpush3.bf16.msra.mxu1 %v14731_v63 }
 0x4f4   : > { %13573 = vmatprep.subr.bf16.mxu1 %v14985_v20 }
 0x4fa   : > { %13556 = vmatmul.mubr.msk.bf16.gmra.mxu1 %vm1531_vm0, %v14725_v42 }
 0x4fb   : > { %13559 = vmatprep.mubr.msk.bf16.mxu1 %vm1531_vm0, %v14726_v44 }
 0x502   : > { %13560 = vmatmul.mubr.msk.bf16.gmra.mxu1 %vm1531_vm0, %v14727_v58 }
 0x503   : > { %13563 = vmatprep.mubr.msk.bf16.mxu1 %vm1531_vm0, %v14728_v59 }
 0x50a   : > { %13564 = vmatmul.mubr.msk.bf16.gmra.mxu1 %vm1531_vm0, %v14729_v62 }
 0x50b   : > { %13569 = vmatprep.mubr.msk.bf16.mxu1 %vm14986_vm1, %v14985_v20 }
 0x5b2   : > { %v13553_v1 = vpop.f32.mrf.mxu1 }
 0x5b4   : > { %v3183_v4 = vpop.f32.mrf.mxu1 }
 0x5b6   : > { %v13554_v6 = vpop.f32.mrf.mxu1 }
 0x5b7   : > { %v3247_v28 = vpack.c.bf16 %v13554_v6, %v13553_v1 }
 0x5b8   : > { %v3186_v9 = vpop.f32.mrf.mxu1 }
 0x5b9   : > { %v3246_v10 = vpack.c.bf16 %v3186_v9, %v3183_v4  ;;  %v3413_v5 = vrot.slane %v3247_v28, 4 }
 0x5ba   : > { %v13557_v11 = vpop.f32.mrf.mxu1 }
 0x5bb   : > { %v3259_v14 = vrot.slane %v3246_v10, 4 }
 0x5bc   : > { %v3199_v15 = vpop.f32.mrf.mxu1 }
 0x5bd   : > { %13570 = vmatmul.mubr.msk.bf16.vlgmr.msra.gmra.mxu1 %vm1531_vm0, %v3259_v14 }
 0x5be   : > { %v13558_v22 = vpop.f32.mrf.mxu1  ;;  %13574 = vmatpush3.bf16.msra.mxu1 %v14732_v12  ;;  %13575 = vmatprep.mubr.msk.bf16.mxu1 %vm14986_vm1, %v14985_v20 }
 0x5bf   : > { %13579 = vmatprep.subr.bf16.mxu1 %v14985_v20  ;;  %v3249_v17 = vpack.c.bf16 %v13558_v22, %v13557_v11 }
 0x5c0   : > { %v3202_v23 = vpop.f32.mrf.mxu1 }
 0x5c1   : > { %v3248_v32 = vpack.c.bf16 %v3202_v23, %v3199_v15  ;;  %v3625_v0 = vrot.slane %v3249_v17, 4 }
 0x5c2   : > { %v13561_v37 = vpop.f32.mrf.mxu1 }
 0x5c3   : > { %13594 = vmatmul.mubr.msk.bf16.vlgmr.msra.gmra.mxu0 %vm1531_vm0, %v3248_v32  ;;  %v3519_v21 = vrot.slane %v3248_v32, 4 }
 0x5c4   : > { %13604 = vmatpush3.bf16.msra.mxu0 %v14734_v26  ;;  %13605 = vmatprep.mubr.msk.bf16.mxu0 %vm14986_vm1, %v14985_v20  ;;  %v3215_v2 = vpop.f32.mrf.mxu1 }
 0x5c5   : > { %13576 = vmatmul.mubr.msk.bf16.vlgmr.msra.gmra.mxu1 %vm1531_vm0, %v3246_v10  ;;  %13615 = vmatprep.subr.bf16.mxu0 %v14985_v20 }
 0x5c6   : > { %13580 = vmatpush3.bf16.msra.mxu1 %v14733_v13  ;;  %13581 = vmatprep.mubr.msk.bf16.mxu1 %vm14986_vm1, %v14985_v20  ;;  %v13562_v34 = vpop.f32.mrf.mxu1 }
 0x5c7   : > { %13585 = vmatprep.subr.bf16.mxu1 %v14985_v20  ;;  %v3251_v7 = vpack.c.bf16 %v13562_v34, %v13561_v37 }
 0x5c8   : > { %v3218_v43 = vpop.f32.mrf.mxu1 }
 0x5c9   : > { %v3250_v48 = vpack.c.bf16 %v3218_v43, %v3215_v2  ;;  %v3837_v16 = vrot.slane %v3251_v7, 4 }
 0x5ca   : > { %v13565_v25 = vpop.f32.mrf.mxu1 }
 0x5cb   : > { %13606 = vmatmul.mubr.msk.bf16.vlgmr.msra.gmra.mxu0 %vm1531_vm0, %v3249_v17  ;;  %v3731_v38 = vrot.slane %v3250_v48, 4 }
 0x5cc   : > { %13616 = vmatpush3.bf16.msra.mxu0 %v14736_v41  ;;  %13617 = vmatprep.mubr.msk.bf16.mxu0 %vm14986_vm1, %v14985_v20  ;;  %v3231_v18 = vpop.f32.mrf.mxu1 }
 0x5cd   : > { %13582 = vmatmul.mubr.msk.bf16.vlgmr.msra.gmra.mxu1 %vm1531_vm0, %v3247_v28  ;;  %13627 = vmatprep.subr.bf16.mxu0 %v14985_v20 }
 0x5ce   : > { %13586 = vmatpush3.bf16.msra.mxu1 %v14735_v57  ;;  %13587 = vmatprep.mubr.msk.bf16.mxu1 %vm14986_vm1, %v14985_v20  ;;  %v13566_v19 = vpop.f32.mrf.mxu1 }
 0x5cf   : > { %13597 = vmatprep.subr.bf16.mxu1 %v14985_v20  ;;  %v3253_v52 = vpack.c.bf16 %v13566_v19, %v13565_v25 }
 0x5d0   : > { %v3234_v29 = vpop.f32.mrf.mxu1 }
 0x5d1   : > { %v3252_v30 = vpack.c.bf16 %v3234_v29, %v3231_v18  ;;  %v4049_v46 = vrot.slane %v3253_v52, 4 }
 0x5d3   : > { %13618 = vmatmul.mubr.msk.bf16.vlgmr.msra.gmra.mxu0 %vm1531_vm0, %v3250_v48  ;;  %v3943_v40 = vrot.slane %v3252_v30, 4 }
 0x5d4   : > { %13628 = vmatpush3.bf16.msra.mxu0 %v14738_v3  ;;  %13629 = vmatprep.mubr.msk.bf16.mxu0 %vm14986_vm1, %v14985_v20 }
 0x5d5   : > { %13588 = vmatmul.mubr.msk.bf16.vlgmr.msra.gmra.mxu1 %vm1531_vm0, %v3413_v5  ;;  %13639 = vmatprep.subr.bf16.mxu0 %v14985_v20 }
 0x5d6   : > { %13598 = vmatpush3.bf16.msra.mxu1 %v14737_v8  ;;  %13599 = vmatprep.mubr.msk.bf16.mxu1 %vm14986_vm1, %v14985_v20 }
 0x5d7   : > { %13609 = vmatprep.subr.bf16.mxu1 %v14985_v20 }
 0x5db   : > { %13630 = vmatmul.mubr.msk.bf16.vlgmr.msra.gmra.mxu0 %vm1531_vm0, %v3251_v7 }
 0x5dc   : > { %13640 = vmatpush3.bf16.msra.mxu0 %v14740_v49  ;;  %13641 = vmatprep.mubr.msk.bf16.mxu0 %vm14986_vm1, %v14985_v20 }
 0x5dd   : > { %13600 = vmatmul.mubr.msk.bf16.vlgmr.msra.gmra.mxu1 %vm1531_vm0, %v3519_v21  ;;  %13651 = vmatprep.subr.bf16.mxu0 %v14985_v20 }
 0x5de   : > { %13610 = vmatpush3.bf16.msra.mxu1 %v14739_v36  ;;  %13611 = vmatprep.mubr.msk.bf16.mxu1 %vm14986_vm1, %v14985_v20 }
 0x5df   : > { %13621 = vmatprep.subr.bf16.mxu1 %v14985_v20 }
 0x5e3   : > { %13642 = vmatmul.mubr.msk.bf16.vlgmr.msra.gmra.mxu0 %vm1531_vm0, %v3252_v30 }
 0x5e4   : > { %13652 = vmatpush3.bf16.msra.mxu0 %v14742_v45  ;;  %13653 = vmatprep.mubr.msk.bf16.mxu0 %vm14986_vm1, %v14985_v20 }
 0x5e5   : > { %13612 = vmatmul.mubr.msk.bf16.vlgmr.msra.gmra.mxu1 %vm1531_vm0, %v3625_v0 }
 0x5e6   : > { %13622 = vmatpush3.bf16.msra.mxu1 %v14741_v50  ;;  %13623 = vmatprep.mubr.msk.bf16.mxu1 %vm14986_vm1, %v14985_v20 }
 0x5e7   : > { %13633 = vmatprep.subr.bf16.mxu1 %v14985_v20 }
 0x5eb   : > { %13654 = vmatmul.mubr.msk.bf16.vlgmr.msra.gmra.mxu0 %vm1531_vm0, %v3253_v52 }
 0x5ec   : > { %13665 = vmatprep.mubr.msk.bf16.mxu0 %vm4221_vm3, %v14746_v47 }
 0x5ed   : > { %13624 = vmatmul.mubr.msk.bf16.vlgmr.msra.gmra.mxu1 %vm1531_vm0, %v3731_v38 }
 0x5ee   : > { %13634 = vmatpush3.bf16.msra.mxu1 %v14743_v31  ;;  %13635 = vmatprep.mubr.msk.bf16.mxu1 %vm14986_vm1, %v14985_v20 }
 0x5ef   : > { %13645 = vmatprep.subr.bf16.mxu1 %v14985_v20 }
 0x5f5   : > { %13636 = vmatmul.mubr.msk.bf16.vlgmr.msra.gmra.mxu1 %vm1531_vm0, %v3837_v16 }
 0x5f6   : > { %13646 = vmatpush3.bf16.msra.mxu1 %v14744_v39  ;;  %13647 = vmatprep.mubr.msk.bf16.mxu1 %vm14986_vm1, %v14985_v20 }
 0x5f7   : > { %13657 = vmatprep.subr.bf16.mxu1 %v14985_v20 }
 0x5fd   : > { %13648 = vmatmul.mubr.msk.bf16.vlgmr.msra.gmra.mxu1 %vm1531_vm0, %v3943_v40 }
 0x5fe   : > { %13658 = vmatpush3.bf16.msra.mxu1 %v14745_v53  ;;  %13659 = vmatprep.mubr.msk.bf16.mxu1 %vm14986_vm1, %v14985_v20 }
 0x5ff   : > { %13697 = vmatprep.subr.bf16.mxu1 %v14985_v20 }
 0x605   : > { %13660 = vmatmul.mubr.msk.bf16.vlgmr.msra.gmra.mxu1 %vm1531_vm0, %v4049_v46 }
 0x606   : > { %13699 = vmatprep.mubr.msk.bf16.mxu1 %vm14986_vm1, %v14985_v20 }
 0x67d   : > { %v3303_v27 = vpop.f32.mrf.mxu1 }
 0x67f   : > { %v13571_v54 = vpop.f32.mrf.mxu1 }
 0x681   : > { %v3306_v51 = vpop.f32.mrf.mxu1 }
 0x683   : > { %v13572_v55 = vpop.f32.mrf.mxu1  ;;  %v3509_v56 = vpop.f32.mrf.mxu0 }
 0x685   : > { %v3352_v35 = vpop.f32.mrf.mxu1  ;;  %v13595_v60 = vpop.f32.mrf.mxu0 }
 0x686   : > { %v3353_v2 = vadd.f32 %v3352_v35, %v3303_v27 }
 0x687   : > { %v13577_v61 = vpop.f32.mrf.mxu1  ;;  %v3512_v24 = vpop.f32.mrf.mxu0 }
 0x689   : > { %v3355_v33 = vpop.f32.mrf.mxu1  ;;  %v13596_v42 = vpop.f32.mrf.mxu0 }
 0x68b   : > { %v13578_v44 = vpop.f32.mrf.mxu1  ;;  %v3615_v58 = vpop.f32.mrf.mxu0 }
 0x68d   : > { %v3403_v59 = vpop.f32.mrf.mxu1  ;;  %v13607_v62 = vpop.f32.mrf.mxu0 }
 0x68e   : > { %v3409_v41 = vadd.f32 %v3403_v59, %v3353_v2  ;;  %v14758_v2 = vld [vmem:[%s18596_s10 + $0x60] sm:$0xff]  }
 0x68f   : > { %v13583_v63 = vpop.f32.mrf.mxu1  ;;  %v3618_v1 = vpop.f32.mrf.mxu0 }
 0x691   : > { %v3406_v4 = vpop.f32.mrf.mxu1  ;;  %v13608_v6 = vpop.f32.mrf.mxu0 }
 0x693   : > { %v13584_v9 = vpop.f32.mrf.mxu1  ;;  %v3721_v10 = vpop.f32.mrf.mxu0 }
 0x695   : > { %v3457_v11 = vpop.f32.mrf.mxu1  ;;  %v13619_v12 = vpop.f32.mrf.mxu0 }
 0x696   : > { %v3463_v43 = vadd.f32 %v3457_v11, %v3409_v41  ;;  %v14748_v11 = vld [vmem:[%s18596_s10 + $0x10] sm:$0xff]   ;;  %v14749_v12 = vld [vmem:[%s18596_s10 + $0x18] sm:$0xff]  }
 0x697   : > { %v13589_v14 = vpop.f32.mrf.mxu1  ;;  %v3724_v15 = vpop.f32.mrf.mxu0  ;;  %v14761_v41 = vld [vmem:[%s18596_s10 + $0x78] sm:$0xff]  }
 0x698   : > { %v3515_v5 = vadd.f32 %v3509_v56, %v3463_v43  ;;  %v14750_v14 = vld [vmem:[%s18596_s10 + $0x20] sm:$0xff]   ;;  %v14751_v15 = vld [vmem:[%s18596_s10 + $0x28] sm:$0xff]  }
 0x699   : > { %v3460_v22 = vpop.f32.mrf.mxu1  ;;  %v13620_v23 = vpop.f32.mrf.mxu0 }
 0x69a   : > { %v14752_v22 = vld [vmem:[%s18596_s10 + $0x30] sm:$0xff]   ;;  %v14753_v23 = vld [vmem:[%s18596_s10 + $0x38] sm:$0xff]  }
 0x69b   : > { %v13590_v26 = vpop.f32.mrf.mxu1  ;;  %v3827_v32 = vpop.f32.mrf.mxu0 }
 0x69c   : > { %v14754_v26 = vld [vmem:[%s18596_s10 + $0x40] sm:$0xff]  }
 0x69d   : > { %v3563_v13 = vpop.f32.mrf.mxu1  ;;  %v13631_v37 = vpop.f32.mrf.mxu0 }
 0x69e   : > { %v3569_v19 = vadd.f32 %v3563_v13, %v3515_v5  ;;  %v14756_v13 = vld [vmem:[%s18596_s10 + $0x50] sm:$0xff]   ;;  %v14757_v37 = vld [vmem:[%s18596_s10 + $0x58] sm:$0xff]  }
 0x69f   : > { %v13601_v17 = vpop.f32.mrf.mxu1  ;;  %v3830_v34 = vpop.f32.mrf.mxu0 }
 0x6a0   : > { %v3621_v30 = vadd.f32 %v3615_v58, %v3569_v19  ;;  %v12183_v58 = vld [vmem:[%s18595_s9] ss:$0 sm:$0xff]  ;;  %v14759_v17 = vld [vmem:[%s18596_s10 + $0x68] sm:$0xff]   ;;  %v14760_v34 = vld [vmem:[%s18596_s10 + $0x70] sm:$0xff]  }
 0x6a1   : > { %v3566_v57 = vpop.f32.mrf.mxu1  ;;  %v13632_v28 = vpop.f32.mrf.mxu0 }
 0x6a2   : > { %v14762_v57 = vld [vmem:[%s18597_s11 + $0x8] sm:$0xff]   ;;  %v14769_v28 = vld [vmem:[%s18597_s11 + $0x40] sm:$0xff]  }
 0x6a3   : > { %v13602_v48 = vpop.f32.mrf.mxu1  ;;  %v3933_v3 = vpop.f32.mrf.mxu0  ;;  %13698 = vmatpush3.bf16.msra.mxu1 %v14762_v57 }
 0x6a4   : > { %13703 = vmatprep.subr.bf16.mxu1 %v14985_v20 }
 0x6a5   : > { %v3669_v25 = vpop.f32.mrf.mxu1  ;;  %v13643_v8 = vpop.f32.mrf.mxu0 }
 0x6a6   : > { %v3675_v0 = vadd.f32 %v3669_v25, %v3621_v30  ;;  %v14763_v25 = vld [vmem:[%s18597_s11] sm:$0xff]  }
 0x6a7   : > { %v13613_v18 = vpop.f32.mrf.mxu1  ;;  %v3936_v7 = vpop.f32.mrf.mxu0 }
 0x6a8   : > { %v3727_v16 = vadd.f32 %v3721_v10, %v3675_v0  ;;  %v14747_v10 = vld [vmem:[%s18596_s10 + $0x8] sm:$0xff]  }
 0x6a9   : > { %v3672_v49 = vpop.f32.mrf.mxu1  ;;  %v13644_v36 = vpop.f32.mrf.mxu0 }
 0x6aa   : > { %v14764_v49 = vld [vmem:[%s18597_s11 + $0x10] sm:$0xff]  }
 0x6ab   : > { %v13614_v21 = vpop.f32.mrf.mxu1  ;;  %v4039_v29 = vpop.f32.mrf.mxu0 }
 0x6ad   : > { %v3775_v45 = vpop.f32.mrf.mxu1  ;;  %v13655_v50 = vpop.f32.mrf.mxu0 }
 0x6ae   : > { %v3781_v40 = vadd.f32 %v3775_v45, %v3727_v16  ;;  %v14765_v50 = vld [vmem:[%s18597_s11 + $0x18] sm:$0xff]  }
 0x6af   : > { %v13625_v52 = vpop.f32.mrf.mxu1  ;;  %v4042_v31 = vpop.f32.mrf.mxu0 }
 0x6b0   : > { %v3833_v27 = vadd.f32 %v3827_v32, %v3781_v40  ;;  %v14755_v32 = vld [vmem:[%s18596_s10 + $0x48] sm:$0xff]  }
 0x6b1   : > { %v3778_v38 = vpop.f32.mrf.mxu1  ;;  %v13656_v39 = vpop.f32.mrf.mxu0 }
 0x6b2   : > { %v14766_v39 = vld [vmem:[%s18597_s11 + $0x20] sm:$0xff]  }
 0x6b3   : > { %v13626_v53 = vpop.f32.mrf.mxu1 }
 0x6b5   : > { %v3881_v46 = vpop.f32.mrf.mxu1 }
 0x6b6   : > { %v3887_v51 = vadd.f32 %v3881_v46, %v3833_v27  ;;  %v14767_v27 = vld [vmem:[%s18597_s11 + $0x28] sm:$0xff]  }
 0x6b7   : > { %v13637_v47 = vpop.f32.mrf.mxu1 }
 0x6b8   : > { %v3939_v35 = vadd.f32 %v3933_v3, %v3887_v51 }
 0x6b9   : > { %v3884_v54 = vpop.f32.mrf.mxu1 }
 0x6bb   : > { %v13638_v55 = vpop.f32.mrf.mxu1 }
 0x6bd   : > { %v3987_v56 = vpop.f32.mrf.mxu1 }
 0x6be   : > { %v3993_v61 = vadd.f32 %v3987_v56, %v3939_v35  ;;  %v14771_v56 = vld [vmem:[%s18597_s11 + $0x50] sm:$0xff]  }
 0x6bf   : > { %v13649_v60 = vpop.f32.mrf.mxu1 }
 0x6c0   : > { %v4045_v42 = vadd.f32 %v4039_v29, %v3993_v61 }
 0x6c1   : > { %v3990_v24 = vpop.f32.mrf.mxu1 }
 0x6c2   : > { %v14768_v24 = vld [vmem:[%s18597_s11 + $0x30] sm:$0xff]  }
 0x6c3   : > { %v13650_v33 = vpop.f32.mrf.mxu1 }
 0x6c5   : > { %v4093_v44 = vpop.f32.mrf.mxu1 }
 0x6c6   : > { %v4099_v59 = vadd.f32 %v4093_v44, %v4045_v42 }
 0x6c7   : > { %v13661_v62 = vpop.f32.mrf.mxu1 }
 0x6c8   : > { %v4107_v63 = vadd.f32 %v12183_v58, %v4099_v59  ;;  %v14773_v58 = vld [vmem:[%s18597_s11 + $0x60] sm:$0xff]  }
 0x6c9   : > { %v4096_v1 = vpop.f32.mrf.mxu1 }
 0x6ca   : > { %v4108_v4 = vpack.c.bf16 %v4107_v63, %v4107_v63  ;;  %v14770_v1 = vld [vmem:[%s18597_s11 + $0x38] sm:$0xff]  }
 0x6cb   : > { %v13662_v6 = vpop.f32.mrf.mxu1 }
 0x6cc   : > { %14559 = vmatprep.subr.msk.bf16.mxu0 %vm4270_vm4, %v4108_v4  ;;  %v4272_v9 = vsel %vm4270_vm4, %v4108_v4, 0 }
 0x6cd   : > { %13664 = vmatpush3.bf16.msra.mxu0 %v4272_v9 }
 0x6ce   : > { %13745 = vmatprep.subr.bf16.mxu0 %v14985_v20 }
 0x6d0   : > { %13666 = vmatmul.mubr.msk.bf16.vlgmr.msra.gmra.mxu0 %vm4221_vm3, %v14747_v10  ;;  %v14775_v10 = vld [vmem:[%s18597_s11 + $0x70] sm:$0xff]  }
 0x6d1   : > { %13669 = vmatprep.mubr.msk.bf16.mxu0 %vm4221_vm3, %v14748_v11  ;;  %13746 = vmatpush3.bf16.msra.mxu0 %v14769_v28  ;;  %v14778_v28 = vld [vmem:[%s18599_s13] sm:$0xff]  }
 0x6d2   : > { %13757 = vmatprep.subr.bf16.mxu0 %v14985_v20 }
 0x6d8   : > { %13670 = vmatmul.mubr.msk.bf16.gmra.mxu0 %vm4221_vm3, %v14749_v12 }
 0x6d9   : > { %13673 = vmatprep.mubr.msk.bf16.mxu0 %vm4221_vm3, %v14750_v14 }
 0x6e0   : > { %13674 = vmatmul.mubr.msk.bf16.gmra.mxu0 %vm4221_vm3, %v14751_v15  ;;  %v14772_v15 = vld [vmem:[%s18597_s11 + $0x48] sm:$0xff]  }
 0x6e1   : > { %13677 = vmatprep.mubr.msk.bf16.mxu0 %vm4221_vm3, %v14752_v22 }
 0x6e8   : > { %13678 = vmatmul.mubr.msk.bf16.gmra.mxu0 %vm4221_vm3, %v14753_v23 }
 0x6e9   : > { %13681 = vmatprep.mubr.msk.bf16.mxu0 %vm4221_vm3, %v14754_v26 }
 0x6f0   : > { %13682 = vmatmul.mubr.msk.bf16.gmra.mxu0 %vm4221_vm3, %v14755_v32 }
 0x6f1   : > { %13685 = vmatprep.mubr.msk.bf16.mxu0 %vm4221_vm3, %v14756_v13  ;;  %v14774_v13 = vld [vmem:[%s18597_s11 + $0x58] sm:$0xff]  }
 0x6f8   : > { %13686 = vmatmul.mubr.msk.bf16.gmra.mxu0 %vm4221_vm3, %v14757_v37 }
 0x6f9   : > { %13689 = vmatprep.mubr.msk.bf16.mxu0 %vm4221_vm3, %v14758_v2  ;;  %v14776_v2 = vld [vmem:[%s18597_s11 + $0x68] sm:$0xff]  }
 0x700   : > { %13690 = vmatmul.mubr.msk.bf16.gmra.mxu0 %vm4221_vm3, %v14759_v17 }
 0x701   : > { %13693 = vmatprep.mubr.msk.bf16.mxu0 %vm4221_vm3, %v14760_v34  ;;  %v14777_v34 = vld [vmem:[%s18597_s11 + $0x78] sm:$0xff]  }
 0x708   : > { %13694 = vmatmul.mubr.msk.bf16.gmra.mxu0 %vm4221_vm3, %v14761_v41 }
 0x709   : > { %13747 = vmatprep.mubr.msk.bf16.mxu0 %vm14986_vm1, %v14985_v20 }
 0x790   : > { %v13667_v43 = vpop.f32.mrf.mxu0 }
 0x792   : > { %v4308_v48 = vpop.f32.mrf.mxu0 }
 0x794   : > { %v13668_v3 = vpop.f32.mrf.mxu0 }
 0x795   : > { %v4436_v8 = vpack.c.bf16 %v13668_v3, %v13667_v43 }
 0x796   : > { %v4311_v5 = vpop.f32.mrf.mxu0 }
 0x797   : > { %13700 = vmatmul.mubr.msk.bf16.vlgmr.msra.gmra.mxu1 %vm1531_vm0, %v4436_v8  ;;  %v4435_v36 = vpack.c.bf16 %v4311_v5, %v4308_v48 }
 0x798   : > { %v13671_v18 = vpop.f32.mrf.mxu0  ;;  %13704 = vmatpush3.bf16.msra.mxu1 %v14763_v25  ;;  %13705 = vmatprep.mubr.msk.bf16.mxu1 %vm14986_vm1, %v14985_v20 }
 0x799   : > { %13709 = vmatprep.subr.bf16.mxu1 %v14985_v20 }
 0x79a   : > { %v4324_v7 = vpop.f32.mrf.mxu0 }
 0x79c   : > { %v13672_v19 = vpop.f32.mrf.mxu0 }
 0x79d   : > { %v4438_v53 = vpack.c.bf16 %v13672_v19, %v13671_v18 }
 0x79e   : > { %v4327_v21 = vpop.f32.mrf.mxu0 }
 0x79f   : > { %13706 = vmatmul.mubr.msk.bf16.vlgmr.msra.gmra.mxu1 %vm1531_vm0, %v4435_v36  ;;  %v4437_v0 = vpack.c.bf16 %v4327_v21, %v4324_v7 }
 0x7a0   : > { %13710 = vmatpush3.bf16.msra.mxu1 %v14764_v49  ;;  %13711 = vmatprep.mubr.msk.bf16.mxu1 %vm14986_vm1, %v14985_v20  ;;  %v13675_v29 = vpop.f32.mrf.mxu0 }
 0x7a1   : > { %13715 = vmatprep.subr.bf16.mxu1 %v14985_v20 }
 0x7a2   : > { %v4340_v30 = vpop.f32.mrf.mxu0 }
 0x7a4   : > { %v13676_v45 = vpop.f32.mrf.mxu0 }
 0x7a5   : > { %v4440_v42 = vpack.c.bf16 %v13676_v45, %v13675_v29 }
 0x7a6   : > { %v4343_v52 = vpop.f32.mrf.mxu0 }
 0x7a7   : > { %13712 = vmatmul.mubr.msk.bf16.vlgmr.msra.gmra.mxu1 %vm1531_vm0, %v4437_v0  ;;  %v4439_v51 = vpack.c.bf16 %v4343_v52, %v4340_v30 }
 0x7a8   : > { %13716 = vmatpush3.bf16.msra.mxu1 %v14765_v50  ;;  %13717 = vmatprep.mubr.msk.bf16.mxu1 %vm14986_vm1, %v14985_v20  ;;  %v15846_v31 = vpop.f32.mrf.mxu0 }
 0x7a9   : > { %13721 = vmatprep.subr.bf16.mxu1 %v14985_v20 }
 0x7aa   : > { %v4356_v38 = vpop.f32.mrf.mxu0 }
 0x7ac   : > { %v13680_v16 = vpop.f32.mrf.mxu0 }
 0x7ad   : > { %v4442_v23 = vpack.c.bf16 %v13680_v16, %v15846_v31 }
 0x7ae   : > { %v4359_v40 = vpop.f32.mrf.mxu0 }
 0x7af   : > { %13718 = vmatmul.mubr.msk.bf16.vlgmr.msra.gmra.mxu1 %vm1531_vm0, %v4438_v53  ;;  %v4441_v6 = vpack.c.bf16 %v4359_v40, %v4356_v38 }
 0x7b0   : > { %13722 = vmatpush3.bf16.msra.mxu1 %v14766_v39  ;;  %13723 = vmatprep.mubr.msk.bf16.mxu1 %vm14986_vm1, %v14985_v20  ;;  %v15855_v46 = vpop.f32.mrf.mxu0 }
 0x7b1   : > { %13727 = vmatprep.subr.bf16.mxu1 %v14985_v20 }
 0x7b2   : > { %v4372_v47 = vpop.f32.mrf.mxu0 }
 0x7b4   : > { %v13684_v54 = vpop.f32.mrf.mxu0 }
 0x7b5   : > { %v4444_v37 = vpack.c.bf16 %v13684_v54, %v15855_v46 }
 0x7b6   : > { %v4375_v55 = vpop.f32.mrf.mxu0 }
 0x7b7   : > { %13724 = vmatmul.mubr.msk.bf16.vlgmr.msra.gmra.mxu1 %vm1531_vm0, %v4439_v51  ;;  %v4443_v35 = vpack.c.bf16 %v4375_v55, %v4372_v47 }
 0x7b8   : > { %13728 = vmatpush3.bf16.msra.mxu1 %v14767_v27  ;;  %13729 = vmatprep.mubr.msk.bf16.mxu1 %vm14986_vm1, %v14985_v20  ;;  %v13687_v60 = vpop.f32.mrf.mxu0 }
 0x7b9   : > { %13733 = vmatprep.subr.bf16.mxu1 %v14985_v20  ;;  %13748 = vmatmul.mubr.msk.bf16.vlgmr.msra.gmra.mxu0 %vm1531_vm0, %v4443_v35 }
 0x7ba   : > { %v4388_v61 = vpop.f32.mrf.mxu0  ;;  %13758 = vmatpush3.bf16.msra.mxu0 %v14771_v56  ;;  %13759 = vmatprep.mubr.msk.bf16.mxu0 %vm14986_vm1, %v14985_v20 }
 0x7bb   : > { %13769 = vmatprep.subr.bf16.mxu0 %v14985_v20 }
 0x7bc   : > { %v13688_v33 = vpop.f32.mrf.mxu0 }
 0x7bd   : > { %v4446_v17 = vpack.c.bf16 %v13688_v33, %v13687_v60 }
 0x7be   : > { %v4391_v44 = vpop.f32.mrf.mxu0 }
 0x7bf   : > { %13730 = vmatmul.mubr.msk.bf16.vlgmr.msra.gmra.mxu1 %vm1531_vm0, %v4440_v42  ;;  %v4445_v59 = vpack.c.bf16 %v4391_v44, %v4388_v61 }
 0x7c0   : > { %13734 = vmatpush3.bf16.msra.mxu1 %v14768_v24  ;;  %13735 = vmatprep.mubr.msk.bf16.mxu1 %vm14986_vm1, %v14985_v20  ;;  %v13691_v62 = vpop.f32.mrf.mxu0 }
 0x7c1   : > { %13739 = vmatprep.subr.bf16.mxu1 %v14985_v20  ;;  %13760 = vmatmul.mubr.msk.bf16.vlgmr.msra.gmra.mxu0 %vm1531_vm0, %v4445_v59 }
 0x7c2   : > { %v4404_v63 = vpop.f32.mrf.mxu0  ;;  %13770 = vmatpush3.bf16.msra.mxu0 %v14773_v58  ;;  %13771 = vmatprep.mubr.msk.bf16.mxu0 %vm14986_vm1, %v14985_v20 }
 0x7c3   : > { %13781 = vmatprep.subr.bf16.mxu0 %v14985_v20 }
 0x7c4   : > { %v13692_v4 = vpop.f32.mrf.mxu0 }
 0x7c5   : > { %v4448_v41 = vpack.c.bf16 %v13692_v4, %v13691_v62 }
 0x7c6   : > { %v4407_v9 = vpop.f32.mrf.mxu0 }
 0x7c7   : > { %13736 = vmatmul.mubr.msk.bf16.vlgmr.msra.gmra.mxu1 %vm1531_vm0, %v4441_v6  ;;  %v4447_v11 = vpack.c.bf16 %v4407_v9, %v4404_v63 }
 0x7c8   : > { %13740 = vmatpush3.bf16.msra.mxu1 %v14770_v1  ;;  %13741 = vmatprep.mubr.msk.bf16.mxu1 %vm14986_vm1, %v14985_v20  ;;  %v13695_v12 = vpop.f32.mrf.mxu0 }
 0x7c9   : > { %13751 = vmatprep.subr.bf16.mxu1 %v14985_v20  ;;  %13772 = vmatmul.mubr.msk.bf16.vlgmr.msra.gmra.mxu0 %vm1531_vm0, %v4447_v11 }
 0x7ca   : > { %v4420_v14 = vpop.f32.mrf.mxu0  ;;  %13782 = vmatpush3.bf16.msra.mxu0 %v14775_v10  ;;  %13783 = vmatprep.mubr.msk.bf16.mxu0 %vm14986_vm1, %v14985_v20 }
 0x7cc   : > { %v13696_v22 = vpop.f32.mrf.mxu0 }
 0x7cd   : > { %v4450_v57 = vpack.c.bf16 %v13696_v22, %v13695_v12 }
 0x7ce   : > { %v4423_v26 = vpop.f32.mrf.mxu0 }
 0x7cf   : > { %13742 = vmatmul.mubr.msk.bf16.vlgmr.msra.gmra.mxu1 %vm1531_vm0, %v4442_v23  ;;  %v4449_v32 = vpack.c.bf16 %v4423_v26, %v4420_v14 }
 0x7d0   : > { %13752 = vmatpush3.bf16.msra.mxu1 %v14772_v15  ;;  %13753 = vmatprep.mubr.msk.bf16.mxu1 %vm14986_vm1, %v14985_v20 }
 0x7d1   : > { %13763 = vmatprep.subr.bf16.mxu1 %v14985_v20  ;;  %13784 = vmatmul.mubr.msk.bf16.vlgmr.msra.gmra.mxu0 %vm1531_vm0, %v4449_v32 }
 0x7d2   : > { %13795 = vmatprep.mubr.msk.bf16.mxu0 %vm1531_vm0, %v14778_v28 }
 0x7d7   : > { %13754 = vmatmul.mubr.msk.bf16.vlgmr.msra.gmra.mxu1 %vm1531_vm0, %v4444_v37 }
 0x7d8   : > { %13764 = vmatpush3.bf16.msra.mxu1 %v14774_v13  ;;  %13765 = vmatprep.mubr.msk.bf16.mxu1 %vm14986_vm1, %v14985_v20 }
 0x7d9   : > { %13775 = vmatprep.subr.bf16.mxu1 %v14985_v20 }
 0x7df   : > { %13766 = vmatmul.mubr.msk.bf16.vlgmr.msra.gmra.mxu1 %vm1531_vm0, %v4446_v17 }
 0x7e0   : > { %13776 = vmatpush3.bf16.msra.mxu1 %v14776_v2  ;;  %13777 = vmatprep.mubr.msk.bf16.mxu1 %vm14986_vm1, %v14985_v20 }
 0x7e1   : > { %13787 = vmatprep.subr.bf16.mxu1 %v14985_v20 }
 0x7e7   : > { %13778 = vmatmul.mubr.msk.bf16.vlgmr.msra.gmra.mxu1 %vm1531_vm0, %v4448_v41 }
 0x7e8   : > { %13788 = vmatpush3.bf16.msra.mxu1 %v14777_v34  ;;  %13789 = vmatprep.mubr.msk.bf16.mxu1 %vm14986_vm1, %v14985_v20 }
 0x7ef   : > { %13790 = vmatmul.mubr.msk.bf16.vlgmr.msra.gmra.mxu1 %vm1531_vm0, %v4450_v57 }
 0x857   : > { %v4498_v43 = vpop.f32.mrf.mxu1 }
 0x859   : > { %v13701_v48 = vpop.f32.mrf.mxu1 }
 0x85b   : > { %v4501_v3 = vpop.f32.mrf.mxu1 }
 0x85d   : > { %v13702_v25 = vpop.f32.mrf.mxu1 }
 0x85f   : > { %v4548_v8 = vpop.f32.mrf.mxu1 }
 0x860   : > { %v4549_v42 = vadd.f32 %v4548_v8, %v4498_v43 }
 0x861   : > { %v13707_v5 = vpop.f32.mrf.mxu1 }
 0x863   : > { %v4551_v18 = vpop.f32.mrf.mxu1 }
 0x864   : > { %v4552_v1 = vadd.f32 %v4551_v18, %v4501_v3 }
 0x865   : > { %v13708_v7 = vpop.f32.mrf.mxu1 }
 0x867   : > { %v4600_v19 = vpop.f32.mrf.mxu1 }
 0x868   : > { %v4607_v59 = vadd.f32 %v4600_v19, %v4549_v42  ;;  %v14779_v42 = vld [vmem:[%s18599_s13 + $0x8] sm:$0xff]  }
 0x869   : > { %v13713_v49 = vpop.f32.mrf.mxu1 }
 0x86b   : > { %v4603_v20 = vpop.f32.mrf.mxu1 }
 0x86c   : > { %v4608_v10 = vadd.f32 %v4603_v20, %v4552_v1  ;;  %v14785_v1 = vld [vmem:[%s18599_s13 + $0x38] sm:$0xff]  }
 0x86d   : > { %v13714_v36 = vpop.f32.mrf.mxu1 }
 0x86f   : > { %v4654_v21 = vpop.f32.mrf.mxu1 }
 0x870   : > { %v4661_v4 = vadd.f32 %v4654_v21, %v4607_v59  ;;  %v14782_v59 = vld [vmem:[%s18599_s13 + $0x20] sm:$0xff]  }
 0x871   : > { %v13719_v29 = vpop.f32.mrf.mxu1 }
 0x873   : > { %v4657_v30 = vpop.f32.mrf.mxu1 }
 0x874   : > { %v4662_v15 = vadd.f32 %v4657_v30, %v4608_v10  ;;  %v14789_v10 = vld [vmem:[%s18599_s13 + $0x58] sm:$0xff]  }
 0x875   : > { %v13720_v45 = vpop.f32.mrf.mxu1 }
 0x877   : > { %v4708_v50 = vpop.f32.mrf.mxu1 }
 0x878   : > { %v4715_v11 = vadd.f32 %v4708_v50, %v4661_v4  ;;  %v14786_v4 = vld [vmem:[%s18599_s13 + $0x40] sm:$0xff]  }
 0x879   : > { %v13725_v0 = vpop.f32.mrf.mxu1  ;;  %v4924_v52 = vpop.f32.mrf.mxu0 }
 0x87b   : > { %v4711_v31 = vpop.f32.mrf.mxu1  ;;  %v13749_v38 = vpop.f32.mrf.mxu0 }
 0x87c   : > { %v4716_v32 = vadd.f32 %v4711_v31, %v4662_v15  ;;  %v14793_v15 = vld [vmem:[%s18599_s13 + $0x78] sm:$0xff]  }
 0x87d   : > { %v13726_v39 = vpop.f32.mrf.mxu1  ;;  %v4927_v16 = vpop.f32.mrf.mxu0 }
 0x87f   : > { %v4762_v53 = vpop.f32.mrf.mxu1  ;;  %v13750_v40 = vpop.f32.mrf.mxu0 }
 0x880   : > { %v4769_v22 = vadd.f32 %v4762_v53, %v4715_v11  ;;  %v14790_v11 = vld [vmem:[%s18599_s13 + $0x60] sm:$0xff]  }
 0x881   : > { %v13731_v46 = vpop.f32.mrf.mxu1  ;;  %v5032_v47 = vpop.f32.mrf.mxu0 }
 0x883   : > { %v4765_v27 = vpop.f32.mrf.mxu1  ;;  %v13761_v54 = vpop.f32.mrf.mxu0 }
 0x884   : > { %v4770_v17 = vadd.f32 %v4765_v27, %v4716_v32  ;;  %v14797_v32 = vld [vmem:[%s18599_s13 + $0x98] sm:$0xff]  }
 0x885   : > { %v13732_v51 = vpop.f32.mrf.mxu1  ;;  %v5035_v55 = vpop.f32.mrf.mxu0 }
 0x886   : > { %v5312_v51 = vld [vmem:[%s18598_s12 + $0x8] sm:$0xff] }
 0x887   : > { %v4816_v56 = vpop.f32.mrf.mxu1  ;;  %v13762_v35 = vpop.f32.mrf.mxu0 }
 0x888   : > { %v4823_v13 = vadd.f32 %v4816_v56, %v4769_v22  ;;  %v14794_v22 = vld [vmem:[%s18599_s13 + $0x80] sm:$0xff]  }
 0x889   : > { %v13737_v60 = vpop.f32.mrf.mxu1  ;;  %v5140_v61 = vpop.f32.mrf.mxu0 }
 0x88b   : > { %v4819_v24 = vpop.f32.mrf.mxu1  ;;  %v13773_v33 = vpop.f32.mrf.mxu0 }
 0x88c   : > { %v4824_v57 = vadd.f32 %v4819_v24, %v4770_v17  ;;  %v14801_v17 = vld [vmem:[%s18599_s13 + $0xb8] sm:$0xff]  }
 0x88d   : > { %v13738_v44 = vpop.f32.mrf.mxu1  ;;  %v5143_v58 = vpop.f32.mrf.mxu0 }
 0x88e   : > { %v14780_v44 = vld [vmem:[%s18599_s13 + $0x10] sm:$0xff]  }
 0x88f   : > { %v4870_v62 = vpop.f32.mrf.mxu1  ;;  %v13774_v63 = vpop.f32.mrf.mxu0 }
 0x890   : > { %v4877_v34 = vadd.f32 %v4870_v62, %v4823_v13  ;;  %v14783_v62 = vld [vmem:[%s18599_s13 + $0x28] sm:$0xff]   ;;  %v14784_v63 = vld [vmem:[%s18599_s13 + $0x30] sm:$0xff]   ;;  %v14798_v13 = vld [vmem:[%s18599_s13 + $0xa0] sm:$0xff]  }
 0x891   : > { %v13743_v6 = vpop.f32.mrf.mxu1  ;;  %v5248_v9 = vpop.f32.mrf.mxu0 }
 0x892   : > { %v4931_v48 = vadd.f32 %v4924_v52, %v4877_v34  ;;  %v14787_v6 = vld [vmem:[%s18599_s13 + $0x48] sm:$0xff]  }
 0x893   : > { %v4873_v12 = vpop.f32.mrf.mxu1  ;;  %v13785_v14 = vpop.f32.mrf.mxu0  ;;  %v14814_v34 = vld [vmem:[%s18600_s14 + $0x8] sm:$0xff]  }
 0x894   : > { %v4878_v43 = vadd.f32 %v4873_v12, %v4824_v57  ;;  %v14791_v12 = vld [vmem:[%s18599_s13 + $0x68] sm:$0xff]   ;;  %v14792_v14 = vld [vmem:[%s18599_s13 + $0x70] sm:$0xff]   ;;  %13867 = vmatprep.subr.bf16.mxu1 %v14814_v34 }
 0x895   : > { %v13744_v23 = vpop.f32.mrf.mxu1  ;;  %v5251_v26 = vpop.f32.mrf.mxu0  ;;  %13868 = vmatpush3.bf16.msra.mxu1 %v14814_v34  ;;  %v14803_v57 = vld [vmem:[%s18599_s13 + $0xc8] sm:$0xff]  }
 0x896   : > { %v4932_v5 = vadd.f32 %v4927_v16, %v4878_v43  ;;  %v5311_v16 = vld [vmem:[%s18598_s12] sm:$0xff]  ;;  %v14795_v23 = vld [vmem:[%s18599_s13 + $0x88] sm:$0xff]  }
 0x897   : > { %v4978_v37 = vpop.f32.mrf.mxu1  ;;  %v13786_v2 = vpop.f32.mrf.mxu0  ;;  %v14815_v43 = vld [vmem:[%s18600_s14] sm:$0xff]  }
 0x898   : > { %v4985_v25 = vadd.f32 %v4978_v37, %v4931_v48  ;;  %v14799_v37 = vld [vmem:[%s18599_s13 + $0xa8] sm:$0xff]   ;;  %v14800_v2 = vld [vmem:[%s18599_s13 + $0xb0] sm:$0xff]   ;;  %v14805_v48 = vld [vmem:[%s18599_s13 + $0xd8] sm:$0xff]   ;;  %13877 = vmatprep.subr.bf16.mxu1 %v14815_v43 }
 0x899   : > { %v13755_v41 = vpop.f32.mrf.mxu1 }
 0x89a   : > { %v5039_v19 = vadd.f32 %v5032_v47, %v4985_v25  ;;  %v14802_v41 = vld [vmem:[%s18599_s13 + $0xc0] sm:$0xff]   ;;  %v14807_v25 = vld [vmem:[%s18599_s13 + $0xe8] sm:$0xff]  }
 0x89b   : > { %v4981_v28 = vpop.f32.mrf.mxu1 }
 0x89c   : > { %v4986_v7 = vadd.f32 %v4981_v28, %v4932_v5  ;;  %v14804_v28 = vld [vmem:[%s18599_s13 + $0xd0] sm:$0xff]   ;;  %v14809_v5 = vld [vmem:[%s18599_s13 + $0xf8] sm:$0xff]  }
 0x89d   : > { %v13756_v3 = vpop.f32.mrf.mxu1 }
 0x89e   : > { %v5040_v21 = vadd.f32 %v5035_v55, %v4986_v7  ;;  %v14806_v3 = vld [vmem:[%s18599_s13 + $0xe0] sm:$0xff]   ;;  %v14811_v7 = vld [vmem:[%s18599_s13 + $0x108] sm:$0xff]  }
 0x89f   : > { %v5086_v8 = vpop.f32.mrf.mxu1 }
 0x8a0   : > { %v5093_v20 = vadd.f32 %v5086_v8, %v5039_v19  ;;  %v14808_v8 = vld [vmem:[%s18599_s13 + $0xf0] sm:$0xff]  }
 0x8a1   : > { %v13767_v18 = vpop.f32.mrf.mxu1  ;;  %v14812_v19 = vld [vmem:[%s18599_s13 + $0x110] sm:$0xff]  }
 0x8a2   : > { %v5147_v45 = vadd.f32 %v5140_v61, %v5093_v20  ;;  %v14810_v18 = vld [vmem:[%s18599_s13 + $0x100] sm:$0xff]  }
 0x8a3   : > { %v5089_v49 = vpop.f32.mrf.mxu1 }
 0x8a4   : > { %v5094_v30 = vadd.f32 %v5089_v49, %v5040_v21  ;;  %v14813_v49 = vld [vmem:[%s18599_s13 + $0x118] sm:$0xff]  }
 0x8a5   : > { %v13768_v36 = vpop.f32.mrf.mxu1 }
 0x8a6   : > { %v5148_v38 = vadd.f32 %v5143_v58, %v5094_v30  ;;  %v14781_v58 = vld [vmem:[%s18599_s13 + $0x18] sm:$0xff]  }
 0x8a7   : > { %v5194_v29 = vpop.f32.mrf.mxu1 }
 0x8a8   : > { %v5201_v0 = vadd.f32 %v5194_v29, %v5147_v45 }
 0x8a9   : > { %v13779_v50 = vpop.f32.mrf.mxu1 }
 0x8aa   : > { %v5255_v53 = vadd.f32 %v5248_v9, %v5201_v0  ;;  %v14788_v9 = vld [vmem:[%s18599_s13 + $0x50] sm:$0xff]  }
 0x8ab   : > { %v5197_v31 = vpop.f32.mrf.mxu1 }
 0x8ac   : > { %v5202_v52 = vadd.f32 %v5197_v31, %v5148_v38 }
 0x8ad   : > { %v13780_v39 = vpop.f32.mrf.mxu1 }
 0x8ae   : > { %v5256_v27 = vadd.f32 %v5251_v26, %v5202_v52  ;;  %v14796_v26 = vld [vmem:[%s18599_s13 + $0x90] sm:$0xff]  }
 0x8af   : > { %v5302_v40 = vpop.f32.mrf.mxu1 }
 0x8b0   : > { %v5309_v46 = vadd.f32 %v5302_v40, %v5255_v53 }
 0x8b1   : > { %v13791_v47 = vpop.f32.mrf.mxu1 }
 0x8b2   : > { %v5313_v55 = vadd.f32 %v5311_v16, %v5309_v46  ;;  %v14816_v16 = vld [vmem:[%s18600_s14 + $0x10] sm:$0xff]  }
 0x8b3   : > { %v5305_v54 = vpop.f32.mrf.mxu1 }
 0x8b4   : > { %v5310_v56 = vadd.f32 %v5305_v54, %v5256_v27  ;;  %v5315_v61 = vmax.f32 %v5313_v55, 0.0 }
 0x8b5   : > { %v13792_v35 = vpop.f32.mrf.mxu1 }
 0x8b6   : > { %v5314_v60 = vadd.f32 %v5312_v51, %v5310_v56 }
 0x8b8   : > { %v5316_v24 = vmax.f32 %v5314_v60, 0.0 }
 0x8ba   : > { %v5317_v33 = vpack.c.bf16 %v5316_v24, %v5315_v61 }
 0x8bc   : > { %13793 = vmatprep.subr.bf16.mxu0 %v5317_v33 }
 0x8bd   : > { %13794 = vmatpush3.bf16.msra.mxu0 %v5317_v33 }
 0x8c0   : > { %13796 = vmatmul.mubr.msk.bf16.vlgmr.msra.gmra.mxu0 %vm1531_vm0, %v14779_v42 }
 0x8c1   : > { %13799 = vmatprep.mubr.msk.bf16.mxu0 %vm1531_vm0, %v14780_v44  ;;  %v14817_v44 = vld [vmem:[%s18600_s14 + $0x18] sm:$0xff]  }
 0x8c8   : > { %13800 = vmatmul.mubr.msk.bf16.gmra.mxu0 %vm1531_vm0, %v14781_v58 }
 0x8c9   : > { %13803 = vmatprep.mubr.msk.bf16.mxu0 %vm1531_vm0, %v14782_v59 }
 0x8d0   : > { %13804 = vmatmul.mubr.msk.bf16.gmra.mxu0 %vm1531_vm0, %v14783_v62 }
 0x8d1   : > { %13807 = vmatprep.mubr.msk.bf16.mxu0 %vm1531_vm0, %v14784_v63 }
 0x8d8   : > { %13808 = vmatmul.mubr.msk.bf16.gmra.mxu0 %vm1531_vm0, %v14785_v1 }
 0x8d9   : > { %13811 = vmatprep.mubr.msk.bf16.mxu0 %vm1531_vm0, %v14786_v4 }
 0x8e0   : > { %13812 = vmatmul.mubr.msk.bf16.gmra.mxu0 %vm1531_vm0, %v14787_v6 }
 0x8e1   : > { %13815 = vmatprep.mubr.msk.bf16.mxu0 %vm1531_vm0, %v14788_v9 }
 0x8e8   : > { %13816 = vmatmul.mubr.msk.bf16.gmra.mxu0 %vm1531_vm0, %v14789_v10 }
 0x8e9   : > { %13819 = vmatprep.mubr.msk.bf16.mxu0 %vm1531_vm0, %v14790_v11 }
 0x8f0   : > { %13820 = vmatmul.mubr.msk.bf16.gmra.mxu0 %vm1531_vm0, %v14791_v12 }
 0x8f1   : > { %13823 = vmatprep.mubr.msk.bf16.mxu0 %vm1531_vm0, %v14792_v14 }
 0x8f8   : > { %13824 = vmatmul.mubr.msk.bf16.gmra.mxu0 %vm1531_vm0, %v14793_v15 }
 0x8f9   : > { %13827 = vmatprep.mubr.msk.bf16.mxu0 %vm1531_vm0, %v14794_v22  ;;  %v14818_v22 = vld [vmem:[%s18600_s14 + $0x20] sm:$0xff]  }
 0x900   : > { %13828 = vmatmul.mubr.msk.bf16.gmra.mxu0 %vm1531_vm0, %v14795_v23 }
 0x901   : > { %13831 = vmatprep.mubr.msk.bf16.mxu0 %vm1531_vm0, %v14796_v26 }
 0x908   : > { %13832 = vmatmul.mubr.msk.bf16.gmra.mxu0 %vm1531_vm0, %v14797_v32 }
 0x909   : > { %13835 = vmatprep.mubr.msk.bf16.mxu0 %vm1531_vm0, %v14798_v13 }
 0x910   : > { %13836 = vmatmul.mubr.msk.bf16.gmra.mxu0 %vm1531_vm0, %v14799_v37 }
 0x911   : > { %13839 = vmatprep.mubr.msk.bf16.mxu0 %vm1531_vm0, %v14800_v2 }
 0x918   : > { %13840 = vmatmul.mubr.msk.bf16.gmra.mxu0 %vm1531_vm0, %v14801_v17 }
 0x919   : > { %13843 = vmatprep.mubr.msk.bf16.mxu0 %vm1531_vm0, %v14802_v41 }
 0x920   : > { %13844 = vmatmul.mubr.msk.bf16.gmra.mxu0 %vm1531_vm0, %v14803_v57 }
 0x921   : > { %13847 = vmatprep.mubr.msk.bf16.mxu0 %vm1531_vm0, %v14804_v28 }
 0x928   : > { %13848 = vmatmul.mubr.msk.bf16.gmra.mxu0 %vm1531_vm0, %v14805_v48  ;;  %v14819_v48 = vld [vmem:[%s18600_s14 + $0x28] sm:$0xff]  }
 0x929   : > { %13851 = vmatprep.mubr.msk.bf16.mxu0 %vm1531_vm0, %v14806_v3 }
 0x930   : > { %13852 = vmatmul.mubr.msk.bf16.gmra.mxu0 %vm1531_vm0, %v14807_v25 }
 0x931   : > { %13855 = vmatprep.mubr.msk.bf16.mxu0 %vm1531_vm0, %v14808_v8 }
 0x938   : > { %13856 = vmatmul.mubr.msk.bf16.gmra.mxu0 %vm1531_vm0, %v14809_v5 }
 0x939   : > { %13859 = vmatprep.mubr.msk.bf16.mxu0 %vm1531_vm0, %v14810_v18 }
 0x940   : > { %13860 = vmatmul.mubr.msk.bf16.gmra.mxu0 %vm1531_vm0, %v14811_v7 }
 0x941   : > { %13863 = vmatprep.mubr.msk.bf16.mxu0 %vm1531_vm0, %v14812_v19 }
 0x948   : > { %13864 = vmatmul.mubr.msk.bf16.gmra.mxu0 %vm1531_vm0, %v14813_v49 }
 0x980   : > { %v13797_v20 = vpop.f32.mrf.mxu0 }
 0x982   : > { %v5712_v36 = vpop.f32.mrf.mxu0 }
 0x984   : > { %v13798_v21 = vpop.f32.mrf.mxu0 }
 0x985   : > { %v6000_v33 = vpack.c.bf16 %v13798_v21, %v13797_v20 }
 0x986   : > { %v5715_v29 = vpop.f32.mrf.mxu0 }
 0x987   : > { %v5999_v35 = vpack.c.bf16 %v5715_v29, %v5712_v36 }
 0x988   : > { %v13801_v30 = vpop.f32.mrf.mxu0 }
 0x98a   : > { %v5728_v45 = vpop.f32.mrf.mxu0 }
 0x98c   : > { %v13802_v50 = vpop.f32.mrf.mxu0 }
 0x98d   : > { %v6002_v4 = vpack.c.bf16 %v13802_v50, %v13801_v30  ;;  %v14820_v30 = vld [vmem:[%s18600_s14 + $0x30] sm:$0xff]  }
 0x98e   : > { %v5731_v0 = vpop.f32.mrf.mxu0 }
 0x98f   : > { %v6001_v58 = vpack.c.bf16 %v5731_v0, %v5728_v45 }
 0x990   : > { %v13805_v31 = vpop.f32.mrf.mxu0 }
 0x992   : > { %v5744_v38 = vpop.f32.mrf.mxu0 }
 0x994   : > { %v13806_v39 = vpop.f32.mrf.mxu0 }
 0x995   : > { %v6004_v40 = vpack.c.bf16 %v13806_v39, %v13805_v31 }
 0x996   : > { %v5747_v52 = vpop.f32.mrf.mxu0 }
 0x997   : > { %v6003_v53 = vpack.c.bf16 %v5747_v52, %v5744_v38 }
 0x998   : > { %v13809_v46 = vpop.f32.mrf.mxu0 }
 0x999   : > { %13869 = vmatprep.mubr.msk.bf16.mxu1 %vm1531_vm0, %v6003_v53 }
 0x99a   : > { %v5760_v47 = vpop.f32.mrf.mxu0  ;;  %13870 = vmatmul.mubr.msk.bf16.vlgmr.msra.gmra.mxu1 %vm1531_vm0, %v6004_v40 }
 0x99b   : > { %13878 = vmatpush3.bf16.msra.mxu1 %v14815_v43 }
 0x99c   : > { %v13810_v27 = vpop.f32.mrf.mxu0  ;;  %13887 = vmatprep.subr.bf16.mxu1 %v14816_v16 }
 0x99d   : > { %v6006_v55 = vpack.c.bf16 %v13810_v27, %v13809_v46  ;;  %v14821_v27 = vld [vmem:[%s18600_s14 + $0x38] sm:$0xff]  }
 0x99e   : > { %v5763_v54 = vpop.f32.mrf.mxu0 }
 0x99f   : > { %v6005_v51 = vpack.c.bf16 %v5763_v54, %v5760_v47 }
 0x9a0   : > { %v13813_v56 = vpop.f32.mrf.mxu0 }
 0x9a1   : > { %13873 = vmatprep.mubr.msk.bf16.mxu1 %vm1531_vm0, %v6005_v51 }
 0x9a2   : > { %13874 = vmatmul.mubr.msk.bf16.gmra.mxu1 %vm1531_vm0, %v6006_v55  ;;  %v5776_v60 = vpop.f32.mrf.mxu0 }
 0x9a3   : > { %13879 = vmatprep.mubr.msk.bf16.mxu1 %vm1531_vm0, %v5999_v35 }
 0x9a4   : > { %v13814_v61 = vpop.f32.mrf.mxu0 }
 0x9a5   : > { %v6008_v14 = vpack.c.bf16 %v13814_v61, %v13813_v56 }
 0x9a6   : > { %v5779_v24 = vpop.f32.mrf.mxu0 }
 0x9a7   : > { %v6007_v1 = vpack.c.bf16 %v5779_v24, %v5776_v60 }
 0x9a8   : > { %v13817_v42 = vpop.f32.mrf.mxu0 }
 0x9aa   : > { %13880 = vmatmul.mubr.msk.bf16.vlgmr.msra.gmra.mxu1 %vm1531_vm0, %v6000_v33  ;;  %v5792_v59 = vpop.f32.mrf.mxu0 }
 0x9ab   : > { %13883 = vmatprep.mubr.msk.bf16.mxu1 %vm1531_vm0, %v6001_v58  ;;  %13888 = vmatpush3.bf16.msra.mxu1 %v14816_v16 }
 0x9ac   : > { %v13818_v62 = vpop.f32.mrf.mxu0  ;;  %13897 = vmatprep.subr.bf16.mxu1 %v14817_v44 }
 0x9ad   : > { %v6010_v37 = vpack.c.bf16 %v13818_v62, %v13817_v42 }
 0x9ae   : > { %v5795_v63 = vpop.f32.mrf.mxu0 }
 0x9af   : > { %v6009_v12 = vpack.c.bf16 %v5795_v63, %v5792_v59  ;;  %v14822_v59 = vld [vmem:[%s18600_s14 + $0x40] sm:$0xff]  }
 0x9b0   : > { %v13821_v6 = vpop.f32.mrf.mxu0 }
 0x9b2   : > { %13884 = vmatmul.mubr.msk.bf16.gmra.mxu1 %vm1531_vm0, %v6002_v4  ;;  %v5808_v9 = vpop.f32.mrf.mxu0 }
 0x9b3   : > { %13889 = vmatprep.mubr.msk.bf16.mxu1 %vm1531_vm0, %v6007_v1 }
 0x9b4   : > { %v13822_v10 = vpop.f32.mrf.mxu0 }
 0x9b5   : > { %v6012_v28 = vpack.c.bf16 %v13822_v10, %v13821_v6 }
 0x9b6   : > { %v5811_v11 = vpop.f32.mrf.mxu0 }
 0x9b7   : > { %v6011_v13 = vpack.c.bf16 %v5811_v11, %v5808_v9 }
 0x9b8   : > { %v13825_v15 = vpop.f32.mrf.mxu0 }
 0x9ba   : > { %13890 = vmatmul.mubr.msk.bf16.vlgmr.msra.gmra.mxu1 %vm1531_vm0, %v6008_v14  ;;  %v5824_v23 = vpop.f32.mrf.mxu0 }
 0x9bb   : > { %13893 = vmatprep.mubr.msk.bf16.mxu1 %vm1531_vm0, %v6009_v12  ;;  %13898 = vmatpush3.bf16.msra.mxu1 %v14817_v44 }
 0x9bc   : > { %v13826_v26 = vpop.f32.mrf.mxu0  ;;  %13907 = vmatprep.subr.bf16.mxu1 %v14818_v22 }
 0x9bd   : > { %v6014_v18 = vpack.c.bf16 %v13826_v26, %v13825_v15 }
 0x9be   : > { %v5827_v32 = vpop.f32.mrf.mxu0 }
 0x9bf   : > { %v6013_v57 = vpack.c.bf16 %v5827_v32, %v5824_v23 }
 0x9c0   : > { %v13829_v2 = vpop.f32.mrf.mxu0 }
 0x9c2   : > { %13894 = vmatmul.mubr.msk.bf16.gmra.mxu1 %vm1531_vm0, %v6010_v37  ;;  %v5840_v17 = vpop.f32.mrf.mxu0 }
 0x9c3   : > { %13899 = vmatprep.mubr.msk.bf16.mxu1 %vm1531_vm0, %v6011_v13 }
 0x9c4   : > { %v13830_v34 = vpop.f32.mrf.mxu0 }
 0x9c5   : > { %v6016_v21 = vpack.c.bf16 %v13830_v34, %v13829_v2 }
 0x9c6   : > { %v5843_v41 = vpop.f32.mrf.mxu0 }
 0x9c7   : > { %v6015_v5 = vpack.c.bf16 %v5843_v41, %v5840_v17 }
 0x9c8   : > { %v13833_v43 = vpop.f32.mrf.mxu0 }
 0x9ca   : > { %13900 = vmatmul.mubr.msk.bf16.vlgmr.msra.gmra.mxu1 %vm1531_vm0, %v6012_v28  ;;  %v5856_v3 = vpop.f32.mrf.mxu0 }
 0x9cb   : > { %13903 = vmatprep.mubr.msk.bf16.mxu1 %vm1531_vm0, %v6013_v57  ;;  %13908 = vmatpush3.bf16.msra.mxu1 %v14818_v22 }
 0x9cc   : > { %v13834_v25 = vpop.f32.mrf.mxu0  ;;  %13917 = vmatprep.subr.bf16.mxu1 %v14819_v48 }
 0x9cd   : > { %v6018_v38 = vpack.c.bf16 %v13834_v25, %v13833_v43 }
 0x9ce   : > { %v5859_v8 = vpop.f32.mrf.mxu0 }
 0x9cf   : > { %v6017_v36 = vpack.c.bf16 %v5859_v8, %v5856_v3 }
 0x9d0   : > { %v13837_v7 = vpop.f32.mrf.mxu0 }
 0x9d2   : > { %13904 = vmatmul.mubr.msk.bf16.gmra.mxu1 %vm1531_vm0, %v6014_v18  ;;  %v5872_v19 = vpop.f32.mrf.mxu0 }
 0x9d3   : > { %13909 = vmatprep.mubr.msk.bf16.mxu1 %vm1531_vm0, %v6015_v5 }
 0x9d4   : > { %v13838_v49 = vpop.f32.mrf.mxu0 }
 0x9d5   : > { %v6020_v16 = vpack.c.bf16 %v13838_v49, %v13837_v7 }
 0x9d6   : > { %v5875_v20 = vpop.f32.mrf.mxu0 }
 0x9d7   : > { %v6019_v31 = vpack.c.bf16 %v5875_v20, %v5872_v19 }
 0x9d8   : > { %v13841_v29 = vpop.f32.mrf.mxu0 }
 0x9da   : > { %13910 = vmatmul.mubr.msk.bf16.vlgmr.msra.gmra.mxu1 %vm1531_vm0, %v6016_v21  ;;  %v5888_v45 = vpop.f32.mrf.mxu0 }
 0x9db   : > { %13913 = vmatprep.mubr.msk.bf16.mxu1 %vm1531_vm0, %v6017_v36  ;;  %13918 = vmatpush3.bf16.msra.mxu1 %v14819_v48 }
 0x9dc   : > { %v13842_v50 = vpop.f32.mrf.mxu0  ;;  %13927 = vmatprep.subr.bf16.mxu1 %v14820_v30 }
 0x9dd   : > { %v6022_v35 = vpack.c.bf16 %v13842_v50, %v13841_v29 }
 0x9de   : > { %v5891_v0 = vpop.f32.mrf.mxu0 }
 0x9df   : > { %v6021_v46 = vpack.c.bf16 %v5891_v0, %v5888_v45 }
 0x9e0   : > { %v13845_v39 = vpop.f32.mrf.mxu0 }
 0x9e2   : > { %13914 = vmatmul.mubr.msk.bf16.gmra.mxu1 %vm1531_vm0, %v6018_v38  ;;  %v5904_v52 = vpop.f32.mrf.mxu0 }
 0x9e3   : > { %13919 = vmatprep.mubr.msk.bf16.mxu1 %vm1531_vm0, %v6019_v31 }
 0x9e4   : > { %v13846_v53 = vpop.f32.mrf.mxu0 }
 0x9e5   : > { %v6024_v44 = vpack.c.bf16 %v13846_v53, %v13845_v39  ;;  %v14823_v53 = vld [vmem:[%s18602_s16] sm:$0xff]  }
 0x9e6   : > { %v5907_v40 = vpop.f32.mrf.mxu0  ;;  %13965 = vmatprep.mubr.msk.bf16.mxu0 %vm2433_vm2, %v14823_v53 }
 0x9e7   : > { %v6023_v56 = vpack.c.bf16 %v5907_v40, %v5904_v52 }
 0x9e8   : > { %v13849_v47 = vpop.f32.mrf.mxu0 }
 0x9ea   : > { %13920 = vmatmul.mubr.msk.bf16.vlgmr.msra.gmra.mxu1 %vm1531_vm0, %v6020_v16  ;;  %v5920_v54 = vpop.f32.mrf.mxu0 }
 0x9eb   : > { %13923 = vmatprep.mubr.msk.bf16.mxu1 %vm1531_vm0, %v6021_v46  ;;  %13928 = vmatpush3.bf16.msra.mxu1 %v14820_v30 }
 0x9ec   : > { %v13850_v51 = vpop.f32.mrf.mxu0  ;;  %13937 = vmatprep.subr.bf16.mxu1 %v14821_v27 }
 0x9ed   : > { %v6026_v6 = vpack.c.bf16 %v13850_v51, %v13849_v47 }
 0x9ee   : > { %v5923_v55 = vpop.f32.mrf.mxu0 }
 0x9ef   : > { %v6025_v42 = vpack.c.bf16 %v5923_v55, %v5920_v54 }
 0x9f0   : > { %v13853_v60 = vpop.f32.mrf.mxu0 }
 0x9f2   : > { %13924 = vmatmul.mubr.msk.bf16.gmra.mxu1 %vm1531_vm0, %v6022_v35  ;;  %v5936_v61 = vpop.f32.mrf.mxu0 }
 0x9f3   : > { %13929 = vmatprep.mubr.msk.bf16.mxu1 %vm1531_vm0, %v6023_v56 }
 0x9f4   : > { %v13854_v24 = vpop.f32.mrf.mxu0 }
 0x9f5   : > { %v6028_v15 = vpack.c.bf16 %v13854_v24, %v13853_v60 }
 0x9f6   : > { %v5939_v33 = vpop.f32.mrf.mxu0 }
 0x9f7   : > { %v6027_v4 = vpack.c.bf16 %v5939_v33, %v5936_v61 }
 0x9f8   : > { %v13857_v58 = vpop.f32.mrf.mxu0 }
 0x9fa   : > { %13930 = vmatmul.mubr.msk.bf16.vlgmr.msra.gmra.mxu1 %vm1531_vm0, %v6024_v44  ;;  %v5952_v62 = vpop.f32.mrf.mxu0 }
 0x9fb   : > { %13933 = vmatprep.mubr.msk.bf16.mxu1 %vm1531_vm0, %v6025_v42  ;;  %13938 = vmatpush3.bf16.msra.mxu1 %v14821_v27 }
 0x9fc   : > { %v13858_v63 = vpop.f32.mrf.mxu0  ;;  %13947 = vmatprep.subr.bf16.mxu1 %v14822_v59 }
 0x9fd   : > { %v6030_v32 = vpack.c.bf16 %v13858_v63, %v13857_v58 }
 0x9fe   : > { %v5955_v1 = vpop.f32.mrf.mxu0 }
 0x9ff   : > { %v6029_v14 = vpack.c.bf16 %v5955_v1, %v5952_v62 }
 0xa00   : > { %v13861_v9 = vpop.f32.mrf.mxu0 }
 0xa02   : > { %13934 = vmatmul.mubr.msk.bf16.gmra.mxu1 %vm1531_vm0, %v6026_v6  ;;  %v5968_v10 = vpop.f32.mrf.mxu0 }
 0xa03   : > { %13939 = vmatprep.mubr.msk.bf16.mxu1 %vm1531_vm0, %v6027_v4 }
 0xa04   : > { %v13862_v11 = vpop.f32.mrf.mxu0 }
 0xa05   : > { %v6032_v17 = vpack.c.bf16 %v13862_v11, %v13861_v9 }
 0xa06   : > { %v5971_v12 = vpop.f32.mrf.mxu0 }
 0xa07   : > { %v6031_v26 = vpack.c.bf16 %v5971_v12, %v5968_v10 }
 0xa08   : > { %v13865_v22 = vpop.f32.mrf.mxu0 }
 0xa0a   : > { %13940 = vmatmul.mubr.msk.bf16.vlgmr.msra.gmra.mxu1 %vm1531_vm0, %v6028_v15  ;;  %v5984_v23 = vpop.f32.mrf.mxu0 }
 0xa0b   : > { %13943 = vmatprep.mubr.msk.bf16.mxu1 %vm1531_vm0, %v6029_v14  ;;  %13948 = vmatpush3.bf16.msra.mxu1 %v14822_v59 }
 0xa0c   : > { %v13866_v13 = vpop.f32.mrf.mxu0 }
 0xa0d   : > { %v6034_v34 = vpack.c.bf16 %v13866_v13, %v13865_v22 }
 0xa0e   : > { %v5987_v37 = vpop.f32.mrf.mxu0 }
 0xa0f   : > { %v6033_v2 = vpack.c.bf16 %v5987_v37, %v5984_v23 }
 0xa12   : > { %13944 = vmatmul.mubr.msk.bf16.gmra.mxu1 %vm1531_vm0, %v6030_v32 }
 0xa13   : > { %13949 = vmatprep.mubr.msk.bf16.mxu1 %vm1531_vm0, %v6031_v26 }
 0xa1a   : > { %13950 = vmatmul.mubr.msk.bf16.vlgmr.msra.gmra.mxu1 %vm1531_vm0, %v6032_v17 }
 0xa1b   : > { %13953 = vmatprep.mubr.msk.bf16.mxu1 %vm1531_vm0, %v6033_v2 }
 0xa22   : > { %13954 = vmatmul.mubr.msk.bf16.gmra.mxu1 %vm1531_vm0, %v6034_v34 }
 0xa5a   : > { %v13871_v41 = vpop.f32.mrf.mxu1 }
 0xa5c   : > { %v6091_v57 = vpop.f32.mrf.mxu1 }
 0xa5e   : > { %v13872_v28 = vpop.f32.mrf.mxu1 }
 0xa60   : > { %v16143_v43 = vpop.f32.mrf.mxu1 }
 0xa62   : > { %v13875_v48 = vpop.f32.mrf.mxu1 }
 0xa64   : > { %v6107_v3 = vpop.f32.mrf.mxu1 }
 0xa66   : > { %v13876_v25 = vpop.f32.mrf.mxu1 }
 0xa68   : > { %v16145_v8 = vpop.f32.mrf.mxu1 }
 0xa6a   : > { %v13881_v5 = vpop.f32.mrf.mxu1 }
 0xa6b   : > { %v6183_v18 = vadd.f32 %v13881_v5, %v13871_v41 }
 0xa6c   : > { %v6174_v7 = vpop.f32.mrf.mxu1 }
 0xa6d   : > { %v6175_v19 = vadd.f32 %v6174_v7, %v6091_v57 }
 0xa6e   : > { %v13882_v49 = vpop.f32.mrf.mxu1 }
 0xa6f   : > { %v6186_v20 = vadd.f32 %v13882_v49, %v13872_v28 }
 0xa70   : > { %v16147_v36 = vpop.f32.mrf.mxu1 }
 0xa72   : > { %v13885_v21 = vpop.f32.mrf.mxu1 }
 0xa73   : > { %v6199_v29 = vadd.f32 %v13885_v21, %v13875_v48 }
 0xa74   : > { %v6190_v30 = vpop.f32.mrf.mxu1 }
 0xa75   : > { %v6191_v45 = vadd.f32 %v6190_v30, %v6107_v3 }
 0xa76   : > { %v13886_v50 = vpop.f32.mrf.mxu1 }
 0xa77   : > { %v6202_v0 = vadd.f32 %v13886_v50, %v13876_v25 }
 0xa78   : > { %v16149_v31 = vpop.f32.mrf.mxu1 }
 0xa7a   : > { %v13891_v38 = vpop.f32.mrf.mxu1 }
 0xa7b   : > { %v6292_v39 = vadd.f32 %v13891_v38, %v6183_v18 }
 0xa7c   : > { %v6259_v52 = vpop.f32.mrf.mxu1 }
 0xa7d   : > { %v6290_v40 = vadd.f32 %v6259_v52, %v6175_v19 }
 0xa7e   : > { %v13892_v46 = vpop.f32.mrf.mxu1 }
 0xa7f   : > { %v6293_v16 = vadd.f32 %v13892_v46, %v6186_v20 }
 0xa80   : > { %v16155_v47 = vpop.f32.mrf.mxu1 }
 0xa82   : > { %v13895_v27 = vpop.f32.mrf.mxu1 }
 0xa83   : > { %v6296_v54 = vadd.f32 %v13895_v27, %v6199_v29 }
 0xa84   : > { %v6275_v51 = vpop.f32.mrf.mxu1 }
 0xa85   : > { %v6294_v55 = vadd.f32 %v6275_v51, %v6191_v45 }
 0xa86   : > { %v13896_v56 = vpop.f32.mrf.mxu1 }
 0xa87   : > { %v6297_v35 = vadd.f32 %v13896_v56, %v6202_v0 }
 0xa88   : > { %v6278_v60 = vpop.f32.mrf.mxu1 }
 0xa8a   : > { %v13901_v61 = vpop.f32.mrf.mxu1 }
 0xa8b   : > { %v6385_v24 = vadd.f32 %v13901_v61, %v6292_v39  ;;  %v6178_v61 = vadd.f32 %v16147_v36, %v16143_v43 }
 0xa8c   : > { %v6352_v33 = vpop.f32.mrf.mxu1 }
 0xa8d   : > { %v6383_v42 = vadd.f32 %v6352_v33, %v6290_v40  ;;  %v12365_v33 = vld [vmem:[%s18601_s15] ss:$0 sm:$0xff] }
 0xa8e   : > { %v13902_v44 = vpop.f32.mrf.mxu1 }
 0xa8f   : > { %v6386_v58 = vadd.f32 %v13902_v44, %v6293_v16 }
 0xa90   : > { %v16157_v59 = vpop.f32.mrf.mxu1 }
 0xa92   : > { %v13905_v62 = vpop.f32.mrf.mxu1 }
 0xa93   : > { %v6389_v63 = vadd.f32 %v13905_v62, %v6296_v54  ;;  %v6194_v54 = vadd.f32 %v16149_v31, %v16145_v8 }
 0xa94   : > { %v6368_v1 = vpop.f32.mrf.mxu1 }
 0xa95   : > { %v6387_v4 = vadd.f32 %v6368_v1, %v6294_v55  ;;  %v6291_v1 = vadd.f32 %v16155_v47, %v6178_v61  ;;  %v14825_v61 = vld [vmem:[%s18602_s16 + $0x10] sm:$0xff]  }
 0xa96   : > { %v13906_v6 = vpop.f32.mrf.mxu1 }
 0xa97   : > { %v6390_v9 = vadd.f32 %v13906_v6, %v6297_v35  ;;  %v6384_v43 = vadd.f32 %v16157_v59, %v6291_v1  ;;  %v14832_v1 = vld [vmem:[%s18602_s16 + $0x48] sm:$0xff]  }
 0xa98   : > { %v6371_v10 = vpop.f32.mrf.mxu1 }
 0xa9a   : > { %v13911_v11 = vpop.f32.mrf.mxu1 }
 0xa9b   : > { %v6478_v12 = vadd.f32 %v13911_v11, %v6385_v24  ;;  %v6295_v24 = vadd.f32 %v6278_v60, %v6194_v54 }
 0xa9c   : > { %v6445_v14 = vpop.f32.mrf.mxu1 }
 0xa9d   : > { %v16159_v15 = vadd.f32 %v6445_v14, %v6383_v42  ;;  %v6388_v6 = vadd.f32 %v6371_v10, %v6295_v24  ;;  %v14826_v24 = vld [vmem:[%s18602_s16 + $0x18] sm:$0xff]  }
 0xa9e   : > { %v13912_v22 = vpop.f32.mrf.mxu1 }
 0xa9f   : > { %v6479_v23 = vadd.f32 %v13912_v22, %v6386_v58 }
 0xaa0   : > { %v6448_v26 = vpop.f32.mrf.mxu1 }
 0xaa2   : > { %v13915_v32 = vpop.f32.mrf.mxu1 }
 0xaa3   : > { %v6482_v55 = vadd.f32 %v13915_v32, %v6389_v63 }
 0xaa4   : > { %v6461_v13 = vpop.f32.mrf.mxu1 }
 0xaa5   : > { %v6480_v44 = vadd.f32 %v6461_v13, %v6387_v4  ;;  %v6477_v4 = vadd.f32 %v6448_v26, %v6384_v43  ;;  %v14840_v43 = vld [vmem:[%s18602_s16 + $0x88] sm:$0xff]  }
 0xaa6   : > { %v13916_v37 = vpop.f32.mrf.mxu1 }
 0xaa7   : > { %v6483_v8 = vadd.f32 %v13916_v37, %v6390_v9 }
 0xaa8   : > { %v6464_v2 = vpop.f32.mrf.mxu1 }
 0xaa9   : > { %v6481_v36 = vadd.f32 %v6464_v2, %v6388_v6  ;;  %v14833_v6 = vld [vmem:[%s18602_s16 + $0x50] sm:$0xff]  }
 0xaaa   : > { %v13921_v17 = vpop.f32.mrf.mxu1 }
 0xaab   : > { %v6571_v52 = vadd.f32 %v13921_v17, %v6478_v12 }
 0xaac   : > { %v16161_v34 = vpop.f32.mrf.mxu1 }
 0xaad   : > { %v6569_v2 = vadd.f32 %v16161_v34, %v16159_v15 }
 0xaae   : > { %v13922_v41 = vpop.f32.mrf.mxu1 }
 0xaaf   : > { %v6572_v16 = vadd.f32 %v13922_v41, %v6479_v23 }
 0xab0   : > { %v6541_v57 = vpop.f32.mrf.mxu1 }
 0xab2   : > { %v13925_v28 = vpop.f32.mrf.mxu1 }
 0xab3   : > { %v6575_v58 = vadd.f32 %v13925_v28, %v6482_v55 }
 0xab4   : > { %v6554_v48 = vpop.f32.mrf.mxu1 }
 0xab5   : > { %v6573_v63 = vadd.f32 %v6554_v48, %v6480_v44  ;;  %v6570_v48 = vadd.f32 %v6541_v57, %v6477_v4  ;;  %v14829_v44 = vld [vmem:[%s18602_s16 + $0x30] sm:$0xff]   ;;  %v14847_v4 = vld [vmem:[%s18602_s16 + $0xc0] sm:$0xff]  }
 0xab6   : > { %v13926_v3 = vpop.f32.mrf.mxu1 }
 0xab7   : > { %v6576_v60 = vadd.f32 %v13926_v3, %v6483_v8  ;;  %v14834_v8 = vld [vmem:[%s18602_s16 + $0x58] sm:$0xff]  }
 0xab8   : > { %v6557_v25 = vpop.f32.mrf.mxu1 }
 0xab9   : > { %v6574_v13 = vadd.f32 %v6557_v25, %v6481_v36  ;;  %v14841_v36 = vld [vmem:[%s18602_s16 + $0x90] sm:$0xff]  }
 0xaba   : > { %v13931_v5 = vpop.f32.mrf.mxu1 }
 0xabb   : > { %v6664_v40 = vadd.f32 %v13931_v5, %v6571_v52 }
 0xabc   : > { %v16163_v18 = vpop.f32.mrf.mxu1 }
 0xabe   : > { %v13932_v7 = vpop.f32.mrf.mxu1 }
 0xabf   : > { %v6665_v56 = vadd.f32 %v13932_v7, %v6572_v16 }
 0xac0   : > { %v6634_v19 = vpop.f32.mrf.mxu1 }
 0xac2   : > { %v13935_v49 = vpop.f32.mrf.mxu1 }
 0xac3   : > { %v6668_v11 = vadd.f32 %v13935_v49, %v6575_v58  ;;  %v14830_v58 = vld [vmem:[%s18602_s16 + $0x38] sm:$0xff]  }
 0xac4   : > { %v6647_v20 = vpop.f32.mrf.mxu1 }
 0xac5   : > { %v6666_v23 = vadd.f32 %v6647_v20, %v6573_v63  ;;  %v6663_v20 = vadd.f32 %v6634_v19, %v6570_v48  ;;  %v14836_v63 = vld [vmem:[%s18602_s16 + $0x68] sm:$0xff]   ;;  %v14855_v48 = vld [vmem:[%s18602_s16 + $0x100] sm:$0xff]  }
 0xac6   : > { %v13936_v21 = vpop.f32.mrf.mxu1 }
 0xac7   : > { %v6669_v41 = vadd.f32 %v13936_v21, %v6576_v60  ;;  %v6662_v21 = vadd.f32 %v16163_v18, %v6569_v2  ;;  %v14842_v60 = vld [vmem:[%s18602_s16 + $0x98] sm:$0xff]   ;;  %v14860_v2 = vld [vmem:[%s18602_s16 + $0x128] sm:$0xff]  }
 0xac8   : > { %v6650_v29 = vpop.f32.mrf.mxu1 }
 0xac9   : > { %v6667_v7 = vadd.f32 %v6650_v29, %v6574_v13  ;;  %v14848_v13 = vld [vmem:[%s18602_s16 + $0xc8] sm:$0xff]  }
 0xaca   : > { %v13941_v30 = vpop.f32.mrf.mxu1 }
 0xacb   : > { %v6757_v27 = vadd.f32 %v13941_v30, %v6664_v40 }
 0xacc   : > { %v16165_v45 = vpop.f32.mrf.mxu1 }
 0xacd   : > { %v6755_v29 = vadd.f32 %v16165_v45, %v6662_v21  ;;  %v14824_v45 = vld [vmem:[%s18602_s16 + $0x8] sm:$0xff]   ;;  %v14866_v21 = vld [vmem:[%s18602_s16 + $0x158] sm:$0xff]  }
 0xace   : > { %v13942_v50 = vpop.f32.mrf.mxu1 }
 0xacf   : > { %v6758_v62 = vadd.f32 %v13942_v50, %v6665_v56 }
 0xad0   : > { %v6727_v0 = vpop.f32.mrf.mxu1 }
 0xad2   : > { %v13945_v38 = vpop.f32.mrf.mxu1 }
 0xad3   : > { %v6761_v32 = vadd.f32 %v13945_v38, %v6668_v11  ;;  %v14837_v11 = vld [vmem:[%s18602_s16 + $0x70] sm:$0xff]  }
 0xad4   : > { %v6740_v39 = vpop.f32.mrf.mxu1 }
 0xad5   : > { %v6759_v47 = vadd.f32 %v6740_v39, %v6666_v23  ;;  %v6756_v39 = vadd.f32 %v6727_v0, %v6663_v20  ;;  %v14844_v23 = vld [vmem:[%s18602_s16 + $0xa8] sm:$0xff]   ;;  %v14862_v20 = vld [vmem:[%s18602_s16 + $0x138] sm:$0xff]  }
 0xad6   : > { %v13946_v53 = vpop.f32.mrf.mxu1 }
 0xad7   : > { %v6762_v49 = vadd.f32 %v13946_v53, %v6669_v41  ;;  %v14849_v41 = vld [vmem:[%s18602_s16 + $0xd0] sm:$0xff]  }
 0xad8   : > { %v6743_v46 = vpop.f32.mrf.mxu1 }
 0xad9   : > { %v6760_v50 = vadd.f32 %v6743_v46, %v6667_v7  ;;  %v14857_v7 = vld [vmem:[%s18602_s16 + $0x110] sm:$0xff]  }
 0xada   : > { %v13951_v51 = vpop.f32.mrf.mxu1 }
 0xadb   : > { %v6850_v35 = vadd.f32 %v13951_v51, %v6757_v27 }
 0xadc   : > { %v6817_v42 = vpop.f32.mrf.mxu1 }
 0xadd   : > { %v6865_v12 = vadd.f32 %v12365_v33, %v6850_v35  ;;  %v6848_v51 = vadd.f32 %v6817_v42, %v6755_v29  ;;  %v14828_v42 = vld [vmem:[%s18602_s16 + $0x28] sm:$0xff]  }
 0xade   : > { %v13952_v31 = vpop.f32.mrf.mxu1  ;;  %v14872_v29 = vld [vmem:[%s18602_s16 + $0x188] sm:$0xff]  }
 0xadf   : > { %v6851_v14 = vadd.f32 %v13952_v31, %v6758_v62  ;;  %v6873_v10 = vmax.f32 %v6865_v12, 0.0  ;;  %v6863_v18 = vadd.f32 %v12365_v33, %v6848_v51  ;;  %v14831_v62 = vld [vmem:[%s18602_s16 + $0x40] sm:$0xff]   ;;  %v14838_v12 = vld [vmem:[%s18602_s16 + $0x78] sm:$0xff]  }
 0xae0   : > { %v6820_v22 = vpop.f32.mrf.mxu1  ;;  %v14835_v31 = vld [vmem:[%s18602_s16 + $0x60] sm:$0xff]  }
 0xae1   : > { %v6866_v17 = vadd.f32 %v12365_v33, %v6851_v14  ;;  %v6849_v53 = vadd.f32 %v6820_v22, %v6756_v39  ;;  %v6871_v56 = vmax.f32 %v6863_v18, 0.0  ;;  %v14839_v14 = vld [vmem:[%s18602_s16 + $0x80] sm:$0xff]   ;;  %v14868_v39 = vld [vmem:[%s18602_s16 + $0x168] sm:$0xff]  }
 0xae2   : > { %v13955_v28 = vpop.f32.mrf.mxu1  ;;  %v14843_v22 = vld [vmem:[%s18602_s16 + $0xa0] sm:$0xff]  }
 0xae3   : > { %v6874_v9 = vmax.f32 %v6866_v17, 0.0  ;;  %v6854_v37 = vadd.f32 %v13955_v28, %v6761_v32  ;;  %v6864_v46 = vadd.f32 %v12365_v33, %v6849_v53  ;;  %v14845_v32 = vld [vmem:[%s18602_s16 + $0xb0] sm:$0xff]   ;;  %v14846_v17 = vld [vmem:[%s18602_s16 + $0xb8] sm:$0xff]  }
 0xae4   : > { %v6833_v5 = vpop.f32.mrf.mxu1  ;;  %v14850_v28 = vld [vmem:[%s18602_s16 + $0xd8] sm:$0xff]   ;;  %v14874_v53 = vld [vmem:[%s18602_s16 + $0x190] sm:$0xff]  }
 0xae5   : > { %v6852_v30 = vadd.f32 %v6833_v5, %v6759_v47  ;;  %v6880_v59 = vpack.c.bf16 %v6874_v9, %v6873_v10  ;;  %v6869_v26 = vadd.f32 %v12365_v33, %v6854_v37  ;;  %v6872_v0 = vmax.f32 %v6864_v46, 0.0  ;;  %v14851_v47 = vld [vmem:[%s18602_s16 + $0xe0] sm:$0xff]   ;;  %v14852_v10 = vld [vmem:[%s18602_s16 + $0xe8] sm:$0xff]   ;;  %v14853_v9 = vld [vmem:[%s18602_s16 + $0xf0] sm:$0xff]  }
 0xae6   : > { %v13956_v3 = vpop.f32.mrf.mxu1  ;;  %v14854_v37 = vld [vmem:[%s18602_s16 + $0xf8] sm:$0xff]   ;;  %v14856_v5 = vld [vmem:[%s18602_s16 + $0x108] sm:$0xff]  }
 0xae7   : > { %v6855_v25 = vadd.f32 %v13956_v3, %v6762_v49  ;;  %v6867_v52 = vadd.f32 %v12365_v33, %v6852_v30  ;;  %v6877_v16 = vmax.f32 %v6869_v26, 0.0  ;;  %v6879_v35 = vpack.c.bf16 %v6872_v0, %v6871_v56  ;;  %v14858_v49 = vld [vmem:[%s18602_s16 + $0x118] sm:$0xff]   ;;  %v14873_v30 = vld [vmem:[%s18603_s17 + $0x8] sm:$0xff]   ;;  %v14861_v3 = vld [vmem:[%s18602_s16 + $0x130] sm:$0xff]  }
 0xae8   : > { %v6836_v38 = vpop.f32.mrf.mxu1  ;;  %14253 = vmatprep.subr.bf16.mxu1 %v14873_v30  ;;  %v14864_v26 = vld [vmem:[%s18602_s16 + $0x148] sm:$0xff]  }
 0xae9   : > { %v6870_v40 = vadd.f32 %v12365_v33, %v6855_v25  ;;  %v6853_v57 = vadd.f32 %v6836_v38, %v6760_v50  ;;  %v6875_v15 = vmax.f32 %v6867_v52, 0.0  ;;  %14254 = vmatpush3.bf16.msra.mxu1 %v14873_v30  ;;  %v14863_v50 = vld [vmem:[%s18602_s16 + $0x140] sm:$0xff]   ;;  %v14865_v25 = vld [vmem:[%s18602_s16 + $0x150] sm:$0xff]  }
 0xaea   : > { %v14867_v38 = vld [vmem:[%s18602_s16 + $0x160] sm:$0xff]   ;;  %v14869_v52 = vld [vmem:[%s18602_s16 + $0x170] sm:$0xff]  }
 0xaeb   : > { %v6878_v27 = vmax.f32 %v6870_v40, 0.0  ;;  %v6868_v54 = vadd.f32 %v12365_v33, %v6853_v57  ;;  %v14827_v33 = vld [vmem:[%s18602_s16 + $0x20] sm:$0xff]   ;;  %v14870_v40 = vld [vmem:[%s18602_s16 + $0x178] sm:$0xff]  }
 0xaec   : > { %v14871_v57 = vld [vmem:[%s18602_s16 + $0x180] sm:$0xff]  }
 0xaed   : > { %v6876_v34 = vmax.f32 %v6868_v54, 0.0  ;;  %v6882_v19 = vpack.c.bf16 %v6878_v27, %v6877_v16  ;;  %v16390_v54 = vld [vmem:[%s18603_s17] sm:$0xff]  }
 0xaee   : > { %14287 = vmatprep.subr.bf16.mxu1 %v16390_v54 }
 0xaef   : > { %13957 = vmatprep.subr.bf16.mxu0 %v6882_v19  ;;  %v6881_v55 = vpack.c.bf16 %v6876_v34, %v6875_v15  ;;  %v14875_v15 = vld [vmem:[%s18602_s16 + $0x198] sm:$0xff]  }
 0xaf0   : > { %13958 = vmatpush3.bf16.msra.mxu0 %v6882_v19  ;;  %v14876_v19 = vld [vmem:[%s18602_s16 + $0x1a0] sm:$0xff]  }
 0xaf1   : > { %13959 = vmatprep.subr.bf16.mxu0 %v6881_v55 }
 0xaf4   : > { %13960 = vmatpush3.bf16.msra.mxu0 %v6881_v55 }
 0xaf5   : > { %13961 = vmatprep.subr.bf16.mxu0 %v6880_v59 }
 0xaf8   : > { %13962 = vmatpush3.bf16.msra.mxu0 %v6880_v59  ;;  %v14859_v59 = vld [vmem:[%s18602_s16 + $0x120] sm:$0xff]  }
 0xaf9   : > { %13963 = vmatprep.subr.bf16.mxu0 %v6879_v35 }
 0xafc   : > { %13964 = vmatpush3.bf16.msra.mxu0 %v6879_v35  ;;  %v14877_v35 = vld [vmem:[%s18602_s16 + $0x1a8] sm:$0xff]  }
 0xaff   : > { %13966 = vmatmul.mubr.msk.bf16.vlgmr.msra.gmra.mxu0 %vm2433_vm2, %v14824_v45 }
 0xb00   : > { %13969 = vmatprep.mubr.msk.bf16.mxu0 %vm2433_vm2, %v14825_v61  ;;  %v14878_v61 = vld [vmem:[%s18602_s16 + $0x1b0] sm:$0xff]  }
 0xb07   : > { %13970 = vmatmul.mubr.msk.bf16.gmra.mxu0 %vm2433_vm2, %v14826_v24 }
 0xb08   : > { %13973 = vmatprep.mubr.msk.bf16.mxu0 %vm2433_vm2, %v14827_v33 }
 0xb0f   : > { %13974 = vmatmul.mubr.msk.bf16.gmra.mxu0 %vm2433_vm2, %v14828_v42 }
 0xb10   : > { %13977 = vmatprep.mubr.msk.bf16.mxu0 %vm2433_vm2, %v14829_v44 }
 0xb17   : > { %13978 = vmatmul.mubr.msk.bf16.gmra.mxu0 %vm2433_vm2, %v14830_v58 }
 0xb18   : > { %13981 = vmatprep.mubr.msk.bf16.mxu0 %vm2433_vm2, %v14831_v62  ;;  %v14879_v62 = vld [vmem:[%s18602_s16 + $0x1b8] sm:$0xff]  }
 0xb1f   : > { %13982 = vmatmul.mubr.msk.bf16.gmra.mxu0 %vm2433_vm2, %v14832_v1 }
 0xb20   : > { %13985 = vmatprep.mubr.msk.bf16.mxu0 %vm2433_vm2, %v14833_v6  ;;  %v14880_v6 = vld [vmem:[%s18602_s16 + $0x1c0] sm:$0xff]  }
 0xb27   : > { %13986 = vmatmul.mubr.msk.bf16.gmra.mxu0 %vm2433_vm2, %v14834_v8 }
 0xb28   : > { %13989 = vmatprep.mubr.msk.bf16.mxu0 %vm2433_vm2, %v14835_v31 }
 0xb2f   : > { %13990 = vmatmul.mubr.msk.bf16.gmra.mxu0 %vm2433_vm2, %v14836_v63 }
 0xb30   : > { %13993 = vmatprep.mubr.msk.bf16.mxu0 %vm2433_vm2, %v14837_v11 }
 0xb37   : > { %13994 = vmatmul.mubr.msk.bf16.gmra.mxu0 %vm2433_vm2, %v14838_v12 }
 0xb38   : > { %13997 = vmatprep.mubr.msk.bf16.mxu0 %vm2433_vm2, %v14839_v14  ;;  %v14881_v14 = vld [vmem:[%s18602_s16 + $0x1c8] sm:$0xff]  }
 0xb3f   : > { %13998 = vmatmul.mubr.msk.bf16.gmra.mxu0 %vm2433_vm2, %v14840_v43 }
 0xb40   : > { %14001 = vmatprep.mubr.msk.bf16.mxu0 %vm2433_vm2, %v14841_v36  ;;  %v14882_v36 = vld [vmem:[%s18602_s16 + $0x1d0] sm:$0xff]  }
 0xb47   : > { %14002 = vmatmul.mubr.msk.bf16.gmra.mxu0 %vm2433_vm2, %v14842_v60 }
 0xb48   : > { %14005 = vmatprep.mubr.msk.bf16.mxu0 %vm2433_vm2, %v14843_v22 }
 0xb4f   : > { %14006 = vmatmul.mubr.msk.bf16.gmra.mxu0 %vm2433_vm2, %v14844_v23 }
 0xb50   : > { %14009 = vmatprep.mubr.msk.bf16.mxu0 %vm2433_vm2, %v14845_v32 }
 0xb57   : > { %14010 = vmatmul.mubr.msk.bf16.gmra.mxu0 %vm2433_vm2, %v14846_v17 }
 0xb58   : > { %14013 = vmatprep.mubr.msk.bf16.mxu0 %vm2433_vm2, %v14847_v4  ;;  %v14883_v4 = vld [vmem:[%s18602_s16 + $0x1d8] sm:$0xff]  }
 0xb5f   : > { %14014 = vmatmul.mubr.msk.bf16.gmra.mxu0 %vm2433_vm2, %v14848_v13 }
 0xb60   : > { %14017 = vmatprep.mubr.msk.bf16.mxu0 %vm2433_vm2, %v14849_v41  ;;  %v14884_v41 = vld [vmem:[%s18602_s16 + $0x1e0] sm:$0xff]  }
 0xb67   : > { %14018 = vmatmul.mubr.msk.bf16.gmra.mxu0 %vm2433_vm2, %v14850_v28 }
 0xb68   : > { %14021 = vmatprep.mubr.msk.bf16.mxu0 %vm2433_vm2, %v14851_v47 }
 0xb6f   : > { %14022 = vmatmul.mubr.msk.bf16.gmra.mxu0 %vm2433_vm2, %v14852_v10 }
 0xb70   : > { %14025 = vmatprep.mubr.msk.bf16.mxu0 %vm2433_vm2, %v14853_v9 }
 0xb77   : > { %14026 = vmatmul.mubr.msk.bf16.gmra.mxu0 %vm2433_vm2, %v14854_v37 }
 0xb78   : > { %14029 = vmatprep.mubr.msk.bf16.mxu0 %vm2433_vm2, %v14855_v48  ;;  %v14885_v48 = vld [vmem:[%s18602_s16 + $0x1e8] sm:$0xff]  }
 0xb7f   : > { %14030 = vmatmul.mubr.msk.bf16.gmra.mxu0 %vm2433_vm2, %v14856_v5 }
 0xb80   : > { %14033 = vmatprep.mubr.msk.bf16.mxu0 %vm2433_vm2, %v14857_v7  ;;  %v14886_v7 = vld [vmem:[%s18602_s16 + $0x1f0] sm:$0xff]  }
 0xb87   : > { %14034 = vmatmul.mubr.msk.bf16.gmra.mxu0 %vm2433_vm2, %v14858_v49 }
 0xb88   : > { %14037 = vmatprep.mubr.msk.bf16.mxu0 %vm2433_vm2, %v14859_v59 }
 0xb8f   : > { %14038 = vmatmul.mubr.msk.bf16.gmra.mxu0 %vm2433_vm2, %v14860_v2 }
 0xb90   : > { %14041 = vmatprep.mubr.msk.bf16.mxu0 %vm2433_vm2, %v14861_v3 }
 0xb97   : > { %14042 = vmatmul.mubr.msk.bf16.gmra.mxu0 %vm2433_vm2, %v14862_v20  ;;  %v14887_v20 = vld [vmem:[%s18602_s16 + $0x1f8] sm:$0xff]  }
 0xb98   : > { %14045 = vmatprep.mubr.msk.bf16.mxu0 %vm2433_vm2, %v14863_v50 }
 0xb9f   : > { %14046 = vmatmul.mubr.msk.bf16.gmra.mxu0 %vm2433_vm2, %v14864_v26  ;;  %v14888_v26 = vld [vmem:[%s18602_s16 + $0x200] sm:$0xff]  }
 0xba0   : > { %14049 = vmatprep.mubr.msk.bf16.mxu0 %vm2433_vm2, %v14865_v25 }
 0xba7   : > { %14050 = vmatmul.mubr.msk.bf16.gmra.mxu0 %vm2433_vm2, %v14866_v21 }
 0xba8   : > { %14053 = vmatprep.mubr.msk.bf16.mxu0 %vm2433_vm2, %v14867_v38 }
 0xbaf   : > { %14054 = vmatmul.mubr.msk.bf16.gmra.mxu0 %vm2433_vm2, %v14868_v39 }
 0xbb0   : > { %14057 = vmatprep.mubr.msk.bf16.mxu0 %vm2433_vm2, %v14869_v52 }
 0xbb7   : > { %14058 = vmatmul.mubr.msk.bf16.gmra.mxu0 %vm2433_vm2, %v14870_v40  ;;  %v14889_v40 = vld [vmem:[%s18602_s16 + $0x208] sm:$0xff]  }
 0xbb8   : > { %14061 = vmatprep.mubr.msk.bf16.mxu0 %vm2433_vm2, %v14871_v57 }
 0xbbf   : > { %v16381_v16 = vpop.f32.mrf.mxu0  ;;  %14062 = vmatmul.mubr.msk.bf16.gmra.mxu0 %vm2433_vm2, %v14872_v29  ;;  %v14891_v29 = vld [vmem:[%s18602_s16 + $0x210] sm:$0xff]  }
 0xbc0   : > { %14065 = vmatprep.mubr.msk.bf16.mxu0 %vm2433_vm2, %v14874_v53 }
 0xbc1   : > { %v16385_v27 = vpop.f32.mrf.mxu0 }
 0xbc3   : > { %v16392_v51 = vpop.f32.mrf.mxu0 }
 0xbc4   : > { %v9509_v34 = vpack.c.bf16 %v16392_v51, %v16381_v16  ;;  %v14912_v16 = vld [vmem:[%s18602_s16 + $0x2b0] sm:$0xff]  }
 0xbc5   : > { %v16403_v46 = vpop.f32.mrf.mxu0 }
 0xbc6   : > { %v9508_v55 = vpack.c.bf16 %v16403_v46, %v16385_v27  ;;  %v16660_v27 = vld [vmem:[%s18603_s17 + $0x18] sm:$0xff]  }
 0xbc7   : > { %v16407_v18 = vpop.f32.mrf.mxu0  ;;  %14066 = vmatmul.mubr.msk.bf16.gmra.mxu0 %vm2433_vm2, %v14875_v15 }
 0xbc8   : > { %14069 = vmatprep.mubr.msk.bf16.mxu0 %vm2433_vm2, %v14876_v19 }
 0xbc9   : > { %v16411_v0 = vpop.f32.mrf.mxu0 }
 0xbcb   : > { %v16413_v56 = vpop.f32.mrf.mxu0 }
 0xbcc   : > { %v9511_v45 = vpack.c.bf16 %v16413_v56, %v16407_v18 }
 0xbcd   : > { %v16423_v24 = vpop.f32.mrf.mxu0 }
 0xbce   : > { %v9510_v33 = vpack.c.bf16 %v16423_v24, %v16411_v0 }
 0xbcf   : > { %v16427_v42 = vpop.f32.mrf.mxu0  ;;  %14070 = vmatmul.mubr.msk.bf16.gmra.mxu0 %vm2433_vm2, %v14877_v35 }
 0xbd0   : > { %14073 = vmatprep.mubr.msk.bf16.mxu0 %vm2433_vm2, %v14878_v61 }
 0xbd1   : > { %v16431_v44 = vpop.f32.mrf.mxu0 }
 0xbd3   : > { %v16433_v58 = vpop.f32.mrf.mxu0 }
 0xbd4   : > { %v9513_v1 = vpack.c.bf16 %v16433_v58, %v16427_v42 }
 0xbd5   : > { %v16443_v8 = vpop.f32.mrf.mxu0 }
 0xbd6   : > { %v9512_v31 = vpack.c.bf16 %v16443_v8, %v16431_v44  ;;  %v14915_v8 = vld [vmem:[%s18602_s16 + $0x2c8] sm:$0xff]  }
 0xbd7   : > { %v16447_v63 = vpop.f32.mrf.mxu0  ;;  %14074 = vmatmul.mubr.msk.bf16.gmra.mxu0 %vm2433_vm2, %v14879_v62  ;;  %v14892_v62 = vld [vmem:[%s18602_s16 + $0x218] sm:$0xff]  }
 0xbd8   : > { %14077 = vmatprep.mubr.msk.bf16.mxu0 %vm2433_vm2, %v14880_v6  ;;  %v14893_v6 = vld [vmem:[%s18602_s16 + $0x220] sm:$0xff]  }
 0xbd9   : > { %v16451_v11 = vpop.f32.mrf.mxu0 }
 0xbdb   : > { %v16453_v12 = vpop.f32.mrf.mxu0 }
 0xbdc   : > { %v9515_v43 = vpack.c.bf16 %v16453_v12, %v16447_v63 }
 0xbdd   : > { %v16463_v60 = vpop.f32.mrf.mxu0 }
 0xbde   : > { %v9514_v22 = vpack.c.bf16 %v16463_v60, %v16451_v11  ;;  %v14917_v60 = vld [vmem:[%s18602_s16 + $0x2d8] sm:$0xff]  }
 0xbdf   : > { %v16467_v23 = vpop.f32.mrf.mxu0  ;;  %14078 = vmatmul.mubr.msk.bf16.gmra.mxu0 %vm2433_vm2, %v14881_v14 }
 0xbe0   : > { %14081 = vmatprep.mubr.msk.bf16.mxu0 %vm2433_vm2, %v14882_v36 }
 0xbe1   : > { %v16471_v32 = vpop.f32.mrf.mxu0 }
 0xbe3   : > { %v16473_v17 = vpop.f32.mrf.mxu0 }
 0xbe4   : > { %v9517_v13 = vpack.c.bf16 %v16473_v17, %v16467_v23 }
 0xbe5   : > { %v16483_v28 = vpop.f32.mrf.mxu0 }
 0xbe6   : > { %v9516_v47 = vpack.c.bf16 %v16483_v28, %v16471_v32  ;;  %v14919_v28 = vld [vmem:[%s18602_s16 + $0x2e8] sm:$0xff]  }
 0xbe7   : > { %v16487_v10 = vpop.f32.mrf.mxu0  ;;  %14082 = vmatmul.mubr.msk.bf16.gmra.mxu0 %vm2433_vm2, %v14883_v4 }
 0xbe8   : > { %14085 = vmatprep.mubr.msk.bf16.mxu0 %vm2433_vm2, %v14884_v41 }
 0xbe9   : > { %v16491_v9 = vpop.f32.mrf.mxu0 }
 0xbeb   : > { %v16493_v37 = vpop.f32.mrf.mxu0 }
 0xbec   : > { %v9519_v5 = vpack.c.bf16 %v16493_v37, %v16487_v10 }
 0xbed   : > { %v16503_v49 = vpop.f32.mrf.mxu0 }
 0xbee   : > { %v9518_v30 = vpack.c.bf16 %v16503_v49, %v16491_v9  ;;  %v14921_v49 = vld [vmem:[%s18602_s16 + $0x2f8] sm:$0xff]  }
 0xbef   : > { %v16507_v59 = vpop.f32.mrf.mxu0  ;;  %14086 = vmatmul.mubr.msk.bf16.gmra.mxu0 %vm2433_vm2, %v14885_v48  ;;  %v16559_v48 = vld [vmem:[%s18603_s17 + $0x10] sm:$0xff]  }
 0xbf0   : > { %14089 = vmatprep.mubr.msk.bf16.mxu0 %vm2433_vm2, %v14886_v7 }
 0xbf1   : > { %v16511_v2 = vpop.f32.mrf.mxu0 }
 0xbf3   : > { %v16513_v3 = vpop.f32.mrf.mxu0 }
 0xbf4   : > { %v9521_v50 = vpack.c.bf16 %v16513_v3, %v16507_v59 }
 0xbf5   : > { %v16523_v25 = vpop.f32.mrf.mxu0 }
 0xbf6   : > { %v9520_v21 = vpack.c.bf16 %v16523_v25, %v16511_v2  ;;  %v14923_v25 = vld [vmem:[%s18602_s16 + $0x308] sm:$0xff]  }
 0xbf7   : > { %v16527_v38 = vpop.f32.mrf.mxu0  ;;  %14090 = vmatmul.mubr.msk.bf16.gmra.mxu0 %vm2433_vm2, %v14887_v20 }
 0xbf8   : > { %14093 = vmatprep.mubr.msk.bf16.mxu0 %vm2433_vm2, %v14888_v26  ;;  %v14894_v26 = vld [vmem:[%s18602_s16 + $0x228] sm:$0xff]  }
 0xbf9   : > { %v16531_v39 = vpop.f32.mrf.mxu0 }
 0xbfb   : > { %v16533_v52 = vpop.f32.mrf.mxu0 }
 0xbfc   : > { %v9523_v57 = vpack.c.bf16 %v16533_v52, %v16527_v38 }
 0xbfd   : > { %v16543_v53 = vpop.f32.mrf.mxu0 }
 0xbfe   : > { %v9522_v15 = vpack.c.bf16 %v16543_v53, %v16531_v39 }
 0xbff   : > { %v13999_v19 = vpop.f32.mrf.mxu0  ;;  %14094 = vmatmul.mubr.msk.bf16.gmra.mxu0 %vm2433_vm2, %v14889_v40  ;;  %v14895_v40 = vld [vmem:[%s18602_s16 + $0x230] sm:$0xff]  }
 0xc00   : > { %14097 = vmatprep.mubr.msk.bf16.mxu0 %vm2433_vm2, %v14891_v29 }
 0xc01   : > { %v8485_v35 = vpop.f32.mrf.mxu0 }
 0xc03   : > { %v14000_v61 = vpop.f32.mrf.mxu0 }
 0xc04   : > { %v9525_v4 = vpack.c.bf16 %v14000_v61, %v13999_v19 }
 0xc05   : > { %v8488_v14 = vpop.f32.mrf.mxu0 }
 0xc06   : > { %v9524_v36 = vpack.c.bf16 %v8488_v14, %v8485_v35  ;;  %v14897_v14 = vld [vmem:[%s18602_s16 + $0x240] sm:$0xff]  }
 0xc07   : > { %v14003_v41 = vpop.f32.mrf.mxu0  ;;  %14098 = vmatmul.mubr.msk.bf16.gmra.mxu0 %vm2433_vm2, %v14892_v62 }
 0xc08   : > { %14255 = vmatprep.mubr.msk.bf16.mxu1 %vm1531_vm0, %v9524_v36  ;;  %14101 = vmatprep.mubr.msk.bf16.mxu0 %vm2433_vm2, %v14893_v6  ;;  %v14896_v6 = vld [vmem:[%s18602_s16 + $0x238] sm:$0xff]  }
 0xc09   : > { %v8501_v7 = vpop.f32.mrf.mxu0  ;;  %14256 = vmatmul.mubr.msk.bf16.vlgmr.msra.gmra.mxu1 %vm1531_vm0, %v9525_v4 }
 0xc0a   : > { %14288 = vmatpush3.bf16.msra.mxu1 %v16390_v54 }
 0xc0b   : > { %v14004_v20 = vpop.f32.mrf.mxu0  ;;  %14321 = vmatprep.subr.bf16.mxu1 %v16559_v48 }
 0xc0c   : > { %v9527_v35 = vpack.c.bf16 %v14004_v20, %v14003_v41 }
 0xc0d   : > { %v8504_v29 = vpop.f32.mrf.mxu0 }
 0xc0e   : > { %v9526_v19 = vpack.c.bf16 %v8504_v29, %v8501_v7  ;;  %v14899_v29 = vld [vmem:[%s18602_s16 + $0x250] sm:$0xff]  }
 0xc0f   : > { %v14007_v61 = vpop.f32.mrf.mxu0  ;;  %14102 = vmatmul.mubr.msk.bf16.gmra.mxu0 %vm2433_vm2, %v14894_v26 }
 0xc10   : > { %14259 = vmatprep.mubr.msk.bf16.mxu1 %vm1531_vm0, %v9526_v19  ;;  %14105 = vmatprep.mubr.msk.bf16.mxu0 %vm2433_vm2, %v14895_v40  ;;  %v14898_v40 = vld [vmem:[%s18602_s16 + $0x248] sm:$0xff]  }
 0xc11   : > { %v8517_v54 = vpop.f32.mrf.mxu0  ;;  %14260 = vmatmul.mubr.msk.bf16.gmra.mxu1 %vm1531_vm0, %v9527_v35 }
 0xc13   : > { %v14008_v62 = vpop.f32.mrf.mxu0 }
 0xc14   : > { %v9529_v41 = vpack.c.bf16 %v14008_v62, %v14007_v61 }
 0xc15   : > { %v8520_v36 = vpop.f32.mrf.mxu0 }
 0xc16   : > { %v9528_v4 = vpack.c.bf16 %v8520_v36, %v8517_v54  ;;  %v14901_v36 = vld [vmem:[%s18602_s16 + $0x260] sm:$0xff]  }
 0xc17   : > { %v14011_v7 = vpop.f32.mrf.mxu0  ;;  %14106 = vmatmul.mubr.msk.bf16.gmra.mxu0 %vm2433_vm2, %v14896_v6 }
 0xc18   : > { %14263 = vmatprep.mubr.msk.bf16.mxu1 %vm1531_vm0, %v9528_v4  ;;  %14109 = vmatprep.mubr.msk.bf16.mxu0 %vm2433_vm2, %v14897_v14  ;;  %v14900_v14 = vld [vmem:[%s18602_s16 + $0x258] sm:$0xff]  }
 0xc19   : > { %v8533_v20 = vpop.f32.mrf.mxu0  ;;  %14264 = vmatmul.mubr.msk.bf16.gmra.mxu1 %vm1531_vm0, %v9529_v41 }
 0xc1b   : > { %v14012_v26 = vpop.f32.mrf.mxu0 }
 0xc1c   : > { %v9531_v61 = vpack.c.bf16 %v14012_v26, %v14011_v7 }
 0xc1d   : > { %v8536_v19 = vpop.f32.mrf.mxu0 }
 0xc1e   : > { %v9530_v35 = vpack.c.bf16 %v8536_v19, %v8533_v20  ;;  %v14903_v19 = vld [vmem:[%s18602_s16 + $0x270] sm:$0xff]  }
 0xc1f   : > { %v14015_v54 = vpop.f32.mrf.mxu0  ;;  %14110 = vmatmul.mubr.msk.bf16.gmra.mxu0 %vm2433_vm2, %v14898_v40 }
 0xc20   : > { %14267 = vmatprep.mubr.msk.bf16.mxu1 %vm1531_vm0, %v9530_v35  ;;  %14113 = vmatprep.mubr.msk.bf16.mxu0 %vm2433_vm2, %v14899_v29  ;;  %v14902_v29 = vld [vmem:[%s18602_s16 + $0x268] sm:$0xff]  }
 0xc21   : > { %v8549_v62 = vpop.f32.mrf.mxu0  ;;  %14268 = vmatmul.mubr.msk.bf16.gmra.mxu1 %vm1531_vm0, %v9531_v61 }
 0xc23   : > { %v14016_v6 = vpop.f32.mrf.mxu0 }
 0xc24   : > { %v9533_v7 = vpack.c.bf16 %v14016_v6, %v14015_v54 }
 0xc25   : > { %v8552_v4 = vpop.f32.mrf.mxu0 }
 0xc26   : > { %v9532_v41 = vpack.c.bf16 %v8552_v4, %v8549_v62  ;;  %v14905_v4 = vld [vmem:[%s18602_s16 + $0x280] sm:$0xff]  }
 0xc27   : > { %v14019_v20 = vpop.f32.mrf.mxu0  ;;  %14114 = vmatmul.mubr.msk.bf16.gmra.mxu0 %vm2433_vm2, %v14900_v14 }
 0xc28   : > { %14271 = vmatprep.mubr.msk.bf16.mxu1 %vm1531_vm0, %v9532_v41  ;;  %14117 = vmatprep.mubr.msk.bf16.mxu0 %vm2433_vm2, %v14901_v36  ;;  %v14904_v36 = vld [vmem:[%s18602_s16 + $0x278] sm:$0xff]  }
 0xc29   : > { %v8565_v26 = vpop.f32.mrf.mxu0  ;;  %14272 = vmatmul.mubr.msk.bf16.gmra.mxu1 %vm1531_vm0, %v9533_v7 }
 0xc2b   : > { %v14020_v40 = vpop.f32.mrf.mxu0 }
 0xc2c   : > { %v9535_v54 = vpack.c.bf16 %v14020_v40, %v14019_v20 }
 0xc2d   : > { %v8568_v35 = vpop.f32.mrf.mxu0 }
 0xc2e   : > { %v9534_v61 = vpack.c.bf16 %v8568_v35, %v8565_v26  ;;  %v14908_v35 = vld [vmem:[%s18602_s16 + $0x290] sm:$0xff]  }
 0xc2f   : > { %v14023_v62 = vpop.f32.mrf.mxu0  ;;  %14118 = vmatmul.mubr.msk.bf16.gmra.mxu0 %vm2433_vm2, %v14902_v29 }
 0xc30   : > { %14275 = vmatprep.mubr.msk.bf16.mxu1 %vm1531_vm0, %v9534_v61  ;;  %14121 = vmatprep.mubr.msk.bf16.mxu0 %vm2433_vm2, %v14903_v19  ;;  %v14906_v19 = vld [vmem:[%s18602_s16 + $0x288] sm:$0xff]  }
 0xc31   : > { %v8581_v6 = vpop.f32.mrf.mxu0  ;;  %14276 = vmatmul.mubr.msk.bf16.gmra.mxu1 %vm1531_vm0, %v9535_v54 }
 0xc33   : > { %v14024_v14 = vpop.f32.mrf.mxu0 }
 0xc34   : > { %v9537_v20 = vpack.c.bf16 %v14024_v14, %v14023_v62 }
 0xc35   : > { %v8584_v41 = vpop.f32.mrf.mxu0 }
 0xc36   : > { %v9536_v7 = vpack.c.bf16 %v8584_v41, %v8581_v6  ;;  %v14910_v41 = vld [vmem:[%s18602_s16 + $0x2a0] sm:$0xff]  }
 0xc37   : > { %v14027_v26 = vpop.f32.mrf.mxu0  ;;  %14122 = vmatmul.mubr.msk.bf16.gmra.mxu0 %vm2433_vm2, %v14904_v36 }
 0xc38   : > { %14279 = vmatprep.mubr.msk.bf16.mxu1 %vm1531_vm0, %v9536_v7  ;;  %14125 = vmatprep.mubr.msk.bf16.mxu0 %vm2433_vm2, %v14905_v4  ;;  %v14909_v4 = vld [vmem:[%s18602_s16 + $0x298] sm:$0xff]  }
 0xc39   : > { %v8597_v40 = vpop.f32.mrf.mxu0  ;;  %14280 = vmatmul.mubr.msk.bf16.gmra.mxu1 %vm1531_vm0, %v9537_v20 }
 0xc3b   : > { %v14028_v29 = vpop.f32.mrf.mxu0 }
 0xc3c   : > { %v9539_v62 = vpack.c.bf16 %v14028_v29, %v14027_v26  ;;  %v14911_v26 = vld [vmem:[%s18602_s16 + $0x2a8] sm:$0xff]  }
 0xc3d   : > { %v8600_v61 = vpop.f32.mrf.mxu0 }
 0xc3e   : > { %v9538_v54 = vpack.c.bf16 %v8600_v61, %v8597_v40  ;;  %v14927_v40 = vld [vmem:[%s18602_s16 + $0x320] sm:$0xff]  }
 0xc3f   : > { %v16632_v6 = vpop.f32.mrf.mxu0  ;;  %14126 = vmatmul.mubr.msk.bf16.gmra.mxu0 %vm2433_vm2, %v14906_v19  ;;  %v16862_v19 = vld [vmem:[%s18603_s17 + $0x20] sm:$0xff]  }
 0xc40   : > { %14283 = vmatprep.mubr.msk.bf16.mxu1 %vm1531_vm0, %v9538_v54  ;;  %14129 = vmatprep.mubr.msk.bf16.mxu0 %vm2433_vm2, %v14908_v35  ;;  %v14928_v54 = vld [vmem:[%s18602_s16 + $0x328] sm:$0xff]  }
 0xc41   : > { %14284 = vmatmul.mubr.msk.bf16.gmra.mxu1 %vm1531_vm0, %v9539_v62  ;;  %v16638_v14 = vpop.f32.mrf.mxu0  ;;  %v14929_v62 = vld [vmem:[%s18602_s16 + $0x330] sm:$0xff]  }
 0xc42   : > { %14289 = vmatprep.mubr.msk.bf16.mxu1 %vm1531_vm0, %v9508_v55 }
 0xc43   : > { %v16644_v36 = vpop.f32.mrf.mxu0 }
 0xc44   : > { %v9541_v52 = vpack.c.bf16 %v16644_v36, %v16632_v6 }
 0xc45   : > { %v16652_v7 = vpop.f32.mrf.mxu0 }
 0xc46   : > { %v9540_v3 = vpack.c.bf16 %v16652_v7, %v16638_v14 }
 0xc47   : > { %v16654_v20 = vpop.f32.mrf.mxu0  ;;  %14130 = vmatmul.mubr.msk.bf16.gmra.mxu0 %vm2433_vm2, %v14909_v4 }
 0xc48   : > { %14133 = vmatprep.mubr.msk.bf16.mxu0 %vm2433_vm2, %v14910_v41 }
 0xc49   : > { %14290 = vmatmul.mubr.msk.bf16.vlgmr.msra.gmra.mxu1 %vm1531_vm0, %v9509_v34  ;;  %v16667_v46 = vpop.f32.mrf.mxu0 }
 0xc4a   : > { %14293 = vmatprep.mubr.msk.bf16.mxu1 %vm1531_vm0, %v9510_v33  ;;  %14322 = vmatpush3.bf16.msra.mxu1 %v16559_v48  ;;  %v14913_v33 = vld [vmem:[%s18602_s16 + $0x2b8] sm:$0xff]   ;;  %v14914_v48 = vld [vmem:[%s18602_s16 + $0x2c0] sm:$0xff]  }
 0xc4b   : > { %v16674_v55 = vpop.f32.mrf.mxu0  ;;  %14355 = vmatprep.subr.bf16.mxu1 %v16660_v27 }
 0xc4c   : > { %v9543_v36 = vpack.c.bf16 %v16674_v55, %v16654_v20  ;;  %v14931_v20 = vld [vmem:[%s18602_s16 + $0x340] sm:$0xff]  }
 0xc4d   : > { %v16683_v51 = vpop.f32.mrf.mxu0 }
 0xc4e   : > { %v9542_v38 = vpack.c.bf16 %v16683_v51, %v16667_v46 }
 0xc4f   : > { %v16685_v34 = vpop.f32.mrf.mxu0  ;;  %14134 = vmatmul.mubr.msk.bf16.gmra.mxu0 %vm2433_vm2, %v14911_v26 }
 0xc50   : > { %14137 = vmatprep.mubr.msk.bf16.mxu0 %vm2433_vm2, %v14912_v16 }
 0xc51   : > { %14294 = vmatmul.mubr.msk.bf16.gmra.mxu1 %vm1531_vm0, %v9511_v45  ;;  %v16693_v0 = vpop.f32.mrf.mxu0 }
 0xc52   : > { %14297 = vmatprep.mubr.msk.bf16.mxu1 %vm1531_vm0, %v9512_v31  ;;  %v14916_v31 = vld [vmem:[%s18602_s16 + $0x2d0] sm:$0xff]  }
 0xc53   : > { %v16699_v24 = vpop.f32.mrf.mxu0 }
 0xc54   : > { %v9545_v26 = vpack.c.bf16 %v16699_v24, %v16685_v34  ;;  %v14933_v34 = vld [vmem:[%s18602_s16 + $0x350] sm:$0xff]  }
 0xc55   : > { %v16707_v18 = vpop.f32.mrf.mxu0 }
 0xc56   : > { %v9544_v14 = vpack.c.bf16 %v16707_v18, %v16693_v0 }
 0xc57   : > { %v16709_v56 = vpop.f32.mrf.mxu0  ;;  %14138 = vmatmul.mubr.msk.bf16.gmra.mxu0 %vm2433_vm2, %v14913_v33  ;;  %v14932_v33 = vld [vmem:[%s18602_s16 + $0x348] sm:$0xff]  }
 0xc58   : > { %14141 = vmatprep.mubr.msk.bf16.mxu0 %vm2433_vm2, %v14914_v48 }
 0xc59   : > { %14298 = vmatmul.mubr.msk.bf16.gmra.mxu1 %vm1531_vm0, %v9513_v1  ;;  %v16717_v45 = vpop.f32.mrf.mxu0 }
 0xc5a   : > { %14301 = vmatprep.mubr.msk.bf16.mxu1 %vm1531_vm0, %v9514_v22  ;;  %v14918_v22 = vld [vmem:[%s18602_s16 + $0x2e0] sm:$0xff]  }
 0xc5b   : > { %v16723_v44 = vpop.f32.mrf.mxu0 }
 0xc5c   : > { %v9547_v18 = vpack.c.bf16 %v16723_v44, %v16709_v56  ;;  %v14935_v56 = vld [vmem:[%s18602_s16 + $0x360] sm:$0xff]  }
 0xc5d   : > { %v16731_v42 = vpop.f32.mrf.mxu0 }
 0xc5e   : > { %v9546_v55 = vpack.c.bf16 %v16731_v42, %v16717_v45  ;;  %v14934_v42 = vld [vmem:[%s18602_s16 + $0x358] sm:$0xff]  }
 0xc5f   : > { %v16733_v58 = vpop.f32.mrf.mxu0  ;;  %14142 = vmatmul.mubr.msk.bf16.gmra.mxu0 %vm2433_vm2, %v14915_v8 }
 0xc60   : > { %14145 = vmatprep.mubr.msk.bf16.mxu0 %vm2433_vm2, %v14916_v31 }
 0xc61   : > { %14302 = vmatmul.mubr.msk.bf16.gmra.mxu1 %vm1531_vm0, %v9515_v43  ;;  %v16741_v1 = vpop.f32.mrf.mxu0 }
 0xc62   : > { %14305 = vmatprep.mubr.msk.bf16.mxu1 %vm1531_vm0, %v9516_v47  ;;  %v14920_v47 = vld [vmem:[%s18602_s16 + $0x2f0] sm:$0xff]  }
 0xc63   : > { %v16747_v11 = vpop.f32.mrf.mxu0 }
 0xc65   : > { %v16755_v63 = vpop.f32.mrf.mxu0 }
 0xc66   : > { %v9548_v48 = vpack.c.bf16 %v16755_v63, %v16741_v1 }
 0xc67   : > { %v16757_v12 = vpop.f32.mrf.mxu0  ;;  %14146 = vmatmul.mubr.msk.bf16.gmra.mxu0 %vm2433_vm2, %v14917_v60  ;;  %v9549_v60 = vpack.c.bf16 %v16747_v11, %v16733_v58  ;;  %v14937_v58 = vld [vmem:[%s18602_s16 + $0x370] sm:$0xff]  }
 0xc68   : > { %14149 = vmatprep.mubr.msk.bf16.mxu0 %vm2433_vm2, %v14918_v22 }
 0xc69   : > { %14306 = vmatmul.mubr.msk.bf16.gmra.mxu1 %vm1531_vm0, %v9517_v13  ;;  %v16765_v43 = vpop.f32.mrf.mxu0 }
 0xc6a   : > { %14309 = vmatprep.mubr.msk.bf16.mxu1 %vm1531_vm0, %v9518_v30  ;;  %v14922_v30 = vld [vmem:[%s18602_s16 + $0x300] sm:$0xff]  }
 0xc6b   : > { %v16771_v32 = vpop.f32.mrf.mxu0 }
 0xc6d   : > { %v16779_v23 = vpop.f32.mrf.mxu0 }
 0xc6e   : > { %v9550_v1 = vpack.c.bf16 %v16779_v23, %v16765_v43  ;;  %v14936_v43 = vld [vmem:[%s18602_s16 + $0x368] sm:$0xff]   ;;  %v9551_v23 = vpack.c.bf16 %v16771_v32, %v16757_v12  ;;  %v14939_v12 = vld [vmem:[%s18602_s16 + $0x380] sm:$0xff]  }
 0xc6f   : > { %v16781_v17 = vpop.f32.mrf.mxu0  ;;  %14150 = vmatmul.mubr.msk.bf16.gmra.mxu0 %vm2433_vm2, %v14919_v28 }
 0xc70   : > { %14153 = vmatprep.mubr.msk.bf16.mxu0 %vm2433_vm2, %v14920_v47 }
 0xc71   : > { %14310 = vmatmul.mubr.msk.bf16.gmra.mxu1 %vm1531_vm0, %v9519_v5  ;;  %v16789_v13 = vpop.f32.mrf.mxu0 }
 0xc72   : > { %14313 = vmatprep.mubr.msk.bf16.mxu1 %vm1531_vm0, %v9520_v21  ;;  %v14925_v21 = vld [vmem:[%s18602_s16 + $0x310] sm:$0xff]  }
 0xc73   : > { %v16795_v9 = vpop.f32.mrf.mxu0 }
 0xc75   : > { %v16803_v10 = vpop.f32.mrf.mxu0 }
 0xc76   : > { %v9552_v47 = vpack.c.bf16 %v16803_v10, %v16789_v13  ;;  %v14938_v13 = vld [vmem:[%s18602_s16 + $0x378] sm:$0xff]  }
 0xc77   : > { %v16805_v37 = vpop.f32.mrf.mxu0  ;;  %14154 = vmatmul.mubr.msk.bf16.gmra.mxu0 %vm2433_vm2, %v14921_v49 }
 0xc78   : > { %14157 = vmatprep.mubr.msk.bf16.mxu0 %vm2433_vm2, %v14922_v30 }
 0xc79   : > { %14314 = vmatmul.mubr.msk.bf16.gmra.mxu1 %vm1531_vm0, %v9521_v50  ;;  %v16813_v5 = vpop.f32.mrf.mxu0 }
 0xc7a   : > { %14317 = vmatprep.mubr.msk.bf16.mxu1 %vm1531_vm0, %v9522_v15  ;;  %v14926_v15 = vld [vmem:[%s18602_s16 + $0x318] sm:$0xff]  }
 0xc7b   : > { %v16819_v2 = vpop.f32.mrf.mxu0 }
 0xc7d   : > { %v16827_v59 = vpop.f32.mrf.mxu0 }
 0xc7e   : > { %v9554_v10 = vpack.c.bf16 %v16827_v59, %v16813_v5  ;;  %v14940_v5 = vld [vmem:[%s18602_s16 + $0x388] sm:$0xff]  }
 0xc7f   : > { %v16831_v50 = vpop.f32.mrf.mxu0  ;;  %14158 = vmatmul.mubr.msk.bf16.gmra.mxu0 %vm2433_vm2, %v14923_v25 }
 0xc80   : > { %14161 = vmatprep.mubr.msk.bf16.mxu0 %vm2433_vm2, %v14925_v21  ;;  %v9553_v21 = vpack.c.bf16 %v16795_v9, %v16781_v17  ;;  %v14942_v17 = vld [vmem:[%s18602_s16 + $0x390] sm:$0xff]  }
 0xc81   : > { %14318 = vmatmul.mubr.msk.bf16.gmra.mxu1 %vm1531_vm0, %v9523_v57  ;;  %v16839_v39 = vpop.f32.mrf.mxu0 }
 0xc82   : > { %14323 = vmatprep.mubr.msk.bf16.mxu1 %vm1531_vm0, %v9540_v3 }
 0xc83   : > { %v16842_v53 = vpop.f32.mrf.mxu0 }
 0xc85   : > { %v16850_v29 = vpop.f32.mrf.mxu0 }
 0xc86   : > { %v9556_v59 = vpack.c.bf16 %v16850_v29, %v16839_v39  ;;  %v14943_v39 = vld [vmem:[%s18602_s16 + $0x398] sm:$0xff]  }
 0xc87   : > { %v16856_v57 = vpop.f32.mrf.mxu0  ;;  %14162 = vmatmul.mubr.msk.bf16.gmra.mxu0 %vm2433_vm2, %v14926_v15 }
 0xc88   : > { %14165 = vmatprep.mubr.msk.bf16.mxu0 %vm2433_vm2, %v14927_v40 }
 0xc89   : > { %14324 = vmatmul.mubr.msk.bf16.vlgmr.msra.gmra.mxu1 %vm1531_vm0, %v9541_v52  ;;  %v16866_v35 = vpop.f32.mrf.mxu0 }
 0xc8a   : > { %14327 = vmatprep.mubr.msk.bf16.mxu1 %vm1531_vm0, %v9542_v38  ;;  %14356 = vmatpush3.bf16.msra.mxu1 %v16660_v27  ;;  %v14930_v27 = vld [vmem:[%s18602_s16 + $0x338] sm:$0xff]   ;;  %v9555_v38 = vpack.c.bf16 %v16819_v2, %v16805_v37  ;;  %v14944_v37 = vld [vmem:[%s18602_s16 + $0x3a0] sm:$0xff]  }
 0xc8b   : > { %v16870_v61 = vpop.f32.mrf.mxu0  ;;  %14389 = vmatprep.subr.bf16.mxu1 %v16862_v19 }
 0xc8d   : > { %v16879_v6 = vpop.f32.mrf.mxu0 }
 0xc8e   : > { %v9558_v29 = vpack.c.bf16 %v16879_v6, %v16866_v35  ;;  %v14945_v35 = vld [vmem:[%s18602_s16 + $0x3a8] sm:$0xff]   ;;  %v14946_v6 = vld [vmem:[%s18602_s16 + $0x3b0] sm:$0xff]  }
 0xc8f   : > { %v16885_v4 = vpop.f32.mrf.mxu0  ;;  %14166 = vmatmul.mubr.msk.bf16.gmra.mxu0 %vm2433_vm2, %v14928_v54 }
 0xc90   : > { %14169 = vmatprep.mubr.msk.bf16.mxu0 %vm2433_vm2, %v14929_v62 }
 0xc91   : > { %14328 = vmatmul.mubr.msk.bf16.gmra.mxu1 %vm1531_vm0, %v9543_v36  ;;  %v16890_v41 = vpop.f32.mrf.mxu0 }
 0xc92   : > { %14331 = vmatprep.mubr.msk.bf16.mxu1 %vm1531_vm0, %v9544_v14  ;;  %v9557_v14 = vpack.c.bf16 %v16842_v53, %v16831_v50 }
 0xc93   : > { %v16893_v7 = vpop.f32.mrf.mxu0 }
 0xc95   : > { %v16901_v46 = vpop.f32.mrf.mxu0 }
 0xc97   : > { %v16907_v16 = vpop.f32.mrf.mxu0  ;;  %14170 = vmatmul.mubr.msk.bf16.gmra.mxu0 %vm2433_vm2, %v14930_v27  ;;  %v17045_v27 = vld [vmem:[%s18603_s17 + $0x28] sm:$0xff]  }
 0xc98   : > { %14173 = vmatprep.mubr.msk.bf16.mxu0 %vm2433_vm2, %v14931_v20 }
 0xc99   : > { %14332 = vmatmul.mubr.msk.bf16.gmra.mxu1 %vm1531_vm0, %v9545_v26  ;;  %v16912_v51 = vpop.f32.mrf.mxu0 }
 0xc9a   : > { %14335 = vmatprep.mubr.msk.bf16.mxu1 %vm1531_vm0, %v9546_v55 }
 0xc9b   : > { %v16915_v0 = vpop.f32.mrf.mxu0 }
 0xc9d   : > { %v16923_v24 = vpop.f32.mrf.mxu0 }
 0xc9f   : > { %v16929_v45 = vpop.f32.mrf.mxu0  ;;  %14174 = vmatmul.mubr.msk.bf16.gmra.mxu0 %vm2433_vm2, %v14932_v33 }
 0xca0   : > { %14177 = vmatprep.mubr.msk.bf16.mxu0 %vm2433_vm2, %v14933_v34  ;;  %v9559_v34 = vpack.c.bf16 %v16870_v61, %v16856_v57  ;;  %v14947_v57 = vld [vmem:[%s18602_s16 + $0x3b8] sm:$0xff]   ;;  %v14948_v61 = vld [vmem:[%s18602_s16 + $0x3c0] sm:$0xff]  }
 0xca1   : > { %14336 = vmatmul.mubr.msk.bf16.gmra.mxu1 %vm1531_vm0, %v9547_v18  ;;  %v16934_v8 = vpop.f32.mrf.mxu0 }
 0xca2   : > { %14339 = vmatprep.mubr.msk.bf16.mxu1 %vm1531_vm0, %v9548_v48 }
 0xca3   : > { %v16937_v31 = vpop.f32.mrf.mxu0 }
 0xca5   : > { %v16945_v44 = vpop.f32.mrf.mxu0 }
 0xca7   : > { %v16951_v22 = vpop.f32.mrf.mxu0  ;;  %14178 = vmatmul.mubr.msk.bf16.gmra.mxu0 %vm2433_vm2, %v14934_v42 }
 0xca8   : > { %14181 = vmatprep.mubr.msk.bf16.mxu0 %vm2433_vm2, %v14935_v56 }
 0xca9   : > { %14340 = vmatmul.mubr.msk.bf16.gmra.mxu1 %vm1531_vm0, %v9549_v60  ;;  %v16956_v63 = vpop.f32.mrf.mxu0 }
 0xcaa   : > { %14343 = vmatprep.mubr.msk.bf16.mxu1 %vm1531_vm0, %v9550_v1 }
 0xcab   : > { %v16959_v28 = vpop.f32.mrf.mxu0 }
 0xcad   : > { %v16967_v11 = vpop.f32.mrf.mxu0 }
 0xcaf   : > { %v16973_v49 = vpop.f32.mrf.mxu0  ;;  %14182 = vmatmul.mubr.msk.bf16.gmra.mxu0 %vm2433_vm2, %v14936_v43  ;;  %v9562_v43 = vpack.c.bf16 %v16923_v24, %v16912_v51 }
 0xcb0   : > { %14185 = vmatprep.mubr.msk.bf16.mxu0 %vm2433_vm2, %v14937_v58  ;;  %v9561_v58 = vpack.c.bf16 %v16893_v7, %v16885_v4  ;;  %v14949_v4 = vld [vmem:[%s18602_s16 + $0x3c8] sm:$0xff]   ;;  %v14950_v7 = vld [vmem:[%s18602_s16 + $0x3d0] sm:$0xff]  }
 0xcb1   : > { %14344 = vmatmul.mubr.msk.bf16.gmra.mxu1 %vm1531_vm0, %v9551_v23  ;;  %v16978_v30 = vpop.f32.mrf.mxu0 }
 0xcb2   : > { %14347 = vmatprep.mubr.msk.bf16.mxu1 %vm1531_vm0, %v9552_v47 }
 0xcb3   : > { %v16981_v25 = vpop.f32.mrf.mxu0 }
 0xcb5   : > { %v16989_v32 = vpop.f32.mrf.mxu0 }
 0xcb7   : > { %v16995_v3 = vpop.f32.mrf.mxu0  ;;  %14186 = vmatmul.mubr.msk.bf16.gmra.mxu0 %vm2433_vm2, %v14938_v13 }
 0xcb8   : > { %14189 = vmatprep.mubr.msk.bf16.mxu0 %vm2433_vm2, %v14939_v12 }
 0xcb9   : > { %14348 = vmatmul.mubr.msk.bf16.gmra.mxu1 %vm1531_vm0, %v9553_v21  ;;  %v17000_v15 = vpop.f32.mrf.mxu0 }
 0xcba   : > { %14351 = vmatprep.mubr.msk.bf16.mxu1 %vm1531_vm0, %v9554_v10 }
 0xcbb   : > { %v17003_v40 = vpop.f32.mrf.mxu0 }
 0xcbd   : > { %v17011_v9 = vpop.f32.mrf.mxu0 }
 0xcbf   : > { %v17017_v52 = vpop.f32.mrf.mxu0  ;;  %14190 = vmatmul.mubr.msk.bf16.gmra.mxu0 %vm2433_vm2, %v14940_v5  ;;  %v9564_v5 = vpack.c.bf16 %v16945_v44, %v16934_v8 }
 0xcc0   : > { %14193 = vmatprep.mubr.msk.bf16.mxu0 %vm2433_vm2, %v14942_v17  ;;  %v9563_v17 = vpack.c.bf16 %v16915_v0, %v16907_v16  ;;  %v14951_v16 = vld [vmem:[%s18602_s16 + $0x3d8] sm:$0xff]   ;;  %v14952_v0 = vld [vmem:[%s18602_s16 + $0x3e0] sm:$0xff]  }
 0xcc1   : > { %14352 = vmatmul.mubr.msk.bf16.gmra.mxu1 %vm1531_vm0, %v9555_v38  ;;  %v17022_v54 = vpop.f32.mrf.mxu0 }
 0xcc2   : > { %14357 = vmatprep.mubr.msk.bf16.mxu1 %vm1531_vm0, %v9556_v59 }
 0xcc3   : > { %v17025_v62 = vpop.f32.mrf.mxu0 }
 0xcc5   : > { %v17033_v2 = vpop.f32.mrf.mxu0 }
 0xcc7   : > { %v17039_v36 = vpop.f32.mrf.mxu0  ;;  %14194 = vmatmul.mubr.msk.bf16.gmra.mxu0 %vm2433_vm2, %v14943_v39 }
 0xcc8   : > { %14197 = vmatprep.mubr.msk.bf16.mxu0 %vm2433_vm2, %v14944_v37 }
 0xcc9   : > { %v17048_v20 = vpop.f32.mrf.mxu1  ;;  %14358 = vmatmul.mubr.msk.bf16.vlgmr.msra.gmra.mxu1 %vm1531_vm0, %v9557_v14  ;;  %v17051_v55 = vpop.f32.mrf.mxu0 }
 0xcca   : > { %14361 = vmatprep.mubr.msk.bf16.mxu1 %vm1531_vm0, %v9558_v29  ;;  %14390 = vmatpush3.bf16.msra.mxu1 %v16862_v19  ;;  %v9560_v19 = vpack.c.bf16 %v16901_v46, %v16890_v41 }
 0xccb   : > { %v17055_v50 = vpop.f32.mrf.mxu1  ;;  %v17057_v53 = vpop.f32.mrf.mxu0  ;;  %14423 = vmatprep.subr.bf16.mxu1 %v17045_v27 }
 0xccd   : > { %v17066_v26 = vpop.f32.mrf.mxu1  ;;  %v17068_v33 = vpop.f32.mrf.mxu0 }
 0xccf   : > { %v17074_v48 = vpop.f32.mrf.mxu1  ;;  %v17076_v18 = vpop.f32.mrf.mxu0  ;;  %14198 = vmatmul.mubr.msk.bf16.gmra.mxu0 %vm2433_vm2, %v14945_v35  ;;  %v9566_v35 = vpack.c.bf16 %v16967_v11, %v16956_v63 }
 0xcd0   : > { %14201 = vmatprep.mubr.msk.bf16.mxu0 %vm2433_vm2, %v14946_v6  ;;  %v9565_v6 = vpack.c.bf16 %v16937_v31, %v16929_v45  ;;  %v14953_v45 = vld [vmem:[%s18602_s16 + $0x3e8] sm:$0xff]   ;;  %v14954_v31 = vld [vmem:[%s18602_s16 + $0x3f0] sm:$0xff]  }
 0xcd1   : > { %v17080_v42 = vpop.f32.mrf.mxu1  ;;  %14362 = vmatmul.mubr.msk.bf16.gmra.mxu1 %vm1531_vm0, %v9559_v34  ;;  %v17083_v56 = vpop.f32.mrf.mxu0 }
 0xcd2   : > { %14365 = vmatprep.mubr.msk.bf16.mxu1 %vm1531_vm0, %v9560_v19 }
 0xcd3   : > { %v17086_v41 = vpop.f32.mrf.mxu1  ;;  %v17088_v46 = vpop.f32.mrf.mxu0 }
 0xcd5   : > { %v17096_v1 = vpop.f32.mrf.mxu1  ;;  %v17098_v60 = vpop.f32.mrf.mxu0 }
 0xcd7   : > { %v17104_v47 = vpop.f32.mrf.mxu1  ;;  %v17106_v23 = vpop.f32.mrf.mxu0  ;;  %14202 = vmatmul.mubr.msk.bf16.gmra.mxu0 %vm2433_vm2, %v14947_v57 }
 0xcd8   : > { %14205 = vmatprep.mubr.msk.bf16.mxu0 %vm2433_vm2, %v14948_v61 }
 0xcd9   : > { %v17110_v13 = vpop.f32.mrf.mxu1  ;;  %14366 = vmatmul.mubr.msk.bf16.gmra.mxu1 %vm1531_vm0, %v9561_v58  ;;  %v17113_v12 = vpop.f32.mrf.mxu0 }
 0xcda   : > { %14369 = vmatprep.mubr.msk.bf16.mxu1 %vm1531_vm0, %v9562_v43 }
 0xcdb   : > { %v17116_v51 = vpop.f32.mrf.mxu1  ;;  %v17118_v24 = vpop.f32.mrf.mxu0 }
 0xcdd   : > { %v17126_v10 = vpop.f32.mrf.mxu1  ;;  %v17128_v21 = vpop.f32.mrf.mxu0 }
 0xcdf   : > { %v17134_v59 = vpop.f32.mrf.mxu1  ;;  %v17136_v38 = vpop.f32.mrf.mxu0  ;;  %14206 = vmatmul.mubr.msk.bf16.gmra.mxu0 %vm2433_vm2, %v14949_v4  ;;  %v9568_v4 = vpack.c.bf16 %v16989_v32, %v16978_v30 }
 0xce0   : > { %14209 = vmatprep.mubr.msk.bf16.mxu0 %vm2433_vm2, %v14950_v7  ;;  %v9567_v7 = vpack.c.bf16 %v16959_v28, %v16951_v22  ;;  %v14955_v22 = vld [vmem:[%s18602_s16 + $0x3f8] sm:$0xff]   ;;  %v14956_v28 = vld [vmem:[%s18602_s16 + $0x400] sm:$0xff]  }
 0xce1   : > { %v17140_v39 = vpop.f32.mrf.mxu1  ;;  %14370 = vmatmul.mubr.msk.bf16.gmra.mxu1 %vm1531_vm0, %v9563_v17  ;;  %v17143_v37 = vpop.f32.mrf.mxu0 }
 0xce2   : > { %14373 = vmatprep.mubr.msk.bf16.mxu1 %vm1531_vm0, %v9564_v5 }
 0xce3   : > { %v17146_v8 = vpop.f32.mrf.mxu1  ;;  %v17148_v44 = vpop.f32.mrf.mxu0 }
 0xce5   : > { %v17156_v29 = vpop.f32.mrf.mxu1  ;;  %v17158_v14 = vpop.f32.mrf.mxu0 }
 0xce7   : > { %v17164_v19 = vpop.f32.mrf.mxu1  ;;  %v17166_v34 = vpop.f32.mrf.mxu0  ;;  %14210 = vmatmul.mubr.msk.bf16.gmra.mxu0 %vm2433_vm2, %v14951_v16 }
 0xce8   : > { %14213 = vmatprep.mubr.msk.bf16.mxu0 %vm2433_vm2, %v14952_v0 }
 0xce9   : > { %v17170_v57 = vpop.f32.mrf.mxu1  ;;  %14374 = vmatmul.mubr.msk.bf16.gmra.mxu1 %vm1531_vm0, %v9565_v6  ;;  %v17173_v61 = vpop.f32.mrf.mxu0 }
 0xcea   : > { %14377 = vmatprep.mubr.msk.bf16.mxu1 %vm1531_vm0, %v9566_v35 }
 0xceb   : > { %v17176_v63 = vpop.f32.mrf.mxu1  ;;  %v17178_v11 = vpop.f32.mrf.mxu0 }
 0xced   : > { %v17186_v43 = vpop.f32.mrf.mxu1  ;;  %v17188_v58 = vpop.f32.mrf.mxu0 }
 0xcef   : > { %v17194_v5 = vpop.f32.mrf.mxu1  ;;  %v17196_v17 = vpop.f32.mrf.mxu0  ;;  %14214 = vmatmul.mubr.msk.bf16.gmra.mxu0 %vm2433_vm2, %v14953_v45  ;;  %v9570_v45 = vpack.c.bf16 %v17011_v9, %v17000_v15 }
 0xcf0   : > { %18617 = vst [vmem:[#allocation2_spill] sm:$0xff] %v17196_v17  ;;  %14217 = vmatprep.mubr.msk.bf16.mxu0 %vm2433_vm2, %v14954_v31  ;;  %v9569_v31 = vpack.c.bf16 %v16981_v25, %v16973_v49  ;;  %v14957_v49 = vld [vmem:[%s18602_s16 + $0x408] sm:$0xff]   ;;  %v14959_v25 = vld [vmem:[%s18602_s16 + $0x410] sm:$0xff]  }
 0xcf1   : > { %v17200_v16 = vpop.f32.mrf.mxu1  ;;  %14378 = vmatmul.mubr.msk.bf16.gmra.mxu1 %vm1531_vm0, %v9567_v7  ;;  %v17203_v0 = vpop.f32.mrf.mxu0 }
 0xcf2   : > { %14381 = vmatprep.mubr.msk.bf16.mxu1 %vm1531_vm0, %v9568_v4 }
 0xcf3   : > { %v17206_v30 = vpop.f32.mrf.mxu1  ;;  %v17208_v32 = vpop.f32.mrf.mxu0 }
 0xcf4   : > { %18618 = vst [vmem:[#allocation3_spill] sm:$0xff] %v17208_v32 }
 0xcf5   : > { %v17216_v35 = vpop.f32.mrf.mxu1  ;;  %v17218_v6 = vpop.f32.mrf.mxu0 }
 0xcf7   : > { %v17224_v4 = vpop.f32.mrf.mxu1  ;;  %v17226_v7 = vpop.f32.mrf.mxu0  ;;  %14218 = vmatmul.mubr.msk.bf16.gmra.mxu0 %vm2433_vm2, %v14955_v22 }
 0xcf8   : > { %18619 = vst [vmem:[#allocation4_spill] sm:$0xff] %v17226_v7  ;;  %14221 = vmatprep.mubr.msk.bf16.mxu0 %vm2433_vm2, %v14956_v28 }
 0xcf9   : > { %v17230_v32 = vpop.f32.mrf.mxu1  ;;  %14382 = vmatmul.mubr.msk.bf16.gmra.mxu1 %vm1531_vm0, %v9569_v31  ;;  %v17233_v17 = vpop.f32.mrf.mxu0  ;;  %v9572_v31 = vpack.c.bf16 %v17033_v2, %v17022_v54 }
 0xcfa   : > { %14385 = vmatprep.mubr.msk.bf16.mxu1 %vm1531_vm0, %v9570_v45  ;;  %v9571_v45 = vpack.c.bf16 %v17003_v40, %v16995_v3  ;;  %v14960_v3 = vld [vmem:[%s18602_s16 + $0x418] sm:$0xff]   ;;  %v14961_v40 = vld [vmem:[%s18602_s16 + $0x420] sm:$0xff]  }
 0xcfb   : > { %v17236_v15 = vpop.f32.mrf.mxu1  ;;  %v17238_v9 = vpop.f32.mrf.mxu0 }
 0xcfc   : > { %18620 = vst [vmem:[#allocation5_spill] sm:$0xff] %v17236_v15  ;;  %18621 = vst [vmem:[#allocation6_spill] sm:$0xff] %v17238_v9 }
 0xcfd   : > { %v17246_v22 = vpop.f32.mrf.mxu1  ;;  %v17248_v28 = vpop.f32.mrf.mxu0 }
 0xcfe   : > { %18622 = vst [vmem:[#allocation7_spill] sm:$0xff] %v17246_v22 }
 0xcff   : > { %v17254_v7 = vpop.f32.mrf.mxu1  ;;  %v17256_v9 = vpop.f32.mrf.mxu0  ;;  %14222 = vmatmul.mubr.msk.bf16.gmra.mxu0 %vm2433_vm2, %v14957_v49 }
 0xd00   : > { %18623 = vst [vmem:[#allocation8_spill] sm:$0xff] %v17256_v9  ;;  %14225 = vmatprep.mubr.msk.bf16.mxu0 %vm2433_vm2, %v14959_v25 }
 0xd01   : > { %v17260_v15 = vpop.f32.mrf.mxu1  ;;  %14386 = vmatmul.mubr.msk.bf16.gmra.mxu1 %vm1531_vm0, %v9571_v45  ;;  %v17263_v22 = vpop.f32.mrf.mxu0  ;;  %v9574_v45 = vpack.c.bf16 %v17068_v33, %v17051_v55 }
 0xd02   : > { %14391 = vmatprep.mubr.msk.bf16.mxu1 %vm1531_vm0, %v9572_v31  ;;  %v9573_v31 = vpack.c.bf16 %v17025_v62, %v17017_v52 }
 0xd03   : > { %v17266_v54 = vpop.f32.mrf.mxu1  ;;  %v17268_v2 = vpop.f32.mrf.mxu0 }
 0xd04   : > { %18624 = vst [vmem:[#allocation9_spill] sm:$0xff] %v17266_v54  ;;  %18625 = vst [vmem:[#allocation10_spill] sm:$0xff] %v17268_v2  ;;  %v17292_v54 = vld [vmem:[%s18603_s17 + $0x30] sm:$0xff]  }
 0xd05   : > { %v17276_v49 = vpop.f32.mrf.mxu1  ;;  %v17278_v25 = vpop.f32.mrf.mxu0  ;;  %18628 = vst [vmem:[#allocation13_spill] sm:$0xff] %v17292_v54 }
 0xd06   : > { %18626 = vst [vmem:[#allocation11_spill] sm:$0xff] %v17276_v49 }
 0xd07   : > { %v17284_v9 = vpop.f32.mrf.mxu1  ;;  %v17286_v2 = vpop.f32.mrf.mxu0  ;;  %14226 = vmatmul.mubr.msk.bf16.gmra.mxu0 %vm2433_vm2, %v14960_v3  ;;  %v14962_v3 = vld [vmem:[%s18602_s16 + $0x428] sm:$0xff]  }
 0xd08   : > { %18627 = vst [vmem:[#allocation12_spill] sm:$0xff] %v17286_v2  ;;  %14229 = vmatprep.mubr.msk.bf16.mxu0 %vm2433_vm2, %v14961_v40 }
 0xd09   : > { %v14291_v49 = vpop.f32.mrf.mxu1  ;;  %14392 = vmatmul.mubr.msk.bf16.vlgmr.msra.gmra.mxu1 %vm1531_vm0, %v9573_v31  ;;  %v17296_v55 = vpop.f32.mrf.mxu0  ;;  %v9576_v31 = vpack.c.bf16 %v17098_v60, %v17083_v56 }
 0xd0a   : > { %v17299_v52 = vadd.f32 %v14291_v49, %v17048_v20  ;;  %14395 = vmatprep.mubr.msk.bf16.mxu1 %vm1531_vm0, %v9574_v45  ;;  %14424 = vmatpush3.bf16.msra.mxu1 %v17045_v27  ;;  %v14963_v20 = vld [vmem:[%s18602_s16 + $0x430] sm:$0xff]  }
 0xd0b   : > { %v9959_v62 = vpop.f32.mrf.mxu1  ;;  %v17303_v33 = vpop.f32.mrf.mxu0  ;;  %14457 = vmatprep.subr.bf16.mxu1 %v17292_v54 }
 0xd0c   : > { %18629 = vst [vmem:[#allocation14_spill] sm:$0xff] %v17303_v33  ;;  %v17310_v40 = vadd.f32 %v9959_v62, %v17055_v50  ;;  %v9575_v33 = vpack.c.bf16 %v17057_v53, %v17039_v36 }
 0xd0d   : > { %v14292_v49 = vpop.f32.mrf.mxu1  ;;  %v17315_v45 = vpop.f32.mrf.mxu0 }
 0xd0e   : > { %v17318_v27 = vadd.f32 %v14292_v49, %v17066_v26  ;;  %v9577_v49 = vpack.c.bf16 %v17088_v46, %v17076_v18 }
 0xd0f   : > { %v9962_v2 = vpop.f32.mrf.mxu1  ;;  %v17324_v54 = vpop.f32.mrf.mxu0  ;;  %14230 = vmatmul.mubr.msk.bf16.gmra.mxu0 %vm2433_vm2, %v14962_v3 }
 0xd10   : > { %v17328_v50 = vadd.f32 %v9962_v2, %v17074_v48  ;;  %14233 = vmatprep.mubr.msk.bf16.mxu0 %vm2433_vm2, %v14963_v20  ;;  %v14964_v48 = vld [vmem:[%s18602_s16 + $0x438] sm:$0xff]   ;;  %v14965_v2 = vld [vmem:[%s18602_s16 + $0x440] sm:$0xff]   ;;  %v9578_v20 = vpack.c.bf16 %v17128_v21, %v17113_v12 }
 0xd11   : > { %v14295_v62 = vpop.f32.mrf.mxu1  ;;  %14396 = vmatmul.mubr.msk.bf16.gmra.mxu1 %vm1531_vm0, %v9575_v33  ;;  %v17332_v26 = vpop.f32.mrf.mxu0 }
 0xd12   : > { %v17335_v56 = vadd.f32 %v14295_v62, %v17080_v42  ;;  %14399 = vmatprep.mubr.msk.bf16.mxu1 %vm1531_vm0, %v9576_v31 }
 0xd13   : > { %v9975_v36 = vpop.f32.mrf.mxu1  ;;  %v17338_v53 = vpop.f32.mrf.mxu0 }
 0xd14   : > { %v17344_v60 = vadd.f32 %v9975_v36, %v17086_v41 }
 0xd15   : > { %v14296_v33 = vpop.f32.mrf.mxu1  ;;  %v17349_v3 = vpop.f32.mrf.mxu0 }
 0xd16   : > { %v17352_v42 = vadd.f32 %v14296_v33, %v17096_v1 }
 0xd17   : > { %v9978_v31 = vpop.f32.mrf.mxu1  ;;  %v17358_v62 = vpop.f32.mrf.mxu0  ;;  %14234 = vmatmul.mubr.msk.bf16.gmra.mxu0 %vm2433_vm2, %v14964_v48  ;;  %v14967_v48 = vld [vmem:[%s18602_s16 + $0x450] sm:$0xff]  }
 0xd18   : > { %v17362_v41 = vadd.f32 %v9978_v31, %v17104_v47  ;;  %14237 = vmatprep.mubr.msk.bf16.mxu0 %vm2433_vm2, %v14965_v2  ;;  %v14966_v47 = vld [vmem:[%s18602_s16 + $0x448] sm:$0xff]  }
 0xd19   : > { %v14299_v36 = vpop.f32.mrf.mxu1  ;;  %14400 = vmatmul.mubr.msk.bf16.gmra.mxu1 %vm1531_vm0, %v9577_v49  ;;  %v17366_v1 = vpop.f32.mrf.mxu0  ;;  %v9579_v49 = vpack.c.bf16 %v17118_v24, %v17106_v23 }
 0xd1a   : > { %v17369_v12 = vadd.f32 %v14299_v36, %v17110_v13  ;;  %14403 = vmatprep.mubr.msk.bf16.mxu1 %vm1531_vm0, %v9578_v20  ;;  %v9580_v20 = vpack.c.bf16 %v17158_v14, %v17143_v37 }
 0xd1b   : > { %v9991_v18 = vpop.f32.mrf.mxu1  ;;  %v17372_v46 = vpop.f32.mrf.mxu0 }
 0xd1c   : > { %v17378_v21 = vadd.f32 %v9991_v18, %v17116_v51 }
 0xd1d   : > { %v14300_v2 = vpop.f32.mrf.mxu1  ;;  %v17383_v33 = vpop.f32.mrf.mxu0 }
 0xd1e   : > { %v17386_v13 = vadd.f32 %v14300_v2, %v17126_v10 }
 0xd1f   : > { %v9994_v31 = vpop.f32.mrf.mxu1  ;;  %v17392_v36 = vpop.f32.mrf.mxu0  ;;  %14238 = vmatmul.mubr.msk.bf16.gmra.mxu0 %vm2433_vm2, %v14966_v47  ;;  %v14969_v47 = vld [vmem:[%s18602_s16 + $0x460] sm:$0xff]  }
 0xd20   : > { %v17396_v51 = vadd.f32 %v9994_v31, %v17134_v59  ;;  %14241 = vmatprep.mubr.msk.bf16.mxu0 %vm2433_vm2, %v14967_v48  ;;  %v14968_v59 = vld [vmem:[%s18602_s16 + $0x458] sm:$0xff]  }
 0xd21   : > { %v14303_v18 = vpop.f32.mrf.mxu1  ;;  %14404 = vmatmul.mubr.msk.bf16.gmra.mxu1 %vm1531_vm0, %v9579_v49  ;;  %v17400_v10 = vpop.f32.mrf.mxu0  ;;  %v9581_v49 = vpack.c.bf16 %v17148_v44, %v17136_v38 }
 0xd22   : > { %v17403_v37 = vadd.f32 %v14303_v18, %v17140_v39  ;;  %14407 = vmatprep.mubr.msk.bf16.mxu1 %vm1531_vm0, %v9580_v20  ;;  %v9582_v20 = vpack.c.bf16 %v17188_v58, %v17173_v61 }
 0xd23   : > { %v10007_v23 = vpop.f32.mrf.mxu1  ;;  %v17406_v24 = vpop.f32.mrf.mxu0 }
 0xd24   : > { %v17412_v14 = vadd.f32 %v10007_v23, %v17146_v8 }
 0xd25   : > { %v14304_v48 = vpop.f32.mrf.mxu1  ;;  %v17417_v2 = vpop.f32.mrf.mxu0 }
 0xd26   : > { %v17420_v39 = vadd.f32 %v14304_v48, %v17156_v29 }
 0xd27   : > { %v10010_v31 = vpop.f32.mrf.mxu1  ;;  %v17426_v18 = vpop.f32.mrf.mxu0  ;;  %14242 = vmatmul.mubr.msk.bf16.gmra.mxu0 %vm2433_vm2, %v14968_v59  ;;  %v14971_v59 = vld [vmem:[%s18602_s16 + $0x470] sm:$0xff]  }
 0xd28   : > { %v17430_v8 = vadd.f32 %v10010_v31, %v17164_v19  ;;  %14245 = vmatprep.mubr.msk.bf16.mxu0 %vm2433_vm2, %v14969_v47  ;;  %v14970_v19 = vld [vmem:[%s18602_s16 + $0x468] sm:$0xff]  }
 0xd29   : > { %v14307_v23 = vpop.f32.mrf.mxu1  ;;  %14408 = vmatmul.mubr.msk.bf16.gmra.mxu1 %vm1531_vm0, %v9581_v49  ;;  %v17434_v29 = vpop.f32.mrf.mxu0  ;;  %v9583_v49 = vpack.c.bf16 %v17178_v11, %v17166_v34 }
 0xd2a   : > { %v17437_v61 = vadd.f32 %v14307_v23, %v17170_v57  ;;  %14411 = vmatprep.mubr.msk.bf16.mxu1 %vm1531_vm0, %v9582_v20  ;;  %v9584_v20 = vpack.c.bf16 %v17218_v6, %v17203_v0 }
 0xd2b   : > { %v10023_v38 = vpop.f32.mrf.mxu1  ;;  %v17440_v44 = vpop.f32.mrf.mxu0 }
 0xd2c   : > { %v17446_v58 = vadd.f32 %v10023_v38, %v17176_v63 }
 0xd2d   : > { %v14308_v47 = vpop.f32.mrf.mxu1  ;;  %v17451_v48 = vpop.f32.mrf.mxu0 }
 0xd2e   : > { %v17454_v57 = vadd.f32 %v14308_v47, %v17186_v43 }
 0xd2f   : > { %v10026_v31 = vpop.f32.mrf.mxu1  ;;  %v17460_v23 = vpop.f32.mrf.mxu0  ;;  %14246 = vmatmul.mubr.msk.bf16.gmra.mxu0 %vm2433_vm2, %v14970_v19 }
 0xd30   : > { %18630 = vst [vmem:[#allocation15_spill] sm:$0xff] %v17460_v23  ;;  %v17464_v63 = vadd.f32 %v10026_v31, %v17194_v5  ;;  %14249 = vmatprep.mubr.msk.bf16.mxu0 %vm2433_vm2, %v14971_v59  ;;  %v14972_v5 = vld [vmem:[%s18602_s16 + $0x478] sm:$0xff]  }
 0xd31   : > { %v14311_v38 = vpop.f32.mrf.mxu1  ;;  %14412 = vmatmul.mubr.msk.bf16.gmra.mxu1 %vm1531_vm0, %v9583_v49  ;;  %v17468_v43 = vpop.f32.mrf.mxu0  ;;  %v18633_v49 = vld [vmem:[#allocation3_spill] sm:$0xff] }
 0xd32   : > { %v17471_v0 = vadd.f32 %v14311_v38, %v17200_v16  ;;  %14415 = vmatprep.mubr.msk.bf16.mxu1 %vm1531_vm0, %v9584_v20  ;;  %v9586_v16 = vpack.c.bf16 %v17248_v28, %v17233_v17  ;;  %v18632_v20 = vld [vmem:[#allocation2_spill] sm:$0xff] }
 0xd33   : > { %v10039_v34 = vpop.f32.mrf.mxu1  ;;  %v17474_v11 = vpop.f32.mrf.mxu0  ;;  %v9585_v31 = vpack.c.bf16 %v18633_v49, %v18632_v20 }
 0xd34   : > { %18631 = vst [vmem:[#allocation16_spill] sm:$0xff] %v17474_v11  ;;  %v17480_v6 = vadd.f32 %v10039_v34, %v17206_v30 }
 0xd35   : > { %v14312_v19 = vpop.f32.mrf.mxu1  ;;  %v17482_v59 = vpop.f32.mrf.mxu0 }
 0xd36   : > { %v17485_v47 = vadd.f32 %v14312_v19, %v17216_v35  ;;  %v18637_v19 = vld [vmem:[#allocation5_spill] sm:$0xff] }
 0xd37   : > { %v10042_v38 = vpop.f32.mrf.mxu1  ;;  %v17491_v11 = vpop.f32.mrf.mxu0  ;;  %14250 = vmatmul.mubr.msk.bf16.gmra.mxu0 %vm2433_vm2, %v14972_v5 }
 0xd38   : > { %18634 = vst [vmem:[#allocation2_spill] sm:$0xff] %v17491_v11  ;;  %v17495_v30 = vadd.f32 %v10042_v38, %v17224_v4  ;;  %v18638_v4 = vld [vmem:[#allocation7_spill] sm:$0xff]  ;;  %v18639_v11 = vld [vmem:[#allocation4_spill] sm:$0xff] }
 0xd39   : > { %v14315_v34 = vpop.f32.mrf.mxu1  ;;  %14416 = vmatmul.mubr.msk.bf16.gmra.mxu1 %vm1531_vm0, %v9585_v31  ;;  %v17498_v23 = vpop.f32.mrf.mxu0  ;;  %v9588_v31 = vpack.c.bf16 %v17278_v25, %v17263_v22 }
 0xd3a   : > { %v17501_v35 = vadd.f32 %v14315_v34, %v17230_v32  ;;  %14419 = vmatprep.mubr.msk.bf16.mxu1 %vm1531_vm0, %v9586_v16  ;;  %v18640_v32 = vld [vmem:[#allocation6_spill] sm:$0xff] }
 0xd3b   : > { %v10055_v17 = vpop.f32.mrf.mxu1  ;;  %v17504_v28 = vpop.f32.mrf.mxu0  ;;  %v9587_v34 = vpack.c.bf16 %v18640_v32, %v18639_v11  ;;  %v18645_v11 = vld [vmem:[#allocation9_spill] sm:$0xff] }
 0xd3c   : > { %18635 = vst [vmem:[#allocation3_spill] sm:$0xff] %v17501_v35  ;;  %18636 = vst [vmem:[#allocation17_spill] sm:$0xff] %v17504_v28  ;;  %v17507_v20 = vadd.f32 %v10055_v17, %v18637_v19 }
 0xd3d   : > { %v14316_v5 = vpop.f32.mrf.mxu1  ;;  %v17509_v49 = vpop.f32.mrf.mxu0 }
 0xd3e   : > { %v17512_v38 = vadd.f32 %v14316_v5, %v18638_v4 }
 0xd3f   : > { %v10058_v35 = vpop.f32.mrf.mxu1  ;;  %v17518_v16 = vpop.f32.mrf.mxu0 }
 0xd40   : > { %18641 = vst [vmem:[#allocation5_spill] sm:$0xff] %v17518_v16  ;;  %v17521_v28 = vadd.f32 %v10058_v35, %v17254_v7  ;;  %v18646_v7 = vld [vmem:[#allocation11_spill] sm:$0xff] }
 0xd41   : > { %v14319_v17 = vpop.f32.mrf.mxu1  ;;  %14420 = vmatmul.mubr.msk.bf16.gmra.mxu1 %vm1531_vm0, %v9587_v34  ;;  %v17524_v19 = vpop.f32.mrf.mxu0  ;;  %v9590_v34 = vpack.c.bf16 %v17315_v45, %v17296_v55  ;;  %v18651_v45 = vld [vmem:[#allocation13_spill] sm:$0xff] }
 0xd42   : > { %18642 = vst [vmem:[#allocation7_spill] sm:$0xff] %v17521_v28  ;;  %v17527_v5 = vadd.f32 %v14319_v17, %v17260_v15  ;;  %14425 = vmatprep.mubr.msk.bf16.mxu1 %vm1531_vm0, %v9588_v31  ;;  %v18647_v28 = vld [vmem:[#allocation8_spill] sm:$0xff]  ;;  %v18648_v15 = vld [vmem:[#allocation10_spill] sm:$0xff] }
 0xd43   : > { %v10071_v22 = vpop.f32.mrf.mxu1  ;;  %v17530_v25 = vpop.f32.mrf.mxu0  ;;  %v9589_v17 = vpack.c.bf16 %v18648_v15, %v18647_v28 }
 0xd44   : > { %18643 = vst [vmem:[#allocation4_spill] sm:$0xff] %v17527_v5  ;;  %18644 = vst [vmem:[#allocation6_spill] sm:$0xff] %v17530_v25  ;;  %v17533_v4 = vadd.f32 %v10071_v22, %v18645_v11  ;;  %v17549_v22 = vld [vmem:[%s18603_s17 + $0x38] sm:$0xff]  }
 0xd45   : > { %v14320_v32 = vpop.f32.mrf.mxu1  ;;  %v17535_v16 = vpop.f32.mrf.mxu0 }
 0xd46   : > { %v17538_v35 = vadd.f32 %v14320_v32, %v18646_v7 }
 0xd47   : > { %v10074_v5 = vpop.f32.mrf.mxu1  ;;  %v17544_v31 = vpop.f32.mrf.mxu0 }
 0xd48   : > { %18649 = vst [vmem:[#allocation9_spill] sm:$0xff] %v17544_v31  ;;  %v17552_v11 = vadd.f32 %v10074_v5, %v17284_v9 }
 0xd49   : > { %v14325_v25 = vpop.f32.mrf.mxu1  ;;  %14426 = vmatmul.mubr.msk.bf16.vlgmr.msra.gmra.mxu1 %vm1531_vm0, %v9589_v17  ;;  %v17555_v32 = vpop.f32.mrf.mxu0 }
 0xd4a   : > { %v17558_v55 = vadd.f32 %v14325_v25, %v17299_v52  ;;  %14429 = vmatprep.mubr.msk.bf16.mxu1 %vm1531_vm0, %v9590_v34  ;;  %14458 = vmatpush3.bf16.msra.mxu1 %v18651_v45  ;;  %v9592_v52 = vpack.c.bf16 %v17349_v3, %v17332_v26  ;;  %v18653_v25 = vld [vmem:[#allocation12_spill] sm:$0xff]  ;;  %v18654_v34 = vld [vmem:[#allocation14_spill] sm:$0xff] }
 0xd4b   : > { %v10176_v28 = vpop.f32.mrf.mxu1  ;;  %v17562_v7 = vpop.f32.mrf.mxu0  ;;  %14491 = vmatprep.subr.bf16.mxu1 %v17549_v22  ;;  %v9591_v45 = vpack.c.bf16 %v18654_v34, %v18653_v25 }
 0xd4c   : > { %18650 = vst [vmem:[#allocation11_spill] sm:$0xff] %v17558_v55  ;;  %18652 = vst [vmem:[#allocation8_spill] sm:$0xff] %v17562_v7  ;;  %v17566_v9 = vadd.f32 %v10176_v28, %v17310_v40 }
 0xd4d   : > { %v14326_v5 = vpop.f32.mrf.mxu1  ;;  %v17568_v15 = vpop.f32.mrf.mxu0 }
 0xd4e   : > { %v17571_v17 = vadd.f32 %v14326_v5, %v17318_v27 }
 0xd4f   : > { %v10179_v31 = vpop.f32.mrf.mxu1  ;;  %v17577_v55 = vpop.f32.mrf.mxu0 }
 0xd50   : > { %v17580_v7 = vadd.f32 %v10179_v31, %v17328_v50  ;;  %v9594_v31 = vpack.c.bf16 %v17383_v33, %v17366_v1 }
 0xd51   : > { %v14329_v40 = vpop.f32.mrf.mxu1  ;;  %14430 = vmatmul.mubr.msk.bf16.gmra.mxu1 %vm1531_vm0, %v9591_v45  ;;  %v17583_v28 = vpop.f32.mrf.mxu0 }
 0xd52   : > { %v17586_v27 = vadd.f32 %v14329_v40, %v17335_v56  ;;  %14433 = vmatprep.mubr.msk.bf16.mxu1 %vm1531_vm0, %v9592_v52  ;;  %v9593_v56 = vpack.c.bf16 %v17338_v53, %v17324_v54 }
 0xd53   : > { %v10192_v26 = vpop.f32.mrf.mxu1  ;;  %v17589_v3 = vpop.f32.mrf.mxu0 }
 0xd54   : > { %v17592_v5 = vadd.f32 %v10192_v26, %v17344_v60 }
 0xd55   : > { %v14330_v25 = vpop.f32.mrf.mxu1  ;;  %v17594_v34 = vpop.f32.mrf.mxu0 }
 0xd56   : > { %v17597_v50 = vadd.f32 %v14330_v25, %v17352_v42 }
 0xd57   : > { %v10195_v45 = vpop.f32.mrf.mxu1  ;;  %v17603_v52 = vpop.f32.mrf.mxu0 }
 0xd58   : > { %v17606_v40 = vadd.f32 %v10195_v45, %v17362_v41 }
 0xd59   : > { %v14333_v60 = vpop.f32.mrf.mxu1  ;;  %14434 = vmatmul.mubr.msk.bf16.gmra.mxu1 %vm1531_vm0, %v9593_v56  ;;  %v17609_v26 = vpop.f32.mrf.mxu0  ;;  %v9596_v56 = vpack.c.bf16 %v17417_v2, %v17400_v10 }
 0xd5a   : > { %v17612_v42 = vadd.f32 %v14333_v60, %v17369_v12  ;;  %14437 = vmatprep.mubr.msk.bf16.mxu1 %vm1531_vm0, %v9594_v31  ;;  %v9595_v12 = vpack.c.bf16 %v17372_v46, %v17358_v62 }
 0xd5b   : > { %v10208_v1 = vpop.f32.mrf.mxu1  ;;  %v17615_v33 = vpop.f32.mrf.mxu0 }
 0xd5c   : > { %v17618_v54 = vadd.f32 %v10208_v1, %v17378_v21 }
 0xd5d   : > { %v14334_v53 = vpop.f32.mrf.mxu1  ;;  %v17620_v25 = vpop.f32.mrf.mxu0 }
 0xd5e   : > { %v17623_v41 = vadd.f32 %v14334_v53, %v17386_v13 }
 0xd5f   : > { %v10211_v45 = vpop.f32.mrf.mxu1  ;;  %v17629_v31 = vpop.f32.mrf.mxu0 }
 0xd60   : > { %v17632_v60 = vadd.f32 %v10211_v45, %v17396_v51 }
 0xd61   : > { %v14337_v21 = vpop.f32.mrf.mxu1  ;;  %14438 = vmatmul.mubr.msk.bf16.gmra.mxu1 %vm1531_vm0, %v9595_v12  ;;  %v17635_v1 = vpop.f32.mrf.mxu0  ;;  %v9598_v12 = vpack.c.bf16 %v17451_v48, %v17434_v29 }
 0xd62   : > { %v17638_v13 = vadd.f32 %v14337_v21, %v17403_v37  ;;  %14441 = vmatprep.mubr.msk.bf16.mxu1 %vm1531_vm0, %v9596_v56  ;;  %v9597_v37 = vpack.c.bf16 %v17406_v24, %v17392_v36 }
 0xd63   : > { %v10224_v10 = vpop.f32.mrf.mxu1  ;;  %v17641_v2 = vpop.f32.mrf.mxu0 }
 0xd64   : > { %v17644_v62 = vadd.f32 %v10224_v10, %v17412_v14 }
 0xd65   : > { %v14338_v46 = vpop.f32.mrf.mxu1  ;;  %v17646_v53 = vpop.f32.mrf.mxu0 }
 0xd66   : > { %v17649_v51 = vadd.f32 %v14338_v46, %v17420_v39 }
 0xd67   : > { %v10227_v45 = vpop.f32.mrf.mxu1  ;;  %v17655_v56 = vpop.f32.mrf.mxu0 }
 0xd68   : > { %v17658_v21 = vadd.f32 %v10227_v45, %v17430_v8 }
 0xd69   : > { %v14341_v14 = vpop.f32.mrf.mxu1  ;;  %14442 = vmatmul.mubr.msk.bf16.gmra.mxu1 %vm1531_vm0, %v9597_v37  ;;  %v17661_v10 = vpop.f32.mrf.mxu0  ;;  %v9600_v37 = vpack.c.bf16 %v17482_v59, %v17468_v43 }
 0xd6a   : > { %v17664_v39 = vadd.f32 %v14341_v14, %v17437_v61  ;;  %14445 = vmatprep.mubr.msk.bf16.mxu1 %vm1531_vm0, %v9598_v12  ;;  %v9599_v61 = vpack.c.bf16 %v17440_v44, %v17426_v18 }
 0xd6b   : > { %v10240_v29 = vpop.f32.mrf.mxu1  ;;  %v17667_v48 = vpop.f32.mrf.mxu0 }
 0xd6c   : > { %v17670_v36 = vadd.f32 %v10240_v29, %v17446_v58 }
 0xd6d   : > { %v14342_v24 = vpop.f32.mrf.mxu1  ;;  %v17672_v46 = vpop.f32.mrf.mxu0 }
 0xd6e   : > { %v17675_v8 = vadd.f32 %v14342_v24, %v17454_v57 }
 0xd6f   : > { %v10243_v45 = vpop.f32.mrf.mxu1  ;;  %v17681_v12 = vpop.f32.mrf.mxu0 }
 0xd70   : > { %18655 = vst [vmem:[#allocation10_spill] sm:$0xff] %v17681_v12  ;;  %v17684_v14 = vadd.f32 %v10243_v45, %v17464_v63  ;;  %v18658_v45 = vld [vmem:[#allocation15_spill] sm:$0xff] }
 0xd71   : > { %v14345_v58 = vpop.f32.mrf.mxu1  ;;  %14446 = vmatmul.mubr.msk.bf16.gmra.mxu1 %vm1531_vm0, %v9599_v61  ;;  %v17687_v29 = vpop.f32.mrf.mxu0  ;;  %v9602_v61 = vpack.c.bf16 %v17509_v49, %v17498_v23 }
 0xd72   : > { %v17690_v57 = vadd.f32 %v14345_v58, %v17471_v0  ;;  %14449 = vmatprep.mubr.msk.bf16.mxu1 %vm1531_vm0, %v9600_v37  ;;  %v18659_v0 = vld [vmem:[#allocation16_spill] sm:$0xff] }
 0xd73   : > { %v10256_v43 = vpop.f32.mrf.mxu1  ;;  %v17693_v59 = vpop.f32.mrf.mxu0  ;;  %v9601_v58 = vpack.c.bf16 %v18659_v0, %v18658_v45 }
 0xd74   : > { %18656 = vst [vmem:[#allocation13_spill] sm:$0xff] %v17693_v59  ;;  %v17696_v18 = vadd.f32 %v10256_v43, %v17480_v6 }
 0xd75   : > { %v14346_v44 = vpop.f32.mrf.mxu1  ;;  %v17698_v24 = vpop.f32.mrf.mxu0 }
 0xd76   : > { %18657 = vst [vmem:[#allocation12_spill] sm:$0xff] %v17696_v18  ;;  %v17701_v63 = vadd.f32 %v14346_v44, %v17485_v47  ;;  %v18661_v18 = vld [vmem:[#allocation3_spill] sm:$0xff] }
 0xd77   : > { %v10259_v12 = vpop.f32.mrf.mxu1  ;;  %v17707_v37 = vpop.f32.mrf.mxu0 }
 0xd78   : > { %18660 = vst [vmem:[#allocation14_spill] sm:$0xff] %v17707_v37  ;;  %v17710_v59 = vadd.f32 %v10259_v12, %v17495_v30  ;;  %v9604_v12 = vpack.c.bf16 %v17535_v16, %v17524_v19 }
 0xd79   : > { %v14349_v6 = vpop.f32.mrf.mxu1  ;;  %14450 = vmatmul.mubr.msk.bf16.gmra.mxu1 %vm1531_vm0, %v9601_v58  ;;  %v17713_v43 = vpop.f32.mrf.mxu0  ;;  %v18665_v58 = vld [vmem:[#allocation2_spill] sm:$0xff] }
 0xd7a   : > { %v17716_v47 = vadd.f32 %v14349_v6, %v18661_v18  ;;  %14453 = vmatprep.mubr.msk.bf16.mxu1 %vm1531_vm0, %v9602_v61  ;;  %v18666_v18 = vld [vmem:[#allocation17_spill] sm:$0xff] }
 0xd7b   : > { %v10272_v23 = vpop.f32.mrf.mxu1  ;;  %v17719_v49 = vpop.f32.mrf.mxu0  ;;  %v9603_v6 = vpack.c.bf16 %v18666_v18, %v18665_v58 }
 0xd7c   : > { %18662 = vst [vmem:[#allocation15_spill] sm:$0xff] %v17716_v47  ;;  %18663 = vst [vmem:[#allocation16_spill] sm:$0xff] %v17719_v49  ;;  %v17722_v44 = vadd.f32 %v10272_v23, %v17507_v20  ;;  %v18668_v47 = vld [vmem:[#allocation7_spill] sm:$0xff] }
 0xd7d   : > { %v14350_v45 = vpop.f32.mrf.mxu1  ;;  %v17724_v0 = vpop.f32.mrf.mxu0 }
 0xd7e   : > { %18664 = vst [vmem:[#allocation3_spill] sm:$0xff] %v17722_v44  ;;  %v17727_v30 = vadd.f32 %v14350_v45, %v17512_v38  ;;  %v18669_v44 = vld [vmem:[#allocation4_spill] sm:$0xff] }
 0xd7f   : > { %v10275_v37 = vpop.f32.mrf.mxu1  ;;  %v17733_v61 = vpop.f32.mrf.mxu0 }
 0xd80   : > { %18667 = vst [vmem:[#allocation2_spill] sm:$0xff] %v17733_v61  ;;  %v17736_v49 = vadd.f32 %v10275_v37, %v18668_v47  ;;  %v9606_v47 = vpack.c.bf16 %v17568_v15, %v17555_v32  ;;  %v18674_v32 = vld [vmem:[#allocation11_spill] sm:$0xff] }
 0xd81   : > { %v14353_v20 = vpop.f32.mrf.mxu1  ;;  %14454 = vmatmul.mubr.msk.bf16.gmra.mxu1 %vm1531_vm0, %v9603_v6  ;;  %v17739_v23 = vpop.f32.mrf.mxu0  ;;  %v18671_v6 = vld [vmem:[#allocation5_spill] sm:$0xff] }
 0xd82   : > { %v17742_v38 = vadd.f32 %v14353_v20, %v18669_v44  ;;  %14459 = vmatprep.mubr.msk.bf16.mxu1 %vm1531_vm0, %v9604_v12  ;;  %v18672_v44 = vld [vmem:[#allocation6_spill] sm:$0xff] }
 0xd83   : > { %v10288_v16 = vpop.f32.mrf.mxu1  ;;  %v17745_v19 = vpop.f32.mrf.mxu0  ;;  %v9605_v20 = vpack.c.bf16 %v18672_v44, %v18671_v6 }
 0xd84   : > { %18670 = vst [vmem:[#allocation17_spill] sm:$0xff] %v17745_v19  ;;  %v17748_v45 = vadd.f32 %v10288_v16, %v17533_v4  ;;  %v17764_v4 = vld [vmem:[%s18603_s17 + $0x40] sm:$0xff]  }
 0xd85   : > { %v14354_v58 = vpop.f32.mrf.mxu1  ;;  %v17750_v18 = vpop.f32.mrf.mxu0 }
 0xd86   : > { %v17753_v37 = vadd.f32 %v14354_v58, %v17538_v35 }
 0xd87   : > { %v10291_v61 = vpop.f32.mrf.mxu1  ;;  %v17759_v12 = vpop.f32.mrf.mxu0 }
 0xd88   : > { %18673 = vst [vmem:[#allocation7_spill] sm:$0xff] %v17759_v12  ;;  %v17767_v16 = vadd.f32 %v10291_v61, %v17552_v11 }
 0xd89   : > { %v14359_v19 = vpop.f32.mrf.mxu1  ;;  %14460 = vmatmul.mubr.msk.bf16.vlgmr.msra.gmra.mxu1 %vm1531_vm0, %v9605_v20  ;;  %v17770_v35 = vpop.f32.mrf.mxu0 }
 0xd8a   : > { %v17773_v15 = vadd.f32 %v14359_v19, %v18674_v32  ;;  %14463 = vmatprep.mubr.msk.bf16.mxu1 %vm1531_vm0, %v9606_v47  ;;  %14492 = vmatpush3.bf16.msra.mxu1 %v17549_v22  ;;  %v9608_v19 = vpack.c.bf16 %v17594_v34, %v17583_v28  ;;  %v18677_v47 = vld [vmem:[#allocation9_spill] sm:$0xff]  ;;  %v18678_v32 = vld [vmem:[#allocation8_spill] sm:$0xff] }
 0xd8b   : > { %v10425_v58 = vpop.f32.mrf.mxu1  ;;  %v17777_v6 = vpop.f32.mrf.mxu0  ;;  %14525 = vmatprep.subr.bf16.mxu1 %v17764_v4  ;;  %v9607_v22 = vpack.c.bf16 %v18678_v32, %v18677_v47 }
 0xd8c   : > { %18675 = vst [vmem:[#allocation4_spill] sm:$0xff] %v17773_v15  ;;  %18676 = vst [vmem:[#allocation5_spill] sm:$0xff] %v17777_v6  ;;  %v17781_v11 = vadd.f32 %v10425_v58, %v17566_v9 }
 0xd8d   : > { %v14360_v61 = vpop.f32.mrf.mxu1  ;;  %v17783_v44 = vpop.f32.mrf.mxu0 }
 0xd8e   : > { %v17786_v20 = vadd.f32 %v14360_v61, %v17571_v17 }
 0xd8f   : > { %v10428_v12 = vpop.f32.mrf.mxu1  ;;  %v17792_v15 = vpop.f32.mrf.mxu0 }
 0xd90   : > { %v17795_v6 = vadd.f32 %v10428_v12, %v17580_v7  ;;  %v9610_v12 = vpack.c.bf16 %v17620_v25, %v17609_v26 }
 0xd91   : > { %v14363_v9 = vpop.f32.mrf.mxu1  ;;  %14464 = vmatmul.mubr.msk.bf16.gmra.mxu1 %vm1531_vm0, %v9607_v22  ;;  %v17798_v58 = vpop.f32.mrf.mxu0 }
 0xd92   : > { %v17801_v17 = vadd.f32 %v14363_v9, %v17586_v27  ;;  %14467 = vmatprep.mubr.msk.bf16.mxu1 %vm1531_vm0, %v9608_v19  ;;  %v9609_v27 = vpack.c.bf16 %v17589_v3, %v17577_v55 }
 0xd93   : > { %v10441_v28 = vpop.f32.mrf.mxu1  ;;  %v17804_v34 = vpop.f32.mrf.mxu0 }
 0xd94   : > { %v17807_v61 = vadd.f32 %v10441_v28, %v17592_v5 }
 0xd95   : > { %v14364_v47 = vpop.f32.mrf.mxu1  ;;  %v17809_v32 = vpop.f32.mrf.mxu0 }
 0xd96   : > { %v17812_v7 = vadd.f32 %v14364_v47, %v17597_v50 }
 0xd97   : > { %v10444_v22 = vpop.f32.mrf.mxu1  ;;  %v17818_v19 = vpop.f32.mrf.mxu0 }
 0xd98   : > { %v17821_v9 = vadd.f32 %v10444_v22, %v17606_v40 }
 0xd99   : > { %v14367_v5 = vpop.f32.mrf.mxu1  ;;  %14468 = vmatmul.mubr.msk.bf16.gmra.mxu1 %vm1531_vm0, %v9609_v27  ;;  %v17824_v28 = vpop.f32.mrf.mxu0  ;;  %v9612_v27 = vpack.c.bf16 %v17646_v53, %v17635_v1 }
 0xd9a   : > { %v17827_v50 = vadd.f32 %v14367_v5, %v17612_v42  ;;  %14471 = vmatprep.mubr.msk.bf16.mxu1 %vm1531_vm0, %v9610_v12  ;;  %v9611_v42 = vpack.c.bf16 %v17615_v33, %v17603_v52 }
 0xd9b   : > { %v10457_v26 = vpop.f32.mrf.mxu1  ;;  %v17830_v25 = vpop.f32.mrf.mxu0 }
 0xd9c   : > { %v17833_v55 = vadd.f32 %v10457_v26, %v17618_v54 }
 0xd9d   : > { %v14368_v3 = vpop.f32.mrf.mxu1  ;;  %v17835_v47 = vpop.f32.mrf.mxu0 }
 0xd9e   : > { %v17838_v40 = vadd.f32 %v14368_v3, %v17623_v41 }
 0xd9f   : > { %v10460_v22 = vpop.f32.mrf.mxu1  ;;  %v17844_v12 = vpop.f32.mrf.mxu0 }
 0xda0   : > { %v17847_v5 = vadd.f32 %v10460_v22, %v17632_v60 }
 0xda1   : > { %v14371_v54 = vpop.f32.mrf.mxu1  ;;  %14472 = vmatmul.mubr.msk.bf16.gmra.mxu1 %vm1531_vm0, %v9611_v42  ;;  %v17850_v26 = vpop.f32.mrf.mxu0  ;;  %v9614_v42 = vpack.c.bf16 %v17672_v46, %v17661_v10 }
 0xda2   : > { %v17853_v41 = vadd.f32 %v14371_v54, %v17638_v13  ;;  %14475 = vmatprep.mubr.msk.bf16.mxu1 %vm1531_vm0, %v9612_v27  ;;  %v9613_v13 = vpack.c.bf16 %v17641_v2, %v17629_v31 }
 0xda3   : > { %v10473_v1 = vpop.f32.mrf.mxu1  ;;  %v17856_v53 = vpop.f32.mrf.mxu0 }
 0xda4   : > { %v17859_v52 = vadd.f32 %v10473_v1, %v17644_v62 }
 0xda5   : > { %v14372_v33 = vpop.f32.mrf.mxu1  ;;  %v17861_v3 = vpop.f32.mrf.mxu0 }
 0xda6   : > { %v17864_v60 = vadd.f32 %v14372_v33, %v17649_v51 }
 0xda7   : > { %v10476_v22 = vpop.f32.mrf.mxu1  ;;  %v17870_v27 = vpop.f32.mrf.mxu0 }
 0xda8   : > { %v17873_v54 = vadd.f32 %v10476_v22, %v17658_v21 }
 0xda9   : > { %v14375_v62 = vpop.f32.mrf.mxu1  ;;  %14476 = vmatmul.mubr.msk.bf16.gmra.mxu1 %vm1531_vm0, %v9613_v13  ;;  %v17876_v1 = vpop.f32.mrf.mxu0  ;;  %v9616_v13 = vpack.c.bf16 %v17698_v24, %v17687_v29 }
 0xdaa   : > { %v17879_v51 = vadd.f32 %v14375_v62, %v17664_v39  ;;  %14479 = vmatprep.mubr.msk.bf16.mxu1 %vm1531_vm0, %v9614_v42  ;;  %v9615_v39 = vpack.c.bf16 %v17667_v48, %v17655_v56  ;;  %v18682_v56 = vld [vmem:[#allocation12_spill] sm:$0xff] }
 0xdab   : > { %v10489_v10 = vpop.f32.mrf.mxu1  ;;  %v17882_v46 = vpop.f32.mrf.mxu0 }
 0xdac   : > { %v17885_v31 = vadd.f32 %v10489_v10, %v17670_v36 }
 0xdad   : > { %v14376_v2 = vpop.f32.mrf.mxu1  ;;  %v17887_v33 = vpop.f32.mrf.mxu0 }
 0xdae   : > { %v17890_v21 = vadd.f32 %v14376_v2, %v17675_v8 }
 0xdaf   : > { %v10492_v22 = vpop.f32.mrf.mxu1  ;;  %v17896_v42 = vpop.f32.mrf.mxu0 }
 0xdb0   : > { %18679 = vst [vmem:[#allocation6_spill] sm:$0xff] %v17896_v42  ;;  %v17899_v62 = vadd.f32 %v10492_v22, %v17684_v14  ;;  %v18684_v22 = vld [vmem:[#allocation10_spill] sm:$0xff] }
 0xdb1   : > { %v14379_v36 = vpop.f32.mrf.mxu1  ;;  %14480 = vmatmul.mubr.msk.bf16.gmra.mxu1 %vm1531_vm0, %v9615_v39  ;;  %v17902_v10 = vpop.f32.mrf.mxu0  ;;  %v9618_v39 = vpack.c.bf16 %v17724_v0, %v17713_v43 }
 0xdb2   : > { %v17905_v8 = vadd.f32 %v14379_v36, %v17690_v57  ;;  %14483 = vmatprep.mubr.msk.bf16.mxu1 %vm1531_vm0, %v9616_v13  ;;  %v18685_v57 = vld [vmem:[#allocation13_spill] sm:$0xff] }
 0xdb3   : > { %v10505_v29 = vpop.f32.mrf.mxu1  ;;  %v17908_v24 = vpop.f32.mrf.mxu0  ;;  %v9617_v36 = vpack.c.bf16 %v18685_v57, %v18684_v22 }
 0xdb4   : > { %18680 = vst [vmem:[#allocation11_spill] sm:$0xff] %v17905_v8  ;;  %18681 = vst [vmem:[#allocation9_spill] sm:$0xff] %v17908_v24  ;;  %v17911_v48 = vadd.f32 %v10505_v29, %v18682_v56 }
 0xdb5   : > { %v14380_v2 = vpop.f32.mrf.mxu1  ;;  %v17913_v42 = vpop.f32.mrf.mxu0 }
 0xdb6   : > { %18683 = vst [vmem:[#allocation8_spill] sm:$0xff] %v17911_v48  ;;  %v17916_v14 = vadd.f32 %v14380_v2, %v17701_v63  ;;  %v18687_v48 = vld [vmem:[#allocation15_spill] sm:$0xff] }
 0xdb7   : > { %v10508_v8 = vpop.f32.mrf.mxu1  ;;  %v17922_v13 = vpop.f32.mrf.mxu0  ;;  %v18690_v2 = vld [vmem:[#allocation3_spill] sm:$0xff] }
 0xdb8   : > { %18686 = vst [vmem:[#allocation12_spill] sm:$0xff] %v17922_v13  ;;  %v17925_v24 = vadd.f32 %v10508_v8, %v17710_v59  ;;  %v9620_v8 = vpack.c.bf16 %v17750_v18, %v17739_v23 }
 0xdb9   : > { %v14383_v29 = vpop.f32.mrf.mxu1  ;;  %14484 = vmatmul.mubr.msk.bf16.gmra.mxu1 %vm1531_vm0, %v9617_v36  ;;  %v17928_v56 = vpop.f32.mrf.mxu0  ;;  %v18691_v36 = vld [vmem:[#allocation14_spill] sm:$0xff] }
 0xdba   : > { %v17931_v63 = vadd.f32 %v14383_v29, %v18687_v48  ;;  %14487 = vmatprep.mubr.msk.bf16.mxu1 %vm1531_vm0, %v9618_v39  ;;  %v18692_v48 = vld [vmem:[#allocation16_spill] sm:$0xff] }
 0xdbb   : > { %v10521_v43 = vpop.f32.mrf.mxu1  ;;  %v17934_v0 = vpop.f32.mrf.mxu0  ;;  %v9619_v29 = vpack.c.bf16 %v18692_v48, %v18691_v36 }
 0xdbc   : > { %18688 = vst [vmem:[#allocation10_spill] sm:$0xff] %v17931_v63  ;;  %18689 = vst [vmem:[#allocation13_spill] sm:$0xff] %v17934_v0  ;;  %v17937_v22 = vadd.f32 %v10521_v43, %v18690_v2 }
 0xdbd   : > { %v14384_v57 = vpop.f32.mrf.mxu1  ;;  %v17939_v13 = vpop.f32.mrf.mxu0 }
 0xdbe   : > { %v17942_v59 = vadd.f32 %v14384_v57, %v17727_v30 }
 0xdbf   : > { %v10524_v63 = vpop.f32.mrf.mxu1  ;;  %v17948_v39 = vpop.f32.mrf.mxu0 }
 0xdc0   : > { %18693 = vst [vmem:[#allocation15_spill] sm:$0xff] %v17948_v39  ;;  %v17951_v0 = vadd.f32 %v10524_v63, %v17736_v49  ;;  %v9622_v63 = vpack.c.bf16 %v17783_v44, %v17770_v35 }
 0xdc1   : > { %v14387_v43 = vpop.f32.mrf.mxu1  ;;  %14488 = vmatmul.mubr.msk.bf16.gmra.mxu1 %vm1531_vm0, %v9619_v29  ;;  %v17954_v2 = vpop.f32.mrf.mxu0  ;;  %v18696_v29 = vld [vmem:[#allocation2_spill] sm:$0xff] }
 0xdc2   : > { %v17957_v30 = vadd.f32 %v14387_v43, %v17742_v38  ;;  %14493 = vmatprep.mubr.msk.bf16.mxu1 %vm1531_vm0, %v9620_v8  ;;  %v18697_v38 = vld [vmem:[#allocation17_spill] sm:$0xff] }
 0xdc3   : > { %v10537_v23 = vpop.f32.mrf.mxu1  ;;  %v17960_v18 = vpop.f32.mrf.mxu0  ;;  %v9621_v43 = vpack.c.bf16 %v18697_v38, %v18696_v29  ;;  %v18699_v29 = vld [vmem:[#allocation7_spill] sm:$0xff]  ;;  %v18700_v38 = vld [vmem:[#allocation5_spill] sm:$0xff] }
 0xdc4   : > { %18694 = vst [vmem:[#allocation3_spill] sm:$0xff] %v17960_v18  ;;  %v17963_v57 = vadd.f32 %v10537_v23, %v17748_v45  ;;  %v18698_v23 = vld [vmem:[#allocation4_spill] sm:$0xff] }
 0xdc5   : > { %v14388_v36 = vpop.f32.mrf.mxu1  ;;  %v17965_v48 = vpop.f32.mrf.mxu0 }
 0xdc6   : > { %18695 = vst [vmem:[#allocation14_spill] sm:$0xff] %v17963_v57  ;;  %v17968_v49 = vadd.f32 %v14388_v36, %v17753_v37 }
 0xdc7   : > { %v10540_v39 = vpop.f32.mrf.mxu1  ;;  %v17974_v8 = vpop.f32.mrf.mxu0 }
 0xdc8   : > { %v17977_v18 = vadd.f32 %v10540_v39, %v17767_v16  ;;  %v9624_v39 = vpack.c.bf16 %v17809_v32, %v17798_v58 }
 0xdc9   : > { %v14393_v45 = vpop.f32.mrf.mxu1  ;;  %14494 = vmatmul.mubr.msk.bf16.vlgmr.msra.gmra.mxu1 %vm1531_vm0, %v9621_v43  ;;  %v17985_v35 = vpop.f32.mrf.mxu0  ;;  %v9623_v43 = vpack.c.bf16 %v18700_v38, %v18699_v29  ;;  %v9625_v29 = vpack.c.bf16 %v17804_v34, %v17792_v15 }
 0xdca   : > { %v17981_v57 = vadd.f32 %v14393_v45, %v18698_v23  ;;  %14497 = vmatprep.mubr.msk.bf16.mxu1 %vm1531_vm0, %v9622_v63  ;;  %14526 = vmatpush3.bf16.msra.mxu1 %v17764_v4 }
 0xdcb   : > { %v10674_v37 = vpop.f32.mrf.mxu1  ;;  %v17997_v63 = vpop.f32.mrf.mxu0 }
 0xdcc   : > { %v17988_v44 = vadd.f32 %v10674_v37, %v17781_v11 }
 0xdcd   : > { %v14394_v36 = vpop.f32.mrf.mxu1  ;;  %v18007_v37 = vpop.f32.mrf.mxu0 }
 0xdce   : > { %v17991_v16 = vadd.f32 %v14394_v36, %v17786_v20 }
 0xdcf   : > { %v10677_v45 = vpop.f32.mrf.mxu1  ;;  %v18019_v38 = vpop.f32.mrf.mxu0 }
 0xdd0   : > { %v18000_v4 = vadd.f32 %v10677_v45, %v17795_v6  ;;  %v9626_v6 = vpack.c.bf16 %v17835_v47, %v17824_v28  ;;  %v9627_v47 = vpack.c.bf16 %v17830_v25, %v17818_v19 }
 0xdd1   : > { %v14397_v23 = vpop.f32.mrf.mxu1  ;;  %14498 = vmatmul.mubr.msk.bf16.gmra.mxu1 %vm1531_vm0, %v9623_v43  ;;  %v18029_v45 = vpop.f32.mrf.mxu0 }
 0xdd2   : > { %v18004_v11 = vadd.f32 %v14397_v23, %v17801_v17  ;;  %14501 = vmatprep.mubr.msk.bf16.mxu1 %vm1531_vm0, %v9624_v39 }
 0xdd3   : > { %v10690_v20 = vpop.f32.mrf.mxu1  ;;  %v18041_v23 = vpop.f32.mrf.mxu0 }
 0xdd4   : > { %v18010_v58 = vadd.f32 %v10690_v20, %v17807_v61 }
 0xdd5   : > { %v14398_v32 = vpop.f32.mrf.mxu1 }
 0xdd6   : > { %v18013_v36 = vadd.f32 %v14398_v32, %v17812_v7 }
 0xdd7   : > { %v10693_v17 = vpop.f32.mrf.mxu1 }
 0xdd8   : > { %v18022_v39 = vadd.f32 %v10693_v17, %v17821_v9  ;;  %v9628_v9 = vpack.c.bf16 %v17861_v3, %v17850_v26  ;;  %v9629_v3 = vpack.c.bf16 %v17856_v53, %v17844_v12 }
 0xdd9   : > { %v14401_v43 = vpop.f32.mrf.mxu1  ;;  %14502 = vmatmul.mubr.msk.bf16.gmra.mxu1 %vm1531_vm0, %v9625_v29 }
 0xdda   : > { %v18026_v61 = vadd.f32 %v14401_v43, %v17827_v50  ;;  %14505 = vmatprep.mubr.msk.bf16.mxu1 %vm1531_vm0, %v9626_v6  ;;  %v18051_v6 = vpop.f32.mrf.mxu0 }
 0xddb   : > { %v10706_v7 = vpop.f32.mrf.mxu1 }
 0xddc   : > { %v18032_v28 = vadd.f32 %v10706_v7, %v17833_v55  ;;  %v18063_v29 = vpop.f32.mrf.mxu0 }
 0xddd   : > { %v14402_v15 = vpop.f32.mrf.mxu1 }
 0xdde   : > { %v18035_v34 = vadd.f32 %v14402_v15, %v17838_v40  ;;  %v18073_v7 = vpop.f32.mrf.mxu0 }
 0xddf   : > { %v10709_v50 = vpop.f32.mrf.mxu1 }
 0xde0   : > { %v18044_v20 = vadd.f32 %v10709_v50, %v17847_v5  ;;  %v9630_v5 = vpack.c.bf16 %v17887_v33, %v17876_v1  ;;  %v9631_v33 = vpack.c.bf16 %v17882_v46, %v17870_v27  ;;  %v18085_v15 = vpop.f32.mrf.mxu0 }
 0xde1   : > { %v14405_v32 = vpop.f32.mrf.mxu1  ;;  %14506 = vmatmul.mubr.msk.bf16.gmra.mxu1 %vm1531_vm0, %v9627_v47 }
 0xde2   : > { %v18048_v55 = vadd.f32 %v14405_v32, %v17853_v41  ;;  %14509 = vmatprep.mubr.msk.bf16.mxu1 %vm1531_vm0, %v9628_v9  ;;  %v18095_v32 = vpop.f32.mrf.mxu0 }
 0xde3   : > { %v10722_v40 = vpop.f32.mrf.mxu1 }
 0xde4   : > { %v18054_v26 = vadd.f32 %v10722_v40, %v17859_v52  ;;  %v18703_v40 = vld [vmem:[#allocation6_spill] sm:$0xff] }
 0xde5   : > { %v14406_v19 = vpop.f32.mrf.mxu1 }
 0xde6   : > { %v18057_v25 = vadd.f32 %v14406_v19, %v17864_v60  ;;  %v18704_v19 = vld [vmem:[#allocation9_spill] sm:$0xff] }
 0xde7   : > { %v10725_v41 = vpop.f32.mrf.mxu1 }
 0xde8   : > { %v18066_v17 = vadd.f32 %v10725_v41, %v17873_v54  ;;  %v9632_v54 = vpack.c.bf16 %v17913_v42, %v17902_v10  ;;  %v18702_v42 = vld [vmem:[#allocation8_spill] sm:$0xff]  ;;  %v18107_v41 = vpop.f32.mrf.mxu0 }
 0xde9   : > { %v14409_v43 = vpop.f32.mrf.mxu1  ;;  %14510 = vmatmul.mubr.msk.bf16.gmra.mxu1 %vm1531_vm0, %v9629_v3 }
 0xdea   : > { %v18070_v52 = vadd.f32 %v14409_v43, %v17879_v51  ;;  %14513 = vmatprep.mubr.msk.bf16.mxu1 %vm1531_vm0, %v9630_v5  ;;  %v9633_v5 = vpack.c.bf16 %v18704_v19, %v18703_v40 }
 0xdeb   : > { %v10738_v60 = vpop.f32.mrf.mxu1 }
 0xdec   : > { %v18076_v1 = vadd.f32 %v10738_v60, %v17885_v31  ;;  %v18701_v31 = vld [vmem:[#allocation11_spill] sm:$0xff] }
 0xded   : > { %v14410_v12 = vpop.f32.mrf.mxu1 }
 0xdee   : > { %v18079_v53 = vadd.f32 %v14410_v12, %v17890_v21  ;;  %v18705_v12 = vld [vmem:[#allocation10_spill] sm:$0xff] }
 0xdef   : > { %v10741_v51 = vpop.f32.mrf.mxu1 }
 0xdf0   : > { %v18088_v9 = vadd.f32 %v10741_v51, %v17899_v62  ;;  %v9634_v62 = vpack.c.bf16 %v17939_v13, %v17928_v56 }
 0xdf1   : > { %v14413_v47 = vpop.f32.mrf.mxu1  ;;  %14514 = vmatmul.mubr.msk.bf16.gmra.mxu1 %vm1531_vm0, %v9631_v33  ;;  %v18117_v33 = vpop.f32.mrf.mxu0 }
 0xdf2   : > { %v18092_v50 = vadd.f32 %v14413_v47, %v18701_v31  ;;  %14517 = vmatprep.mubr.msk.bf16.mxu1 %vm1531_vm0, %v9632_v54  ;;  %v18706_v47 = vld [vmem:[#allocation12_spill] sm:$0xff]  ;;  %v18707_v31 = vld [vmem:[#allocation13_spill] sm:$0xff] }
 0xdf3   : > { %v10754_v21 = vpop.f32.mrf.mxu1 }
 0xdf4   : > { %v18098_v10 = vadd.f32 %v10754_v21, %v18702_v42  ;;  %v9635_v21 = vpack.c.bf16 %v18707_v31, %v18706_v47 }
 0xdf5   : > { %v14414_v27 = vpop.f32.mrf.mxu1 }
 0xdf6   : > { %v18101_v46 = vadd.f32 %v14414_v27, %v17916_v14  ;;  %v18129_v27 = vpop.f32.mrf.mxu0 }
 0xdf7   : > { %v10757_v3 = vpop.f32.mrf.mxu1 }
 0xdf8   : > { %v18110_v43 = vadd.f32 %v10757_v3, %v17925_v24  ;;  %v9636_v24 = vpack.c.bf16 %v17965_v48, %v17954_v2  ;;  %v9448_v19 = vpop.f32.mrf.mxu0  ;;  %v18708_v2 = vld [vmem:[#allocation14_spill] sm:$0xff] }
 0xdf9   : > { %v14417_v60 = vpop.f32.mrf.mxu1  ;;  %14518 = vmatmul.mubr.msk.bf16.gmra.mxu1 %vm1531_vm0, %v9633_v5 }
 0xdfa   : > { %v18114_v54 = vadd.f32 %v14417_v60, %v18705_v12  ;;  %14521 = vmatprep.mubr.msk.bf16.mxu1 %vm1531_vm0, %v9634_v62  ;;  %v18709_v60 = vld [vmem:[#allocation15_spill] sm:$0xff] }
 0xdfb   : > { %v10770_v14 = vpop.f32.mrf.mxu1  ;;  %v18710_v12 = vld [vmem:[#allocation3_spill] sm:$0xff] }
 0xdfc   : > { %v18120_v13 = vadd.f32 %v10770_v14, %v17937_v22  ;;  %v9637_v14 = vpack.c.bf16 %v18710_v12, %v18709_v60 }
 0xdfd   : > { %v14418_v56 = vpop.f32.mrf.mxu1 }
 0xdfe   : > { %v18123_v51 = vadd.f32 %v14418_v56, %v17942_v59 }
 0xdff   : > { %v10773_v42 = vpop.f32.mrf.mxu1 }
 0xe00   : > { %v18132_v62 = vadd.f32 %v10773_v42, %v17951_v0  ;;  %v9638_v0 = vpack.c.bf16 %v18007_v37, %v17985_v35 }
 0xe01   : > { %v14421_v40 = vpop.f32.mrf.mxu1  ;;  %14522 = vmatmul.mubr.msk.bf16.gmra.mxu1 %vm1531_vm0, %v9635_v21 }
 0xe02   : > { %v18136_v22 = vadd.f32 %v14421_v40, %v17957_v30  ;;  %14527 = vmatprep.mubr.msk.bf16.mxu1 %vm1531_vm0, %v9636_v24  ;;  %v18149_v30 = vpop.f32.mrf.mxu0  ;;  %v9639_v40 = vpack.c.bf16 %v17997_v63, %v17974_v8  ;;  %v9642_v63 = vpack.c.bf16 %v18095_v32, %v18073_v7 }
 0xe03   : > { %v10786_v59 = vpop.f32.mrf.mxu1 }
 0xe04   : > { %v18140_v48 = vadd.f32 %v10786_v59, %v18708_v2  ;;  %v9461_v21 = vpop.f32.mrf.mxu0 }
 0xe05   : > { %v14422_v5 = vpop.f32.mrf.mxu1 }
 0xe06   : > { %v18143_v3 = vadd.f32 %v14422_v5, %v17968_v49 }
 0xe07   : > { %v10789_v56 = vpop.f32.mrf.mxu1 }
 0xe08   : > { %v18152_v24 = vadd.f32 %v10789_v56, %v17977_v18  ;;  %v9640_v18 = vpack.c.bf16 %v18051_v6, %v18029_v45 }
 0xe09   : > { %v14427_v47 = vpop.f32.mrf.mxu1  ;;  %14528 = vmatmul.mubr.msk.bf16.vlgmr.msra.gmra.mxu1 %vm1531_vm0, %v9637_v14 }
 0xe0a   : > { %v18156_v31 = vadd.f32 %v14427_v47, %v17981_v57  ;;  %14531 = vmatprep.mubr.msk.bf16.mxu1 %vm1531_vm0, %v9638_v0  ;;  %v14244_v57 = vpop.f32.mrf.mxu0 }
 0xe0b   : > { %v10923_v49 = vpop.f32.mrf.mxu1 }
 0xe0c   : > { %v18160_v35 = vadd.f32 %v10923_v49, %v17988_v44  ;;  %v9464_v0 = vpop.f32.mrf.mxu0 }
 0xe0d   : > { %v14428_v37 = vpop.f32.mrf.mxu1 }
 0xe0e   : > { %v18163_v42 = vadd.f32 %v14428_v37, %v17991_v16 }
 0xe0f   : > { %v10926_v59 = vpop.f32.mrf.mxu1 }
 0xe10   : > { %v18170_v2 = vadd.f32 %v10926_v59, %v18000_v4  ;;  %v9641_v4 = vpack.c.bf16 %v18041_v23, %v18019_v38  ;;  %v9643_v23 = vpack.c.bf16 %v18085_v15, %v18063_v29  ;;  %v9646_v15 = vpack.c.bf16 %v9464_v0, %v9461_v21 }
 0xe11   : > { %v14431_v5 = vpop.f32.mrf.mxu1  ;;  %14532 = vmatmul.mubr.msk.bf16.gmra.mxu1 %vm1531_vm0, %v9639_v40 }
 0xe12   : > { %v18174_v44 = vadd.f32 %v14431_v5, %v18004_v11  ;;  %14535 = vmatprep.mubr.msk.bf16.mxu1 %vm1531_vm0, %v9640_v18  ;;  %v14247_v11 = vpop.f32.mrf.mxu0 }
 0xe13   : > { %v10939_v16 = vpop.f32.mrf.mxu1 }
 0xe14   : > { %v18178_v45 = vadd.f32 %v10939_v16, %v18010_v58  ;;  %v9477_v56 = vpop.f32.mrf.mxu0 }
 0xe15   : > { %v14432_v6 = vpop.f32.mrf.mxu1 }
 0xe16   : > { %v18181_v8 = vadd.f32 %v14432_v6, %v18013_v36  ;;  %v14248_v49 = vpop.f32.mrf.mxu0 }
 0xe17   : > { %v10942_v60 = vpop.f32.mrf.mxu1 }
 0xe18   : > { %v18188_v12 = vadd.f32 %v10942_v60, %v18022_v39  ;;  %v9644_v39 = vpack.c.bf16 %v9448_v19, %v18117_v33  ;;  %v9480_v18 = vpop.f32.mrf.mxu0 }
 0xe19   : > { %v14435_v14 = vpop.f32.mrf.mxu1  ;;  %14536 = vmatmul.mubr.msk.bf16.gmra.mxu1 %vm1531_vm0, %v9641_v4 }
 0xe1a   : > { %v18192_v58 = vadd.f32 %v14435_v14, %v18026_v61  ;;  %14539 = vmatprep.mubr.msk.bf16.mxu1 %vm1531_vm0, %v9642_v63  ;;  %v14251_v59 = vpop.f32.mrf.mxu0 }
 0xe1b   : > { %v10955_v36 = vpop.f32.mrf.mxu1 }
 0xe1c   : > { %v18196_v7 = vadd.f32 %v10955_v36, %v18032_v28 }
 0xe1d   : > { %v14436_v32 = vpop.f32.mrf.mxu1 }
 0xe1e   : > { %v18199_v38 = vadd.f32 %v14436_v32, %v18035_v34 }
 0xe1f   : > { %v10958_v47 = vpop.f32.mrf.mxu1 }
 0xe20   : > { %v18205_v61 = vadd.f32 %v10958_v47, %v18044_v20  ;;  %v9645_v20 = vpack.c.bf16 %v18129_v27, %v18107_v41  ;;  %v9648_v27 = vpack.c.bf16 %v9480_v18, %v9477_v56 }
 0xe21   : > { %v14439_v37 = vpop.f32.mrf.mxu1  ;;  %14540 = vmatmul.mubr.msk.bf16.gmra.mxu1 %vm1531_vm0, %v9643_v23 }
 0xe22   : > { %v18209_v28 = vadd.f32 %v14439_v37, %v18048_v55  ;;  %14543 = vmatprep.mubr.msk.bf16.mxu1 %vm1531_vm0, %v9644_v39 }
 0xe23   : > { %v10971_v34 = vpop.f32.mrf.mxu1 }
 0xe24   : > { %v18213_v33 = vadd.f32 %v10971_v34, %v18054_v26 }
 0xe25   : > { %v14440_v19 = vpop.f32.mrf.mxu1 }
 0xe26   : > { %v18216_v29 = vadd.f32 %v14440_v19, %v18057_v25  ;;  %v9493_v25 = vpop.f32.mrf.mxu0 }
 0xe27   : > { %v10974_v40 = vpop.f32.mrf.mxu1 }
 0xe28   : > { %v18221_v55 = vadd.f32 %v10974_v40, %v18066_v17  ;;  %v9647_v17 = vpack.c.bf16 %v14244_v57, %v18149_v30  ;;  %v14252_v63 = vpop.f32.mrf.mxu0 }
 0xe29   : > { %v14443_v5 = vpop.f32.mrf.mxu1  ;;  %14544 = vmatmul.mubr.msk.bf16.gmra.mxu1 %vm1531_vm0, %v9645_v20 }
 0xe2a   : > { %v18225_v16 = vadd.f32 %v14443_v5, %v18070_v52  ;;  %14547 = vmatprep.mubr.msk.bf16.mxu1 %vm1531_vm0, %v9646_v15  ;;  %v9496_v14 = vpop.f32.mrf.mxu0 }
 0xe2b   : > { %v10987_v26 = vpop.f32.mrf.mxu1  ;;  %v9650_v57 = vpack.c.bf16 %v9496_v14, %v9493_v25 }
 0xe2c   : > { %v18229_v21 = vadd.f32 %v10987_v26, %v18076_v1 }
 0xe2d   : > { %v14444_v0 = vpop.f32.mrf.mxu1 }
 0xe2e   : > { %v18232_v41 = vadd.f32 %v14444_v0, %v18079_v53 }
 0xe2f   : > { %v10990_v6 = vpop.f32.mrf.mxu1 }
 0xe30   : > { %v18236_v4 = vadd.f32 %v10990_v6, %v18088_v9  ;;  %v9649_v9 = vpack.c.bf16 %v14248_v49, %v14247_v11  ;;  %v9651_v11 = vpack.c.bf16 %v14252_v63, %v14251_v59 }
 0xe31   : > { %v14447_v52 = vpop.f32.mrf.mxu1  ;;  %14548 = vmatmul.mubr.msk.bf16.gmra.mxu1 %vm1531_vm0, %v9647_v17 }
 0xe32   : > { %v18240_v60 = vadd.f32 %v14447_v52, %v18092_v50  ;;  %14551 = vmatprep.mubr.msk.bf16.mxu1 %vm1531_vm0, %v9648_v27 }
 0xe33   : > { %v11003_v1 = vpop.f32.mrf.mxu1 }
 0xe34   : > { %v18244_v53 = vadd.f32 %v11003_v1, %v18098_v10 }
 0xe35   : > { %v14448_v36 = vpop.f32.mrf.mxu1 }
 0xe36   : > { %v18247_v30 = vadd.f32 %v14448_v36, %v18101_v46 }
 0xe37   : > { %v11006_v56 = vpop.f32.mrf.mxu1 }
 0xe38   : > { %v18250_v32 = vadd.f32 %v11006_v56, %v18110_v43 }
 0xe39   : > { %v14451_v39 = vpop.f32.mrf.mxu1  ;;  %14552 = vmatmul.mubr.msk.bf16.gmra.mxu1 %vm1531_vm0, %v9649_v9 }
 0xe3a   : > { %v18254_v50 = vadd.f32 %v14451_v39, %v18114_v54  ;;  %14555 = vmatprep.mubr.msk.bf16.mxu1 %vm1531_vm0, %v9650_v57 }
 0xe3b   : > { %v11019_v10 = vpop.f32.mrf.mxu1 }
 0xe3c   : > { %v18258_v23 = vadd.f32 %v11019_v10, %v18120_v13 }
 0xe3d   : > { %v14452_v46 = vpop.f32.mrf.mxu1 }
 0xe3e   : > { %v18261_v47 = vadd.f32 %v14452_v46, %v18123_v51 }
 0xe3f   : > { %v11022_v49 = vpop.f32.mrf.mxu1 }
 0xe40   : > { %v18264_v43 = vadd.f32 %v11022_v49, %v18132_v62 }
 0xe41   : > { %v14455_v37 = vpop.f32.mrf.mxu1  ;;  %14556 = vmatmul.mubr.msk.bf16.gmra.mxu1 %vm1531_vm0, %v9651_v11 }
 0xe42   : > { %v18268_v54 = vadd.f32 %v14455_v37, %v18136_v22 }
 0xe43   : > { %v11035_v34 = vpop.f32.mrf.mxu1 }
 0xe44   : > { %v18271_v18 = vadd.f32 %v11035_v34, %v18140_v48 }
 0xe45   : > { %v14456_v13 = vpop.f32.mrf.mxu1 }
 0xe46   : > { %v18274_v19 = vadd.f32 %v14456_v13, %v18143_v3 }
 0xe47   : > { %v11038_v51 = vpop.f32.mrf.mxu1 }
 0xe48   : > { %v18277_v15 = vadd.f32 %v11038_v51, %v18152_v24 }
 0xe49   : > { %v14461_v62 = vpop.f32.mrf.mxu1 }
 0xe4a   : > { %v18280_v20 = vadd.f32 %v14461_v62, %v18156_v31 }
 0xe4b   : > { %v11172_v40 = vpop.f32.mrf.mxu1 }
 0xe4c   : > { %v18283_v22 = vadd.f32 %v11172_v40, %v18160_v35 }
 0xe4d   : > { %v14462_v59 = vpop.f32.mrf.mxu1 }
 0xe4e   : > { %v18286_v48 = vadd.f32 %v14462_v59, %v18163_v42 }
 0xe4f   : > { %v11175_v5 = vpop.f32.mrf.mxu1 }
 0xe50   : > { %v18289_v3 = vadd.f32 %v11175_v5, %v18170_v2 }
 0xe51   : > { %v14465_v26 = vpop.f32.mrf.mxu1 }
 0xe52   : > { %v18292_v24 = vadd.f32 %v14465_v26, %v18174_v44 }
 0xe53   : > { %v11188_v25 = vpop.f32.mrf.mxu1 }
 0xe54   : > { %v18295_v31 = vadd.f32 %v11188_v25, %v18178_v45 }
 0xe55   : > { %v14466_v0 = vpop.f32.mrf.mxu1 }
 0xe56   : > { %v18298_v35 = vadd.f32 %v14466_v0, %v18181_v8 }
 0xe57   : > { %v11191_v27 = vpop.f32.mrf.mxu1 }
 0xe58   : > { %v18301_v42 = vadd.f32 %v11191_v27, %v18188_v12 }
 0xe59   : > { %v14469_v17 = vpop.f32.mrf.mxu1 }
 0xe5a   : > { %v18304_v2 = vadd.f32 %v14469_v17, %v18192_v58 }
 0xe5b   : > { %v11204_v6 = vpop.f32.mrf.mxu1 }
 0xe5c   : > { %v18307_v44 = vadd.f32 %v11204_v6, %v18196_v7 }
 0xe5d   : > { %v14470_v63 = vpop.f32.mrf.mxu1 }
 0xe5e   : > { %v18310_v45 = vadd.f32 %v14470_v63, %v18199_v38 }
 0xe5f   : > { %v11207_v52 = vpop.f32.mrf.mxu1 }
 0xe60   : > { %v18313_v8 = vadd.f32 %v11207_v52, %v18205_v61 }
 0xe61   : > { %v14473_v1 = vpop.f32.mrf.mxu1 }
 0xe62   : > { %v18316_v12 = vadd.f32 %v14473_v1, %v18209_v28 }
 0xe63   : > { %v11220_v14 = vpop.f32.mrf.mxu1 }
 0xe64   : > { %v18319_v58 = vadd.f32 %v11220_v14, %v18213_v33 }
 0xe65   : > { %v14474_v36 = vpop.f32.mrf.mxu1 }
 0xe66   : > { %v18322_v7 = vadd.f32 %v14474_v36, %v18216_v29 }
 0xe67   : > { %v11223_v57 = vpop.f32.mrf.mxu1 }
 0xe68   : > { %v18325_v38 = vadd.f32 %v11223_v57, %v18221_v55 }
 0xe69   : > { %v14477_v9 = vpop.f32.mrf.mxu1 }
 0xe6a   : > { %v18328_v61 = vadd.f32 %v14477_v9, %v18225_v16 }
 0xe6b   : > { %v11236_v56 = vpop.f32.mrf.mxu1 }
 0xe6c   : > { %v18331_v28 = vadd.f32 %v11236_v56, %v18229_v21 }
 0xe6d   : > { %v14478_v39 = vpop.f32.mrf.mxu1 }
 0xe6e   : > { %v18334_v33 = vadd.f32 %v14478_v39, %v18232_v41 }
 0xe6f   : > { %v11239_v10 = vpop.f32.mrf.mxu1 }
 0xe70   : > { %v18337_v29 = vadd.f32 %v11239_v10, %v18236_v4 }
 0xe71   : > { %v14481_v46 = vpop.f32.mrf.mxu1 }
 0xe72   : > { %v18340_v55 = vadd.f32 %v14481_v46, %v18240_v60 }
 0xe73   : > { %v11252_v11 = vpop.f32.mrf.mxu1 }
 0xe74   : > { %v18343_v16 = vadd.f32 %v11252_v11, %v18244_v53 }
 0xe75   : > { %v14482_v49 = vpop.f32.mrf.mxu1 }
 0xe76   : > { %v18346_v21 = vadd.f32 %v14482_v49, %v18247_v30 }
 0xe77   : > { %v11255_v37 = vpop.f32.mrf.mxu1 }
 0xe78   : > { %v18349_v41 = vadd.f32 %v11255_v37, %v18250_v32 }
 0xe79   : > { %v14485_v34 = vpop.f32.mrf.mxu1 }
 0xe7a   : > { %v18352_v4 = vadd.f32 %v14485_v34, %v18254_v50 }
 0xe7b   : > { %v11268_v13 = vpop.f32.mrf.mxu1 }
 0xe7c   : > { %v18355_v60 = vadd.f32 %v11268_v13, %v18258_v23 }
 0xe7d   : > { %v14486_v51 = vpop.f32.mrf.mxu1 }
 0xe7e   : > { %v18358_v53 = vadd.f32 %v14486_v51, %v18261_v47 }
 0xe7f   : > { %v11271_v62 = vpop.f32.mrf.mxu1 }
 0xe80   : > { %v18361_v30 = vadd.f32 %v11271_v62, %v18264_v43 }
 0xe81   : > { %v14489_v40 = vpop.f32.mrf.mxu1 }
 0xe82   : > { %v18364_v32 = vadd.f32 %v14489_v40, %v18268_v54 }
 0xe83   : > { %v11284_v59 = vpop.f32.mrf.mxu1 }
 0xe84   : > { %18711 = vst [vmem:[#allocation16_spill] sm:$0xff] %v18364_v32  ;;  %v18367_v50 = vadd.f32 %v11284_v59, %v18271_v18 }
 0xe85   : > { %v14490_v5 = vpop.f32.mrf.mxu1 }
 0xe86   : > { %18712 = vst [vmem:[#allocation2_spill] sm:$0xff] %v18367_v50  ;;  %v18370_v23 = vadd.f32 %v14490_v5, %v18274_v19  ;;  %v18426_v50 = vld [vmem:[%s18604_s18] ss:$0 sm:$0xff] }
 0xe87   : > { %v11287_v26 = vpop.f32.mrf.mxu1 }
 0xe88   : > { %18713 = vst [vmem:[#allocation17_spill] sm:$0xff] %v18370_v23  ;;  %v18373_v47 = vadd.f32 %v11287_v26, %v18277_v15 }
 0xe89   : > { %v14495_v25 = vpop.f32.mrf.mxu1 }
 0xe8a   : > { %18714 = vst [vmem:[#allocation4_spill] sm:$0xff] %v18373_v47  ;;  %v11550_v47 = vadd.f32 %v14495_v25, %v18280_v20 }
 0xe8b   : > { %v11421_v0 = vpop.f32.mrf.mxu1 }
 0xe8c   : > { %v11548_v32 = vadd.f32 %v11421_v0, %v18283_v22 }
 0xe8d   : > { %v14496_v43 = vpop.f32.mrf.mxu1 }
 0xe8e   : > { %v11551_v20 = vadd.f32 %v14496_v43, %v18286_v48 }
 0xe8f   : > { %v11424_v27 = vpop.f32.mrf.mxu1 }
 0xe91   : > { %v14499_v17 = vpop.f32.mrf.mxu1 }
 0xe92   : > { %v11554_v0 = vadd.f32 %v14499_v17, %v18292_v24 }
 0xe93   : > { %v11437_v6 = vpop.f32.mrf.mxu1 }
 0xe95   : > { %v14500_v54 = vpop.f32.mrf.mxu1 }
 0xe97   : > { %v11440_v63 = vpop.f32.mrf.mxu1 }
 0xe99   : > { %v14503_v52 = vpop.f32.mrf.mxu1 }
 0xe9b   : > { %v18375_v1 = vpop.f32.mrf.mxu1 }
 0xe9d   : > { %v18377_v18 = vpop.f32.mrf.mxu1 }
 0xe9f   : > { %v18379_v14 = vpop.f32.mrf.mxu1 }
 0xea1   : > { %v18381_v19 = vpop.f32.mrf.mxu1 }
 0xea3   : > { %v18383_v36 = vpop.f32.mrf.mxu1 }
 0xea5   : > { %v18385_v15 = vpop.f32.mrf.mxu1 }
 0xea7   : > { %v18387_v57 = vpop.f32.mrf.mxu1 }
 0xea9   : > { %v18389_v9 = vpop.f32.mrf.mxu1 }
 0xeab   : > { %v18391_v56 = vpop.f32.mrf.mxu1 }
 0xead   : > { %v18393_v39 = vpop.f32.mrf.mxu1 }
 0xeaf   : > { %v18395_v10 = vpop.f32.mrf.mxu1 }
 0xeb1   : > { %v18397_v46 = vpop.f32.mrf.mxu1 }
 0xeb3   : > { %v18399_v11 = vpop.f32.mrf.mxu1 }
 0xeb5   : > { %v18401_v49 = vpop.f32.mrf.mxu1 }
 0xeb7   : > { %v18403_v37 = vpop.f32.mrf.mxu1 }
 0xeb9   : > { %v18405_v34 = vpop.f32.mrf.mxu1 }
 0xebb   : > { %v18407_v13 = vpop.f32.mrf.mxu1 }
 0xebd   : > { %v18409_v51 = vpop.f32.mrf.mxu1 }
 0xebf   : > { %v18411_v62 = vpop.f32.mrf.mxu1 }
 0xec0   : > { %18715 = vst [vmem:[#allocation7_spill] sm:$0xff] %v18411_v62 }
 0xec1   : > { %v18413_v40 = vpop.f32.mrf.mxu1 }
 0xec2   : > { %18716 = vst [vmem:[#allocation5_spill] sm:$0xff] %v18413_v40  ;;  %v11549_v40 = vadd.f32 %v11424_v27, %v18289_v3 }
 0xec3   : > { %v18415_v59 = vpop.f32.mrf.mxu1 }
 0xec4   : > { %18717 = vst [vmem:[#allocation11_spill] sm:$0xff] %v18415_v59 }
 0xec5   : > { %v18417_v5 = vpop.f32.mrf.mxu1 }
 0xec6   : > { %18718 = vst [vmem:[#allocation8_spill] sm:$0xff] %v18417_v5 }
 0xec7   : > { %v18419_v26 = vpop.f32.mrf.mxu1 }
 0xec8   : > { %18719 = vst [vmem:[#allocation6_spill] sm:$0xff] %v18419_v26 }
 0xec9   : > { %v14529_v23 = vpop.f32.mrf.mxu1 }
 0xeca   : > { %v11799_v62 = vadd.f32 %v14529_v23, %v11550_v47 }
 0xecb   : > { %v11670_v26 = vpop.f32.mrf.mxu1 }
 0xecc   : > { %v11838_v25 = vadd.f32 %v18426_v50, %v11799_v62  ;;  %v11797_v5 = vadd.f32 %v11670_v26, %v11548_v32  ;;  %v11552_v32 = vadd.f32 %v11437_v6, %v18295_v31 }
 0xecd   : > { %v14530_v59 = vpop.f32.mrf.mxu1 }
 0xece   : > { %11870 = vst.msk [vmem:[%s18432_s28 + $0x10] sm:$0xff] %vm1531_vm0, %v11838_v25  ;;  %v11836_v22 = vadd.f32 %v18426_v50, %v11797_v5  ;;  %v11800_v23 = vadd.f32 %v14530_v59, %v11551_v20  ;;  %v11555_v59 = vadd.f32 %v14500_v54, %v18298_v35  ;;  %v11558_v25 = vadd.f32 %v14503_v52, %v18304_v2 }
 0xecf   : > { %v11673_v47 = vpop.f32.mrf.mxu1  ;;  %v11559_v2 = vadd.f32 %v18377_v18, %v18310_v45  ;;  %v11562_v45 = vadd.f32 %v18381_v19, %v18316_v12  ;;  %v11563_v12 = vadd.f32 %v18385_v15, %v18322_v7  ;;  %v11566_v7 = vadd.f32 %v18389_v9, %v18328_v61 }
 0xed0   : > { %11868 = vst.msk [vmem:[%s18432_s28] sm:$0xff] %vm1531_vm0, %v11836_v22  ;;  %v11839_v48 = vadd.f32 %v18426_v50, %v11800_v23  ;;  %v11798_v43 = vadd.f32 %v11673_v47, %v11549_v40  ;;  %v11553_v40 = vadd.f32 %v11440_v63, %v18301_v42  ;;  %v11556_v23 = vadd.f32 %v18375_v1, %v18307_v44 }
 0xed1   : > { %v14533_v62 = vpop.f32.mrf.mxu1  ;;  %v11557_v44 = vadd.f32 %v18379_v14, %v18313_v8  ;;  %v11560_v8 = vadd.f32 %v18383_v36, %v18319_v58  ;;  %v11561_v58 = vadd.f32 %v18387_v57, %v18325_v38  ;;  %v11564_v38 = vadd.f32 %v18391_v56, %v18331_v28 }
 0xed2   : > { %11871 = vst.msk [vmem:[%s18432_s28 + $0x18] sm:$0xff] %vm1531_vm0, %v11839_v48  ;;  %v11837_v3 = vadd.f32 %v18426_v50, %v11798_v43  ;;  %v11803_v27 = vadd.f32 %v14533_v62, %v11554_v0  ;;  %v11567_v61 = vadd.f32 %v18393_v39, %v18334_v33  ;;  %v11565_v28 = vadd.f32 %v18395_v10, %v18337_v29 }
 0xed3   : > { %v11686_v5 = vpop.f32.mrf.mxu1  ;;  %v11570_v33 = vadd.f32 %v18397_v46, %v18340_v55  ;;  %v11568_v29 = vadd.f32 %v18399_v11, %v18343_v16  ;;  %v11571_v55 = vadd.f32 %v18401_v49, %v18346_v21  ;;  %v11569_v16 = vadd.f32 %v18403_v37, %v18349_v41 }
 0xed4   : > { %11869 = vst.msk [vmem:[%s18432_s28 + $0x8] sm:$0xff] %vm1531_vm0, %v11837_v3  ;;  %v11842_v24 = vadd.f32 %v18426_v50, %v11803_v27  ;;  %v11801_v17 = vadd.f32 %v11686_v5, %v11552_v32  ;;  %v11574_v21 = vadd.f32 %v18405_v34, %v18352_v4  ;;  %v11572_v41 = vadd.f32 %v18407_v13, %v18355_v60 }
 0xed5   : > { %v14534_v26 = vpop.f32.mrf.mxu1  ;;  %v11575_v4 = vadd.f32 %v18409_v51, %v18358_v53 }
 0xed6   : > { %11874 = vst.msk [vmem:[%s18432_s28 + $0x30] sm:$0xff] %vm1531_vm0, %v11842_v24  ;;  %v11840_v31 = vadd.f32 %v18426_v50, %v11801_v17  ;;  %v11804_v6 = vadd.f32 %v14534_v26, %v11555_v59 }
 0xed7   : > { %v11689_v20 = vpop.f32.mrf.mxu1 }
 0xed8   : > { %11872 = vst.msk [vmem:[%s18432_s28 + $0x20] sm:$0xff] %vm1531_vm0, %v11840_v31  ;;  %v11843_v35 = vadd.f32 %v18426_v50, %v11804_v6  ;;  %v11802_v54 = vadd.f32 %v11689_v20, %v11553_v40 }
 0xed9   : > { %v14537_v22 = vpop.f32.mrf.mxu1 }
 0xeda   : > { %11875 = vst.msk [vmem:[%s18432_s28 + $0x38] sm:$0xff] %vm1531_vm0, %v11843_v35  ;;  %v11841_v42 = vadd.f32 %v18426_v50, %v11802_v54  ;;  %v11807_v63 = vadd.f32 %v14537_v22, %v11558_v25 }
 0xedb   : > { %v11702_v47 = vpop.f32.mrf.mxu1 }
 0xedc   : > { %11873 = vst.msk [vmem:[%s18432_s28 + $0x28] sm:$0xff] %vm1531_vm0, %v11841_v42  ;;  %v11846_v52 = vadd.f32 %v18426_v50, %v11807_v63  ;;  %v11805_v0 = vadd.f32 %v11702_v47, %v11556_v23 }
 0xedd   : > { %v14538_v48 = vpop.f32.mrf.mxu1 }
 0xede   : > { %11878 = vst.msk [vmem:[%s18432_s28 + $0x50] sm:$0xff] %vm1531_vm0, %v11846_v52  ;;  %v11844_v1 = vadd.f32 %v18426_v50, %v11805_v0  ;;  %v11808_v43 = vadd.f32 %v14538_v48, %v11559_v2 }
 0xedf   : > { %v11705_v62 = vpop.f32.mrf.mxu1 }
 0xee0   : > { %11876 = vst.msk [vmem:[%s18432_s28 + $0x40] sm:$0xff] %vm1531_vm0, %v11844_v1  ;;  %v11847_v18 = vadd.f32 %v18426_v50, %v11808_v43  ;;  %v11806_v32 = vadd.f32 %v11705_v62, %v11557_v44 }
 0xee1   : > { %v14541_v3 = vpop.f32.mrf.mxu1 }
 0xee2   : > { %11879 = vst.msk [vmem:[%s18432_s28 + $0x58] sm:$0xff] %vm1531_vm0, %v11847_v18  ;;  %v11845_v14 = vadd.f32 %v18426_v50, %v11806_v32  ;;  %v11811_v27 = vadd.f32 %v14541_v3, %v11562_v45  ;;  %v18720_v32 = vld [vmem:[#allocation7_spill] sm:$0xff] }
 0xee3   : > { %v11718_v5 = vpop.f32.mrf.mxu1  ;;  %v11573_v60 = vadd.f32 %v18720_v32, %v18361_v30 }
 0xee4   : > { %11877 = vst.msk [vmem:[%s18432_s28 + $0x48] sm:$0xff] %vm1531_vm0, %v11845_v14  ;;  %v11850_v19 = vadd.f32 %v18426_v50, %v11811_v27  ;;  %v11809_v59 = vadd.f32 %v11718_v5, %v11560_v8  ;;  %v18721_v14 = vld [vmem:[#allocation16_spill] sm:$0xff]  ;;  %v18722_v27 = vld [vmem:[#allocation5_spill] sm:$0xff] }
 0xee5   : > { %v14542_v24 = vpop.f32.mrf.mxu1  ;;  %v11578_v53 = vadd.f32 %v18722_v27, %v18721_v14 }
 0xee6   : > { %11882 = vst.msk [vmem:[%s18432_s28 + $0x70] sm:$0xff] %vm1531_vm0, %v11850_v19  ;;  %v11848_v36 = vadd.f32 %v18426_v50, %v11809_v59  ;;  %v11812_v17 = vadd.f32 %v14542_v24, %v11563_v12  ;;  %v18723_v19 = vld [vmem:[#allocation2_spill] sm:$0xff]  ;;  %v18724_v59 = vld [vmem:[#allocation11_spill] sm:$0xff] }
 0xee7   : > { %v11721_v26 = vpop.f32.mrf.mxu1  ;;  %v11576_v30 = vadd.f32 %v18724_v59, %v18723_v19 }
 0xee8   : > { %11880 = vst.msk [vmem:[%s18432_s28 + $0x60] sm:$0xff] %vm1531_vm0, %v11848_v36  ;;  %v11851_v15 = vadd.f32 %v18426_v50, %v11812_v17  ;;  %v11810_v40 = vadd.f32 %v11721_v26, %v11561_v58  ;;  %v18725_v17 = vld [vmem:[#allocation17_spill] sm:$0xff]  ;;  %v18726_v26 = vld [vmem:[#allocation8_spill] sm:$0xff] }
 0xee9   : > { %v14545_v31 = vpop.f32.mrf.mxu1 }
 0xeea   : > { %11883 = vst.msk [vmem:[%s18432_s28 + $0x78] sm:$0xff] %vm1531_vm0, %v11851_v15  ;;  %v11849_v57 = vadd.f32 %v18426_v50, %v11810_v40  ;;  %v11815_v6 = vadd.f32 %v14545_v31, %v11566_v7  ;;  %v11579_v7 = vadd.f32 %v18726_v26, %v18725_v17 }
 0xeeb   : > { %v11734_v20 = vpop.f32.mrf.mxu1 }
 0xeec   : > { %11881 = vst.msk [vmem:[%s18432_s28 + $0x68] sm:$0xff] %vm1531_vm0, %v11849_v57  ;;  %v11854_v9 = vadd.f32 %v18426_v50, %v11815_v6  ;;  %v11813_v25 = vadd.f32 %v11734_v20, %v11564_v38  ;;  %v18727_v38 = vld [vmem:[#allocation4_spill] sm:$0xff]  ;;  %v18728_v57 = vld [vmem:[#allocation6_spill] sm:$0xff] }
 0xeed   : > { %v14546_v35 = vpop.f32.mrf.mxu1  ;;  %v11577_v6 = vadd.f32 %v18728_v57, %v18727_v38 }
 0xeee   : > { %11886 = vst.msk [vmem:[%s18432_s28 + $0x90] sm:$0xff] %vm1531_vm0, %v11854_v9  ;;  %v11852_v56 = vadd.f32 %v18426_v50, %v11813_v25  ;;  %v11816_v54 = vadd.f32 %v14546_v35, %v11567_v61 }
 0xeef   : > { %v11737_v22 = vpop.f32.mrf.mxu1 }
 0xef0   : > { %11884 = vst.msk [vmem:[%s18432_s28 + $0x80] sm:$0xff] %vm1531_vm0, %v11852_v56  ;;  %v11855_v39 = vadd.f32 %v18426_v50, %v11816_v54  ;;  %v11814_v23 = vadd.f32 %v11737_v22, %v11565_v28 }
 0xef1   : > { %v14549_v42 = vpop.f32.mrf.mxu1 }
 0xef2   : > { %11887 = vst.msk [vmem:[%s18432_s28 + $0x98] sm:$0xff] %vm1531_vm0, %v11855_v39  ;;  %v11853_v10 = vadd.f32 %v18426_v50, %v11814_v23  ;;  %v11819_v63 = vadd.f32 %v14549_v42, %v11570_v33 }
 0xef3   : > { %v11750_v47 = vpop.f32.mrf.mxu1 }
 0xef4   : > { %11885 = vst.msk [vmem:[%s18432_s28 + $0x88] sm:$0xff] %vm1531_vm0, %v11853_v10  ;;  %v11858_v46 = vadd.f32 %v18426_v50, %v11819_v63  ;;  %v11817_v2 = vadd.f32 %v11750_v47, %v11568_v29 }
 0xef5   : > { %v14550_v52 = vpop.f32.mrf.mxu1 }
 0xef6   : > { %11890 = vst.msk [vmem:[%s18432_s28 + $0xb0] sm:$0xff] %vm1531_vm0, %v11858_v46  ;;  %v11856_v11 = vadd.f32 %v18426_v50, %v11817_v2  ;;  %v11820_v0 = vadd.f32 %v14550_v52, %v11571_v55 }
 0xef7   : > { %v11753_v48 = vpop.f32.mrf.mxu1 }
 0xef8   : > { %11888 = vst.msk [vmem:[%s18432_s28 + $0xa0] sm:$0xff] %vm1531_vm0, %v11856_v11  ;;  %v11859_v49 = vadd.f32 %v18426_v50, %v11820_v0  ;;  %v11818_v44 = vadd.f32 %v11753_v48, %v11569_v16 }
 0xef9   : > { %v14553_v1 = vpop.f32.mrf.mxu1 }
 0xefa   : > { %11891 = vst.msk [vmem:[%s18432_s28 + $0xb8] sm:$0xff] %vm1531_vm0, %v11859_v49  ;;  %v11857_v37 = vadd.f32 %v18426_v50, %v11818_v44  ;;  %v11823_v43 = vadd.f32 %v14553_v1, %v11574_v21 }
 0xefb   : > { %v11766_v62 = vpop.f32.mrf.mxu1 }
 0xefc   : > { %11889 = vst.msk [vmem:[%s18432_s28 + $0xa8] sm:$0xff] %vm1531_vm0, %v11857_v37  ;;  %v11862_v34 = vadd.f32 %v18426_v50, %v11823_v43  ;;  %v11821_v45 = vadd.f32 %v11766_v62, %v11572_v41 }
 0xefd   : > { %v14554_v18 = vpop.f32.mrf.mxu1 }
 0xefe   : > { %11894 = vst.msk [vmem:[%s18432_s28 + $0xd0] sm:$0xff] %vm1531_vm0, %v11862_v34  ;;  %v11860_v13 = vadd.f32 %v18426_v50, %v11821_v45  ;;  %v11824_v3 = vadd.f32 %v14554_v18, %v11575_v4 }
 0xeff   : > { %v11769_v8 = vpop.f32.mrf.mxu1 }
 0xf00   : > { %11892 = vst.msk [vmem:[%s18432_s28 + $0xc0] sm:$0xff] %vm1531_vm0, %v11860_v13  ;;  %v11863_v51 = vadd.f32 %v18426_v50, %v11824_v3  ;;  %v11822_v5 = vadd.f32 %v11769_v8, %v11573_v60 }
 0xf01   : > { %v14557_v12 = vpop.f32.mrf.mxu1 }
 0xf02   : > { %11895 = vst.msk [vmem:[%s18432_s28 + $0xd8] sm:$0xff] %vm1531_vm0, %v11863_v51  ;;  %v11861_v24 = vadd.f32 %v18426_v50, %v11822_v5  ;;  %v11827_v58 = vadd.f32 %v14557_v12, %v11578_v53 }
 0xf03   : > { %v11782_v36 = vpop.f32.mrf.mxu1 }
 0xf04   : > { %11893 = vst.msk [vmem:[%s18432_s28 + $0xc8] sm:$0xff] %vm1531_vm0, %v11861_v24  ;;  %v11866_v15 = vadd.f32 %v18426_v50, %v11827_v58  ;;  %v11825_v40 = vadd.f32 %v11782_v36, %v11576_v30 }
 0xf05   : > { %v14558_v31 = vpop.f32.mrf.mxu1 }
 0xf06   : > { %11898 = vst.msk [vmem:[%s18432_s28 + $0xf0] sm:$0xff] %vm1531_vm0, %v11866_v15  ;;  %v11864_v20 = vadd.f32 %v18426_v50, %v11825_v40  ;;  %v11828_v61 = vadd.f32 %v14558_v31, %v11579_v7 }
 0xf07   : > { %v11785_v9 = vpop.f32.mrf.mxu1 }
 0xf08   : > { %11896 = vst.msk [vmem:[%s18432_s28 + $0xe0] sm:$0xff] %vm1531_vm0, %v11864_v20  ;;  %v11867_v25 = vadd.f32 %v18426_v50, %v11828_v61  ;;  %v11826_v35 = vadd.f32 %v11785_v9, %v11577_v6 }
 0xf0a   : > { %11899 = vst.msk [vmem:[%s18432_s28 + $0xf8] sm:$0xff] %vm1531_vm0, %v11867_v25  ;;  %v11865_v28 = vadd.f32 %v18426_v50, %v11826_v35 }
 0xf0c   : > { %11897 = vst.msk [vmem:[%s18432_s28 + $0xe8] sm:$0xff] %vm1531_vm0, %v11865_v28 }
 0xf0d PF: > { %s29_s0 = sadd.s32 1, %s14982_s0  }
 0xf0e   : > { %p26_p4 = scmp.ge.s32.totalorder %s29_s0, 4  }
 0xf10   :  { %28 = sbr.rel (!%p26_p4) target bundleno = 5 (0x5), region = 126 }

</bundles_post_ra>
